<compile_context>
chip_gen: v5e
topology: v5e:2x2
jax: 0.10.0
libtpu: 0.0.40
codegen_flags: <defaults>
</compile_context>

<pallas_src>
import jax
import jax.numpy as jnp
from jax.experimental import pallas as pl
from jax.experimental.pallas import tpu as pltpu

IN_CHANNELS = 36
HIDDEN = 512
N_ACTIONS = 6
N_HIDDEN_LAYERS = 6          # fc1 .. fc6 (all followed by ReLU), then head

# Padded feature sizes so matmul contraction / output lanes are 128-aligned.
IN_PAD = 128                 # 36  -> 128 (zero padded; exact)
OUT_PAD = 128                # 6   -> 128 (extra columns sliced off after kernel)


# ----------------------------------------------------------------------------
# Kernel
# ----------------------------------------------------------------------------
def _dqn_kernel(x_ref, w1_ref, wq_ref, sc_ref, wh_ref, bhid_ref, bh_ref, o_ref):
    """One batch tile through the whole 7-layer MLP.

    x_ref    : (tile_b, IN_PAD)        bf16
    w1_ref   : (IN_PAD, HIDDEN)        bf16
    wq_ref   : (5, HIDDEN, HIDDEN)     int8   (fc2..fc6, per-out-col quantized)
    sc_ref   : (5, HIDDEN)             f32    (per-output-channel scales)
    wh_ref   : (HIDDEN, OUT_PAD)       bf16
    bhid_ref : (6, HIDDEN)             f32    (b1..b6)
    bh_ref   : (1, OUT_PAD)            f32
    o_ref    : (tile_b, OUT_PAD)       f32
    """
    # fc1: bf16 weight, f32 accumulate, bias+ReLU in f32, back to bf16.
    h = jnp.dot(x_ref[...], w1_ref[...], preferred_element_type=jnp.float32)
    h = jnp.maximum(h + bhid_ref[pl.ds(0, 1), :], 0.0).astype(jnp.bfloat16)

    # fc2 .. fc6 (statically unrolled; static index into stacked int8 weights).
    for i in range(N_HIDDEN_LAYERS - 1):
        # int8 -> bf16 is exact for |q| <= 127; scale applied post-accumulate
        # (per-output-column), so (h @ (q * s)) == (h @ q) * s.
        w = wq_ref[i].astype(jnp.bfloat16)
        y = jnp.dot(h, w, preferred_element_type=jnp.float32)
        y = y * sc_ref[pl.ds(i, 1), :] + bhid_ref[pl.ds(i + 1, 1), :]
        h = jnp.maximum(y, 0.0).astype(jnp.bfloat16)

    # head (no ReLU), f32 output, lane-dense (OUT_PAD=128) store.
    o_ref[...] = (jnp.dot(h, wh_ref[...], preferred_element_type=jnp.float32)
                  + bh_ref[...])


# ----------------------------------------------------------------------------
# Wrapper
# ----------------------------------------------------------------------------
def _choose_tiling(b):
    if b <= 128:
        tile_b = max(8, pl.next_power_of_2(b))     # single tile, single grid step
    elif b <= 256:
        tile_b = 128                               # grid of 2 -> both TCs on v7x
    else:
        tile_b = 256                               # training batches: fill MXU rows
    b_pad = pl.cdiv(b, tile_b) * tile_b
    return tile_b, b_pad


def prepare_params(params):
    """One-time prep: pad / cast / quantize / stack weights into kernel arrays."""
    # fc1: zero-pad the 36 input rows to 128, keep bf16.
    w1 = jnp.zeros((IN_PAD, HIDDEN), jnp.bfloat16)
    w1 = w1.at[:IN_CHANNELS, :].set(params["w1"].astype(jnp.bfloat16))

    # fc2..fc6: weight-only int8, per-output-channel scales.
    w_mid = jnp.stack([params[f"w{i}"] for i in range(2, 7)]
                      ).astype(jnp.float32)                        # (5, 512, 512)
    amax = jnp.max(jnp.abs(w_mid), axis=1)                         # (5, 512)
    sc_mid = jnp.where(amax > 0, amax / 127.0, 1.0).astype(jnp.float32)
    wq_mid = jnp.clip(jnp.round(w_mid / sc_mid[:, None, :]),
                      -127, 127).astype(jnp.int8)                  # (5, 512, 512)

    # head: zero-pad the 6 output columns to 128, keep bf16.
    wh = jnp.zeros((HIDDEN, OUT_PAD), jnp.bfloat16)
    wh = wh.at[:, :N_ACTIONS].set(params["wh"].astype(jnp.bfloat16))

    b_hidden = jnp.stack([params[f"b{i}"] for i in range(1, 7)]
                         ).astype(jnp.float32)                     # (6, 512)

    bh = jnp.zeros((1, OUT_PAD), jnp.float32)
    bh = bh.at[0, :N_ACTIONS].set(params["bh"].astype(jnp.float32))

    return {"w1": w1, "wq_mid": wq_mid, "sc_mid": sc_mid, "wh": wh,
            "b_hidden": b_hidden, "bh": bh}


@jax.jit
def dqn_forward(x, prepped):
    """x: [B, IN_CHANNELS] float32, prepped: output of prepare_params()."""
    b = x.shape[0]
    tile_b, b_pad = _choose_tiling(b)

    # Only per-call padding: the (tiny) input batch, in bf16. Zero rows/cols
    # are exact (they meet zero weight rows / are sliced off afterwards).
    x_p = jnp.zeros((b_pad, IN_PAD), jnp.bfloat16)
    x_p = x_p.at[:b, :IN_CHANNELS].set(x.astype(jnp.bfloat16))

    grid = (b_pad // tile_b,)

    # Advisory cost hint for XLA's scheduler around the custom call.
    flops = 2 * b_pad * (IN_PAD * HIDDEN
                         + (N_HIDDEN_LAYERS - 1) * HIDDEN * HIDDEN
                         + HIDDEN * OUT_PAD)
    weight_bytes = (IN_PAD * HIDDEN * 2                       # w1 bf16
                    + (N_HIDDEN_LAYERS - 1) * HIDDEN * HIDDEN  # wq int8
                    + (N_HIDDEN_LAYERS - 1) * HIDDEN * 4       # scales f32
                    + HIDDEN * OUT_PAD * 2                     # wh bf16
                    + N_HIDDEN_LAYERS * HIDDEN * 4             # hidden biases
                    + OUT_PAD * 4)                             # head bias
    bytes_accessed = weight_bytes + b_pad * IN_PAD * 2 + b_pad * OUT_PAD * 4

    out_p = pl.pallas_call(
        _dqn_kernel,
        out_shape=jax.ShapeDtypeStruct((b_pad, OUT_PAD), jnp.float32),
        grid=grid,
        in_specs=[
            pl.BlockSpec((tile_b, IN_PAD), lambda i: (i, 0)),          # x tile
            pl.BlockSpec((IN_PAD, HIDDEN), lambda i: (0, 0)),          # w1
            pl.BlockSpec((N_HIDDEN_LAYERS - 1, HIDDEN, HIDDEN),
                         lambda i: (0, 0, 0)),                         # wq (int8)
            pl.BlockSpec((N_HIDDEN_LAYERS - 1, HIDDEN),
                         lambda i: (0, 0)),                            # scales
            pl.BlockSpec((HIDDEN, OUT_PAD), lambda i: (0, 0)),         # wh
            pl.BlockSpec((N_HIDDEN_LAYERS, HIDDEN), lambda i: (0, 0)),  # b1..b6
            pl.BlockSpec((1, OUT_PAD), lambda i: (0, 0)),              # bh
        ],
        out_specs=pl.BlockSpec((tile_b, OUT_PAD), lambda i: (i, 0)),
        compiler_params=pltpu.CompilerParams(
            dimension_semantics=("parallel",),
            vmem_limit_bytes=16 << 20,
        ),
        cost_estimate=pl.CostEstimate(flops=flops, transcendentals=0,
                                      bytes_accessed=bytes_accessed),
    )(x_p, prepped["w1"], prepped["wq_mid"], prepped["sc_mid"], prepped["wh"],
      prepped["b_hidden"], prepped["bh"])

    return out_p[:b, :N_ACTIONS]


# ----------------------------------------------------------------------------
# Init + references
# ----------------------------------------------------------------------------
def init_params(key):
    """Deterministic parameter init (PyTorch-style uniform fan_in bounds)."""
    params = {}
    dims = [(IN_CHANNELS, HIDDEN)] + [(HIDDEN, HIDDEN)] * 5
    for i, (fan_in, _) in enumerate(dims, start=1):
        key, kw, kb = jax.random.split(key, 3)
        bound = 1.0 / jnp.sqrt(fan_in)
        params[f"w{i}"] = jax.random.uniform(kw, dims[i - 1], jnp.float32,
                                             -bound, bound)
        params[f"b{i}"] = jax.random.uniform(kb, (HIDDEN,), jnp.float32,
                                             -bound, bound)
    key, kw, kb = jax.random.split(key, 3)
    bound = 1.0 / jnp.sqrt(HIDDEN)
    params["wh"] = jax.random.uniform(kw, (HIDDEN, N_ACTIONS), jnp.float32,
                                      -bound, bound)
    params["bh"] = jax.random.uniform(kb, (N_ACTIONS,), jnp.float32,
                                      -bound, bound)
    return params


def reference_forward_f32(x, params):
    """Pure f32 reference (matches the PyTorch module)."""
    h = x
    for i in range(1, 7):
        h = jnp.maximum(h @ params[f"w{i}"] + params[f"b{i}"], 0.0)
    return h @ params["wh"] + params["bh"]


def reference_forward_quant(x, prepped):
    """Reference with the kernel's exact numerics: bf16 activations,
    bf16 fc1/head weights, int8+per-channel-scale hidden weights, f32 accum."""
    b = x.shape[0]
    h = jnp.zeros((b, IN_PAD), jnp.bfloat16)
    h = h.at[:, :IN_CHANNELS].set(x.astype(jnp.bfloat16))
    h = jnp.dot(h, prepped["w1"], preferred_element_type=jnp.float32)
    h = jnp.maximum(h + prepped["b_hidden"][0:1, :], 0.0).astype(jnp.bfloat16)
    for i in range(N_HIDDEN_LAYERS - 1):
        w = prepped["wq_mid"][i].astype(jnp.bfloat16)
        y = jnp.dot(h, w, preferred_element_type=jnp.float32)
        y = y * prepped["sc_mid"][i:i + 1, :] + prepped["b_hidden"][i + 1:i + 2, :]
        h = jnp.maximum(y, 0.0).astype(jnp.bfloat16)
    out = (jnp.dot(h, prepped["wh"], preferred_element_type=jnp.float32)
           + prepped["bh"])
    return out[:, :N_ACTIONS]


# ----------------------------------------------------------------------------
# Main
# ----------------------------------------------------------------------------
if __name__ == "__main__":
    key = jax.random.PRNGKey(0)
    key, kx = jax.random.split(key)
    params = init_params(key)
    prepped = prepare_params(params)   # one-time weight prep (hoisted)

    # single tile / padded rows / multi-tile (128) / 256-row training tiles
    for batch in (4, 20, 200, 512):
        kx, sub = jax.random.split(kx)
        x = jax.random.normal(sub, (batch, IN_CHANNELS), jnp.float32)

        out = jax.block_until_ready(dqn_forward(x, prepped))
        assert out.shape == (batch, N_ACTIONS), out.shape

        # Exact-numerics reference (bf16 activations + int8 weights).
        ref_q = reference_forward_quant(x, prepped)
        assert jnp.allclose(out, ref_q, atol=1e-3, rtol=1e-3), \
            "mismatch vs quantization-matched reference"

        # f32 reference: bounds the accepted bf16/int8 numerics drift.
        ref_f32 = reference_forward_f32(x, params)
        assert jnp.allclose(out, ref_f32, atol=2e-2, rtol=5e-2), \
            "mismatch vs f32 reference"

    print("KERNEL_OK")
</pallas_src>

<mosaic_0001>
module attributes {stable_mosaic.version = 11 : i64} {
  func.func @_dqn_kernel(%arg0: i32, %arg1: memref<8x128xbf16, #tpu.memory_space<vmem>>, %arg2: memref<128x512xbf16, #tpu.memory_space<vmem>>, %arg3: memref<5x512x512xi8, #tpu.memory_space<vmem>>, %arg4: memref<5x512xf32, #tpu.memory_space<vmem>>, %arg5: memref<512x128xbf16, #tpu.memory_space<vmem>>, %arg6: memref<6x512xf32, #tpu.memory_space<vmem>>, %arg7: memref<1x128xf32, #tpu.memory_space<vmem>>, %arg8: memref<8x128xf32, #tpu.memory_space<vmem>>) attributes {dimension_semantics = [#tpu.dimension_semantics<parallel>], iteration_bounds = array<i64: 1>, scalar_prefetch = 0 : i64, scratch_operands = 0 : i64, tpu.core_type = #tpu.core_type<tc>, window_params = [{transform_indices = @transform_0, window_bounds = array<i64: 8, 128>}, {pipeline_mode = #tpu.pipeline_mode<synchronous>, transform_indices = @transform_1, window_bounds = array<i64: 128, 512>}, {pipeline_mode = #tpu.pipeline_mode<synchronous>, transform_indices = @transform_2, window_bounds = array<i64: 5, 512, 512>}, {pipeline_mode = #tpu.pipeline_mode<synchronous>, transform_indices = @transform_3, window_bounds = array<i64: 5, 512>}, {pipeline_mode = #tpu.pipeline_mode<synchronous>, transform_indices = @transform_4, window_bounds = array<i64: 512, 128>}, {pipeline_mode = #tpu.pipeline_mode<synchronous>, transform_indices = @transform_5, window_bounds = array<i64: 6, 512>}, {pipeline_mode = #tpu.pipeline_mode<synchronous>, transform_indices = @transform_6, window_bounds = array<i64: 1, 128>}, {transform_indices = @transform_7, window_bounds = array<i64: 8, 128>}]} {
    %c0 = arith.constant 0 : index
    %c0_0 = arith.constant 0 : index
    %0 = vector.load %arg1[%c0, %c0_0] : memref<8x128xbf16, #tpu.memory_space<vmem>>, vector<8x128xbf16>
    %c0_1 = arith.constant 0 : index
    %c0_2 = arith.constant 0 : index
    %1 = vector.load %arg2[%c0_1, %c0_2] : memref<128x512xbf16, #tpu.memory_space<vmem>>, vector<128x512xbf16>
    %cst = arith.constant dense<0.000000e+00> : vector<8x512xf32>
    %2 = tpu.matmul %0, %1, %cst {dimension_numbers = #tpu.dot_dimension_numbers<[1], [0], [0], [1], [0, 0, 1, 1], [], []>} : vector<8x128xbf16>, vector<128x512xbf16>, vector<8x512xf32> -> vector<8x512xf32>
    %c0_3 = arith.constant 0 : index
    %c0_4 = arith.constant 0 : index
    %3 = vector.load %arg6[%c0_3, %c0_4] : memref<6x512xf32, #tpu.memory_space<vmem>>, vector<1x512xf32>
    %4 = vector.broadcast %3 : vector<1x512xf32> to vector<8x512xf32>
    %5 = arith.addf %2, %4 : vector<8x512xf32>
    %cst_5 = arith.constant 0.000000e+00 : f32
    %6 = vector.broadcast %cst_5 : f32 to vector<8x512xf32>
    %7 = arith.maximumf %5, %6 : vector<8x512xf32>
    %8 = arith.truncf %7 : vector<8x512xf32> to vector<8x512xbf16>
    %c0_6 = arith.constant 0 : index
    %c0_7 = arith.constant 0 : index
    %c0_8 = arith.constant 0 : index
    %9 = vector.load %arg3[%c0_6, %c0_7, %c0_8] : memref<5x512x512xi8, #tpu.memory_space<vmem>>, vector<1x512x512xi8>
    %10 = vector.shape_cast %9 : vector<1x512x512xi8> to vector<512x512xi8>
    %11 = arith.sitofp %10 : vector<512x512xi8> to vector<512x512xbf16>
    %cst_9 = arith.constant dense<0.000000e+00> : vector<8x512xf32>
    %12 = tpu.matmul %8, %11, %cst_9 {dimension_numbers = #tpu.dot_dimension_numbers<[1], [0], [0], [1], [0, 0, 1, 1], [], []>} : vector<8x512xbf16>, vector<512x512xbf16>, vector<8x512xf32> -> vector<8x512xf32>
    %c0_10 = arith.constant 0 : index
    %c0_11 = arith.constant 0 : index
    %13 = vector.load %arg4[%c0_10, %c0_11] : memref<5x512xf32, #tpu.memory_space<vmem>>, vector<1x512xf32>
    %14 = vector.broadcast %13 : vector<1x512xf32> to vector<8x512xf32>
    %15 = arith.mulf %12, %14 : vector<8x512xf32>
    %c1 = arith.constant 1 : index
    %c0_12 = arith.constant 0 : index
    %16 = vector.load %arg6[%c1, %c0_12] : memref<6x512xf32, #tpu.memory_space<vmem>>, vector<1x512xf32>
    %17 = vector.broadcast %16 : vector<1x512xf32> to vector<8x512xf32>
    %18 = arith.addf %15, %17 : vector<8x512xf32>
    %cst_13 = arith.constant 0.000000e+00 : f32
    %19 = vector.broadcast %cst_13 : f32 to vector<8x512xf32>
    %20 = arith.maximumf %18, %19 : vector<8x512xf32>
    %21 = arith.truncf %20 : vector<8x512xf32> to vector<8x512xbf16>
    %c1_14 = arith.constant 1 : index
    %c0_15 = arith.constant 0 : index
    %c0_16 = arith.constant 0 : index
    %22 = vector.load %arg3[%c1_14, %c0_15, %c0_16] : memref<5x512x512xi8, #tpu.memory_space<vmem>>, vector<1x512x512xi8>
    %23 = vector.shape_cast %22 : vector<1x512x512xi8> to vector<512x512xi8>
    %24 = arith.sitofp %23 : vector<512x512xi8> to vector<512x512xbf16>
    %cst_17 = arith.constant dense<0.000000e+00> : vector<8x512xf32>
    %25 = tpu.matmul %21, %24, %cst_17 {dimension_numbers = #tpu.dot_dimension_numbers<[1], [0], [0], [1], [0, 0, 1, 1], [], []>} : vector<8x512xbf16>, vector<512x512xbf16>, vector<8x512xf32> -> vector<8x512xf32>
    %c1_18 = arith.constant 1 : index
    %c0_19 = arith.constant 0 : index
    %26 = vector.load %arg4[%c1_18, %c0_19] : memref<5x512xf32, #tpu.memory_space<vmem>>, vector<1x512xf32>
    %27 = vector.broadcast %26 : vector<1x512xf32> to vector<8x512xf32>
    %28 = arith.mulf %25, %27 : vector<8x512xf32>
    %c2 = arith.constant 2 : index
    %c0_20 = arith.constant 0 : index
    %29 = vector.load %arg6[%c2, %c0_20] : memref<6x512xf32, #tpu.memory_space<vmem>>, vector<1x512xf32>
    %30 = vector.broadcast %29 : vector<1x512xf32> to vector<8x512xf32>
    %31 = arith.addf %28, %30 : vector<8x512xf32>
    %cst_21 = arith.constant 0.000000e+00 : f32
    %32 = vector.broadcast %cst_21 : f32 to vector<8x512xf32>
    %33 = arith.maximumf %31, %32 : vector<8x512xf32>
    %34 = arith.truncf %33 : vector<8x512xf32> to vector<8x512xbf16>
    %c2_22 = arith.constant 2 : index
    %c0_23 = arith.constant 0 : index
    %c0_24 = arith.constant 0 : index
    %35 = vector.load %arg3[%c2_22, %c0_23, %c0_24] : memref<5x512x512xi8, #tpu.memory_space<vmem>>, vector<1x512x512xi8>
    %36 = vector.shape_cast %35 : vector<1x512x512xi8> to vector<512x512xi8>
    %37 = arith.sitofp %36 : vector<512x512xi8> to vector<512x512xbf16>
    %cst_25 = arith.constant dense<0.000000e+00> : vector<8x512xf32>
    %38 = tpu.matmul %34, %37, %cst_25 {dimension_numbers = #tpu.dot_dimension_numbers<[1], [0], [0], [1], [0, 0, 1, 1], [], []>} : vector<8x512xbf16>, vector<512x512xbf16>, vector<8x512xf32> -> vector<8x512xf32>
    %c2_26 = arith.constant 2 : index
    %c0_27 = arith.constant 0 : index
    %39 = vector.load %arg4[%c2_26, %c0_27] : memref<5x512xf32, #tpu.memory_space<vmem>>, vector<1x512xf32>
    %40 = vector.broadcast %39 : vector<1x512xf32> to vector<8x512xf32>
    %41 = arith.mulf %38, %40 : vector<8x512xf32>
    %c3 = arith.constant 3 : index
    %c0_28 = arith.constant 0 : index
    %42 = vector.load %arg6[%c3, %c0_28] : memref<6x512xf32, #tpu.memory_space<vmem>>, vector<1x512xf32>
    %43 = vector.broadcast %42 : vector<1x512xf32> to vector<8x512xf32>
    %44 = arith.addf %41, %43 : vector<8x512xf32>
    %cst_29 = arith.constant 0.000000e+00 : f32
    %45 = vector.broadcast %cst_29 : f32 to vector<8x512xf32>
    %46 = arith.maximumf %44, %45 : vector<8x512xf32>
    %47 = arith.truncf %46 : vector<8x512xf32> to vector<8x512xbf16>
    %c3_30 = arith.constant 3 : index
    %c0_31 = arith.constant 0 : index
    %c0_32 = arith.constant 0 : index
    %48 = vector.load %arg3[%c3_30, %c0_31, %c0_32] : memref<5x512x512xi8, #tpu.memory_space<vmem>>, vector<1x512x512xi8>
    %49 = vector.shape_cast %48 : vector<1x512x512xi8> to vector<512x512xi8>
    %50 = arith.sitofp %49 : vector<512x512xi8> to vector<512x512xbf16>
    %cst_33 = arith.constant dense<0.000000e+00> : vector<8x512xf32>
    %51 = tpu.matmul %47, %50, %cst_33 {dimension_numbers = #tpu.dot_dimension_numbers<[1], [0], [0], [1], [0, 0, 1, 1], [], []>} : vector<8x512xbf16>, vector<512x512xbf16>, vector<8x512xf32> -> vector<8x512xf32>
    %c3_34 = arith.constant 3 : index
    %c0_35 = arith.constant 0 : index
    %52 = vector.load %arg4[%c3_34, %c0_35] : memref<5x512xf32, #tpu.memory_space<vmem>>, vector<1x512xf32>
    %53 = vector.broadcast %52 : vector<1x512xf32> to vector<8x512xf32>
    %54 = arith.mulf %51, %53 : vector<8x512xf32>
    %c4 = arith.constant 4 : index
    %c0_36 = arith.constant 0 : index
    %55 = vector.load %arg6[%c4, %c0_36] : memref<6x512xf32, #tpu.memory_space<vmem>>, vector<1x512xf32>
    %56 = vector.broadcast %55 : vector<1x512xf32> to vector<8x512xf32>
    %57 = arith.addf %54, %56 : vector<8x512xf32>
    %cst_37 = arith.constant 0.000000e+00 : f32
    %58 = vector.broadcast %cst_37 : f32 to vector<8x512xf32>
    %59 = arith.maximumf %57, %58 : vector<8x512xf32>
    %60 = arith.truncf %59 : vector<8x512xf32> to vector<8x512xbf16>
    %c4_38 = arith.constant 4 : index
    %c0_39 = arith.constant 0 : index
    %c0_40 = arith.constant 0 : index
    %61 = vector.load %arg3[%c4_38, %c0_39, %c0_40] : memref<5x512x512xi8, #tpu.memory_space<vmem>>, vector<1x512x512xi8>
    %62 = vector.shape_cast %61 : vector<1x512x512xi8> to vector<512x512xi8>
    %63 = arith.sitofp %62 : vector<512x512xi8> to vector<512x512xbf16>
    %cst_41 = arith.constant dense<0.000000e+00> : vector<8x512xf32>
    %64 = tpu.matmul %60, %63, %cst_41 {dimension_numbers = #tpu.dot_dimension_numbers<[1], [0], [0], [1], [0, 0, 1, 1], [], []>} : vector<8x512xbf16>, vector<512x512xbf16>, vector<8x512xf32> -> vector<8x512xf32>
    %c4_42 = arith.constant 4 : index
    %c0_43 = arith.constant 0 : index
    %65 = vector.load %arg4[%c4_42, %c0_43] : memref<5x512xf32, #tpu.memory_space<vmem>>, vector<1x512xf32>
    %66 = vector.broadcast %65 : vector<1x512xf32> to vector<8x512xf32>
    %67 = arith.mulf %64, %66 : vector<8x512xf32>
    %c5 = arith.constant 5 : index
    %c0_44 = arith.constant 0 : index
    %68 = vector.load %arg6[%c5, %c0_44] : memref<6x512xf32, #tpu.memory_space<vmem>>, vector<1x512xf32>
    %69 = vector.broadcast %68 : vector<1x512xf32> to vector<8x512xf32>
    %70 = arith.addf %67, %69 : vector<8x512xf32>
    %cst_45 = arith.constant 0.000000e+00 : f32
    %71 = vector.broadcast %cst_45 : f32 to vector<8x512xf32>
    %72 = arith.maximumf %70, %71 : vector<8x512xf32>
    %73 = arith.truncf %72 : vector<8x512xf32> to vector<8x512xbf16>
    %c0_46 = arith.constant 0 : index
    %c0_47 = arith.constant 0 : index
    %74 = vector.load %arg5[%c0_46, %c0_47] : memref<512x128xbf16, #tpu.memory_space<vmem>>, vector<512x128xbf16>
    %cst_48 = arith.constant dense<0.000000e+00> : vector<8x128xf32>
    %75 = tpu.matmul %73, %74, %cst_48 {dimension_numbers = #tpu.dot_dimension_numbers<[1], [0], [0], [1], [0, 0, 1, 1], [], []>} : vector<8x512xbf16>, vector<512x128xbf16>, vector<8x128xf32> -> vector<8x128xf32>
    %c0_49 = arith.constant 0 : index
    %c0_50 = arith.constant 0 : index
    %76 = vector.load %arg7[%c0_49, %c0_50] : memref<1x128xf32, #tpu.memory_space<vmem>>, vector<1x128xf32>
    %77 = vector.broadcast %76 : vector<1x128xf32> to vector<8x128xf32>
    %78 = arith.addf %75, %77 : vector<8x128xf32>
    %c0_51 = arith.constant 0 : index
    %c0_52 = arith.constant 0 : index
    %79 = vector.load %arg8[%c0_51, %c0_52] : memref<8x128xf32, #tpu.memory_space<vmem>>, vector<8x128xf32>
    tpu.vector_store %arg8[%c0_51, %c0_52], %78 {strides = array<i32>} : memref<8x128xf32, #tpu.memory_space<vmem>>, vector<8x128xf32>,
    return
  }
  func.func @transform_0(%arg0: i32) -> (i32, i32) {
    %c0_i32 = arith.constant 0 : i32
    %c0_i32_0 = arith.constant 0 : i32
    return %arg0, %c0_i32 : i32, i32
  }
  func.func @transform_1(%arg0: i32) -> (i32, i32) {
    %c0_i32 = arith.constant 0 : i32
    %c0_i32_0 = arith.constant 0 : i32
    %c0_i32_1 = arith.constant 0 : i32
    return %c0_i32, %c0_i32_0 : i32, i32
  }
  func.func @transform_2(%arg0: i32) -> (i32, i32, i32) {
    %c0_i32 = arith.constant 0 : i32
    %c0_i32_0 = arith.constant 0 : i32
    %c0_i32_1 = arith.constant 0 : i32
    %c0_i32_2 = arith.constant 0 : i32
    return %c0_i32, %c0_i32_0, %c0_i32_1 : i32, i32, i32
  }
  func.func @transform_3(%arg0: i32) -> (i32, i32) {
    %c0_i32 = arith.constant 0 : i32
    %c0_i32_0 = arith.constant 0 : i32
    %c0_i32_1 = arith.constant 0 : i32
    return %c0_i32, %c0_i32_0 : i32, i32
  }
  func.func @transform_4(%arg0: i32) -> (i32, i32) {
    %c0_i32 = arith.constant 0 : i32
    %c0_i32_0 = arith.constant 0 : i32
    %c0_i32_1 = arith.constant 0 : i32
    return %c0_i32, %c0_i32_0 : i32, i32
  }
  func.func @transform_5(%arg0: i32) -> (i32, i32) {
    %c0_i32 = arith.constant 0 : i32
    %c0_i32_0 = arith.constant 0 : i32
    %c0_i32_1 = arith.constant 0 : i32
    return %c0_i32, %c0_i32_0 : i32, i32
  }
  func.func @transform_6(%arg0: i32) -> (i32, i32) {
    %c0_i32 = arith.constant 0 : i32
    %c0_i32_0 = arith.constant 0 : i32
    %c0_i32_1 = arith.constant 0 : i32
    return %c0_i32, %c0_i32_0 : i32, i32
  }
  func.func @transform_7(%arg0: i32) -> (i32, i32) {
    %c0_i32 = arith.constant 0 : i32
    %c0_i32_0 = arith.constant 0 : i32
    return %arg0, %c0_i32 : i32, i32
  }
}

</mosaic_0001>

<bundles_post_ra>
// kernel: dqn_forward.1
= control target key start
LH: loop header
LB: loop body
LE: loop exit
PB: predicated region body
PF: predicated region fallthrough
CT: control target
= control target key end

     0   :  { %12 = vsyncpa [#allocation3], 0  ;;  %s7773_s0 = inlined_call_operand.vmem [shape: bf16[8,128], index: 0, kind: input, shape index: {}]   ;;  %s7774_s1 = inlined_call_operand.hbm [shape: bf16[128,512], index: 1, kind: input, shape index: {}]   ;;  %s7775_s2 = inlined_call_operand.hbm [shape: s8[5,512,512], index: 2, kind: input, shape index: {}]   ;;  %s7776_s3 = inlined_call_operand.hbm [shape: f32[5,512], index: 3, kind: input, shape index: {}]   ;;  %s7777_s4 = inlined_call_operand.hbm [shape: bf16[512,128], index: 4, kind: input, shape index: {}]   ;;  %s7778_s5 = inlined_call_operand.hbm [shape: f32[6,512], index: 5, kind: input, shape index: {}]   ;;  %s7779_s6 = inlined_call_operand.hbm [shape: f32[1,128], index: 6, kind: input, shape index: {}]   ;;  %s7780_s7 = inlined_call_operand.vmem [shape: f32[8,128], index: 7, kind: output, shape index: {}]  }
   0x1   :  { %13 = vsyncpa [#allocation5], 0 }
   0x2   :  { %14 = vsyncpa [#allocation8], 0  ;;  %s35_s26 = sshll.u32 %s7775_s2, 4  ;;  %s36_s26 = int_to_ptr.hbm [resolvable:$true] %s35_s26 }
   0x3   :  { %15 = vsyncpa [#allocation11], 0  ;;  %s5936_s27 = smov [#allocation4]   ;;  %s59_s8 = sshll.u32 %s7777_s4, 4  ;;  %s60_s8 = int_to_ptr.hbm [resolvable:$true] %s59_s8 }
   0x4   :  { %s37_s28 = sshll.u32 %s5936_s27, 4  ;;  %s5937_s9 = smov 512   ;;  %s38_s28 = int_to_ptr.vmem [resolvable:$true] %s37_s28 }
   0x5   :  { %s5938_s10 = smov 32   ;;  %s5939_s11 = smov [#allocation7]  }
   0x6   :  { %43 = dma.hbm_to_vmem [thread:$0]  %s36_s26, 40960, %s38_s28, [#allocation5], %s5937_s9, %s5937_s9, %s5938_s10  }
   0x7   :  { %s61_s12 = sshll.u32 %s5939_s11, 4  ;;  %s5940_s13 = smov 64   ;;  %s62_s12 = int_to_ptr.vmem [resolvable:$true] %s61_s12 }
   0x8   :  { %s5941_s14 = smov 4   ;;  %s22_s16 = sshll.u32 %s7774_s1, 4  ;;  %s23_s16 = int_to_ptr.hbm [resolvable:$true] %s22_s16 }
   0x9   :  { %67 = dma.hbm_to_vmem [thread:$0]  %s60_s8, 4096, %s62_s12, [#allocation8], %s5940_s13, %s5940_s13, %s5941_s14  }
   0xa   :  { %s5942_s17 = smov [#allocation2]   ;;  %s49_s20 = sshll.u32 %s7776_s3, 4  ;;  %s50_s20 = int_to_ptr.hbm [resolvable:$true] %s49_s20 }
   0xb   :  { %s24_s18 = sshll.u32 %s5942_s17, 4  ;;  %s5943_s21 = smov 256   ;;  %s25_s18 = int_to_ptr.vmem [resolvable:$true] %s24_s18 }
   0xc   :  { %s5944_s22 = smov 16   ;;  %s5945_s23 = smov [#allocation6]  }
   0xd   :  { %30 = dma.hbm_to_vmem [thread:$0]  %s23_s16, 4096, %s25_s18, [#allocation3], %s5943_s21, %s5943_s21, %s5944_s22  }
   0xe   :  { %s51_s24 = sshll.u32 %s5945_s23, 4  ;;  %s73_s27 = sshll.u32 %s7778_s5, 4  ;;  %s52_s24 = int_to_ptr.vmem [resolvable:$true] %s51_s24  ;;  %s74_s27 = int_to_ptr.hbm [resolvable:$true] %s73_s27 }
   0xf   :  { %54 = dma.hbm_to_vmem [thread:$0]  %s50_s20, 512, %s52_s24, [#allocation5]  }
  0x10   :  { %s84_s29 = sshll.u32 %s7779_s6, 4  ;;  %s5946_s30 = smov [#allocation9]   ;;  %s85_s29 = int_to_ptr.hbm [resolvable:$true] %s84_s29 }
  0x11   :  { %s75_s8 = sshll.u32 %s5946_s30, 4  ;;  %s5947_s3 = smov [#allocation10]   ;;  %s76_s8 = int_to_ptr.vmem [resolvable:$true] %s75_s8 }
  0x12   :  { %78 = dma.hbm_to_vmem [thread:$0]  %s74_s27, 512, %s76_s8, [#allocation8]  }
  0x13   :  { %s86_s9 = sshll.u32 %s5947_s3, 4  ;;  %s87_s9 = int_to_ptr.vmem [resolvable:$true] %s86_s9 }
  0x14   :  { %89 = dma.hbm_to_vmem [thread:$0]  %s85_s29, 16, %s87_s9, [#allocation11]  }
  0x15   :  { %5928 = dma.done.wait [#allocation3], 4096  }
  0x16   :  { %5929 = vsyncadd [#allocation3], 4294963200 }
  0x17   :  { %5930 = dma.done.wait [#allocation5], 41472  }
  0x18   :  { %5931 = vsyncadd [#allocation5], 4294925824 }
  0x19   :  { %5932 = dma.done.wait [#allocation8], 4608  }
  0x1a   :  { %5933 = vsyncadd [#allocation8], 4294962688 }
  0x1b   :  { %5934 = dma.done.wait [#allocation11], 16  }
  0x1c   :  { %5935 = vsyncadd [#allocation11], 4294967280  ;;  %v5565_v0 = vld [vmem:[#allocation2 + $0xe0] sm:$0xf]  ;;  %v5737_v1 = vld [vmem:[#allocation2 + $0xec] sm:$0xf0] }
  0x1d   :  { %v5735_v2 = vld [vmem:[#allocation2 + $0xe4] sm:$0xf]  ;;  %v5566_v3 = vor.u32 %v5737_v1, %v5565_v0  ;;  %v5567_v4 = vld [vmem:[#allocation2 + $0xf0] sm:$0xf0]  ;;  %v5573_v5 = vld [vmem:[#allocation2 + $0xe8] sm:$0xf] }
  0x1e   :  { %v5738_v6 = vld [vmem:[#allocation2 + $0xf4] sm:$0xf0]  ;;  %v5570_v7 = vor.u32 %v5735_v2, %v5567_v4  ;;  %v5736_v9 = vld [vmem:[#allocation2 + $0xec] sm:$0xf]  ;;  %v5575_v10 = vld [vmem:[#allocation2 + $0xf8] sm:$0xf0] }
  0x1f   :  { %v5574_v8 = vor.u32 %v5738_v6, %v5573_v5  ;;  %v5549_v11 = vld [vmem:[#allocation2 + $0xc0] sm:$0xf]  ;;  %317 = vmatpush.bf16.msra.mxu0 %v5566_v3  ;;  %v5578_v12 = vor.u32 %v5736_v9, %v5575_v10  ;;  %v5733_v13 = vld [vmem:[#allocation2 + $0xcc] sm:$0xf0]  ;;  %v5731_v14 = vld [vmem:[#allocation2 + $0xc4] sm:$0xf] }
  0x20   :  { %v5551_v15 = vld [vmem:[#allocation2 + $0xd0] sm:$0xf0]  ;;  %330 = vmatpush.bf16.msra.mxu1 %v5570_v7  ;;  %v5550_v16 = vor.u32 %v5733_v13, %v5549_v11  ;;  %v5557_v18 = vld [vmem:[#allocation2 + $0xc8] sm:$0xf]  ;;  %v5734_v19 = vld [vmem:[#allocation2 + $0xd4] sm:$0xf0] }
  0x21   :  { %343 = vmatpush.bf16.msra.mxu2 %v5574_v8  ;;  %v5554_v17 = vor.u32 %v5731_v14, %v5551_v15  ;;  %v5732_v20 = vld [vmem:[#allocation2 + $0xcc] sm:$0xf]  ;;  %356 = vmatpush.bf16.msra.mxu3 %v5578_v12  ;;  %v5558_v21 = vor.u32 %v5734_v19, %v5557_v18  ;;  %v5559_v22 = vld [vmem:[#allocation2 + $0xd8] sm:$0xf0]  ;;  %v5533_v23 = vld [vmem:[#allocation2 + $0xa0] sm:$0xf] }
  0x22   :  { %v5729_v24 = vld [vmem:[#allocation2 + $0xac] sm:$0xf0]  ;;  %v5562_v25 = vor.u32 %v5732_v20, %v5559_v22  ;;  %v5727_v26 = vld [vmem:[#allocation2 + $0xa4] sm:$0xf]  ;;  %v5535_v27 = vld [vmem:[#allocation2 + $0xb0] sm:$0xf0] }
  0x23   :  { %v5541_v28 = vld [vmem:[#allocation2 + $0xa8] sm:$0xf]  ;;  %318 = vmatpush.bf16.msra.mxu0 %v5550_v16  ;;  %v5534_v29 = vor.u32 %v5729_v24, %v5533_v23  ;;  %v5730_v30 = vld [vmem:[#allocation2 + $0xb4] sm:$0xf0]  ;;  %v5728_v31 = vld [vmem:[#allocation2 + $0xac] sm:$0xf]  ;;  %v5538_v33 = vor.u32 %v5727_v26, %v5535_v27 }
  0x24   :  { %v5543_v32 = vld [vmem:[#allocation2 + $0xb8] sm:$0xf0]  ;;  %331 = vmatpush.bf16.msra.mxu1 %v5554_v17  ;;  %v5542_v34 = vor.u32 %v5730_v30, %v5541_v28  ;;  %v5517_v35 = vld [vmem:[#allocation2 + $0x80] sm:$0xf]  ;;  %v5725_v36 = vld [vmem:[#allocation2 + $0x8c] sm:$0xf0] }
  0x25   :  { %344 = vmatpush.bf16.msra.mxu2 %v5558_v21  ;;  %v5723_v37 = vld [vmem:[#allocation2 + $0x84] sm:$0xf]  ;;  %357 = vmatpush.bf16.msra.mxu3 %v5562_v25  ;;  %v5546_v38 = vor.u32 %v5728_v31, %v5543_v32  ;;  %v5519_v39 = vld [vmem:[#allocation2 + $0x90] sm:$0xf0]  ;;  %v5525_v40 = vld [vmem:[#allocation2 + $0x88] sm:$0xf]  ;;  %v5518_v44 = vor.u32 %v5725_v36, %v5517_v35 }
  0x26   :  { %v5726_v41 = vld [vmem:[#allocation2 + $0x94] sm:$0xf0]  ;;  %v5724_v42 = vld [vmem:[#allocation2 + $0x8c] sm:$0xf]  ;;  %v5527_v43 = vld [vmem:[#allocation2 + $0x98] sm:$0xf0]  ;;  %v5522_v47 = vor.u32 %v5723_v37, %v5519_v39 }
  0x27   :  { %319 = vmatpush.bf16.msra.mxu0 %v5534_v29  ;;  %v5501_v45 = vld [vmem:[#allocation2 + $0x60] sm:$0xf]  ;;  %v5721_v46 = vld [vmem:[#allocation2 + $0x6c] sm:$0xf0]  ;;  %v5526_v48 = vor.u32 %v5726_v41, %v5525_v40  ;;  %v5719_v49 = vld [vmem:[#allocation2 + $0x64] sm:$0xf]  ;;  %v5530_v52 = vor.u32 %v5724_v42, %v5527_v43 }
  0x28   :  { %332 = vmatpush.bf16.msra.mxu1 %v5538_v33  ;;  %v5503_v50 = vld [vmem:[#allocation2 + $0x70] sm:$0xf0]  ;;  %v5509_v51 = vld [vmem:[#allocation2 + $0x68] sm:$0xf]  ;;  %v5722_v53 = vld [vmem:[#allocation2 + $0x74] sm:$0xf0]  ;;  %v5502_v61 = vor.u32 %v5721_v46, %v5501_v45 }
  0x29   :  { %345 = vmatpush.bf16.msra.mxu2 %v5542_v34  ;;  %358 = vmatpush.bf16.msra.mxu3 %v5546_v38  ;;  %v5720_v54 = vld [vmem:[#allocation2 + $0x6c] sm:$0xf]  ;;  %v5511_v55 = vld [vmem:[#allocation2 + $0x78] sm:$0xf0]  ;;  %v5485_v56 = vld [vmem:[#allocation2 + $0x40] sm:$0xf]  ;;  %v5506_v1 = vor.u32 %v5719_v49, %v5503_v50  ;;  %v5510_v2 = vor.u32 %v5722_v53, %v5509_v51 }
  0x2a   :  { %v5717_v57 = vld [vmem:[#allocation2 + $0x4c] sm:$0xf0]  ;;  %v5715_v58 = vld [vmem:[#allocation2 + $0x44] sm:$0xf]  ;;  %v5487_v59 = vld [vmem:[#allocation2 + $0x50] sm:$0xf0]  ;;  %v5514_v6 = vor.u32 %v5720_v54, %v5511_v55 }
  0x2b   :  { %v5493_v60 = vld [vmem:[#allocation2 + $0x48] sm:$0xf]  ;;  %320 = vmatpush.bf16.msra.mxu0 %v5518_v44  ;;  %v5718_v62 = vld [vmem:[#allocation2 + $0x54] sm:$0xf0]  ;;  %v5716_v63 = vld [vmem:[#allocation2 + $0x4c] sm:$0xf]  ;;  %v5486_v13 = vor.u32 %v5717_v57, %v5485_v56  ;;  %v5490_v14 = vor.u32 %v5715_v58, %v5487_v59 }
  0x2c   :  { %v5495_v0 = vld [vmem:[#allocation2 + $0x58] sm:$0xf0]  ;;  %333 = vmatpush.bf16.msra.mxu1 %v5522_v47  ;;  %v6006_v3 = vld [vmem:[#allocation2 + $0x20] sm:$0xf]  ;;  %v5713_v4 = vld [vmem:[#allocation2 + $0x2c] sm:$0xf0]  ;;  %v5494_v15 = vor.u32 %v5718_v62, %v5493_v60 }
  0x2d   :  { %346 = vmatpush.bf16.msra.mxu2 %v5526_v48  ;;  %v6008_v5 = vld [vmem:[#allocation2 + $0x24] sm:$0xf]  ;;  %359 = vmatpush.bf16.msra.mxu3 %v5530_v52  ;;  %v6010_v7 = vld [vmem:[#allocation2 + $0x30] sm:$0xf0]  ;;  %v6012_v8 = vld [vmem:[#allocation2 + $0x28] sm:$0xf]  ;;  %v5498_v16 = vor.u32 %v5716_v63, %v5495_v0  ;;  %v5470_v20 = vor.u32 %v5713_v4, %v6006_v3 }
  0x2e   :  { %v5714_v9 = vld [vmem:[#allocation2 + $0x34] sm:$0xf0]  ;;  %v6014_v10 = vld [vmem:[#allocation2 + $0x2c] sm:$0xf]  ;;  %v6016_v11 = vld [vmem:[#allocation2 + $0x38] sm:$0xf0]  ;;  %v5474_v21 = vor.u32 %v6008_v5, %v6010_v7 }
  0x2f   :  { %v6018_v12 = vld [vmem:[#allocation2] sm:$0xf]  ;;  %321 = vmatpush.bf16.msra.mxu0 %v5502_v61  ;;  %v6020_v17 = vld [vmem:[#allocation2 + $0xc] sm:$0xf0]  ;;  %v6022_v18 = vld [vmem:[#allocation2 + $0x4] sm:$0xf]  ;;  %v5478_v22 = vor.u32 %v5714_v9, %v6012_v8  ;;  %v5482_v26 = vor.u32 %v6014_v10, %v6016_v11 }
  0x30   :  { %v6024_v19 = vld [vmem:[#allocation2 + $0x10] sm:$0xf0]  ;;  %334 = vmatpush.bf16.msra.mxu1 %v5506_v1  ;;  %v6030_v23 = vld [vmem:[#allocation2 + $0x8] sm:$0xf]  ;;  %v6032_v24 = vld [vmem:[#allocation2 + $0x14] sm:$0xf0]  ;;  %v5454_v27 = vor.u32 %v6020_v17, %v6018_v12 }
  0x31   :  { %347 = vmatpush.bf16.msra.mxu2 %v5510_v2  ;;  %v6034_v25 = vld [vmem:[#allocation2 + $0xc] sm:$0xf]  ;;  %360 = vmatpush.bf16.msra.mxu3 %v5514_v6  ;;  %v5458_v28 = vor.u32 %v6022_v18, %v6024_v19  ;;  %v5462_v29 = vor.u32 %v6032_v24, %v6030_v23  ;;  %v6044_v30 = vld [vmem:[#allocation2 + $0x18] sm:$0xf0]  ;;  %v389_v31 = vld [vmem:[#allocation4 + $0x60] sm:$0xff] }
  0x32   :  { %v5466_v32 = vor.u32 %v6034_v25, %v6044_v30  ;;  %v497_v33 = vunpack.c.2.s8 %v389_v31  ;;  %v501_v34 = vunpack.c.3.s8 %v389_v31  ;;  %v405_v35 = vld [vmem:[#allocation4 + $0xe0] sm:$0xff]  ;;  %v489_v36 = vunpack.c.0.s8 %v389_v31 }
  0x33   :  { %322 = vmatpush.bf16.msra.mxu0 %v5486_v13  ;;  %v561_v37 = vunpack.c.2.s8 %v405_v35  ;;  %v565_v38 = vunpack.c.3.s8 %v405_v35  ;;  %v493_v39 = vunpack.c.1.s8 %v389_v31  ;;  %v553_v40 = vunpack.c.0.s8 %v405_v35  ;;  %v421_v41 = vld [vmem:[#allocation4 + $0x160] sm:$0xff] }
  0x34   :  { %335 = vmatpush.bf16.msra.mxu1 %v5490_v14  ;;  %v753_v42 = vcvt.s32.f32 %v497_v33  ;;  %v757_v43 = vcvt.s32.f32 %v501_v34  ;;  %v6048_v44 = vcvt.s32.f32 %v489_v36  ;;  %v557_v45 = vunpack.c.1.s8 %v405_v35  ;;  %v437_v46 = vld [vmem:[#allocation4 + $0x1e0] sm:$0xff] }
  0x35   :  { %348 = vmatpush.bf16.msra.mxu2 %v5494_v15  ;;  %361 = vmatpush.bf16.msra.mxu3 %v5498_v16  ;;  %v817_v47 = vcvt.s32.f32 %v561_v37  ;;  %v821_v48 = vcvt.s32.f32 %v565_v38  ;;  %v6050_v49 = vcvt.s32.f32 %v493_v39  ;;  %v6052_v50 = vcvt.s32.f32 %v553_v40  ;;  %v385_v51 = vld [vmem:[#allocation4 + $0x40] sm:$0xff] }
  0x36   :  { %v981_v52 = vpack.c.bf16 %v757_v43, %v753_v42  ;;  %v6054_v53 = vcvt.s32.f32 %v557_v45  ;;  %v625_v54 = vunpack.c.2.s8 %v421_v41  ;;  %v629_v55 = vunpack.c.3.s8 %v421_v41  ;;  %v6056_v56 = vld [vmem:[#allocation4 + $0xc0] sm:$0xff] }
  0x37   :  { %323 = vmatpush.bf16.msra.mxu0 %v5470_v20  ;;  %v1013_v57 = vpack.c.bf16 %v821_v48, %v817_v47  ;;  %v977_v58 = vpack.c.bf16 %v6050_v49, %v6048_v44  ;;  %v689_v59 = vunpack.c.2.s8 %v437_v46  ;;  %v693_v60 = vunpack.c.3.s8 %v437_v46  ;;  %v114_v9 = vld [vmem:[%s7773_s0] sm:$0xf] }
  0x38   :  { %336 = vmatpush.bf16.msra.mxu1 %v5474_v21  ;;  %v1009_v61 = vpack.c.bf16 %v6054_v53, %v6052_v50  ;;  %v881_v62 = vcvt.s32.f32 %v625_v54  ;;  %v885_v63 = vcvt.s32.f32 %v629_v55  ;;  %v481_v0 = vunpack.c.2.s8 %v385_v51  ;;  %v397_v37 = vld [vmem:[#allocation4 + $0xa0] sm:$0xff] }
  0x39   :  { %349 = vmatpush.bf16.msra.mxu2 %v5478_v22  ;;  %362 = vmatpush.bf16.msra.mxu3 %v5482_v26  ;;  %v945_v1 = vcvt.s32.f32 %v689_v59  ;;  %v949_v2 = vcvt.s32.f32 %v693_v60  ;;  %v485_v3 = vunpack.c.3.s8 %v385_v51  ;;  %v545_v4 = vunpack.c.2.s8 %v6056_v56  ;;  %v417_v22 = vld [vmem:[#allocation4 + $0x140] sm:$0xff] }
  0x3a   :  { %v1045_v5 = vpack.c.bf16 %v885_v63, %v881_v62  ;;  %v6063_v6 = vcvt.s32.f32 %v481_v0  ;;  %v549_v7 = vunpack.c.3.s8 %v6056_v56  ;;  %v617_v8 = vunpack.c.0.s8 %v421_v41 }
  0x3b   :  { %324 = vmatpush.bf16.msra.mxu0 %v5454_v27  ;;  %v1077_v10 = vpack.c.bf16 %v949_v2, %v945_v1  ;;  %v741_v11 = vcvt.s32.f32 %v485_v3  ;;  %v801_v12 = vcvt.s32.f32 %v545_v4  ;;  %v621_v13 = vunpack.c.1.s8 %v421_v41  ;;  %v433_v27 = vld [vmem:[#allocation4 + $0x1c0] sm:$0xff] }
  0x3c   :  { %337 = vmatpush.bf16.msra.mxu1 %v5458_v28  ;;  %v805_v14 = vcvt.s32.f32 %v549_v7  ;;  %v873_v15 = vcvt.s32.f32 %v617_v8  ;;  %v681_v16 = vunpack.c.0.s8 %v437_v46  ;;  %v685_v17 = vunpack.c.1.s8 %v437_v46  ;;  %v413_v2 = vld [vmem:[#allocation4 + $0x120] sm:$0xff] }
  0x3d   :  { %350 = vmatpush.bf16.msra.mxu2 %v5462_v29  ;;  %363 = vmatpush.bf16.msra.mxu3 %v5466_v32  ;;  %v973_v18 = vpack.c.bf16 %v741_v11, %v6063_v6  ;;  %v877_v19 = vcvt.s32.f32 %v621_v13  ;;  %v473_v20 = vunpack.c.0.s8 %v385_v51  ;;  %v477_v21 = vunpack.c.1.s8 %v385_v51  ;;  %v381_v32 = vld [vmem:[#allocation4 + $0x20] sm:$0xff] }
  0x3e   :  { %325 = vmatmul.bf16.vlgmr.msra.gmra.mxu0 %v114_v9  ;;  %v1005_v23 = vpack.c.bf16 %v805_v14, %v801_v12  ;;  %v937_v24 = vcvt.s32.f32 %v681_v16  ;;  %v941_v25 = vcvt.s32.f32 %v685_v17  ;;  %v537_v26 = vunpack.c.0.s8 %v6056_v56  ;;  %v429_v7 = vld [vmem:[#allocation4 + $0x1a0] sm:$0xff] }
  0x3f   :  { %1081 = vmatpush.bf16.msrb.mxu0 %v981_v52  ;;  %338 = vmatmul.bf16.vlgmr.msra.gmra.mxu1 %v114_v9  ;;  %v1041_v28 = vpack.c.bf16 %v877_v19, %v873_v15  ;;  %v729_v29 = vcvt.s32.f32 %v473_v20  ;;  %v733_v30 = vcvt.s32.f32 %v477_v21  ;;  %v541_v31 = vunpack.c.1.s8 %v6056_v56  ;;  %v377_v12 = vld [vmem:[#allocation4] sm:$0xff] }
  0x40   :  { %1094 = vmatpush.bf16.msrb.mxu1 %v1013_v57  ;;  %351 = vmatmul.bf16.vlgmr.msra.gmra.mxu2 %v114_v9  ;;  %v1073_v33 = vpack.c.bf16 %v941_v25, %v937_v24  ;;  %v793_v34 = vcvt.s32.f32 %v537_v26  ;;  %v609_v35 = vunpack.c.2.s8 %v417_v22  ;;  %v613_v36 = vunpack.c.3.s8 %v417_v22  ;;  %v393_v17 = vld [vmem:[#allocation4 + $0x80] sm:$0xff] }
  0x41   :  { %364 = vmatmul.bf16.vlgmr.msra.gmra.mxu3 %v114_v9  ;;  %1107 = vmatpush.bf16.msrb.mxu2 %v1045_v5  ;;  %v969_v38 = vpack.c.bf16 %v733_v30, %v729_v29  ;;  %v797_v39 = vcvt.s32.f32 %v541_v31  ;;  %v673_v40 = vunpack.c.2.s8 %v433_v27  ;;  %v677_v41 = vunpack.c.3.s8 %v433_v27 }
  0x42   :  { %1120 = vmatpush.bf16.msrb.mxu3 %v1077_v10  ;;  %v865_v42 = vcvt.s32.f32 %v609_v35  ;;  %v869_v43 = vcvt.s32.f32 %v613_v36  ;;  %v465_v44 = vunpack.c.2.s8 %v381_v32  ;;  %v469_v45 = vunpack.c.3.s8 %v381_v32 }
  0x43   :  { %1082 = vmatpush.bf16.msrb.mxu0 %v977_v58  ;;  %v1001_v46 = vpack.c.bf16 %v797_v39, %v793_v34  ;;  %v929_v47 = vcvt.s32.f32 %v673_v40  ;;  %v933_v48 = vcvt.s32.f32 %v677_v41  ;;  %v529_v49 = vunpack.c.2.s8 %v397_v37 }
  0x44   :  { %1095 = vmatpush.bf16.msrb.mxu1 %v1009_v61  ;;  %v1037_v50 = vpack.c.bf16 %v869_v43, %v865_v42  ;;  %v721_v51 = vcvt.s32.f32 %v465_v44  ;;  %v725_v52 = vcvt.s32.f32 %v469_v45  ;;  %v533_v53 = vunpack.c.3.s8 %v397_v37 }
  0x45   :  { %1108 = vmatpush.bf16.msrb.mxu2 %v1041_v28  ;;  %v1069_v54 = vpack.c.bf16 %v933_v48, %v929_v47  ;;  %v785_v55 = vcvt.s32.f32 %v529_v49  ;;  %v601_v56 = vunpack.c.0.s8 %v417_v22  ;;  %v605_v57 = vunpack.c.1.s8 %v417_v22 }
  0x46   :  { %1121 = vmatpush.bf16.msrb.mxu3 %v1073_v33  ;;  %v965_v58 = vpack.c.bf16 %v725_v52, %v721_v51  ;;  %v789_v59 = vcvt.s32.f32 %v533_v53  ;;  %v665_v60 = vunpack.c.0.s8 %v433_v27  ;;  %v669_v61 = vunpack.c.1.s8 %v433_v27  ;;  %v406_v51 = vld [vmem:[#allocation4 + $0xe8] sm:$0xff] }
  0x47   :  { %1083 = vmatpush.bf16.msrb.mxu0 %v973_v18  ;;  %v857_v62 = vcvt.s32.f32 %v601_v56  ;;  %v861_v63 = vcvt.s32.f32 %v605_v57  ;;  %v457_v0 = vunpack.c.0.s8 %v381_v32  ;;  %v461_v1 = vunpack.c.1.s8 %v381_v32  ;;  %v409_v56 = vld [vmem:[#allocation4 + $0x100] sm:$0xff] }
  0x48   :  { %1096 = vmatpush.bf16.msrb.mxu1 %v1005_v23  ;;  %v997_v3 = vpack.c.bf16 %v789_v59, %v785_v55  ;;  %v921_v4 = vcvt.s32.f32 %v665_v60  ;;  %v925_v5 = vcvt.s32.f32 %v669_v61  ;;  %v521_v6 = vunpack.c.0.s8 %v397_v37  ;;  %v425_v61 = vld [vmem:[#allocation4 + $0x180] sm:$0xff] }
  0x49   :  { %1109 = vmatpush.bf16.msrb.mxu2 %v1037_v50  ;;  %v1033_v8 = vpack.c.bf16 %v861_v63, %v857_v62  ;;  %v713_v9 = vcvt.s32.f32 %v457_v0  ;;  %v717_v10 = vcvt.s32.f32 %v461_v1  ;;  %v525_v11 = vunpack.c.1.s8 %v397_v37 }
  0x4a   :  { %1122 = vmatpush.bf16.msrb.mxu3 %v1069_v54  ;;  %v1065_v13 = vpack.c.bf16 %v925_v5, %v921_v4  ;;  %v777_v14 = vcvt.s32.f32 %v521_v6  ;;  %v593_v15 = vunpack.c.2.s8 %v413_v2  ;;  %v597_v16 = vunpack.c.3.s8 %v413_v2 }
  0x4b   :  { %1084 = vmatpush.bf16.msrb.mxu0 %v969_v38  ;;  %v961_v18 = vpack.c.bf16 %v717_v10, %v713_v9  ;;  %v781_v19 = vcvt.s32.f32 %v525_v11  ;;  %v657_v20 = vunpack.c.2.s8 %v429_v7  ;;  %v661_v21 = vunpack.c.3.s8 %v429_v7 }
  0x4c   :  { %1097 = vmatpush.bf16.msrb.mxu1 %v1001_v46  ;;  %v849_v22 = vcvt.s32.f32 %v593_v15  ;;  %v853_v23 = vcvt.s32.f32 %v597_v16  ;;  %v449_v24 = vunpack.c.2.s8 %v377_v12  ;;  %v453_v25 = vunpack.c.3.s8 %v377_v12  ;;  %v390_v46 = vld [vmem:[#allocation4 + $0x68] sm:$0xff] }
  0x4d   :  { %1110 = vmatpush.bf16.msrb.mxu2 %v1033_v8  ;;  %v993_v26 = vpack.c.bf16 %v781_v19, %v777_v14  ;;  %v913_v27 = vcvt.s32.f32 %v657_v20  ;;  %v917_v28 = vcvt.s32.f32 %v661_v21  ;;  %v513_v29 = vunpack.c.2.s8 %v393_v17 }
  0x4e   :  { %1123 = vmatpush.bf16.msrb.mxu3 %v1065_v13  ;;  %v1029_v30 = vpack.c.bf16 %v853_v23, %v849_v22  ;;  %v705_v31 = vcvt.s32.f32 %v449_v24  ;;  %v709_v32 = vcvt.s32.f32 %v453_v25  ;;  %v517_v33 = vunpack.c.3.s8 %v393_v17 }
  0x4f   :  { %1085 = vmatpush.bf16.msrb.mxu0 %v965_v58  ;;  %v1061_v34 = vpack.c.bf16 %v917_v28, %v913_v27  ;;  %v769_v35 = vcvt.s32.f32 %v513_v29  ;;  %v585_v36 = vunpack.c.0.s8 %v413_v2  ;;  %v589_v37 = vunpack.c.1.s8 %v413_v2 }
  0x50   :  { %1098 = vmatpush.bf16.msrb.mxu1 %v997_v3  ;;  %v957_v38 = vpack.c.bf16 %v709_v32, %v705_v31  ;;  %v773_v39 = vcvt.s32.f32 %v517_v33  ;;  %v649_v40 = vunpack.c.0.s8 %v429_v7  ;;  %v653_v41 = vunpack.c.1.s8 %v429_v7  ;;  %v438_v31 = vld [vmem:[#allocation4 + $0x1e8] sm:$0xff] }
  0x51   :  { %1111 = vmatpush.bf16.msrb.mxu2 %v1029_v30  ;;  %v841_v42 = vcvt.s32.f32 %v585_v36  ;;  %v845_v43 = vcvt.s32.f32 %v589_v37  ;;  %v441_v44 = vunpack.c.0.s8 %v377_v12  ;;  %v445_v45 = vunpack.c.1.s8 %v377_v12  ;;  %v386_v36 = vld [vmem:[#allocation4 + $0x48] sm:$0xff] }
  0x52   :  { %1124 = vmatpush.bf16.msrb.mxu3 %v1061_v34  ;;  %v989_v47 = vpack.c.bf16 %v773_v39, %v769_v35  ;;  %v905_v48 = vcvt.s32.f32 %v649_v40  ;;  %v909_v49 = vcvt.s32.f32 %v653_v41  ;;  %v505_v50 = vunpack.c.0.s8 %v393_v17  ;;  %v402_v41 = vld [vmem:[#allocation4 + $0xc8] sm:$0xff] }
  0x53   :  { %1086 = vmatpush.bf16.msrb.mxu0 %v961_v18  ;;  %v1025_v52 = vpack.c.bf16 %v845_v43, %v841_v42  ;;  %v697_v53 = vcvt.s32.f32 %v441_v44  ;;  %v701_v54 = vcvt.s32.f32 %v445_v45  ;;  %v509_v55 = vunpack.c.1.s8 %v393_v17 }
  0x54   :  { %1099 = vmatpush.bf16.msrb.mxu1 %v993_v26  ;;  %v1057_v57 = vpack.c.bf16 %v909_v49, %v905_v48  ;;  %v761_v58 = vcvt.s32.f32 %v505_v50  ;;  %v498_v59 = vunpack.c.2.s8 %v390_v46  ;;  %v502_v60 = vunpack.c.3.s8 %v390_v46  ;;  %v422_v26 = vld [vmem:[#allocation4 + $0x168] sm:$0xff] }
  0x55   :  { %1112 = vmatpush.bf16.msrb.mxu2 %v1025_v52  ;;  %v953_v62 = vpack.c.bf16 %v701_v54, %v697_v53  ;;  %v765_v63 = vcvt.s32.f32 %v509_v55  ;;  %v562_v0 = vunpack.c.2.s8 %v406_v51  ;;  %v566_v1 = vunpack.c.3.s8 %v406_v51 }
  0x56   :  { %1125 = vmatpush.bf16.msrb.mxu3 %v1057_v57  ;;  %v754_v2 = vcvt.s32.f32 %v498_v59  ;;  %v758_v3 = vcvt.s32.f32 %v502_v60  ;;  %v577_v4 = vunpack.c.2.s8 %v409_v56  ;;  %v581_v5 = vunpack.c.3.s8 %v409_v56 }
  0x57   :  { %1087 = vmatpush.bf16.msrb.mxu0 %v957_v38  ;;  %v985_v6 = vpack.c.bf16 %v765_v63, %v761_v58  ;;  %v818_v7 = vcvt.s32.f32 %v562_v0  ;;  %v822_v8 = vcvt.s32.f32 %v566_v1  ;;  %v641_v9 = vunpack.c.2.s8 %v425_v61 }
  0x58   :  { %1100 = vmatpush.bf16.msrb.mxu1 %v989_v47  ;;  %v982_v10 = vpack.c.bf16 %v758_v3, %v754_v2  ;;  %v833_v11 = vcvt.s32.f32 %v577_v4  ;;  %v837_v12 = vcvt.s32.f32 %v581_v5  ;;  %v645_v13 = vunpack.c.3.s8 %v425_v61 }
  0x59   :  { %v1014_v14 = vpack.c.bf16 %v822_v8, %v818_v7  ;;  %v897_v15 = vcvt.s32.f32 %v641_v9  ;;  %v490_v16 = vunpack.c.0.s8 %v390_v46  ;;  %v494_v17 = vunpack.c.1.s8 %v390_v46 }
  0x5a   :  { %v1021_v18 = vpack.c.bf16 %v837_v12, %v833_v11  ;;  %v901_v19 = vcvt.s32.f32 %v645_v13  ;;  %v554_v20 = vunpack.c.0.s8 %v406_v51  ;;  %v558_v21 = vunpack.c.1.s8 %v406_v51  ;;  %v434_v11 = vld [vmem:[#allocation4 + $0x1c8] sm:$0xff] }
  0x5b   :  { %1088 = vmatpush.bf16.msrb.mxu0 %v953_v62  ;;  %v746_v22 = vcvt.s32.f32 %v490_v16  ;;  %v750_v23 = vcvt.s32.f32 %v494_v17  ;;  %v569_v24 = vunpack.c.0.s8 %v409_v56  ;;  %v573_v25 = vunpack.c.1.s8 %v409_v56  ;;  %v382_v16 = vld [vmem:[#allocation4 + $0x28] sm:$0xff] }
  0x5c   :  { %1101 = vmatpush.bf16.msrb.mxu1 %v985_v6  ;;  %1113 = vmatpush.bf16.msrb.mxu2 %v1021_v18  ;;  %v1053_v27 = vpack.c.bf16 %v901_v19, %v897_v15  ;;  %v810_v28 = vcvt.s32.f32 %v554_v20  ;;  %v814_v29 = vcvt.s32.f32 %v558_v21  ;;  %v633_v30 = vunpack.c.0.s8 %v425_v61  ;;  %v418_v6 = vld [vmem:[#allocation4 + $0x148] sm:$0xff] }
  0x5d   :  { %v978_v32 = vpack.c.bf16 %v750_v23, %v746_v22  ;;  %v825_v33 = vcvt.s32.f32 %v569_v24  ;;  %v829_v34 = vcvt.s32.f32 %v573_v25  ;;  %v637_v35 = vunpack.c.1.s8 %v425_v61  ;;  %v398_v21 = vld [vmem:[#allocation4 + $0xa8] sm:$0xff] }
  0x5e   :  { %1126 = vmatpush.bf16.msrb.mxu3 %v1053_v27  ;;  %v1010_v37 = vpack.c.bf16 %v814_v29, %v810_v28  ;;  %v889_v38 = vcvt.s32.f32 %v633_v30  ;;  %v626_v39 = vunpack.c.2.s8 %v422_v26  ;;  %v630_v40 = vunpack.c.3.s8 %v422_v26 }
  0x5f   :  { %1133 = vmatpush.bf16.msra.mxu0 %v982_v10  ;;  %v1017_v42 = vpack.c.bf16 %v829_v34, %v825_v33  ;;  %v893_v43 = vcvt.s32.f32 %v637_v35  ;;  %v690_v44 = vunpack.c.2.s8 %v438_v31  ;;  %v694_v45 = vunpack.c.3.s8 %v438_v31 }
  0x60   :  { %1146 = vmatpush.bf16.msra.mxu1 %v1014_v14  ;;  %v882_v46 = vcvt.s32.f32 %v626_v39  ;;  %v886_v47 = vcvt.s32.f32 %v630_v40  ;;  %v482_v48 = vunpack.c.2.s8 %v386_v36  ;;  %v486_v49 = vunpack.c.3.s8 %v386_v36 }
  0x61   :  { %1114 = vmatpush.bf16.msrb.mxu2 %v1017_v42  ;;  %v1049_v50 = vpack.c.bf16 %v893_v43, %v889_v38  ;;  %v946_v51 = vcvt.s32.f32 %v690_v44  ;;  %v950_v52 = vcvt.s32.f32 %v694_v45  ;;  %v546_v53 = vunpack.c.2.s8 %v402_v41 }
  0x62   :  { %v1046_v54 = vpack.c.bf16 %v886_v47, %v882_v46  ;;  %v738_v55 = vcvt.s32.f32 %v482_v48  ;;  %v742_v56 = vcvt.s32.f32 %v486_v49  ;;  %v550_v57 = vunpack.c.3.s8 %v402_v41 }
  0x63   :  { %1134 = vmatpush.bf16.msra.mxu0 %v978_v32  ;;  %1127 = vmatpush.bf16.msrb.mxu3 %v1049_v50  ;;  %v1078_v58 = vpack.c.bf16 %v950_v52, %v946_v51  ;;  %v802_v59 = vcvt.s32.f32 %v546_v53  ;;  %v618_v60 = vunpack.c.0.s8 %v422_v26  ;;  %v622_v61 = vunpack.c.1.s8 %v422_v26 }
  0x64   :  { %1147 = vmatpush.bf16.msra.mxu1 %v1010_v37  ;;  %v974_v62 = vpack.c.bf16 %v742_v56, %v738_v55  ;;  %v806_v63 = vcvt.s32.f32 %v550_v57  ;;  %v682_v0 = vunpack.c.0.s8 %v438_v31  ;;  %v686_v1 = vunpack.c.1.s8 %v438_v31 }
  0x65   :  { %1159 = vmatpush.bf16.msra.mxu2 %v1046_v54  ;;  %v874_v2 = vcvt.s32.f32 %v618_v60  ;;  %v878_v3 = vcvt.s32.f32 %v622_v61  ;;  %v474_v4 = vunpack.c.0.s8 %v386_v36  ;;  %v478_v5 = vunpack.c.1.s8 %v386_v36 }
  0x66   :  { %v1006_v7 = vpack.c.bf16 %v806_v63, %v802_v59  ;;  %v938_v8 = vcvt.s32.f32 %v682_v0  ;;  %v942_v9 = vcvt.s32.f32 %v686_v1  ;;  %v538_v10 = vunpack.c.0.s8 %v402_v41  ;;  %v414_v63 = vld [vmem:[#allocation4 + $0x128] sm:$0xff] }
  0x67   :  { %1172 = vmatpush.bf16.msra.mxu3 %v1078_v58  ;;  %1135 = vmatpush.bf16.msra.mxu0 %v974_v62  ;;  %v1042_v12 = vpack.c.bf16 %v878_v3, %v874_v2  ;;  %v730_v13 = vcvt.s32.f32 %v474_v4  ;;  %v734_v14 = vcvt.s32.f32 %v478_v5  ;;  %v542_v15 = vunpack.c.1.s8 %v402_v41  ;;  %v430_v0 = vld [vmem:[#allocation4 + $0x1a8] sm:$0xff] }
  0x68   :  { %1148 = vmatpush.bf16.msra.mxu1 %v1006_v7  ;;  %v1074_v17 = vpack.c.bf16 %v942_v9, %v938_v8  ;;  %v794_v18 = vcvt.s32.f32 %v538_v10  ;;  %v610_v19 = vunpack.c.2.s8 %v418_v6  ;;  %v614_v20 = vunpack.c.3.s8 %v418_v6  ;;  %v378_v5 = vld [vmem:[#allocation4 + $0x8] sm:$0xff] }
  0x69   :  { %1160 = vmatpush.bf16.msra.mxu2 %v1042_v12  ;;  %v970_v22 = vpack.c.bf16 %v734_v14, %v730_v13  ;;  %v798_v23 = vcvt.s32.f32 %v542_v15  ;;  %v674_v24 = vunpack.c.2.s8 %v434_v11  ;;  %v678_v25 = vunpack.c.3.s8 %v434_v11 }
  0x6a   :  { %v866_v26 = vcvt.s32.f32 %v610_v19  ;;  %v870_v27 = vcvt.s32.f32 %v614_v20  ;;  %v466_v28 = vunpack.c.2.s8 %v382_v16  ;;  %v470_v29 = vunpack.c.3.s8 %v382_v16 }
  0x6b   :  { %1173 = vmatpush.bf16.msra.mxu3 %v1074_v17  ;;  %1136 = vmatpush.bf16.msra.mxu0 %v970_v22  ;;  %v1002_v30 = vpack.c.bf16 %v798_v23, %v794_v18  ;;  %v930_v31 = vcvt.s32.f32 %v674_v24  ;;  %v934_v32 = vcvt.s32.f32 %v678_v25  ;;  %v530_v33 = vunpack.c.2.s8 %v398_v21 }
  0x6c   :  { %v1038_v34 = vpack.c.bf16 %v870_v27, %v866_v26  ;;  %v722_v35 = vcvt.s32.f32 %v466_v28  ;;  %v726_v36 = vcvt.s32.f32 %v470_v29  ;;  %v534_v37 = vunpack.c.3.s8 %v398_v21  ;;  %v6072_v26 = vld [vmem:[#allocation9] ss:$8 sm:$0xf] }
  0x6d   :  { %1149 = vmatpush.bf16.msra.mxu1 %v1002_v30  ;;  %v1070_v38 = vpack.c.bf16 %v934_v32, %v930_v31  ;;  %v786_v39 = vcvt.s32.f32 %v530_v33  ;;  %v602_v40 = vunpack.c.0.s8 %v418_v6  ;;  %v606_v41 = vunpack.c.1.s8 %v418_v6  ;;  %v394_v6 = vld [vmem:[#allocation4 + $0x88] sm:$0xff]  ;;  %v391_v31 = vld [vmem:[#allocation4 + $0x70] sm:$0xff] }
  0x6e   :  { %1161 = vmatpush.bf16.msra.mxu2 %v1038_v34  ;;  %v966_v42 = vpack.c.bf16 %v726_v36, %v722_v35  ;;  %v790_v43 = vcvt.s32.f32 %v534_v37  ;;  %v666_v44 = vunpack.c.0.s8 %v434_v11  ;;  %v670_v45 = vunpack.c.1.s8 %v434_v11 }
  0x6f   :  { %1174 = vmatpush.bf16.msra.mxu3 %v1070_v38  ;;  %v858_v46 = vcvt.s32.f32 %v602_v40  ;;  %v862_v47 = vcvt.s32.f32 %v606_v41  ;;  %v458_v48 = vunpack.c.0.s8 %v382_v16  ;;  %v462_v49 = vunpack.c.1.s8 %v382_v16  ;;  %v407_v40 = vld [vmem:[#allocation4 + $0xf0] sm:$0xff] }
  0x70   :  { %1137 = vmatpush.bf16.msra.mxu0 %v966_v42  ;;  %v998_v50 = vpack.c.bf16 %v790_v43, %v786_v39  ;;  %v922_v51 = vcvt.s32.f32 %v666_v44  ;;  %v926_v52 = vcvt.s32.f32 %v670_v45  ;;  %v522_v53 = vunpack.c.0.s8 %v398_v21  ;;  %v410_v45 = vld [vmem:[#allocation4 + $0x108] sm:$0xff] }
  0x71   :  { %v1034_v54 = vpack.c.bf16 %v862_v47, %v858_v46  ;;  %v714_v55 = vcvt.s32.f32 %v458_v48  ;;  %v718_v56 = vcvt.s32.f32 %v462_v49  ;;  %v526_v57 = vunpack.c.1.s8 %v398_v21  ;;  %v426_v46 = vld [vmem:[#allocation4 + $0x188] sm:$0xff] }
  0x72   :  { %1150 = vmatpush.bf16.msra.mxu1 %v998_v50  ;;  %v1066_v58 = vpack.c.bf16 %v926_v52, %v922_v51  ;;  %v778_v59 = vcvt.s32.f32 %v522_v53  ;;  %v594_v1 = vunpack.c.2.s8 %v414_v63  ;;  %v598_v2 = vunpack.c.3.s8 %v414_v63 }
  0x73   :  { %1162 = vmatpush.bf16.msra.mxu2 %v1034_v54  ;;  %v962_v60 = vpack.c.bf16 %v718_v56, %v714_v55  ;;  %v782_v61 = vcvt.s32.f32 %v526_v57  ;;  %v658_v3 = vunpack.c.2.s8 %v430_v0  ;;  %v662_v4 = vunpack.c.3.s8 %v430_v0 }
  0x74   :  { %1175 = vmatpush.bf16.msra.mxu3 %v1066_v58  ;;  %v850_v7 = vcvt.s32.f32 %v594_v1  ;;  %v854_v8 = vcvt.s32.f32 %v598_v2  ;;  %v450_v11 = vunpack.c.2.s8 %v378_v5  ;;  %v454_v12 = vunpack.c.3.s8 %v378_v5 }
  0x75   :  { %1138 = vmatpush.bf16.msra.mxu0 %v962_v60  ;;  %v994_v62 = vpack.c.bf16 %v782_v61, %v778_v59  ;;  %v914_v9 = vcvt.s32.f32 %v658_v3  ;;  %v918_v10 = vcvt.s32.f32 %v662_v4  ;;  %v514_v13 = vunpack.c.2.s8 %v394_v6 }
  0x76   :  { %v518_v14 = vunpack.c.3.s8 %v394_v6  ;;  %v1030_v15 = vpack.c.bf16 %v854_v8, %v850_v7  ;;  %v586_v17 = vunpack.c.0.s8 %v414_v63  ;;  %v590_v18 = vunpack.c.1.s8 %v414_v63 }
  0x77   :  { %1151 = vmatpush.bf16.msra.mxu1 %v994_v62  ;;  %v1062_v16 = vpack.c.bf16 %v918_v10, %v914_v9  ;;  %v706_v19 = vcvt.s32.f32 %v450_v11  ;;  %v710_v20 = vcvt.s32.f32 %v454_v12  ;;  %v770_v21 = vcvt.s32.f32 %v514_v13  ;;  %v423_v11 = vld [vmem:[#allocation4 + $0x170] sm:$0xff] }
  0x78   :  { %1163 = vmatpush.bf16.msra.mxu2 %v1030_v15  ;;  %v774_v22 = vcvt.s32.f32 %v518_v14  ;;  %v842_v23 = vcvt.s32.f32 %v586_v17  ;;  %v846_v24 = vcvt.s32.f32 %v590_v18  ;;  %v650_v25 = vunpack.c.0.s8 %v430_v0 }
  0x79   :  { %1176 = vmatpush.bf16.msra.mxu3 %v1062_v16  ;;  %v958_v27 = vpack.c.bf16 %v710_v20, %v706_v19  ;;  %v654_v28 = vunpack.c.1.s8 %v430_v0  ;;  %v442_v29 = vunpack.c.0.s8 %v378_v5  ;;  %v446_v30 = vunpack.c.1.s8 %v378_v5  ;;  %v439_v16 = vld [vmem:[#allocation4 + $0x1f0] sm:$0xff] }
  0x7a   :  { %v990_v32 = vpack.c.bf16 %v774_v22, %v770_v21  ;;  %v1026_v33 = vpack.c.bf16 %v846_v24, %v842_v23  ;;  %v906_v34 = vcvt.s32.f32 %v650_v25  ;;  %v506_v35 = vunpack.c.0.s8 %v394_v6  ;;  %v387_v25 = vld [vmem:[#allocation4 + $0x50] sm:$0xff] }
  0x7b   :  { %1139 = vmatpush.bf16.msra.mxu0 %v958_v27  ;;  %v910_v36 = vcvt.s32.f32 %v654_v28  ;;  %v698_v37 = vcvt.s32.f32 %v442_v29  ;;  %v702_v38 = vcvt.s32.f32 %v446_v30  ;;  %v510_v39 = vunpack.c.1.s8 %v394_v6 }
  0x7c   :  { %v149_v41 = vperm.slane %v6072_v26, 0  ;;  %1152 = vmatpush.bf16.msra.mxu1 %v990_v32  ;;  %1164 = vmatpush.bf16.msra.mxu2 %v1026_v33  ;;  %v762_v42 = vcvt.s32.f32 %v506_v35  ;;  %v499_v43 = vunpack.c.2.s8 %v391_v31  ;;  %v503_v44 = vunpack.c.3.s8 %v391_v31 }
  0x7d   :  { %v150_v47 = vperm.slane %v6072_v26, 1  ;;  %v1058_v48 = vpack.c.bf16 %v910_v36, %v906_v34  ;;  %v954_v49 = vpack.c.bf16 %v702_v38, %v698_v37  ;;  %v766_v50 = vcvt.s32.f32 %v510_v39 }
  0x7e   :  { %v6076_v51 = vcvt.s32.f32 %v499_v43  ;;  %v6078_v52 = vcvt.s32.f32 %v503_v44  ;;  %v563_v53 = vunpack.c.2.s8 %v407_v40  ;;  %v567_v54 = vunpack.c.3.s8 %v407_v40 }
  0x7f   :  { %1177 = vmatpush.bf16.msra.mxu3 %v1058_v48  ;;  %1140 = vmatpush.bf16.msra.mxu0 %v954_v49  ;;  %v986_v55 = vpack.c.bf16 %v766_v50, %v762_v42  ;;  %v578_v56 = vunpack.c.2.s8 %v410_v45  ;;  %v582_v57 = vunpack.c.3.s8 %v410_v45  ;;  %v642_v58 = vunpack.c.2.s8 %v426_v46 }
  0x80   :  { %v151_v59 = vperm.slane %v6072_v26, 2  ;;  %v6081_v60 = vcvt.s32.f32 %v563_v53  ;;  %v6083_v61 = vcvt.s32.f32 %v567_v54  ;;  %v646_v62 = vunpack.c.3.s8 %v426_v46 }
  0x81   :  { %1153 = vmatpush.bf16.msra.mxu1 %v986_v55  ;;  %v834_v63 = vcvt.s32.f32 %v578_v56  ;;  %v838_v0 = vcvt.s32.f32 %v582_v57  ;;  %v898_v1 = vcvt.s32.f32 %v642_v58  ;;  %v491_v2 = vunpack.c.0.s8 %v391_v31 }
  0x82   :  { %v152_v3 = vperm.slane %v6072_v26, 3  ;;  %v902_v4 = vcvt.s32.f32 %v646_v62  ;;  %v495_v5 = vunpack.c.1.s8 %v391_v31  ;;  %v555_v6 = vunpack.c.0.s8 %v407_v40  ;;  %v403_v31 = vld [vmem:[#allocation4 + $0xd0] sm:$0xff] }
  0x83   :  { %v983_v7 = vpack.c.bf16 %v6078_v52, %v6076_v51  ;;  %v1022_v8 = vpack.c.bf16 %v838_v0, %v834_v63  ;;  %v559_v9 = vunpack.c.1.s8 %v407_v40  ;;  %v570_v10 = vunpack.c.0.s8 %v410_v45  ;;  %v419_v63 = vld [vmem:[#allocation4 + $0x150] sm:$0xff] }
  0x84   :  { %v1015_v12 = vpack.c.bf16 %v6083_v61, %v6081_v60  ;;  %v1054_v13 = vpack.c.bf16 %v902_v4, %v898_v1  ;;  %v6090_v14 = vcvt.s32.f32 %v491_v2  ;;  %v574_v15 = vunpack.c.1.s8 %v410_v45  ;;  %v6186_v1 = vld [vmem:[#allocation4 + $0x1b0] sm:$0xff] }
  0x85   :  { %1165 = vmatpush.bf16.msra.mxu2 %v1022_v8  ;;  %v6092_v17 = vcvt.s32.f32 %v495_v5  ;;  %v826_v18 = vcvt.s32.f32 %v570_v10  ;;  %v634_v19 = vunpack.c.0.s8 %v426_v46  ;;  %v638_v20 = vunpack.c.1.s8 %v426_v46  ;;  %v435_v5 = vld [vmem:[#allocation4 + $0x1d0] sm:$0xff] }
  0x86   :  { %1178 = vmatpush.bf16.msra.mxu3 %v1054_v13  ;;  %v6094_v21 = vcvt.s32.f32 %v555_v6  ;;  %v830_v22 = vcvt.s32.f32 %v574_v15  ;;  %v627_v23 = vunpack.c.2.s8 %v423_v11  ;;  %v631_v24 = vunpack.c.3.s8 %v423_v11 }
  0x87   :  { %v6096_v27 = vcvt.s32.f32 %v559_v9  ;;  %v890_v28 = vcvt.s32.f32 %v634_v19  ;;  %v894_v29 = vcvt.s32.f32 %v638_v20  ;;  %v691_v30 = vunpack.c.2.s8 %v439_v16 }
  0x88   :  { %v1018_v32 = vpack.c.bf16 %v830_v22, %v826_v18  ;;  %v6098_v33 = vcvt.s32.f32 %v627_v23  ;;  %v6100_v34 = vcvt.s32.f32 %v631_v24  ;;  %v695_v35 = vunpack.c.3.s8 %v439_v16  ;;  %v383_v18 = vld [vmem:[#allocation4 + $0x30] sm:$0xff] }
  0x89   :  { %v979_v36 = vpack.c.bf16 %v6092_v17, %v6090_v14  ;;  %v1050_v37 = vpack.c.bf16 %v894_v29, %v890_v28  ;;  %v483_v38 = vunpack.c.2.s8 %v387_v25  ;;  %v487_v39 = vunpack.c.3.s8 %v387_v25  ;;  %v399_v24 = vld [vmem:[#allocation4 + $0xb0] sm:$0xff] }
  0x8a   :  { %1166 = vmatpush.bf16.msra.mxu2 %v1018_v32  ;;  %v6104_v40 = vcvt.s32.f32 %v691_v30  ;;  %v6106_v42 = vcvt.s32.f32 %v695_v35  ;;  %v547_v43 = vunpack.c.2.s8 %v403_v31  ;;  %v551_v44 = vunpack.c.3.s8 %v403_v31 }
  0x8b   :  { %1179 = vmatpush.bf16.msra.mxu3 %v1050_v37  ;;  %v6108_v45 = vcvt.s32.f32 %v483_v38  ;;  %v6110_v46 = vcvt.s32.f32 %v487_v39  ;;  %v619_v48 = vunpack.c.0.s8 %v423_v11  ;;  %v623_v49 = vunpack.c.1.s8 %v423_v11  ;;  %v6180_v38 = vld [vmem:[#allocation4 + $0x130] sm:$0xff] }
  0x8c   :  { %v1011_v50 = vpack.c.bf16 %v6096_v27, %v6094_v21  ;;  %v6116_v54 = vcvt.s32.f32 %v547_v43  ;;  %v683_v55 = vunpack.c.0.s8 %v439_v16  ;;  %v6118_v56 = vcvt.s32.f32 %v551_v44 }
  0x8d   :  { %v6120_v57 = vcvt.s32.f32 %v619_v48  ;;  %v6122_v58 = vcvt.s32.f32 %v623_v49  ;;  %v687_v62 = vunpack.c.1.s8 %v439_v16  ;;  %v475_v2 = vunpack.c.0.s8 %v387_v25 }
  0x8e   :  { %v479_v4 = vunpack.c.1.s8 %v387_v25  ;;  %v6128_v6 = vcvt.s32.f32 %v683_v55  ;;  %v539_v9 = vunpack.c.0.s8 %v403_v31  ;;  %v543_v10 = vunpack.c.1.s8 %v403_v31 }
  0x8f   :  { %v6130_v8 = vcvt.s32.f32 %v687_v62  ;;  %v6132_v11 = vcvt.s32.f32 %v475_v2  ;;  %v611_v15 = vunpack.c.2.s8 %v419_v63  ;;  %v615_v16 = vunpack.c.3.s8 %v419_v63 }
  0x90   :  { %v6134_v13 = vcvt.s32.f32 %v479_v4  ;;  %v6140_v22 = vcvt.s32.f32 %v539_v9  ;;  %v675_v23 = vunpack.c.2.s8 %v435_v5  ;;  %v6142_v25 = vcvt.s32.f32 %v543_v10 }
  0x91   :  { %v6144_v28 = vcvt.s32.f32 %v611_v15  ;;  %v6146_v29 = vcvt.s32.f32 %v615_v16  ;;  %v679_v30 = vunpack.c.3.s8 %v435_v5  ;;  %v467_v35 = vunpack.c.2.s8 %v383_v18 }
  0x92   :  { %v6150_v32 = vcvt.s32.f32 %v675_v23  ;;  %v471_v37 = vunpack.c.3.s8 %v383_v18  ;;  %v531_v43 = vunpack.c.2.s8 %v399_v24  ;;  %v535_v44 = vunpack.c.3.s8 %v399_v24 }
  0x93   :  { %v6154_v39 = vcvt.s32.f32 %v679_v30  ;;  %v6156_v48 = vcvt.s32.f32 %v467_v35  ;;  %v603_v55 = vunpack.c.0.s8 %v419_v63  ;;  %v607_v62 = vunpack.c.1.s8 %v419_v63 }
  0x94   :  { %v6158_v49 = vcvt.s32.f32 %v471_v37  ;;  %v667_v15 = vunpack.c.0.s8 %v435_v5  ;;  %v6170_v35 = vcvt.s32.f32 %v531_v43  ;;  %v6172_v63 = vcvt.s32.f32 %v535_v44 }
  0x95   :  { %v6176_v4 = vcvt.s32.f32 %v603_v55  ;;  %v6178_v9 = vcvt.s32.f32 %v607_v62  ;;  %v671_v10 = vunpack.c.1.s8 %v435_v5  ;;  %v463_v20 = vunpack.c.1.s8 %v383_v18 }
  0x96   :  { %v523_v44 = vunpack.c.0.s8 %v399_v24  ;;  %v527_v19 = vunpack.c.1.s8 %v399_v24  ;;  %v595_v5 = vunpack.c.2.s8 %v6180_v38  ;;  %v591_v14 = vunpack.c.1.s8 %v6180_v38 }
  0x97   :  { %v6184_v43 = vcvt.s32.f32 %v671_v10  ;;  %v6192_v62 = vcvt.s32.f32 %v463_v20  ;;  %v7781_v21 = vpack.c.bf16 %v6100_v34, %v6098_v33  ;;  %v7783_v33 = vpack.c.bf16 %v6110_v46, %v6108_v45 }
  0x98   :  { %v6201_v10 = vcvt.s32.f32 %v523_v44  ;;  %v6203_v24 = vcvt.s32.f32 %v527_v19 }
  0xbb   :  { %v326_v2 = vpop.f32.mrf.mxu0 }
  0xbc   :  { %v327_v16 = vadd.f32 %v326_v2, %v149_v41  ;;  %v339_v23 = vpop.f32.mrf.mxu1  ;;  %v6182_v41 = vcvt.s32.f32 %v667_v15  ;;  %v459_v2 = vunpack.c.0.s8 %v383_v18  ;;  %v6220_v18 = vcvt.s32.f32 %v595_v5 }
  0xbd   :  { %v340_v37 = vadd.f32 %v339_v23, %v150_v47  ;;  %v995_v5 = vpack.c.bf16 %v6203_v24, %v6201_v10 }
  0xbe   :  { %v369_v31 = vmax.f32 %v327_v16, 0.0  ;;  %v6190_v55 = vcvt.s32.f32 %v459_v2  ;;  %v6195_v16 = vld [vmem:[#allocation4 + $0x10] sm:$0xff] }
  0xbf   :  { %v370_v30 = vmax.f32 %v340_v37, 0.0  ;;  %v599_v37 = vunpack.c.3.s8 %v6180_v38  ;;  %v6212_v2 = vld [vmem:[#allocation4 + $0x90] sm:$0xff]  ;;  %v451_v0 = vunpack.c.2.s8 %v6195_v16  ;;  %v455_v52 = vunpack.c.3.s8 %v6195_v16 }
  0xc0   :  { %v6188_v47 = vpack.c.bf16 %v369_v31, %v369_v31  ;;  %v663_v31 = vunpack.c.3.s8 %v6186_v1  ;;  %v515_v26 = vunpack.c.2.s8 %v6212_v2  ;;  %v519_v61 = vunpack.c.3.s8 %v6212_v2 }
  0xc1   :  { %v6197_v15 = vpack.c.bf16 %v370_v30, %v370_v30  ;;  %v659_v30 = vunpack.c.2.s8 %v6186_v1  ;;  %v6231_v51 = vcvt.s32.f32 %v599_v37  ;;  %v6241_v60 = vcvt.s32.f32 %v451_v0 }
  0xc2   :  { %1089 = vmatmul.bf16.vlgmr.msrb.gmra.mxu0 %v6188_v47  ;;  %v6259_v0 = vcvt.s32.f32 %v515_v26  ;;  %v447_v26 = vunpack.c.1.s8 %v6195_v16 }
  0xc3   :  { %v352_v23 = vpop.f32.mrf.mxu2  ;;  %1102 = vmatmul.bf16.vlgmr.msrb.gmra.mxu1 %v6197_v15  ;;  %1185 = vmatpush.bf16.msrb.mxu0 %v983_v7  ;;  %v328_v20 = vpop.f32.mrf.mxu0  ;;  %v1031_v37 = vpack.c.bf16 %v6231_v51, %v6220_v18 }
  0xc4   :  { %v353_v44 = vadd.f32 %v352_v23, %v151_v59  ;;  %v365_v19 = vpop.f32.mrf.mxu3  ;;  %1198 = vmatpush.bf16.msrb.mxu1 %v1015_v12  ;;  %v341_v59 = vpop.f32.mrf.mxu1  ;;  %v963_v23 = vpack.c.bf16 %v6192_v62, %v6190_v55  ;;  %v6236_v20 = vcvt.s32.f32 %v659_v30  ;;  %v6251_v30 = vcvt.s32.f32 %v455_v52 }
  0xc5   :  { %v366_v53 = vadd.f32 %v365_v19, %v152_v3  ;;  %v6239_v19 = vcvt.s32.f32 %v663_v31  ;;  %v6261_v31 = vcvt.s32.f32 %v519_v61  ;;  %v655_v59 = vunpack.c.1.s8 %v6186_v1 }
  0xc6   :  { %v371_v7 = vmax.f32 %v353_v44, 0.0  ;;  %v587_v44 = vunpack.c.0.s8 %v6180_v38  ;;  %v443_v52 = vunpack.c.0.s8 %v6195_v16  ;;  %v6276_v38 = vcvt.s32.f32 %v591_v14 }
  0xc7   :  { %v372_v3 = vmax.f32 %v366_v53, 0.0  ;;  %1186 = vmatpush.bf16.msrb.mxu0 %v979_v36  ;;  %v651_v36 = vunpack.c.0.s8 %v6186_v1  ;;  %v408_v1 = vld [vmem:[#allocation4 + $0xf8] sm:$0xff]  ;;  %v7782_v61 = vpack.c.bf16 %v6106_v42, %v6104_v40  ;;  %v959_v34 = vpack.c.bf16 %v6251_v30, %v6241_v60 }
  0xc8   :  { %v6244_v12 = vpack.c.bf16 %v371_v7, %v371_v7  ;;  %1199 = vmatpush.bf16.msrb.mxu1 %v1011_v50  ;;  %v6265_v17 = vcvt.s32.f32 %v587_v44  ;;  %v392_v7 = vld [vmem:[#allocation4 + $0x78] sm:$0xff]  ;;  %v6290_v14 = vcvt.s32.f32 %v655_v59  ;;  %v511_v16 = vunpack.c.1.s8 %v6212_v2 }
  0xc9   :  { %v6254_v53 = vpack.c.bf16 %v372_v3, %v372_v3  ;;  %v507_v3 = vunpack.c.0.s8 %v6212_v2  ;;  %v7784_v50 = vpack.c.bf16 %v6118_v56, %v6116_v54  ;;  %v6300_v45 = vcvt.s32.f32 %v443_v52  ;;  %v420_v30 = vld [vmem:[#allocation4 + $0x158] sm:$0xff] }
  0xca   :  { %1115 = vmatmul.bf16.vlgmr.msrb.gmra.mxu2 %v6244_v12  ;;  %v500_v46 = vunpack.c.2.s8 %v392_v7  ;;  %v564_v2 = vunpack.c.2.s8 %v408_v1  ;;  %v7785_v54 = vpack.c.bf16 %v6122_v58, %v6120_v57  ;;  %v6309_v56 = vcvt.s32.f32 %v511_v16 }
  0xcb   :  { %1128 = vmatmul.bf16.vlgmr.msrb.gmra.mxu3 %v6254_v53  ;;  %1211 = vmatpush.bf16.msrb.mxu2 %v7781_v21  ;;  %v354_v27 = vpop.f32.mrf.mxu2  ;;  %v6288_v21 = vcvt.s32.f32 %v651_v36  ;;  %v6302_v36 = vcvt.s32.f32 %v447_v26  ;;  %v6304_v59 = vcvt.s32.f32 %v507_v3  ;;  %v7786_v52 = vpack.c.bf16 %v6130_v8, %v6128_v6 }
  0xcc   :  { %1224 = vmatpush.bf16.msrb.mxu3 %v7782_v61  ;;  %v367_v44 = vpop.f32.mrf.mxu3  ;;  %1187 = vmatpush.bf16.msrb.mxu0 %v7783_v33  ;;  %v411_v27 = vld [vmem:[#allocation4 + $0x110] sm:$0xff]  ;;  %v504_v61 = vunpack.c.3.s8 %v392_v7  ;;  %v568_v33 = vunpack.c.3.s8 %v408_v1  ;;  %v7787_v26 = vpack.c.bf16 %v6134_v13, %v6132_v11  ;;  %v6323_v57 = vcvt.s32.f32 %v564_v2 }
  0xcd   :  { %1200 = vmatpush.bf16.msrb.mxu1 %v7784_v50  ;;  %v427_v44 = vld [vmem:[#allocation4 + $0x190] sm:$0xff]  ;;  %v6311_v50 = vcvt.s32.f32 %v500_v46  ;;  %v579_v42 = vunpack.c.2.s8 %v411_v27  ;;  %v1059_v3 = vpack.c.bf16 %v6290_v14, %v6288_v21  ;;  %v583_v58 = vunpack.c.3.s8 %v411_v27 }
  0xce   :  { %v6321_v40 = vcvt.s32.f32 %v504_v61  ;;  %v7788_v16 = vpack.c.bf16 %v6142_v25, %v6140_v22  ;;  %v6328_v46 = vcvt.s32.f32 %v568_v33  ;;  %v643_v8 = vunpack.c.2.s8 %v427_v44 }
  0xcf   :  { %1212 = vmatpush.bf16.msrb.mxu2 %v7785_v54  ;;  %v6330_v6 = vcvt.s32.f32 %v579_v42  ;;  %v647_v54 = vunpack.c.3.s8 %v427_v44  ;;  %v955_v11 = vpack.c.bf16 %v6302_v36, %v6300_v45  ;;  %v6334_v13 = vcvt.s32.f32 %v583_v58 }
  0xd0   :  { %1225 = vmatpush.bf16.msrb.mxu3 %v7786_v52  ;;  %1188 = vmatpush.bf16.msrb.mxu0 %v7787_v26  ;;  %v492_v61 = vunpack.c.0.s8 %v392_v7  ;;  %v496_v52 = vunpack.c.1.s8 %v392_v7  ;;  %v7789_v2 = vpack.c.bf16 %v6146_v29, %v6144_v28  ;;  %v987_v22 = vpack.c.bf16 %v6309_v56, %v6304_v59 }
  0xd1   :  { %1201 = vmatpush.bf16.msrb.mxu1 %v7788_v16  ;;  %v6344_v42 = vcvt.s32.f32 %v643_v8  ;;  %v556_v33 = vunpack.c.0.s8 %v408_v1  ;;  %v7790_v26 = vpack.c.bf16 %v6154_v39, %v6150_v32  ;;  %v6350_v7 = vcvt.s32.f32 %v647_v54  ;;  %v424_v16 = vld [vmem:[#allocation4 + $0x178] sm:$0xff] }
  0xd2   :  { %1141 = vmatmul.bf16.vlgmr.msra.gmra.mxu0 %v6188_v47  ;;  %v6352_v28 = vcvt.s32.f32 %v492_v61  ;;  %v6354_v29 = vcvt.s32.f32 %v496_v52  ;;  %v560_v58 = vunpack.c.1.s8 %v408_v1  ;;  %v7792_v8 = vpack.c.bf16 %v6172_v63, %v6170_v35  ;;  %v440_v52 = vld [vmem:[#allocation4 + $0x1f8] sm:$0xff] }
  0xd3   :  { %1213 = vmatpush.bf16.msrb.mxu2 %v7789_v2  ;;  %1154 = vmatmul.bf16.vlgmr.msra.gmra.mxu1 %v6197_v15  ;;  %v7791_v2 = vpack.c.bf16 %v6158_v49, %v6156_v48  ;;  %v1016_v32 = vpack.c.bf16 %v6328_v46, %v6323_v57  ;;  %v571_v54 = vunpack.c.0.s8 %v411_v27  ;;  %v575_v61 = vunpack.c.1.s8 %v411_v27  ;;  %v388_v39 = vld [vmem:[#allocation4 + $0x58] sm:$0xff] }
  0xd4   :  { %1226 = vmatpush.bf16.msrb.mxu3 %v7790_v26  ;;  %v6366_v26 = vcvt.s32.f32 %v556_v33  ;;  %v6368_v1 = vcvt.s32.f32 %v560_v58  ;;  %v635_v25 = vunpack.c.0.s8 %v427_v44  ;;  %v639_v48 = vunpack.c.1.s8 %v427_v44 }
  0xd5   :  { %1189 = vmatpush.bf16.msrb.mxu0 %v7791_v2  ;;  %1202 = vmatpush.bf16.msrb.mxu1 %v7792_v8  ;;  %v7793_v49 = vpack.c.bf16 %v6178_v9, %v6176_v4  ;;  %v6373_v35 = vcvt.s32.f32 %v571_v54  ;;  %v6375_v63 = vcvt.s32.f32 %v575_v61  ;;  %v628_v2 = vunpack.c.2.s8 %v424_v16  ;;  %v404_v9 = vld [vmem:[#allocation4 + $0xd8] sm:$0xff] }
  0xd6   :  { %v632_v8 = vunpack.c.3.s8 %v424_v16  ;;  %v7794_v27 = vpack.c.bf16 %v6184_v43, %v6182_v41  ;;  %v1055_v33 = vpack.c.bf16 %v6350_v7, %v6344_v42  ;;  %v980_v44 = vpack.c.bf16 %v6354_v29, %v6352_v28 }
  0xd7   :  { %1214 = vmatpush.bf16.msrb.mxu2 %v7793_v49  ;;  %v6384_v58 = vcvt.s32.f32 %v635_v25  ;;  %v692_v4 = vunpack.c.2.s8 %v440_v52  ;;  %v6392_v41 = vcvt.s32.f32 %v639_v48  ;;  %v6394_v43 = vcvt.s32.f32 %v628_v2 }
  0xd8   :  { %1227 = vmatpush.bf16.msrb.mxu3 %v7794_v27  ;;  %v6396_v54 = vcvt.s32.f32 %v632_v8  ;;  %v696_v61 = vunpack.c.3.s8 %v440_v52  ;;  %v1012_v25 = vpack.c.bf16 %v6368_v1, %v6366_v26  ;;  %v484_v62 = vunpack.c.2.s8 %v388_v39 }
  0xd9   :  { %1190 = vmatpush.bf16.msrb.mxu0 %v963_v23  ;;  %1203 = vmatpush.bf16.msrb.mxu1 %v995_v5  ;;  %v488_v23 = vunpack.c.3.s8 %v388_v39  ;;  %v6407_v10 = vcvt.s32.f32 %v692_v4  ;;  %v548_v5 = vunpack.c.2.s8 %v404_v9  ;;  %v552_v48 = vunpack.c.3.s8 %v404_v9 }
  0xda   :  { %1167 = vmatmul.bf16.vlgmr.msra.gmra.mxu2 %v6244_v12  ;;  %v6409_v24 = vcvt.s32.f32 %v696_v61  ;;  %v7795_v49 = vpack.c.bf16 %v6239_v19, %v6236_v20  ;;  %v6414_v2 = vcvt.s32.f32 %v484_v62  ;;  %v620_v27 = vunpack.c.0.s8 %v424_v16 }
  0xdb   :  { %1180 = vmatmul.bf16.vlgmr.msra.gmra.mxu3 %v6254_v53  ;;  %1215 = vmatpush.bf16.msrb.mxu2 %v1031_v37  ;;  %v6416_v8 = vcvt.s32.f32 %v488_v23  ;;  %v624_v55 = vunpack.c.1.s8 %v424_v16  ;;  %v7796_v18 = vpack.c.bf16 %v6261_v31, %v6259_v0  ;;  %v1051_v51 = vpack.c.bf16 %v6392_v41, %v6384_v58 }
  0xdc   :  { %1228 = vmatpush.bf16.msrb.mxu3 %v7795_v49  ;;  %v1048_v20 = vpack.c.bf16 %v6396_v54, %v6394_v43  ;;  %v6428_v19 = vcvt.s32.f32 %v548_v5  ;;  %v684_v37 = vunpack.c.0.s8 %v440_v52  ;;  %v6430_v4 = vcvt.s32.f32 %v552_v48  ;;  %v6443_v43 = vld [vmem:[#allocation4 + $0x1d8] sm:$0xff] }
  0xdd   :  { %1191 = vmatpush.bf16.msrb.mxu0 %v959_v34  ;;  %1204 = vmatpush.bf16.msrb.mxu1 %v7796_v18  ;;  %v6432_v16 = vcvt.s32.f32 %v620_v27  ;;  %v6434_v61 = vcvt.s32.f32 %v624_v55  ;;  %v688_v60 = vunpack.c.1.s8 %v440_v52  ;;  %v7797_v0 = vpack.c.bf16 %v6276_v38, %v6265_v17 }
  0xde   :  { %v1080_v31 = vpack.c.bf16 %v6409_v24, %v6407_v10  ;;  %v976_v34 = vpack.c.bf16 %v6416_v8, %v6414_v2  ;;  %v476_v58 = vunpack.c.0.s8 %v388_v39  ;;  %v480_v41 = vunpack.c.1.s8 %v388_v39 }
  0xdf   :  { %1216 = vmatpush.bf16.msrb.mxu2 %v7797_v0  ;;  %v6448_v52 = vcvt.s32.f32 %v684_v37  ;;  %v6450_v54 = vcvt.s32.f32 %v688_v60  ;;  %v540_v17 = vunpack.c.0.s8 %v404_v9  ;;  %v544_v38 = vunpack.c.1.s8 %v404_v9  ;;  %v432_v37 = vld [vmem:[#allocation4 + $0x1b8] sm:$0xff] }
  0xe0   :  { %1229 = vmatpush.bf16.msrb.mxu3 %v1059_v3  ;;  %v6458_v39 = vcvt.s32.f32 %v476_v58  ;;  %v6460_v55 = vcvt.s32.f32 %v480_v41  ;;  %v612_v21 = vunpack.c.2.s8 %v420_v30  ;;  %v616_v14 = vunpack.c.3.s8 %v420_v30  ;;  %v384_v3 = vld [vmem:[#allocation4 + $0x38] sm:$0xff] }
  0xe1   :  { %1192 = vmatpush.bf16.msrb.mxu0 %v955_v11  ;;  %1205 = vmatpush.bf16.msrb.mxu1 %v987_v22  ;;  %v7798_v62 = vpack.c.bf16 %v6321_v40, %v6311_v50  ;;  %v1008_v45 = vpack.c.bf16 %v6430_v4, %v6428_v19  ;;  %v1044_v36 = vpack.c.bf16 %v6434_v61, %v6432_v16  ;;  %v6472_v59 = vcvt.s32.f32 %v540_v17  ;;  %v400_v11 = vld [vmem:[#allocation4 + $0xb8] sm:$0xff] }
  0xe2   :  { %v676_v56 = vunpack.c.2.s8 %v6443_v43  ;;  %v7799_v22 = vpack.c.bf16 %v6334_v13, %v6330_v6  ;;  %v6478_v40 = vcvt.s32.f32 %v544_v38  ;;  %v6480_v50 = vcvt.s32.f32 %v612_v21 }
  0xe3   :  { %v6482_v57 = vcvt.s32.f32 %v616_v14  ;;  %v680_v46 = vunpack.c.3.s8 %v6443_v43  ;;  %v972_v6 = vpack.c.bf16 %v6460_v55, %v6458_v39  ;;  %v468_v13 = vunpack.c.2.s8 %v384_v3 }
  0xe4   :  { %1217 = vmatpush.bf16.msrb.mxu2 %v7799_v22  ;;  %1230 = vmatpush.bf16.msrb.mxu3 %v1055_v33  ;;  %v472_v9 = vunpack.c.3.s8 %v384_v3  ;;  %v6494_v23 = vcvt.s32.f32 %v676_v56  ;;  %v532_v24 = vunpack.c.2.s8 %v400_v11  ;;  %v536_v5 = vunpack.c.3.s8 %v400_v11 }
  0xe5   :  { %1237 = vmatpush.bf16.msra.mxu0 %v7798_v62  ;;  %1250 = vmatpush.bf16.msra.mxu1 %v1016_v32  ;;  %v1076_v32 = vpack.c.bf16 %v6450_v54, %v6448_v52  ;;  %v6496_v10 = vcvt.s32.f32 %v680_v46  ;;  %v6504_v42 = vcvt.s32.f32 %v468_v13  ;;  %v604_v33 = vunpack.c.0.s8 %v420_v30  ;;  %v396_v52 = vld [vmem:[#allocation4 + $0x98] sm:$0xff] }
  0xe6   :  { %1193 = vmatmul.bf16.vlgmr.msrb.gmra.mxu0 %v6188_v47  ;;  %1206 = vmatmul.bf16.vlgmr.msrb.gmra.mxu1 %v6197_v15  ;;  %v6506_v7 = vcvt.s32.f32 %v472_v9  ;;  %v608_v48 = vunpack.c.1.s8 %v420_v30  ;;  %v7800_v49 = vpack.c.bf16 %v6375_v63, %v6373_v35  ;;  %v1004_v2 = vpack.c.bf16 %v6478_v40, %v6472_v59  ;;  %v416_v35 = vld [vmem:[#allocation4 + $0x138] sm:$0xff] }
  0xe7   :  { %v1040_v28 = vpack.c.bf16 %v6482_v57, %v6480_v50  ;;  %v788_v29 = vcvt.s32.f32 %v532_v24  ;;  %v668_v26 = vunpack.c.0.s8 %v6443_v43  ;;  %v792_v1 = vcvt.s32.f32 %v536_v5 }
  0xe8   :  { %1218 = vmatpush.bf16.msrb.mxu2 %v7800_v49  ;;  %1231 = vmatpush.bf16.msrb.mxu3 %v1051_v51  ;;  %v672_v8 = vunpack.c.1.s8 %v6443_v43  ;;  %v1072_v63 = vpack.c.bf16 %v6496_v10, %v6494_v23  ;;  %v968_v27 = vpack.c.bf16 %v6506_v7, %v6504_v42  ;;  %v460_v18 = vunpack.c.0.s8 %v384_v3  ;;  %v412_v10 = vld [vmem:[#allocation4 + $0x118] sm:$0xff] }
  0xe9   :  { %1238 = vmatpush.bf16.msra.mxu0 %v980_v44  ;;  %1251 = vmatpush.bf16.msra.mxu1 %v1012_v25  ;;  %v6516_v44 = vcvt.s32.f32 %v604_v33  ;;  %v6518_v25 = vcvt.s32.f32 %v608_v48  ;;  %v464_v19 = vunpack.c.1.s8 %v384_v3  ;;  %v924_v51 = vcvt.s32.f32 %v668_v26  ;;  %v428_v33 = vld [vmem:[#allocation4 + $0x198] sm:$0xff] }
  0xea   :  { %v524_v4 = vunpack.c.0.s8 %v400_v11  ;;  %v528_v16 = vunpack.c.1.s8 %v400_v11  ;;  %v716_v61 = vcvt.s32.f32 %v460_v18  ;;  %v596_v30 = vunpack.c.2.s8 %v416_v35 }
  0xeb   :  { %1219 = vmatmul.bf16.vlgmr.msrb.gmra.mxu2 %v6244_v12  ;;  %1232 = vmatmul.bf16.vlgmr.msrb.gmra.mxu3 %v6254_v53  ;;  %v720_v60 = vcvt.s32.f32 %v464_v19  ;;  %v600_v0 = vunpack.c.3.s8 %v416_v35  ;;  %v1000_v58 = vpack.c.bf16 %v792_v1, %v788_v29  ;;  %v1036_v41 = vpack.c.bf16 %v6518_v25, %v6516_v44 }
  0xec   :  { %1263 = vmatpush.bf16.msra.mxu2 %v1048_v20  ;;  %1276 = vmatpush.bf16.msra.mxu3 %v1080_v31  ;;  %v928_v20 = vcvt.s32.f32 %v672_v8  ;;  %v380_v31 = vld [vmem:[#allocation4 + $0x18] sm:$0xff]  ;;  %v660_v43 = vunpack.c.2.s8 %v432_v37  ;;  %v784_v54 = vcvt.s32.f32 %v528_v16  ;;  %v852_v17 = vcvt.s32.f32 %v596_v30 }
  0xed   :  { %1239 = vmatpush.bf16.msra.mxu0 %v976_v34  ;;  %1252 = vmatpush.bf16.msra.mxu1 %v1008_v45  ;;  %v780_v34 = vcvt.s32.f32 %v524_v4  ;;  %v856_v38 = vcvt.s32.f32 %v600_v0  ;;  %v664_v39 = vunpack.c.3.s8 %v432_v37  ;;  %v452_v14 = vunpack.c.2.s8 %v380_v31 }
  0xee   :  { %v1068_v55 = vpack.c.bf16 %v928_v20, %v924_v51  ;;  %v916_v21 = vcvt.s32.f32 %v660_v43  ;;  %v456_v3 = vunpack.c.3.s8 %v380_v31  ;;  %v964_v62 = vpack.c.bf16 %v720_v60, %v716_v61  ;;  %v1339_v51 = vld [vmem:[#allocation4 + $0x260] sm:$0xff] }
  0xef   :  { %v920_v45 = vcvt.s32.f32 %v664_v39  ;;  %v520_v59 = vunpack.c.3.s8 %v396_v52  ;;  %v708_v56 = vcvt.s32.f32 %v452_v14  ;;  %v588_v22 = vunpack.c.0.s8 %v416_v35 }
  0xf0   :  { %1264 = vmatpush.bf16.msra.mxu2 %v1044_v36  ;;  %1277 = vmatpush.bf16.msra.mxu3 %v1076_v32  ;;  %v516_v36 = vunpack.c.2.s8 %v396_v52  ;;  %v712_v11 = vcvt.s32.f32 %v456_v3  ;;  %v592_v40 = vunpack.c.1.s8 %v416_v35  ;;  %v996_v50 = vpack.c.bf16 %v784_v54, %v780_v34 }
  0xf1   :  { %1240 = vmatpush.bf16.msra.mxu0 %v972_v6  ;;  %1253 = vmatpush.bf16.msra.mxu1 %v1004_v2  ;;  %v1032_v57 = vpack.c.bf16 %v856_v38, %v852_v17  ;;  %v1064_v46 = vpack.c.bf16 %v920_v45, %v916_v21  ;;  %v652_v32 = vunpack.c.0.s8 %v432_v37  ;;  %v776_v9 = vcvt.s32.f32 %v520_v59 }
  0xf2   :  { %v960_v6 = vpack.c.bf16 %v712_v11, %v708_v56  ;;  %v772_v13 = vcvt.s32.f32 %v516_v36  ;;  %v656_v23 = vunpack.c.1.s8 %v432_v37  ;;  %v844_v24 = vcvt.s32.f32 %v588_v22  ;;  %v1355_v56 = vld [vmem:[#allocation4 + $0x2e0] sm:$0xff] }
  0xf3   :  { %v848_v5 = vcvt.s32.f32 %v592_v40  ;;  %v444_v42 = vunpack.c.0.s8 %v380_v31  ;;  %v448_v7 = vunpack.c.1.s8 %v380_v31  ;;  %v908_v48 = vcvt.s32.f32 %v652_v32 }
  0xf4   :  { %1265 = vmatpush.bf16.msra.mxu2 %v1040_v28  ;;  %1278 = vmatpush.bf16.msra.mxu3 %v1072_v63  ;;  %v912_v49 = vcvt.s32.f32 %v656_v23  ;;  %v508_v2 = vunpack.c.0.s8 %v396_v52  ;;  %v512_v28 = vunpack.c.1.s8 %v396_v52  ;;  %v580_v1 = vunpack.c.2.s8 %v412_v10  ;;  %v1335_v52 = vld [vmem:[#allocation4 + $0x240] sm:$0xff] }
  0xf5   :  { %1241 = vmatpush.bf16.msra.mxu0 %v968_v27  ;;  %1254 = vmatpush.bf16.msra.mxu1 %v1000_v58  ;;  %v700_v29 = vcvt.s32.f32 %v444_v42  ;;  %v704_v26 = vcvt.s32.f32 %v448_v7  ;;  %v584_v44 = vunpack.c.3.s8 %v412_v10  ;;  %v992_v25 = vpack.c.bf16 %v776_v9, %v772_v13  ;;  %v1351_v42 = vld [vmem:[#allocation4 + $0x2c0] sm:$0xff] }
  0xf6   :  { %v764_v8 = vcvt.s32.f32 %v508_v2  ;;  %v768_v35 = vcvt.s32.f32 %v512_v28  ;;  %v644_v63 = vunpack.c.2.s8 %v428_v33  ;;  %v1028_v27 = vpack.c.bf16 %v848_v5, %v844_v24 }
  0xf7   :  { %v836_v18 = vcvt.s32.f32 %v580_v1  ;;  %v840_v19 = vcvt.s32.f32 %v584_v44  ;;  %v648_v37 = vunpack.c.3.s8 %v428_v33  ;;  %v1060_v20 = vpack.c.bf16 %v912_v49, %v908_v48 }
  0xf8   :  { %1266 = vmatpush.bf16.msra.mxu2 %v1036_v41  ;;  %1279 = vmatpush.bf16.msra.mxu3 %v1068_v55  ;;  %v900_v4 = vcvt.s32.f32 %v644_v63  ;;  %v572_v16 = vunpack.c.0.s8 %v412_v10  ;;  %v576_v61 = vunpack.c.1.s8 %v412_v10  ;;  %v956_v60 = vpack.c.bf16 %v704_v26, %v700_v29 }
  0xf9   :  { %1242 = vmatpush.bf16.msra.mxu0 %v964_v62  ;;  %1255 = vmatpush.bf16.msra.mxu1 %v996_v50  ;;  %v904_v30 = vcvt.s32.f32 %v648_v37  ;;  %v636_v0 = vunpack.c.0.s8 %v428_v33  ;;  %v640_v31 = vunpack.c.1.s8 %v428_v33  ;;  %v988_v58 = vpack.c.bf16 %v768_v35, %v764_v8 }
  0xfa   :  { %v1024_v41 = vpack.c.bf16 %v840_v19, %v836_v18  ;;  %v1447_v34 = vunpack.c.2.s8 %v1339_v51  ;;  %v1451_v43 = vunpack.c.3.s8 %v1339_v51  ;;  %v828_v17 = vcvt.s32.f32 %v572_v16  ;;  %v1327_v18 = vld [vmem:[#allocation4 + $0x200] sm:$0xff] }
  0xfb   :  { %v1056_v54 = vpack.c.bf16 %v904_v30, %v900_v4  ;;  %v832_v38 = vcvt.s32.f32 %v576_v61  ;;  %v1439_v39 = vunpack.c.0.s8 %v1339_v51  ;;  %v892_v55 = vcvt.s32.f32 %v636_v0  ;;  %v1347_v16 = vld [vmem:[#allocation4 + $0x2a0] sm:$0xff] }
  0xfc   :  { %1267 = vmatpush.bf16.msra.mxu2 %v1032_v57  ;;  %1280 = vmatpush.bf16.msra.mxu3 %v1064_v46  ;;  %v1703_v21 = vcvt.s32.f32 %v1447_v34  ;;  %v1707_v14 = vcvt.s32.f32 %v1451_v43  ;;  %v1443_v3 = vunpack.c.1.s8 %v1339_v51  ;;  %v896_v62 = vcvt.s32.f32 %v640_v31  ;;  %v1331_v46 = vld [vmem:[#allocation4 + $0x220] sm:$0xff] }
  0xfd   :  { %1243 = vmatpush.bf16.msra.mxu0 %v960_v6  ;;  %1256 = vmatpush.bf16.msra.mxu1 %v992_v25  ;;  %v1695_v45 = vcvt.s32.f32 %v1439_v39  ;;  %v1431_v36 = vunpack.c.2.s8 %v1335_v52  ;;  %v1435_v59 = vunpack.c.3.s8 %v1335_v52  ;;  %v1020_v40 = vpack.c.bf16 %v832_v38, %v828_v17  ;;  %v1371_v61 = vld [vmem:[#allocation4 + $0x360] sm:$0xff]  ;;  %v1340_v38 = vld [vmem:[#allocation4 + $0x268] sm:$0xff] }
  0xfe   :  { %v1931_v11 = vpack.c.bf16 %v1707_v14, %v1703_v21  ;;  %v1699_v22 = vcvt.s32.f32 %v1443_v3  ;;  %v1423_v50 = vunpack.c.0.s8 %v1335_v52  ;;  %v1427_v57 = vunpack.c.1.s8 %v1335_v52 }
  0xff   :  { %v1687_v6 = vcvt.s32.f32 %v1431_v36  ;;  %v1691_v13 = vcvt.s32.f32 %v1435_v59  ;;  %v1511_v9 = vunpack.c.2.s8 %v1355_v56  ;;  %v1052_v23 = vpack.c.bf16 %v896_v62, %v892_v55 }
 0x100   :  { %1268 = vmatpush.bf16.msra.mxu2 %v1028_v27  ;;  %1281 = vmatpush.bf16.msra.mxu3 %v1060_v20  ;;  %v1927_v32 = vpack.c.bf16 %v1699_v22, %v1695_v45  ;;  %v1515_v10 = vunpack.c.3.s8 %v1355_v56  ;;  %v1415_v24 = vunpack.c.2.s8 %v1331_v46  ;;  %v1419_v7 = vunpack.c.3.s8 %v1331_v46 }
 0x101   :  { %1244 = vmatpush.bf16.msra.mxu0 %v956_v60  ;;  %1257 = vmatpush.bf16.msra.mxu1 %v988_v58  ;;  %v1767_v5 = vcvt.s32.f32 %v1511_v9  ;;  %v1503_v48 = vunpack.c.0.s8 %v1355_v56  ;;  %v1507_v49 = vunpack.c.1.s8 %v1355_v56  ;;  %v1923_v2 = vpack.c.bf16 %v1691_v13, %v1687_v6 }
 0x102   :  { %v1771_v33 = vcvt.s32.f32 %v1515_v10  ;;  %v1679_v28 = vcvt.s32.f32 %v1423_v50  ;;  %v1683_v29 = vcvt.s32.f32 %v1427_v57  ;;  %v1495_v44 = vunpack.c.2.s8 %v1351_v42 }
 0x103   :  { %v1759_v1 = vcvt.s32.f32 %v1503_v48  ;;  %v1407_v25 = vunpack.c.0.s8 %v1331_v46  ;;  %v1411_v8 = vunpack.c.1.s8 %v1331_v46  ;;  %v1671_v35 = vcvt.s32.f32 %v1415_v24 }
 0x104   :  { %1269 = vmatpush.bf16.msra.mxu2 %v1024_v41  ;;  %1282 = vmatpush.bf16.msra.mxu3 %v1056_v54  ;;  %v1963_v26 = vpack.c.bf16 %v1771_v33, %v1767_v5  ;;  %v1675_v63 = vcvt.s32.f32 %v1419_v7  ;;  %v1751_v19 = vcvt.s32.f32 %v1495_v44  ;;  %v1919_v37 = vpack.c.bf16 %v1683_v29, %v1679_v28 }
 0x105   :  { %2031 = vmatpush.bf16.msrb.mxu0 %v1931_v11  ;;  %1258 = vmatmul.bf16.vlgmr.msra.gmra.mxu1 %v6197_v15  ;;  %v1499_v15 = vunpack.c.3.s8 %v1351_v42  ;;  %v1487_v20 = vunpack.c.0.s8 %v1351_v42  ;;  %v1491_v4 = vunpack.c.1.s8 %v1351_v42  ;;  %v1663_v60 = vcvt.s32.f32 %v1407_v25  ;;  %v1343_v25 = vld [vmem:[#allocation4 + $0x280] sm:$0xff] }
 0x106   :  { %1245 = vmatmul.bf16.vlgmr.msra.gmra.mxu0 %v6188_v47  ;;  %v1763_v47 = vcvt.s32.f32 %v1507_v49  ;;  %2044 = vmatpush.bf16.msrb.mxu1 %v1963_v26  ;;  %v1667_v30 = vcvt.s32.f32 %v1411_v8  ;;  %v1399_v0 = vunpack.c.2.s8 %v1327_v18  ;;  %v1479_v41 = vunpack.c.2.s8 %v1347_v16  ;;  %v1336_v49 = vld [vmem:[#allocation4 + $0x248] sm:$0xff]  ;;  %v1367_v8 = vld [vmem:[#allocation4 + $0x340] sm:$0xff] }
 0x107   :  { %v1755_v51 = vcvt.s32.f32 %v1499_v15  ;;  %v1747_v58 = vcvt.s32.f32 %v1491_v4  ;;  %v1483_v34 = vunpack.c.3.s8 %v1347_v16  ;;  %v1915_v43 = vpack.c.bf16 %v1675_v63, %v1671_v35 }
 0x108   :  { %1270 = vmatpush.bf16.msra.mxu2 %v1020_v40  ;;  %1283 = vmatpush.bf16.msra.mxu3 %v1052_v23  ;;  %v1959_v27 = vpack.c.bf16 %v1763_v47, %v1759_v1  ;;  %v1403_v52 = vunpack.c.3.s8 %v1327_v18  ;;  %v1579_v54 = vunpack.c.3.s8 %v1371_v61  ;;  %v1911_v17 = vpack.c.bf16 %v1667_v30, %v1663_v60 }
 0x109   :  { %2032 = vmatpush.bf16.msrb.mxu0 %v1927_v32  ;;  %v1955_v31 = vpack.c.bf16 %v1755_v51, %v1751_v19  ;;  %v1655_v21 = vcvt.s32.f32 %v1399_v0  ;;  %v1735_v3 = vcvt.s32.f32 %v1479_v41  ;;  %v1739_v62 = vcvt.s32.f32 %v1483_v34 }
 0x10a   :  { %2045 = vmatpush.bf16.msrb.mxu1 %v1959_v27  ;;  %v1835_v55 = vcvt.s32.f32 %v1579_v54  ;;  %v1659_v45 = vcvt.s32.f32 %v1403_v52  ;;  %v1391_v36 = vunpack.c.0.s8 %v1327_v18  ;;  %v1395_v59 = vunpack.c.1.s8 %v1327_v18  ;;  %v1332_v52 = vld [vmem:[#allocation4 + $0x228] sm:$0xff] }
 0x10b   :  { %1271 = vmatmul.bf16.vlgmr.msra.gmra.mxu2 %v6244_v12  ;;  %1284 = vmatmul.bf16.vlgmr.msra.gmra.mxu3 %v6254_v53  ;;  %v1743_v12 = vcvt.s32.f32 %v1487_v20  ;;  %v1575_v53 = vunpack.c.2.s8 %v1371_v61  ;;  %v1448_v11 = vunpack.c.2.s8 %v1340_v38  ;;  %v1452_v22 = vunpack.c.3.s8 %v1340_v38 }
 0x10c   :  { %v1947_v40 = vpack.c.bf16 %v1739_v62, %v1735_v3  ;;  %v1907_v50 = vpack.c.bf16 %v1659_v45, %v1655_v21  ;;  %v1647_v57 = vcvt.s32.f32 %v1391_v36  ;;  %v1651_v46 = vcvt.s32.f32 %v1395_v59 }
 0x10d   :  { %2033 = vmatpush.bf16.msrb.mxu0 %v1923_v2  ;;  %v1831_v39 = vcvt.s32.f32 %v1575_v53  ;;  %v1951_v14 = vpack.c.bf16 %v1747_v58, %v1743_v12  ;;  %v1704_v32 = vcvt.s32.f32 %v1448_v11  ;;  %v1708_v6 = vcvt.s32.f32 %v1452_v22  ;;  %v1356_v53 = vld [vmem:[#allocation4 + $0x2e8] sm:$0xff] }
 0x10e   :  { %2046 = vmatpush.bf16.msrb.mxu1 %v1955_v31  ;;  %v1903_v13 = vpack.c.bf16 %v1651_v46, %v1647_v57  ;;  %v1440_v23 = vunpack.c.0.s8 %v1340_v38  ;;  %v1444_v10 = vunpack.c.1.s8 %v1340_v38  ;;  %v1471_v42 = vunpack.c.0.s8 %v1347_v16 }
 0x10f   :  { %v1995_v56 = vpack.c.bf16 %v1835_v55, %v1831_v39  ;;  %v1932_v9 = vpack.c.bf16 %v1708_v6, %v1704_v32  ;;  %v1475_v7 = vunpack.c.1.s8 %v1347_v16  ;;  %v1567_v33 = vunpack.c.0.s8 %v1371_v61 }
 0x110   :  { %v1696_v24 = vcvt.s32.f32 %v1440_v23  ;;  %v1700_v5 = vcvt.s32.f32 %v1444_v10  ;;  %v1571_v48 = vunpack.c.1.s8 %v1371_v61  ;;  %v1432_v28 = vunpack.c.2.s8 %v1336_v49 }
 0x111   :  { %2034 = vmatpush.bf16.msrb.mxu0 %v1919_v37  ;;  %2057 = vmatpush.bf16.msrb.mxu2 %v1995_v56  ;;  %v1436_v29 = vunpack.c.3.s8 %v1336_v49  ;;  %v1727_v26 = vcvt.s32.f32 %v1471_v42  ;;  %v1731_v1 = vcvt.s32.f32 %v1475_v7  ;;  %v1823_v47 = vcvt.s32.f32 %v1567_v33  ;;  %v1363_v56 = vld [vmem:[#allocation4 + $0x320] sm:$0xff] }
 0x112   :  { %2047 = vmatpush.bf16.msrb.mxu1 %v1951_v14  ;;  %v1928_v2 = vpack.c.bf16 %v1700_v5, %v1696_v24  ;;  %v1827_v44 = vcvt.s32.f32 %v1571_v48  ;;  %v1688_v15 = vcvt.s32.f32 %v1432_v28  ;;  %v1463_v63 = vunpack.c.2.s8 %v1343_v25  ;;  %v6533_v7 = vld [vmem:[#allocation6] ss:$8 sm:$0xf] }
 0x113   :  { %v1692_v35 = vcvt.s32.f32 %v1436_v29  ;;  %v1467_v27 = vunpack.c.3.s8 %v1343_v25  ;;  %v1943_v18 = vpack.c.bf16 %v1731_v1, %v1727_v26  ;;  %v1559_v37 = vunpack.c.2.s8 %v1367_v8  ;;  %v1328_v28 = vld [vmem:[#allocation4 + $0x208] sm:$0xff] }
 0x114   :  { %v1991_v19 = vpack.c.bf16 %v1827_v44, %v1823_v47  ;;  %v1563_v51 = vunpack.c.3.s8 %v1367_v8  ;;  %v1719_v4 = vcvt.s32.f32 %v1463_v63  ;;  %v1424_v61 = vunpack.c.0.s8 %v1336_v49  ;;  %v1352_v29 = vld [vmem:[#allocation4 + $0x2c8] sm:$0xff] }
 0x115   :  { %2035 = vmatpush.bf16.msrb.mxu0 %v1915_v43  ;;  %v1924_v20 = vpack.c.bf16 %v1692_v35, %v1688_v15  ;;  %v1723_v16 = vcvt.s32.f32 %v1467_v27  ;;  %v1815_v60 = vcvt.s32.f32 %v1559_v37  ;;  %v1428_v0 = vunpack.c.1.s8 %v1336_v49 }
 0x116   :  { %2048 = vmatpush.bf16.msrb.mxu1 %v1947_v40  ;;  %2058 = vmatpush.bf16.msrb.mxu2 %v1991_v19  ;;  %v1819_v30 = vcvt.s32.f32 %v1563_v51  ;;  %v1680_v12 = vcvt.s32.f32 %v1424_v61  ;;  %v1455_v34 = vunpack.c.0.s8 %v1343_v25  ;;  %v1459_v43 = vunpack.c.1.s8 %v1343_v25  ;;  %v6536_v25 = vld [vmem:[#allocation9 + $0x1] ss:$8 sm:$0xf] }
 0x117   :  { %v1939_v31 = vpack.c.bf16 %v1723_v16, %v1719_v4  ;;  %v1684_v41 = vcvt.s32.f32 %v1428_v0  ;;  %v1551_v54 = vunpack.c.0.s8 %v1367_v8  ;;  %v1416_v38 = vunpack.c.2.s8 %v1332_v52  ;;  %v1359_v51 = vld [vmem:[#allocation4 + $0x300] sm:$0xff] }
 0x118   :  { %v1987_v58 = vpack.c.bf16 %v1819_v30, %v1815_v60  ;;  %v1420_v39 = vunpack.c.3.s8 %v1332_v52  ;;  %v1711_v21 = vcvt.s32.f32 %v1455_v34  ;;  %v1715_v14 = vcvt.s32.f32 %v1459_v43 }
 0x119   :  { %2036 = vmatpush.bf16.msrb.mxu0 %v1911_v17  ;;  %v1555_v17 = vunpack.c.1.s8 %v1367_v8  ;;  %v1920_v55 = vpack.c.bf16 %v1684_v41, %v1680_v12  ;;  %v1512_v3 = vunpack.c.2.s8 %v1356_v53  ;;  %v1807_v62 = vcvt.s32.f32 %v1551_v54  ;;  %v1341_v12 = vld [vmem:[#allocation4 + $0x270] sm:$0xff] }
 0x11a   :  { %2049 = vmatpush.bf16.msrb.mxu1 %v1943_v18  ;;  %2059 = vmatpush.bf16.msrb.mxu2 %v1987_v58  ;;  %v1672_v36 = vcvt.s32.f32 %v1416_v38  ;;  %v1676_v59 = vcvt.s32.f32 %v1420_v39  ;;  %v1935_v11 = vpack.c.bf16 %v1715_v14, %v1711_v21  ;;  %v1516_v22 = vunpack.c.3.s8 %v1356_v53  ;;  %v1387_v14 = vld [vmem:[#allocation4 + $0x3e0] sm:$0xff] }
 0x11b   :  { %v1811_v45 = vcvt.s32.f32 %v1555_v17  ;;  %v1768_v40 = vcvt.s32.f32 %v1512_v3  ;;  %v1547_v32 = vunpack.c.3.s8 %v1363_v56  ;;  %v1408_v6 = vunpack.c.0.s8 %v1332_v52 }
 0x11c   :  { %v1916_v46 = vpack.c.bf16 %v1676_v59, %v1672_v36  ;;  %v1412_v23 = vunpack.c.1.s8 %v1332_v52  ;;  %v1504_v10 = vunpack.c.0.s8 %v1356_v53  ;;  %v1508_v42 = vunpack.c.1.s8 %v1356_v53  ;;  %v1348_v59 = vld [vmem:[#allocation4 + $0x2a8] sm:$0xff] }
 0x11d   :  { %2037 = vmatpush.bf16.msrb.mxu0 %v1907_v50  ;;  %v1543_v50 = vunpack.c.2.s8 %v1363_v56  ;;  %v1983_v57 = vpack.c.bf16 %v1811_v45, %v1807_v62  ;;  %v1803_v24 = vcvt.s32.f32 %v1547_v32  ;;  %v1664_v5 = vcvt.s32.f32 %v1408_v6 }
 0x11e   :  { %2050 = vmatpush.bf16.msrb.mxu1 %v1939_v31  ;;  %v1668_v48 = vcvt.s32.f32 %v1412_v23  ;;  %v1760_v49 = vcvt.s32.f32 %v1504_v10  ;;  %v1291_v26 = vperm.slane %v6533_v7, 0  ;;  %v1764_v47 = vcvt.s32.f32 %v1508_v42 }
 0x11f   :  { %2060 = vmatpush.bf16.msrb.mxu2 %v1983_v57  ;;  %v1539_v44 = vunpack.c.1.s8 %v1363_v56  ;;  %v1400_v35 = vunpack.c.2.s8 %v1328_v28  ;;  %v1404_v63 = vunpack.c.3.s8 %v1328_v28  ;;  %v1306_v27 = vperm.slane %v6536_v25, 0 }
 0x120   :  { %v1912_v8 = vpack.c.bf16 %v1668_v48, %v1664_v5  ;;  %v1960_v18 = vpack.c.bf16 %v1764_v47, %v1760_v49  ;;  %v1496_v37 = vunpack.c.2.s8 %v1352_v29  ;;  %v1500_v16 = vunpack.c.3.s8 %v1352_v29 }
 0x121   :  { %2038 = vmatpush.bf16.msrb.mxu0 %v1903_v13  ;;  %v1772_v13 = vcvt.s32.f32 %v1516_v22  ;;  %v1795_v19 = vcvt.s32.f32 %v1539_v44  ;;  %v1660_v4 = vcvt.s32.f32 %v1404_v63  ;;  %v1527_v61 = vunpack.c.2.s8 %v1359_v51 }
 0x122   :  { %2051 = vmatpush.bf16.msrb.mxu1 %v1935_v11  ;;  %v1752_v30 = vcvt.s32.f32 %v1496_v37  ;;  %v1531_v0 = vunpack.c.3.s8 %v1359_v51  ;;  %v1392_v31 = vunpack.c.0.s8 %v1328_v28  ;;  %v1756_v41 = vcvt.s32.f32 %v1500_v16  ;;  %v1337_v16 = vld [vmem:[#allocation4 + $0x250] sm:$0xff] }
 0x123   :  { %v1964_v33 = vpack.c.bf16 %v1772_v13, %v1768_v40  ;;  %v1783_v34 = vcvt.s32.f32 %v1527_v61  ;;  %v1396_v43 = vunpack.c.1.s8 %v1328_v28  ;;  %v1488_v54 = vunpack.c.0.s8 %v1352_v29 }
 0x124   :  { %v1787_v52 = vcvt.s32.f32 %v1531_v0  ;;  %v1648_v53 = vcvt.s32.f32 %v1392_v31  ;;  %v1492_v17 = vunpack.c.1.s8 %v1352_v29  ;;  %v1956_v38 = vpack.c.bf16 %v1756_v41, %v1752_v30  ;;  %v1383_v31 = vld [vmem:[#allocation4 + $0x3c0] sm:$0xff] }
 0x125   :  { %2083 = vmatpush.bf16.msra.mxu0 %v1932_v9  ;;  %v1799_v9 = vcvt.s32.f32 %v1543_v50  ;;  %v1652_v39 = vcvt.s32.f32 %v1396_v43  ;;  %v1453_v21 = vunpack.c.3.s8 %v1341_v12  ;;  %v1744_v62 = vcvt.s32.f32 %v1488_v54  ;;  %v1372_v50 = vld [vmem:[#allocation4 + $0x368] sm:$0xff] }
 0x126   :  { %2096 = vmatpush.bf16.msra.mxu1 %v1964_v33  ;;  %v1971_v3 = vpack.c.bf16 %v1787_v52, %v1783_v34  ;;  %v1748_v45 = vcvt.s32.f32 %v1492_v17  ;;  %v1519_v36 = vunpack.c.0.s8 %v1359_v51  ;;  %v1523_v40 = vunpack.c.1.s8 %v1359_v51  ;;  %v1344_v17 = vld [vmem:[#allocation4 + $0x288] sm:$0xff] }
 0x127   :  { %v1979_v1 = vpack.c.bf16 %v1803_v24, %v1799_v9  ;;  %v6541_v22 = vcvt.s32.f32 %v1453_v21  ;;  %v1639_v32 = vunpack.c.2.s8 %v1387_v14  ;;  %v1643_v6 = vunpack.c.3.s8 %v1387_v14 }
 0x128   :  { %v1952_v57 = vpack.c.bf16 %v1748_v45, %v1744_v62  ;;  %v1779_v9 = vcvt.s32.f32 %v1523_v40  ;;  %v1480_v23 = vunpack.c.2.s8 %v1348_v59  ;;  %v1484_v10 = vunpack.c.3.s8 %v1348_v59 }
 0x129   :  { %2084 = vmatpush.bf16.msra.mxu0 %v1928_v2  ;;  %v1535_v2 = vunpack.c.0.s8 %v1363_v56  ;;  %2061 = vmatpush.bf16.msrb.mxu2 %v1979_v1  ;;  %v1904_v56 = vpack.c.bf16 %v1652_v39, %v1648_v53  ;;  %v1895_v24 = vcvt.s32.f32 %v1639_v32  ;;  %v1899_v5 = vcvt.s32.f32 %v1643_v6 }
 0x12a   :  { %2097 = vmatpush.bf16.msra.mxu1 %v1960_v18  ;;  %v1576_v42 = vunpack.c.2.s8 %v1372_v50  ;;  %v1580_v33 = vunpack.c.3.s8 %v1372_v50  ;;  %v1736_v49 = vcvt.s32.f32 %v1480_v23  ;;  %v1441_v28 = vunpack.c.0.s8 %v1341_v12 }
 0x12b   :  { %v1791_v15 = vcvt.s32.f32 %v1535_v2  ;;  %v1740_v2 = vcvt.s32.f32 %v1484_v10  ;;  %v2027_v29 = vpack.c.bf16 %v1899_v5, %v1895_v24  ;;  %v1445_v44 = vunpack.c.1.s8 %v1341_v12 }
 0x12c   :  { %v1832_v1 = vcvt.s32.f32 %v1576_v42  ;;  %v1836_v47 = vcvt.s32.f32 %v1580_v33  ;;  %v6546_v63 = vcvt.s32.f32 %v1441_v28  ;;  %v1631_v18 = vunpack.c.0.s8 %v1387_v14 }
 0x12d   :  { %2085 = vmatpush.bf16.msra.mxu0 %v1924_v20  ;;  %v1656_v20 = vcvt.s32.f32 %v1400_v35  ;;  %v1975_v60 = vpack.c.bf16 %v1795_v19, %v1791_v15  ;;  %v1292_v15 = vperm.slane %v6533_v7, 1  ;;  %v1948_v35 = vpack.c.bf16 %v1740_v2, %v1736_v49  ;;  %2070 = vmatpush.bf16.msrb.mxu3 %v2027_v29 }
 0x12e   :  { %2098 = vmatpush.bf16.msra.mxu1 %v1956_v38  ;;  %v1996_v37 = vpack.c.bf16 %v1836_v47, %v1832_v1  ;;  %v6548_v51 = vcvt.s32.f32 %v1445_v44  ;;  %v1887_v30 = vcvt.s32.f32 %v1631_v18  ;;  %v1476_v0 = vunpack.c.1.s8 %v1348_v59  ;;  %v1333_v44 = vld [vmem:[#allocation4 + $0x230] sm:$0xff] }
 0x12f   :  { %v1908_v58 = vpack.c.bf16 %v1660_v4, %v1656_v20  ;;  %2062 = vmatpush.bf16.msrb.mxu2 %v1975_v60  ;;  %v1635_v20 = vunpack.c.1.s8 %v1387_v14  ;;  %v1472_v4 = vunpack.c.0.s8 %v1348_v59  ;;  %v1307_v60 = vperm.slane %v6536_v25, 1  ;;  %v1368_v14 = vld [vmem:[#allocation4 + $0x348] sm:$0xff] }
 0x130   :  { %v1568_v34 = vunpack.c.0.s8 %v1372_v50  ;;  %v1732_v43 = vcvt.s32.f32 %v1476_v0  ;;  %v1572_v52 = vunpack.c.1.s8 %v1372_v50  ;;  %v1433_v53 = vunpack.c.2.s8 %v1337_v16 }
 0x131   :  { %2086 = vmatpush.bf16.msra.mxu0 %v1920_v55  ;;  %v1449_v55 = vunpack.c.2.s8 %v1341_v12  ;;  %v1929_v12 = vpack.c.bf16 %v6548_v51, %v6546_v63  ;;  %v1728_v41 = vcvt.s32.f32 %v1472_v4  ;;  %v1437_v54 = vunpack.c.3.s8 %v1337_v16 }
 0x132   :  { %2099 = vmatpush.bf16.msra.mxu1 %v1952_v57  ;;  %v1824_v39 = vcvt.s32.f32 %v1568_v34  ;;  %v1627_v21 = vunpack.c.3.s8 %v1383_v31  ;;  %v1828_v62 = vcvt.s32.f32 %v1572_v52  ;;  %v6555_v45 = vcvt.s32.f32 %v1433_v53  ;;  %v1379_v52 = vld [vmem:[#allocation4 + $0x3a0] sm:$0xff] }
 0x133   :  { %v6539_v11 = vcvt.s32.f32 %v1449_v55  ;;  %2063 = vmatpush.bf16.msrb.mxu2 %v1971_v3  ;;  %v1623_v55 = vunpack.c.2.s8 %v1383_v31  ;;  %v1944_v3 = vpack.c.bf16 %v1732_v43, %v1728_v41  ;;  %v1464_v40 = vunpack.c.2.s8 %v1344_v17 }
 0x134   :  { %v1468_v57 = vunpack.c.3.s8 %v1344_v17  ;;  %v1560_v6 = vunpack.c.2.s8 %v1368_v14  ;;  %v1425_v42 = vunpack.c.0.s8 %v1337_v16  ;;  %v1429_v49 = vunpack.c.1.s8 %v1337_v16  ;;  %v6565_v16 = vld [vmem:[#allocation4 + $0x2f0] sm:$0xff] }
 0x135   :  { %2087 = vmatpush.bf16.msra.mxu0 %v1916_v46  ;;  %v1775_v46 = vcvt.s32.f32 %v1519_v36  ;;  %v1933_v13 = vpack.c.bf16 %v6541_v22, %v6539_v11  ;;  %v6557_v36 = vcvt.s32.f32 %v1437_v54  ;;  %v1879_v59 = vcvt.s32.f32 %v1623_v55 }
 0x136   :  { %2100 = vmatpush.bf16.msra.mxu1 %v1948_v35  ;;  %v1720_v24 = vcvt.s32.f32 %v1464_v40  ;;  %v1724_v5 = vcvt.s32.f32 %v1468_v57  ;;  %v1816_v33 = vcvt.s32.f32 %v1560_v6  ;;  %v1615_v2 = vunpack.c.0.s8 %v1383_v31  ;;  %v1364_v57 = vld [vmem:[#allocation4 + $0x328] sm:$0xff] }
 0x137   :  { %v1967_v48 = vpack.c.bf16 %v1779_v9, %v1775_v46  ;;  %v1992_v46 = vpack.c.bf16 %v1828_v62, %v1824_v39  ;;  %v1925_v32 = vpack.c.bf16 %v6557_v36, %v6555_v45  ;;  %v1564_v9 = vunpack.c.3.s8 %v1368_v14 }
 0x138   :  { %v1940_v28 = vpack.c.bf16 %v1724_v5, %v1720_v24  ;;  %v6561_v29 = vcvt.s32.f32 %v1425_v42  ;;  %v1619_v1 = vunpack.c.1.s8 %v1383_v31  ;;  %v1456_v47 = vunpack.c.0.s8 %v1344_v17 }
 0x139   :  { %2088 = vmatpush.bf16.msra.mxu0 %v1912_v8  ;;  %2064 = vmatpush.bf16.msrb.mxu2 %v1967_v48  ;;  %v1820_v48 = vcvt.s32.f32 %v1564_v9  ;;  %v6563_v35 = vcvt.s32.f32 %v1429_v49  ;;  %v1871_v18 = vcvt.s32.f32 %v1615_v2  ;;  %v1556_v0 = vunpack.c.1.s8 %v1368_v14 }
 0x13a   :  { %2101 = vmatpush.bf16.msra.mxu1 %v1944_v3  ;;  %v1712_v4 = vcvt.s32.f32 %v1456_v47  ;;  %v1417_v43 = vunpack.c.2.s8 %v1333_v44  ;;  %v1513_v3 = vunpack.c.2.s8 %v6565_v16  ;;  %v1607_v40 = vunpack.c.2.s8 %v1379_v52 }
 0x13b   :  { %v1921_v31 = vpack.c.bf16 %v6563_v35, %v6561_v29  ;;  %v1611_v9 = vunpack.c.3.s8 %v1379_v52  ;;  %v1293_v5 = vperm.slane %v6533_v7, 2  ;;  %v1413_v47 = vunpack.c.1.s8 %v1333_v44 }
 0x13c   :  { %v6578_v6 = vcvt.s32.f32 %v1513_v3  ;;  %v1863_v24 = vcvt.s32.f32 %v1607_v40 }
 0x13d   :  { %2089 = vmatpush.bf16.msra.mxu0 %v1908_v58  ;;  %2109 = vmatpush.bf16.msra.mxu2 %v1996_v37  ;;  %v1891_v58 = vcvt.s32.f32 %v1635_v20  ;;  %v1875_v20 = vcvt.s32.f32 %v1619_v1  ;;  %v1409_v1 = vunpack.c.0.s8 %v1333_v44 }
 0x13e   :  { %2102 = vmatpush.bf16.msra.mxu1 %v1940_v28  ;;  %v1548_v28 = vunpack.c.3.s8 %v1364_v57 }
 0x13f   :  { %v1090_v8 = vpop.f32.mrf.mxu0  ;;  %v2023_v38 = vpack.c.bf16 %v1891_v58, %v1887_v30  ;;  %v1552_v30 = vunpack.c.0.s8 %v1368_v14  ;;  %v2015_v53 = vpack.c.bf16 %v1875_v20, %v1871_v18  ;;  %v6570_v14 = vcvt.s32.f32 %v1417_v43 }
 0x140   :  { %v1103_v19 = vpop.f32.mrf.mxu1  ;;  %v1505_v20 = vunpack.c.0.s8 %v6565_v16  ;;  %v1599_v43 = vunpack.c.0.s8 %v1379_v52 }
 0x141   :  { %2090 = vmatpush.bf16.msra.mxu0 %v1904_v56  ;;  %v6550_v61 = vadd.f32 %v1103_v19, %v1090_v8  ;;  %2071 = vmatpush.bf16.msrb.mxu3 %v2023_v38  ;;  %v1883_v56 = vcvt.s32.f32 %v1627_v21  ;;  %v1988_v8 = vpack.c.bf16 %v1820_v48, %v1816_v33  ;;  %v1460_v19 = vunpack.c.1.s8 %v1344_v17 }
 0x142   :  { %2110 = vmatpush.bf16.msra.mxu2 %v1992_v46  ;;  %v1808_v54 = vcvt.s32.f32 %v1552_v30  ;;  %v1812_v17 = vcvt.s32.f32 %v1556_v0  ;;  %v1421_v38 = vunpack.c.3.s8 %v1333_v44  ;;  %v1867_v33 = vcvt.s32.f32 %v1611_v9 }
 0x143   :  { %v2019_v10 = vpack.c.bf16 %v1883_v56, %v1879_v59  ;;  %v1716_v34 = vcvt.s32.f32 %v1460_v19  ;;  %v1517_v56 = vunpack.c.3.s8 %v6565_v16  ;;  %v1544_v48 = vunpack.c.2.s8 %v1364_v57 }
 0x144   :  { %v1984_v62 = vpack.c.bf16 %v1812_v17, %v1808_v54  ;;  %v6573_v59 = vcvt.s32.f32 %v1421_v38  ;;  %v2011_v19 = vpack.c.bf16 %v1867_v33, %v1863_v24  ;;  %v6591_v30 = vcvt.s32.f32 %v1409_v1  ;;  %v1353_v54 = vld [vmem:[#allocation4 + $0x2d0] sm:$0xff]  ;;  %v6616_v24 = vld [vmem:[#allocation4 + $0x308] sm:$0xff] }
 0x145   :  { %2072 = vmatpush.bf16.msrb.mxu3 %v2019_v10  ;;  %v1936_v21 = vpack.c.bf16 %v1716_v34, %v1712_v4  ;;  %v6582_v10 = vcvt.s32.f32 %v1517_v56  ;;  %v1804_v4 = vcvt.s32.f32 %v1548_v28  ;;  %v1509_v0 = vunpack.c.1.s8 %v6565_v16  ;;  %v6608_v56 = vld [vmem:[#allocation4 + $0x380] sm:$0xff] }
 0x146   :  { %2111 = vmatpush.bf16.msra.mxu2 %v1988_v8  ;;  %v6600_v44 = vcvt.s32.f32 %v1505_v20  ;;  %v1855_v16 = vcvt.s32.f32 %v1599_v43  ;;  %v1497_v9 = vunpack.c.2.s8 %v1353_v54  ;;  %v1591_v22 = vunpack.c.2.s8 %v6608_v56 }
 0x147   :  { %v1092_v50 = vpop.f32.mrf.mxu0  ;;  %2103 = vmatpush.bf16.msra.mxu1 %v1936_v21  ;;  %v1965_v2 = vpack.c.bf16 %v6582_v10, %v6578_v6  ;;  %v1536_v21 = vunpack.c.0.s8 %v1364_v57  ;;  %v1583_v36 = vunpack.c.0.s8 %v6608_v56 }
 0x148   :  { %v1105_v23 = vpop.f32.mrf.mxu1  ;;  %v6622_v11 = vcvt.s32.f32 %v1497_v9  ;;  %v1847_v20 = vcvt.s32.f32 %v1591_v22 }
 0x149   :  { %2073 = vmatpush.bf16.msrb.mxu3 %v2015_v53  ;;  %v1917_v23 = vpack.c.bf16 %v6573_v59, %v6570_v14  ;;  %v1603_v53 = vunpack.c.1.s8 %v1379_v52  ;;  %v1792_v40 = vcvt.s32.f32 %v1536_v21  ;;  %v1489_v21 = vunpack.c.0.s8 %v1353_v54 }
 0x14a   :  { %2112 = vmatpush.bf16.msra.mxu2 %v1984_v62 }
 0x14b   :  { %v1859_v3 = vcvt.s32.f32 %v1603_v53 }
 0x14d   :  { %v1116_v37 = vpop.f32.mrf.mxu2  ;;  %2074 = vmatpush.bf16.msrb.mxu3 %v2011_v19  ;;  %v1528_v19 = vunpack.c.2.s8 %v6616_v24 }
 0x14e   :  { %v1117_v58 = vadd.f32 %v1116_v37, %v6550_v61  ;;  %v1129_v41 = vpop.f32.mrf.mxu3  ;;  %v1800_v37 = vcvt.s32.f32 %v1544_v48  ;;  %v1501_v48 = vunpack.c.3.s8 %v1353_v54 }
 0x14f   :  { %v1142_v55 = vpop.f32.mrf.mxu0  ;;  %v1784_v53 = vcvt.s32.f32 %v1528_v19  ;;  %v1524_v19 = vunpack.c.1.s8 %v6616_v24 }
 0x150   :  { %v1130_v39 = vadd.f32 %v1129_v41, %v1117_v58  ;;  %v1155_v61 = vpop.f32.mrf.mxu1  ;;  %v6596_v58 = vld [vmem:[#allocation4 + $0x210] sm:$0xff]  ;;  %v1980_v38 = vpack.c.bf16 %v1804_v4, %v1800_v37 }
 0x151   :  { %v1156_v46 = vadd.f32 %v1155_v61, %v1142_v55  ;;  %v6604_v55 = vcvt.s32.f32 %v1509_v0  ;;  %v1540_v61 = vunpack.c.1.s8 %v1364_v57  ;;  %v1401_v62 = vunpack.c.2.s8 %v6596_v58 }
 0x152   :  { %v1299_v50 = vmul.f32 %v1291_v26, %v1130_v39  ;;  %v1308_v26 = vperm.slane %v6536_v25, 2  ;;  %2113 = vmatpush.bf16.msra.mxu2 %v1980_v38  ;;  %v1532_v0 = vunpack.c.3.s8 %v6616_v24 }
 0x153   :  { %v1961_v52 = vpack.c.bf16 %v6604_v55, %v6600_v44  ;;  %v1796_v57 = vcvt.s32.f32 %v1540_v61  ;;  %v6618_v33 = vcvt.s32.f32 %v1401_v62  ;;  %v1493_v62 = vunpack.c.1.s8 %v1353_v54  ;;  %v6732_v55 = vld [vmem:[#allocation4 + $0x350] sm:$0xff] }
 0x154   :  { %v1314_v42 = vadd.f32 %v1306_v27, %v1299_v50  ;;  %v6593_v27 = vcvt.s32.f32 %v1413_v47  ;;  %v1405_v50 = vunpack.c.3.s8 %v6596_v58  ;;  %v1788_v51 = vcvt.s32.f32 %v1532_v0 }
 0x155   :  { %v1118_v49 = vpop.f32.mrf.mxu2 }
 0x156   :  { %v1318_v8 = vmax.f32 %v1314_v42, 0.0  ;;  %v1131_v18 = vpop.f32.mrf.mxu3  ;;  %v1913_v39 = vpack.c.bf16 %v6593_v27, %v6591_v30  ;;  %v2007_v42 = vpack.c.bf16 %v1859_v3, %v1855_v16  ;;  %v6620_v28 = vcvt.s32.f32 %v1405_v50 }
 0x157   :  { %v1144_v34 = vpop.f32.mrf.mxu0  ;;  %v6626_v18 = vcvt.s32.f32 %v1501_v48  ;;  %v1972_v9 = vpack.c.bf16 %v1788_v51, %v1784_v53  ;;  %v1373_v53 = vld [vmem:[#allocation4 + $0x370] sm:$0xff] }
 0x158   :  { %v6598_v41 = vpack.c.bf16 %v1318_v8, %v1318_v8  ;;  %v1157_v17 = vpop.f32.mrf.mxu1  ;;  %2075 = vmatpush.bf16.msrb.mxu3 %v2007_v42  ;;  %v1976_v8 = vpack.c.bf16 %v1796_v57, %v1792_v40  ;;  %v1909_v37 = vpack.c.bf16 %v6620_v28, %v6618_v33  ;;  %v6635_v34 = vld [vmem:[#allocation4 + $0x278] sm:$0xff]  ;;  %v6657_v57 = vcvt.s32.f32 %v1493_v62 }
 0x159   :  { %v1957_v43 = vpack.c.bf16 %v6626_v18, %v6622_v11  ;;  %v1393_v17 = vunpack.c.0.s8 %v6596_v58  ;;  %v1450_v40 = vunpack.c.2.s8 %v6635_v34  ;;  %v1454_v54 = vunpack.c.3.s8 %v6635_v34 }
 0x15a   :  { %2039 = vmatmul.bf16.vlgmr.msrb.gmra.mxu0 %v6598_v41  ;;  %2114 = vmatpush.bf16.msra.mxu2 %v1976_v8  ;;  %v1577_v62 = vunpack.c.2.s8 %v1373_v53 }
 0x15b   :  { %2135 = vmatpush.bf16.msrb.mxu0 %v1933_v13  ;;  %v1595_v13 = vunpack.c.3.s8 %v6608_v56  ;;  %v6643_v61 = vcvt.s32.f32 %v1393_v17  ;;  %v6660_v48 = vcvt.s32.f32 %v1450_v40  ;;  %v6671_v8 = vcvt.s32.f32 %v1454_v54 }
 0x15c   :  { %v1581_v40 = vunpack.c.3.s8 %v1373_v53  ;;  %v1442_v54 = vunpack.c.0.s8 %v6635_v34 }
 0x15d   :  { %v1168_v49 = vpop.f32.mrf.mxu2  ;;  %v1851_v4 = vcvt.s32.f32 %v1595_v13  ;;  %v1520_v13 = vunpack.c.0.s8 %v6616_v24 }
 0x15e   :  { %v1169_v1 = vadd.f32 %v1168_v49, %v1156_v46  ;;  %v1181_v47 = vpop.f32.mrf.mxu3  ;;  %v6662_v49 = vld [vmem:[#allocation4 + $0x3e8] sm:$0xff]  ;;  %2115 = vmatpush.bf16.msra.mxu2 %v1972_v9  ;;  %v6704_v6 = vcvt.s32.f32 %v1442_v54 }
 0x15f   :  { %2136 = vmatpush.bf16.msrb.mxu0 %v1929_v12  ;;  %v2003_v63 = vpack.c.bf16 %v1851_v4, %v1847_v20  ;;  %v1397_v12 = vunpack.c.1.s8 %v6596_v58  ;;  %v6653_v58 = vcvt.s32.f32 %v1489_v21  ;;  %v1349_v20 = vld [vmem:[#allocation4 + $0x2b0] sm:$0xff]  ;;  %v1839_v4 = vcvt.s32.f32 %v1583_v36 }
 0x160   :  { %v1182_v46 = vadd.f32 %v1181_v47, %v1169_v1  ;;  %v1644_v51 = vunpack.c.3.s8 %v6662_v49  ;;  %v1485_v29 = vunpack.c.3.s8 %v1349_v20  ;;  %v1632_v14 = vunpack.c.0.s8 %v6662_v49 }
 0x161   :  { %2076 = vmatpush.bf16.msrb.mxu3 %v2003_v63  ;;  %v6651_v42 = vcvt.s32.f32 %v1397_v12  ;;  %v1953_v47 = vpack.c.bf16 %v6657_v57, %v6653_v58  ;;  %v1780_v63 = vcvt.s32.f32 %v1524_v19  ;;  %v1636_v10 = vunpack.c.1.s8 %v6662_v49 }
 0x162   :  { %v1300_v16 = vmul.f32 %v1292_v15, %v1182_v46  ;;  %v1776_v46 = vcvt.s32.f32 %v1520_v13  ;;  %v6699_v13 = vcvt.s32.f32 %v1581_v40  ;;  %v1888_v19 = vcvt.s32.f32 %v1632_v14 }
 0x163   :  { %v1194_v38 = vpop.f32.mrf.mxu0  ;;  %v1207_v3 = vpop.f32.mrf.mxu1  ;;  %2137 = vmatpush.bf16.msrb.mxu0 %v1925_v32  ;;  %v1905_v45 = vpack.c.bf16 %v6651_v42, %v6643_v61  ;;  %v1587_v32 = vunpack.c.1.s8 %v6608_v56  ;;  %v1640_v56 = vunpack.c.2.s8 %v6662_v49  ;;  %v1565_v14 = vunpack.c.3.s8 %v6732_v55  ;;  %v6783_v42 = vld [vmem:[#allocation4 + $0x238] sm:$0xff] }
 0x164   :  { %v6646_v50 = vadd.f32 %v1207_v3, %v1194_v38  ;;  %v1315_v15 = vadd.f32 %v1307_v60, %v1300_v16  ;;  %v1934_v38 = vpack.c.bf16 %v6671_v8, %v6660_v48  ;;  %v1481_v16 = vunpack.c.2.s8 %v1349_v20 }
 0x165   :  { %v1170_v22 = vpop.f32.mrf.mxu2  ;;  %v1843_v0 = vcvt.s32.f32 %v1587_v32  ;;  %v1896_v21 = vcvt.s32.f32 %v1640_v56  ;;  %v1900_v3 = vcvt.s32.f32 %v1644_v51  ;;  %v6697_v32 = vcvt.s32.f32 %v1577_v62  ;;  %v1384_v51 = vld [vmem:[#allocation4 + $0x3c8] sm:$0xff] }
 0x166   :  { %v1319_v60 = vmax.f32 %v1315_v15, 0.0  ;;  %v1183_v1 = vpop.f32.mrf.mxu3  ;;  %v6691_v9 = vcvt.s32.f32 %v1481_v16  ;;  %v6693_v15 = vcvt.s32.f32 %v1485_v29  ;;  %v1446_v22 = vunpack.c.1.s8 %v6635_v34 }
 0x167   :  { %2138 = vmatpush.bf16.msrb.mxu0 %v1921_v31  ;;  %v1999_v12 = vpack.c.bf16 %v1843_v0, %v1839_v4  ;;  %v1968_v31 = vpack.c.bf16 %v1780_v63, %v1776_v46  ;;  %v2028_v36 = vpack.c.bf16 %v1900_v3, %v1896_v21  ;;  %v1997_v1 = vpack.c.bf16 %v6699_v13, %v6697_v32  ;;  %v6727_v21 = vld [vmem:[#allocation4 + $0x290] sm:$0xff] }
 0x168   :  { %v6678_v17 = vpack.c.bf16 %v1319_v60, %v1319_v60  ;;  %v1949_v59 = vpack.c.bf16 %v6693_v15, %v6691_v9  ;;  %v1473_v4 = vunpack.c.0.s8 %v1349_v20  ;;  %v1477_v0 = vunpack.c.1.s8 %v1349_v20 }
 0x169   :  { %2077 = vmatpush.bf16.msrb.mxu3 %v1999_v12  ;;  %2116 = vmatpush.bf16.msra.mxu2 %v1968_v31  ;;  %v1892_v56 = vcvt.s32.f32 %v1636_v10  ;;  %v1569_v63 = vunpack.c.0.s8 %v1373_v53  ;;  %v1573_v20 = vunpack.c.1.s8 %v1373_v53  ;;  %v1624_v53 = vunpack.c.2.s8 %v1384_v51 }
 0x16a   :  { %2052 = vmatmul.bf16.vlgmr.msrb.gmra.mxu1 %v6678_v17  ;;  %2091 = vmatmul.bf16.vlgmr.msra.gmra.mxu0 %v6598_v41  ;;  %v6724_v12 = vcvt.s32.f32 %v1477_v0  ;;  %v1628_v3 = vunpack.c.3.s8 %v1384_v51  ;;  %v1465_v62 = vunpack.c.2.s8 %v6727_v21  ;;  %v1620_v61 = vunpack.c.1.s8 %v1384_v51 }
 0x16b   :  { %v1196_v24 = vpop.f32.mrf.mxu0  ;;  %v1209_v35 = vpop.f32.mrf.mxu1  ;;  %2139 = vmatpush.bf16.msrb.mxu0 %v1917_v23  ;;  %2148 = vmatpush.bf16.msrb.mxu1 %v1965_v2  ;;  %v6706_v23 = vcvt.s32.f32 %v1446_v22  ;;  %v6709_v2 = vld [vmem:[#allocation4 + $0x258] sm:$0xff]  ;;  %v2024_v27 = vpack.c.bf16 %v1892_v56, %v1888_v19  ;;  %v6736_v16 = vcvt.s32.f32 %v1573_v20  ;;  %v1880_v54 = vcvt.s32.f32 %v1624_v53 }
 0x16c   :  { %v6722_v24 = vcvt.s32.f32 %v1473_v4  ;;  %v1438_v44 = vunpack.c.3.s8 %v6709_v2  ;;  %v1561_v22 = vunpack.c.2.s8 %v6732_v55  ;;  %v1884_v11 = vcvt.s32.f32 %v1628_v3  ;;  %v1365_v3 = vld [vmem:[#allocation4 + $0x330] sm:$0xff] }
 0x16d   :  { %2122 = vmatpush.bf16.msra.mxu3 %v2028_v36  ;;  %v1930_v49 = vpack.c.bf16 %v6706_v23, %v6704_v6  ;;  %v6759_v18 = vcvt.s32.f32 %v1465_v62  ;;  %v1430_v19 = vunpack.c.1.s8 %v6709_v2  ;;  %v1616_v4 = vunpack.c.0.s8 %v1384_v51 }
 0x16e   :  { %v1220_v34 = vpop.f32.mrf.mxu2  ;;  %v1233_v60 = vpop.f32.mrf.mxu3  ;;  %v6748_v31 = vcvt.s32.f32 %v1438_v44  ;;  %v6764_v10 = vcvt.s32.f32 %v1561_v22  ;;  %v1876_v8 = vcvt.s32.f32 %v1620_v61  ;;  %v1422_v15 = vunpack.c.3.s8 %v6783_v42 }
 0x16f   :  { %v1221_v46 = vadd.f32 %v1220_v34, %v6646_v50  ;;  %2140 = vmatpush.bf16.msrb.mxu0 %v1913_v39  ;;  %2149 = vmatpush.bf16.msrb.mxu1 %v1961_v52  ;;  %v1434_v50 = vunpack.c.2.s8 %v6709_v2  ;;  %v6729_v39 = vcvt.s32.f32 %v1569_v63  ;;  %v1945_v52 = vpack.c.bf16 %v6724_v12, %v6722_v24  ;;  %v1358_v63 = vld [vmem:[#allocation4 + $0x2f8] sm:$0xff] }
 0x170   :  { %v1426_v34 = vunpack.c.0.s8 %v6709_v2  ;;  %v1686_v57 = vcvt.s32.f32 %v1430_v19  ;;  %v1553_v2 = vunpack.c.0.s8 %v6732_v55  ;;  %v1678_v13 = vcvt.s32.f32 %v1422_v15 }
 0x171   :  { %v1234_v30 = vadd.f32 %v1233_v60, %v1221_v46  ;;  %v6738_v29 = vcvt.s32.f32 %v1434_v50  ;;  %2123 = vmatpush.bf16.msra.mxu3 %v2024_v27  ;;  %v1993_v40 = vpack.c.bf16 %v6736_v16, %v6729_v39  ;;  %v6779_v46 = vcvt.s32.f32 %v1565_v14 }
 0x172   :  { %v6781_v56 = vcvt.s32.f32 %v1426_v34  ;;  %v1557_v50 = vunpack.c.1.s8 %v6732_v55  ;;  %v6809_v9 = vcvt.s32.f32 %v1553_v2  ;;  %v1514_v55 = vunpack.c.2.s8 %v1358_v63 }
 0x173   :  { %v1301_v35 = vmul.f32 %v1293_v5, %v1234_v30  ;;  %2141 = vmatpush.bf16.msrb.mxu0 %v1909_v37  ;;  %2150 = vmatpush.bf16.msrb.mxu1 %v1957_v43  ;;  %v1469_v5 = vunpack.c.3.s8 %v6727_v21  ;;  %v1926_v28 = vpack.c.bf16 %v6748_v31, %v6738_v29  ;;  %v1989_v48 = vpack.c.bf16 %v6779_v46, %v6764_v10  ;;  %v6829_v29 = vld [vmem:[#allocation4 + $0x218] sm:$0xff] }
 0x174   :  { %v1922_v51 = vpack.c.bf16 %v1686_v57, %v6781_v56  ;;  %v1418_v30 = vunpack.c.2.s8 %v6783_v42  ;;  %v1813_v44 = vcvt.s32.f32 %v1557_v50  ;;  %v1294_v6 = vperm.slane %v6533_v7, 3  ;;  %v1361_v50 = vld [vmem:[#allocation4 + $0x310] sm:$0xff] }
 0x175   :  { %v1316_v33 = vadd.f32 %v1308_v26, %v1301_v35  ;;  %v6761_v36 = vcvt.s32.f32 %v1469_v5  ;;  %v2020_v26 = vpack.c.bf16 %v1884_v11, %v1880_v54  ;;  %v1518_v35 = vunpack.c.3.s8 %v1358_v63 }
 0x176   :  { %v1222_v37 = vpop.f32.mrf.mxu2  ;;  %v1235_v43 = vpop.f32.mrf.mxu3  ;;  %v1674_v53 = vcvt.s32.f32 %v1418_v30  ;;  %v1309_v23 = vperm.slane %v6536_v25, 3  ;;  %v1770_v54 = vcvt.s32.f32 %v1514_v55  ;;  %v1414_v10 = vunpack.c.1.s8 %v6783_v42 }
 0x177   :  { %v1320_v60 = vmax.f32 %v1316_v33, 0.0  ;;  %2142 = vmatpush.bf16.msrb.mxu0 %v1905_v45  ;;  %2151 = vmatpush.bf16.msrb.mxu1 %v1953_v47  ;;  %v1941_v0 = vpack.c.bf16 %v6761_v36, %v6759_v18  ;;  %v1872_v45 = vcvt.s32.f32 %v1616_v4  ;;  %v1457_v47 = vunpack.c.0.s8 %v6727_v21  ;;  %v6831_v4 = vld [vmem:[#allocation4 + $0x2d8] sm:$0xff] }
 0x178   :  { %2124 = vmatpush.bf16.msra.mxu3 %v2020_v26  ;;  %v1774_v5 = vcvt.s32.f32 %v1518_v35  ;;  %v1918_v11 = vpack.c.bf16 %v1678_v13, %v1674_v53  ;;  %v1545_v37 = vunpack.c.2.s8 %v1365_v3  ;;  %v1410_v43 = vunpack.c.0.s8 %v6783_v42 }
 0x179   :  { %v6785_v58 = vpack.c.bf16 %v1320_v60, %v1320_v60  ;;  %v6799_v20 = vcvt.s32.f32 %v1457_v47  ;;  %v1506_v34 = vunpack.c.0.s8 %v1358_v63  ;;  %v1537_v42 = vunpack.c.0.s8 %v1365_v3 }
 0x17a   :  { %2104 = vmatmul.bf16.vlgmr.msra.gmra.mxu1 %v6678_v17  ;;  %2143 = vmatmul.bf16.vlgmr.msrb.gmra.mxu0 %v6598_v41  ;;  %v1966_v24 = vpack.c.bf16 %v1774_v5, %v1770_v54  ;;  %v1801_v14 = vcvt.s32.f32 %v1545_v37  ;;  %v1666_v16 = vcvt.s32.f32 %v1410_v43  ;;  %v1541_v47 = vunpack.c.1.s8 %v1365_v3 }
 0x17b   :  { %2187 = vmatpush.bf16.msra.mxu0 %v1934_v38  ;;  %v1461_v38 = vunpack.c.1.s8 %v6727_v21  ;;  %2065 = vmatmul.bf16.vlgmr.msrb.gmra.mxu2 %v6785_v58  ;;  %v2016_v21 = vpack.c.bf16 %v1876_v8, %v1872_v45  ;;  %v1762_v26 = vcvt.s32.f32 %v1506_v34  ;;  %v1402_v8 = vunpack.c.2.s8 %v6829_v29  ;;  %v1389_v34 = vld [vmem:[#allocation4 + $0x3f0] sm:$0xff] }
 0x17c   :  { %2152 = vmatpush.bf16.msrb.mxu1 %v1949_v59  ;;  %2161 = vmatpush.bf16.msrb.mxu2 %v1997_v1  ;;  %v1380_v59 = vld [vmem:[#allocation4 + $0x3a8] sm:$0xff]  ;;  %v1394_v37 = vunpack.c.0.s8 %v6829_v29  ;;  %v1641_v7 = vunpack.c.2.s8 %v1389_v34 }
 0x17d   :  { %v1717_v27 = vcvt.s32.f32 %v1461_v38  ;;  %2125 = vmatpush.bf16.msra.mxu3 %v2016_v21  ;;  %v1608_v22 = vunpack.c.2.s8 %v1380_v59  ;;  %v1612_v18 = vunpack.c.3.s8 %v1380_v59  ;;  %v1600_v60 = vunpack.c.0.s8 %v1380_v59  ;;  %v6834_v38 = vld [vmem:[#allocation4 + $0x388] sm:$0xff] }
 0x17e   :  { %v1604_v19 = vunpack.c.1.s8 %v1380_v59  ;;  %v1797_v21 = vcvt.s32.f32 %v1541_v47  ;;  %v1596_v53 = vunpack.c.3.s8 %v6834_v38 }
 0x17f   :  { %2188 = vmatpush.bf16.msra.mxu0 %v1930_v49  ;;  %v1937_v32 = vpack.c.bf16 %v1717_v27, %v6799_v20  ;;  %v1985_v49 = vpack.c.bf16 %v1813_v44, %v6809_v9  ;;  %v1864_v12 = vcvt.s32.f32 %v1608_v22  ;;  %v1868_v36 = vcvt.s32.f32 %v1612_v18 }
 0x180   :  { %2153 = vmatpush.bf16.msrb.mxu1 %v1945_v52  ;;  %2162 = vmatpush.bf16.msrb.mxu2 %v1993_v40  ;;  %v1549_v52 = vunpack.c.3.s8 %v1365_v3  ;;  %v1510_v40 = vunpack.c.1.s8 %v1358_v63  ;;  %v1856_v61 = vcvt.s32.f32 %v1600_v60  ;;  %v1860_v45 = vcvt.s32.f32 %v1604_v19  ;;  %v1350_v19 = vld [vmem:[#allocation4 + $0x2b8] sm:$0xff] }
 0x181   :  { %v2012_v31 = vpack.c.bf16 %v1868_v36, %v1864_v12  ;;  %v1793_v63 = vcvt.s32.f32 %v1537_v42  ;;  %v1498_v20 = vunpack.c.2.s8 %v6831_v4  ;;  %v1658_v27 = vcvt.s32.f32 %v1402_v8 }
 0x182   :  { %v1259_v1 = vpop.f32.mrf.mxu1  ;;  %v1805_v39 = vcvt.s32.f32 %v1549_v52  ;;  %v1766_v56 = vcvt.s32.f32 %v1510_v40  ;;  %v2008_v30 = vpack.c.bf16 %v1860_v45, %v1856_v61  ;;  %v1502_v9 = vunpack.c.3.s8 %v6831_v4 }
 0x183   :  { %v1246_v62 = vpop.f32.mrf.mxu0  ;;  %2189 = vmatpush.bf16.msra.mxu0 %v1926_v28  ;;  %v1670_v28 = vcvt.s32.f32 %v1414_v10  ;;  %2126 = vmatpush.bf16.msra.mxu3 %v2012_v31  ;;  %v1754_v59 = vcvt.s32.f32 %v1498_v20  ;;  %v1592_v44 = vunpack.c.2.s8 %v6834_v38  ;;  %v1977_v35 = vpack.c.bf16 %v1797_v21, %v1793_v63 }
 0x184   :  { %v6819_v33 = vadd.f32 %v1259_v1, %v1246_v62  ;;  %2154 = vmatpush.bf16.msrb.mxu1 %v1941_v0  ;;  %2163 = vmatpush.bf16.msrb.mxu2 %v1989_v48  ;;  %v1981_v46 = vpack.c.bf16 %v1805_v39, %v1801_v14  ;;  %v1962_v2 = vpack.c.bf16 %v1766_v56, %v1762_v26  ;;  %v1758_v3 = vcvt.s32.f32 %v1502_v9 }
 0x185   :  { %v1914_v0 = vpack.c.bf16 %v1670_v28, %v1666_v16  ;;  %v1529_v62 = vunpack.c.2.s8 %v1361_v50  ;;  %v1848_v54 = vcvt.s32.f32 %v1592_v44  ;;  %v1852_v5 = vcvt.s32.f32 %v1596_v53  ;;  %v1385_v44 = vld [vmem:[#allocation4 + $0x3d0] sm:$0xff] }
 0x186   :  { %v1958_v22 = vpack.c.bf16 %v1758_v3, %v1754_v59  ;;  %v1398_v52 = vunpack.c.1.s8 %v6829_v29  ;;  %v1650_v36 = vcvt.s32.f32 %v1394_v37  ;;  %v1494_v14 = vunpack.c.1.s8 %v6831_v4 }
 0x187   :  { %2190 = vmatpush.bf16.msra.mxu0 %v1922_v51  ;;  %v1406_v51 = vunpack.c.3.s8 %v6829_v29  ;;  %2127 = vmatpush.bf16.msra.mxu3 %v2008_v30  ;;  %v2004_v12 = vpack.c.bf16 %v1852_v5, %v1848_v54  ;;  %v1584_v10 = vunpack.c.0.s8 %v6834_v38  ;;  %v1588_v60 = vunpack.c.1.s8 %v6834_v38 }
 0x188   :  { %2155 = vmatpush.bf16.msrb.mxu1 %v1937_v32  ;;  %2164 = vmatpush.bf16.msrb.mxu2 %v1985_v49  ;;  %v1533_v32 = vunpack.c.3.s8 %v1361_v50  ;;  %v1654_v16 = vcvt.s32.f32 %v1398_v52  ;;  %v1750_v29 = vcvt.s32.f32 %v1494_v14  ;;  %v1521_v28 = vunpack.c.0.s8 %v1361_v50 }
 0x189   :  { %v1662_v15 = vcvt.s32.f32 %v1406_v51  ;;  %v1840_v31 = vcvt.s32.f32 %v1584_v10  ;;  %v1525_v26 = vunpack.c.1.s8 %v1361_v50  ;;  %v1844_v56 = vcvt.s32.f32 %v1588_v60 }
 0x18a   :  { %v1261_v48 = vpop.f32.mrf.mxu1  ;;  %v1789_v18 = vcvt.s32.f32 %v1533_v32  ;;  %v1645_v45 = vunpack.c.3.s8 %v1389_v34  ;;  %v1633_v21 = vunpack.c.0.s8 %v1389_v34  ;;  %v1637_v59 = vunpack.c.1.s8 %v1389_v34 }
 0x18b   :  { %v1248_v57 = vpop.f32.mrf.mxu0  ;;  %2191 = vmatpush.bf16.msra.mxu0 %v1918_v11  ;;  %2156 = vmatmul.bf16.vlgmr.msrb.gmra.mxu1 %v6678_v17  ;;  %v1910_v49 = vpack.c.bf16 %v1662_v15, %v1658_v27  ;;  %v1785_v11 = vcvt.s32.f32 %v1529_v62  ;;  %v2000_v38 = vpack.c.bf16 %v1844_v56, %v1840_v31  ;;  %v1897_v48 = vcvt.s32.f32 %v1641_v7 }
 0x18c   :  { %2200 = vmatpush.bf16.msra.mxu1 %v1966_v24  ;;  %2117 = vmatmul.bf16.vlgmr.msra.gmra.mxu2 %v6785_v58  ;;  %v1777_v57 = vcvt.s32.f32 %v1521_v28  ;;  %v1901_v25 = vcvt.s32.f32 %v1645_v45  ;;  %v1478_v3 = vunpack.c.1.s8 %v1350_v19  ;;  %v1893_v32 = vcvt.s32.f32 %v1637_v59 }
 0x18d   :  { %2165 = vmatpush.bf16.msrb.mxu2 %v1981_v46  ;;  %v1973_v43 = vpack.c.bf16 %v1789_v18, %v1785_v11  ;;  %2128 = vmatpush.bf16.msra.mxu3 %v2004_v12  ;;  %v1906_v46 = vpack.c.bf16 %v1654_v16, %v1650_v36  ;;  %v1625_v11 = vunpack.c.2.s8 %v1385_v44  ;;  %v1370_v18 = vld [vmem:[#allocation4 + $0x358] sm:$0xff]  ;;  %v1629_v12 = vunpack.c.3.s8 %v1385_v44 }
 0x18e   :  { %v1272_v55 = vpop.f32.mrf.mxu2  ;;  %v1285_v1 = vpop.f32.mrf.mxu3  ;;  %v2029_v27 = vpack.c.bf16 %v1901_v25, %v1897_v48  ;;  %v1562_v34 = vunpack.c.2.s8 %v1370_v18  ;;  %v1617_v60 = vunpack.c.0.s8 %v1385_v44  ;;  %v1558_v45 = vunpack.c.1.s8 %v1370_v18 }
 0x18f   :  { %v1273_v13 = vadd.f32 %v1272_v55, %v6819_v33  ;;  %2192 = vmatpush.bf16.msra.mxu0 %v1914_v0  ;;  %v1490_v33 = vunpack.c.0.s8 %v6831_v4  ;;  %v1781_v0 = vcvt.s32.f32 %v1525_v26  ;;  %v1889_v55 = vcvt.s32.f32 %v1633_v21 }
 0x190   :  { %2201 = vmatpush.bf16.msra.mxu1 %v1962_v2  ;;  %v1482_v2 = vunpack.c.2.s8 %v1350_v19  ;;  %v1885_v10 = vcvt.s32.f32 %v1629_v12  ;;  %v1818_v28 = vcvt.s32.f32 %v1562_v34  ;;  %v1873_v56 = vcvt.s32.f32 %v1617_v60  ;;  %v1390_v12 = vld [vmem:[#allocation4 + $0x3f8] sm:$0xff] }
 0x191   :  { %v1286_v24 = vadd.f32 %v1285_v1, %v1273_v13  ;;  %v1746_v40 = vcvt.s32.f32 %v1490_v33  ;;  %2166 = vmatpush.bf16.msrb.mxu2 %v1977_v35  ;;  %v1969_v63 = vpack.c.bf16 %v1781_v0, %v1777_v57  ;;  %2129 = vmatpush.bf16.msra.mxu3 %v2000_v38  ;;  %v1474_v35 = vunpack.c.0.s8 %v1350_v19 }
 0x192   :  { %v1738_v50 = vcvt.s32.f32 %v1482_v2  ;;  %v2025_v37 = vpack.c.bf16 %v1893_v32, %v1889_v55  ;;  %v1881_v33 = vcvt.s32.f32 %v1625_v11  ;;  %v1554_v0 = vunpack.c.0.s8 %v1370_v18 }
 0x193   :  { %v1302_v39 = vmul.f32 %v1294_v6, %v1286_v24  ;;  %2193 = vmatpush.bf16.msra.mxu0 %v1910_v49  ;;  %v1374_v6 = vld [vmem:[#allocation4 + $0x378] sm:$0xff]  ;;  %v1954_v42 = vpack.c.bf16 %v1750_v29, %v1746_v40  ;;  %v1730_v5 = vcvt.s32.f32 %v1474_v35  ;;  %v1621_v29 = vunpack.c.1.s8 %v1385_v44 }
 0x194   :  { %2202 = vmatpush.bf16.msra.mxu1 %v1958_v22  ;;  %v1578_v51 = vunpack.c.2.s8 %v1374_v6  ;;  %v1582_v30 = vunpack.c.3.s8 %v1374_v6  ;;  %v1570_v13 = vunpack.c.0.s8 %v1374_v6  ;;  %v1574_v1 = vunpack.c.1.s8 %v1374_v6  ;;  %v1346_v49 = vld [vmem:[#allocation4 + $0x298] sm:$0xff] }
 0x195   :  { %v1317_v4 = vadd.f32 %v1309_v23, %v1302_v39  ;;  %2167 = vmatpush.bf16.msrb.mxu2 %v1973_v43  ;;  %v1486_v23 = vunpack.c.3.s8 %v1350_v19  ;;  %v1734_v22 = vcvt.s32.f32 %v1478_v3  ;;  %v1466_v43 = vunpack.c.2.s8 %v1346_v49 }
 0x196   :  { %v1274_v61 = vpop.f32.mrf.mxu2  ;;  %v1287_v8 = vpop.f32.mrf.mxu3  ;;  %v1834_v15 = vcvt.s32.f32 %v1578_v51  ;;  %v1838_v53 = vcvt.s32.f32 %v1582_v30  ;;  %v1826_v24 = vcvt.s32.f32 %v1570_v13  ;;  %v1470_v36 = vunpack.c.3.s8 %v1346_v49 }
 0x197   :  { %v1321_v47 = vmax.f32 %v1317_v4, 0.0  ;;  %2194 = vmatpush.bf16.msra.mxu0 %v1906_v46  ;;  %v1742_v9 = vcvt.s32.f32 %v1486_v23  ;;  %v1946_v52 = vpack.c.bf16 %v1734_v22, %v1730_v5  ;;  %v1566_v39 = vunpack.c.3.s8 %v1370_v18  ;;  %v1381_v4 = vld [vmem:[#allocation4 + $0x3b0] sm:$0xff]  ;;  %v1366_v61 = vld [vmem:[#allocation4 + $0x338] sm:$0xff] }
 0x198   :  { %2203 = vmatpush.bf16.msra.mxu1 %v1954_v42  ;;  %v1998_v54 = vpack.c.bf16 %v1838_v53, %v1834_v15  ;;  %v1722_v16 = vcvt.s32.f32 %v1466_v43  ;;  %v1726_v40 = vcvt.s32.f32 %v1470_v36  ;;  %v2021_v31 = vpack.c.bf16 %v1885_v10, %v1881_v33  ;;  %v1362_v53 = vld [vmem:[#allocation4 + $0x318] sm:$0xff] }
 0x199   :  { %v6854_v20 = vpack.c.bf16 %v1321_v47, %v1321_v47  ;;  %2168 = vmatpush.bf16.msrb.mxu2 %v1969_v63  ;;  %v1950_v62 = vpack.c.bf16 %v1742_v9, %v1738_v50  ;;  %v1822_v26 = vcvt.s32.f32 %v1566_v39  ;;  %v1458_v19 = vunpack.c.0.s8 %v1346_v49 }
 0x19a   :  { %2195 = vmatmul.bf16.vlgmr.msra.gmra.mxu0 %v6598_v41  ;;  %v1830_v41 = vcvt.s32.f32 %v1574_v1  ;;  %v1942_v46 = vpack.c.bf16 %v1726_v40, %v1722_v16  ;;  %v1877_v7 = vcvt.s32.f32 %v1621_v29  ;;  %v1462_v6 = vunpack.c.1.s8 %v1346_v49 }
 0x19b   :  { %2078 = vmatmul.bf16.vlgmr.msrb.gmra.mxu3 %v6854_v20  ;;  %v1990_v42 = vpack.c.bf16 %v1822_v26, %v1818_v28  ;;  %v1714_v57 = vcvt.s32.f32 %v1458_v19  ;;  %v1609_v38 = vunpack.c.2.s8 %v1381_v4  ;;  %v1613_v48 = vunpack.c.3.s8 %v1381_v4  ;;  %v1386_v19 = vld [vmem:[#allocation4 + $0x3d8] sm:$0xff] }
 0x19c   :  { %2174 = vmatpush.bf16.msrb.mxu3 %v2029_v27  ;;  %2204 = vmatpush.bf16.msra.mxu1 %v1950_v62  ;;  %v1994_v14 = vpack.c.bf16 %v1830_v41, %v1826_v24  ;;  %v2017_v47 = vpack.c.bf16 %v1877_v7, %v1873_v56  ;;  %v1718_v8 = vcvt.s32.f32 %v1462_v6  ;;  %v1810_v2 = vcvt.s32.f32 %v1554_v0  ;;  %v1377_v27 = vld [vmem:[#allocation4 + $0x390] sm:$0xff] }
 0x19d   :  { %2213 = vmatpush.bf16.msra.mxu2 %v1998_v54  ;;  %v1814_v63 = vcvt.s32.f32 %v1558_v45  ;;  %v1546_v25 = vunpack.c.2.s8 %v1366_v61  ;;  %v1550_v23 = vunpack.c.3.s8 %v1366_v61  ;;  %v1865_v50 = vcvt.s32.f32 %v1609_v38 }
 0x19e   :  { %2169 = vmatmul.bf16.vlgmr.msrb.gmra.mxu2 %v6785_v58  ;;  %v1938_v51 = vpack.c.bf16 %v1718_v8, %v1714_v57  ;;  %v1869_v30 = vcvt.s32.f32 %v1613_v48  ;;  %v1601_v21 = vunpack.c.0.s8 %v1381_v4  ;;  %v1605_v44 = vunpack.c.1.s8 %v1381_v4 }
 0x19f   :  { %v1986_v9 = vpack.c.bf16 %v1814_v63, %v1810_v2  ;;  %v1802_v15 = vcvt.s32.f32 %v1546_v25  ;;  %v1806_v59 = vcvt.s32.f32 %v1550_v23  ;;  %v1538_v3 = vunpack.c.0.s8 %v1366_v61  ;;  %v1382_v2 = vld [vmem:[#allocation4 + $0x3b8] sm:$0xff] }
 0x1a0   :  { %2175 = vmatpush.bf16.msrb.mxu3 %v2025_v37  ;;  %2205 = vmatpush.bf16.msra.mxu1 %v1946_v52  ;;  %v2013_v55 = vpack.c.bf16 %v1869_v30, %v1865_v50  ;;  %v1857_v35 = vcvt.s32.f32 %v1601_v21  ;;  %v1542_v62 = vunpack.c.1.s8 %v1366_v61  ;;  %v1861_v13 = vcvt.s32.f32 %v1605_v44 }
 0x1a1   :  { %2214 = vmatpush.bf16.msra.mxu2 %v1994_v14  ;;  %v1982_v32 = vpack.c.bf16 %v1806_v59, %v1802_v15  ;;  %v1593_v1 = vunpack.c.2.s8 %v1377_v27  ;;  %v1597_v49 = vunpack.c.3.s8 %v1377_v27  ;;  %v1794_v54 = vcvt.s32.f32 %v1538_v3  ;;  %v1378_v59 = vld [vmem:[#allocation4 + $0x398] sm:$0xff] }
 0x1a2   :  { %v1798_v5 = vcvt.s32.f32 %v1542_v62  ;;  %v1530_v22 = vunpack.c.2.s8 %v1362_v53  ;;  %v1534_v11 = vunpack.c.3.s8 %v1362_v53  ;;  %v2009_v18 = vpack.c.bf16 %v1861_v13, %v1857_v35 }
 0x1a3   :  { %v1849_v37 = vcvt.s32.f32 %v1593_v1  ;;  %v1853_v24 = vcvt.s32.f32 %v1597_v49  ;;  %v1585_v41 = vunpack.c.0.s8 %v1377_v27  ;;  %v1589_v52 = vunpack.c.1.s8 %v1377_v27 }
 0x1a4   :  { %2176 = vmatpush.bf16.msrb.mxu3 %v2021_v31  ;;  %2206 = vmatpush.bf16.msra.mxu1 %v1942_v46  ;;  %v1978_v33 = vpack.c.bf16 %v1798_v5, %v1794_v54  ;;  %v1786_v43 = vcvt.s32.f32 %v1530_v22  ;;  %v1790_v36 = vcvt.s32.f32 %v1534_v11  ;;  %v1522_v14 = vunpack.c.0.s8 %v1362_v53 }
 0x1a5   :  { %2215 = vmatpush.bf16.msra.mxu2 %v1990_v42  ;;  %v1526_v10 = vunpack.c.1.s8 %v1362_v53  ;;  %v1642_v34 = vunpack.c.2.s8 %v1390_v12  ;;  %v1646_v39 = vunpack.c.3.s8 %v1390_v12  ;;  %v2005_v16 = vpack.c.bf16 %v1853_v24, %v1849_v37 }
 0x1a6   :  { %v1841_v40 = vcvt.s32.f32 %v1585_v41  ;;  %v1845_v60 = vcvt.s32.f32 %v1589_v52  ;;  %v1634_v28 = vunpack.c.0.s8 %v1390_v12  ;;  %v1638_v26 = vunpack.c.1.s8 %v1390_v12 }
 0x1a7   :  { %v1898_v29 = vcvt.s32.f32 %v1642_v34  ;;  %v1902_v31 = vcvt.s32.f32 %v1646_v39  ;;  %v1778_v4 = vcvt.s32.f32 %v1522_v14  ;;  %v1782_v46 = vcvt.s32.f32 %v1526_v10  ;;  %v2286_v10 = vld [vmem:[#allocation4 + $0x440] sm:$0xff] }
 0x1a8   :  { %2177 = vmatpush.bf16.msrb.mxu3 %v2017_v47  ;;  %2207 = vmatpush.bf16.msra.mxu1 %v1938_v51  ;;  %v2001_v56 = vpack.c.bf16 %v1845_v60, %v1841_v40  ;;  %v1626_v7 = vunpack.c.2.s8 %v1386_v19  ;;  %v1890_v61 = vcvt.s32.f32 %v1634_v28  ;;  %v1894_v42 = vcvt.s32.f32 %v1638_v26 }
 0x1a9   :  { %2216 = vmatpush.bf16.msra.mxu2 %v1986_v9  ;;  %v2030_v6 = vpack.c.bf16 %v1902_v31, %v1898_v29  ;;  %v1630_v57 = vunpack.c.3.s8 %v1386_v19  ;;  %v1970_v0 = vpack.c.bf16 %v1782_v46, %v1778_v4  ;;  %v1618_v38 = vunpack.c.0.s8 %v1386_v19  ;;  %v2282_v4 = vld [vmem:[#allocation4 + $0x420] sm:$0xff] }
 0x1aa   :  { %v1882_v45 = vcvt.s32.f32 %v1626_v7  ;;  %v2026_v47 = vpack.c.bf16 %v1894_v42, %v1890_v61  ;;  %v1622_v48 = vunpack.c.1.s8 %v1386_v19  ;;  %v1610_v63 = vunpack.c.2.s8 %v1382_v2  ;;  %v2306_v46 = vld [vmem:[#allocation4 + $0x4e0] sm:$0xff] }
 0x1ab   :  { %2130 = vmatmul.bf16.vlgmr.msra.gmra.mxu3 %v6854_v20  ;;  %2208 = vmatmul.bf16.vlgmr.msra.gmra.mxu1 %v6678_v17  ;;  %v1974_v17 = vpack.c.bf16 %v1790_v36, %v1786_v43  ;;  %v1886_v8 = vcvt.s32.f32 %v1630_v57  ;;  %v1874_v23 = vcvt.s32.f32 %v1618_v38  ;;  %v1614_v50 = vunpack.c.3.s8 %v1382_v2 }
 0x1ac   :  { %2178 = vmatpush.bf16.msrb.mxu3 %v2013_v55  ;;  %v1878_v51 = vcvt.s32.f32 %v1622_v48  ;;  %v1602_v30 = vunpack.c.0.s8 %v1382_v2  ;;  %v1866_v27 = vcvt.s32.f32 %v1610_v63  ;;  %v1606_v15 = vunpack.c.1.s8 %v1382_v2 }
 0x1ad   :  { %2217 = vmatpush.bf16.msra.mxu2 %v1982_v32  ;;  %v2022_v25 = vpack.c.bf16 %v1886_v8, %v1882_v45  ;;  %v1870_v9 = vcvt.s32.f32 %v1614_v50  ;;  %v1594_v44 = vunpack.c.2.s8 %v1378_v59  ;;  %v1598_v3 = vunpack.c.3.s8 %v1378_v59 }
 0x1ae   :  { %v2018_v21 = vpack.c.bf16 %v1878_v51, %v1874_v23  ;;  %v1858_v55 = vcvt.s32.f32 %v1602_v30  ;;  %v1862_v35 = vcvt.s32.f32 %v1606_v15  ;;  %v1586_v1 = vunpack.c.0.s8 %v1378_v59  ;;  %v2278_v30 = vld [vmem:[#allocation4 + $0x400] sm:$0xff] }
 0x1af   :  { %v2014_v53 = vpack.c.bf16 %v1870_v9, %v1866_v27  ;;  %v1850_v62 = vcvt.s32.f32 %v1594_v44  ;;  %v1854_v13 = vcvt.s32.f32 %v1598_v3  ;;  %v1590_v49 = vunpack.c.1.s8 %v1378_v59 }
 0x1b0   :  { %2179 = vmatpush.bf16.msrb.mxu3 %v2009_v18  ;;  %v2010_v32 = vpack.c.bf16 %v1862_v35, %v1858_v55  ;;  %v1842_v37 = vcvt.s32.f32 %v1586_v1  ;;  %v2382_v34 = vunpack.c.2.s8 %v2286_v10  ;;  %v2386_v39 = vunpack.c.3.s8 %v2286_v10 }
 0x1b1   :  { %2218 = vmatpush.bf16.msra.mxu2 %v1978_v33  ;;  %v2006_v18 = vpack.c.bf16 %v1854_v13, %v1850_v62  ;;  %v1846_v24 = vcvt.s32.f32 %v1590_v49  ;;  %v2378_v40 = vunpack.c.1.s8 %v2286_v10  ;;  %v2370_v7 = vunpack.c.3.s8 %v2282_v4 }
 0x1b2   :  { %v2638_v60 = vcvt.s32.f32 %v2382_v34  ;;  %v2642_v29 = vcvt.s32.f32 %v2386_v39  ;;  %v2466_v61 = vunpack.c.3.s8 %v2306_v46  ;;  %v2358_v38 = vunpack.c.0.s8 %v2282_v4 }
 0x1b3   :  { %v2002_v36 = vpack.c.bf16 %v1846_v24, %v1842_v37  ;;  %v2634_v28 = vcvt.s32.f32 %v2378_v40  ;;  %v2626_v57 = vcvt.s32.f32 %v2370_v7  ;;  %v2454_v48 = vunpack.c.0.s8 %v2306_v46 }
 0x1b4   :  { %2180 = vmatpush.bf16.msrb.mxu3 %v2005_v16  ;;  %v2374_v16 = vunpack.c.0.s8 %v2286_v10  ;;  %v2874_v26 = vpack.c.bf16 %v2642_v29, %v2638_v60  ;;  %v2722_v45 = vcvt.s32.f32 %v2466_v61  ;;  %v2458_v2 = vunpack.c.1.s8 %v2306_v46 }
 0x1b5   :  { %2219 = vmatpush.bf16.msra.mxu2 %v1974_v17  ;;  %v2614_v63 = vcvt.s32.f32 %v2358_v38  ;;  %v2710_v51 = vcvt.s32.f32 %v2454_v48  ;;  %v2350_v9 = vunpack.c.2.s8 %v2278_v30  ;;  %v2354_v15 = vunpack.c.3.s8 %v2278_v30 }
 0x1b6   :  { %v2630_v31 = vcvt.s32.f32 %v2374_v16  ;;  %v2714_v50 = vcvt.s32.f32 %v2458_v2  ;;  %v2342_v13 = vunpack.c.0.s8 %v2278_v30  ;;  %v2346_v1 = vunpack.c.1.s8 %v2278_v30  ;;  %v2318_v30 = vld [vmem:[#allocation4 + $0x540] sm:$0xff] }
 0x1b7   :  { %v2606_v55 = vcvt.s32.f32 %v2350_v9  ;;  %v2610_v35 = vcvt.s32.f32 %v2354_v15 }
 0x1b8   :  { %2181 = vmatpush.bf16.msrb.mxu3 %v2001_v56  ;;  %v2870_v19 = vpack.c.bf16 %v2634_v28, %v2630_v31  ;;  %v2366_v56 = vunpack.c.2.s8 %v2282_v4  ;;  %v2910_v44 = vpack.c.bf16 %v2714_v50, %v2710_v51  ;;  %v2602_v37 = vcvt.s32.f32 %v2346_v1  ;;  %v2294_v50 = vld [vmem:[#allocation4 + $0x480] sm:$0xff] }
 0x1b9   :  { %2220 = vmatpush.bf16.msra.mxu2 %v1970_v0  ;;  %v2414_v9 = vunpack.c.2.s8 %v2294_v50  ;;  %v2418_v15 = vunpack.c.3.s8 %v2294_v50 }
 0x1ba   :  { %v2622_v42 = vcvt.s32.f32 %v2366_v56 }
 0x1bb   :  { %2182 = vmatmul.bf16.vlgmr.msrb.gmra.mxu3 %v6854_v20 }
 0x1bc   :  { %2226 = vmatpush.bf16.msra.mxu3 %v2030_v6  ;;  %2221 = vmatmul.bf16.vlgmr.msra.gmra.mxu2 %v6785_v58  ;;  %v2290_v58 = vld [vmem:[#allocation4 + $0x460] sm:$0xff]  ;;  %v2462_v6 = vunpack.c.2.s8 %v2306_v46 }
 0x1bd   :  { %v2398_v54 = vunpack.c.2.s8 %v2290_v58  ;;  %v2402_v5 = vunpack.c.3.s8 %v2290_v58  ;;  %v2390_v22 = vunpack.c.0.s8 %v2290_v58  ;;  %v2394_v11 = vunpack.c.1.s8 %v2290_v58  ;;  %v2291_v58 = vld [vmem:[#allocation4 + $0x468] sm:$0xff] }
 0x1be   :  { %v2718_v0 = vcvt.s32.f32 %v2462_v6 }
 0x1bf   :  { %v2654_v41 = vcvt.s32.f32 %v2398_v54  ;;  %v2658_v12 = vcvt.s32.f32 %v2402_v5  ;;  %v2646_v52 = vcvt.s32.f32 %v2390_v22  ;;  %v2650_v33 = vcvt.s32.f32 %v2394_v11 }
 0x1c0   :  { %2227 = vmatpush.bf16.msra.mxu3 %v2026_v47  ;;  %v2866_v47 = vpack.c.bf16 %v2626_v57, %v2622_v42  ;;  %v2914_v8 = vpack.c.bf16 %v2722_v45, %v2718_v0  ;;  %v2399_v22 = vunpack.c.2.s8 %v2291_v58  ;;  %v2403_v11 = vunpack.c.3.s8 %v2291_v58  ;;  %v2287_v42 = vld [vmem:[#allocation4 + $0x448] sm:$0xff] }
 0x1c1   :  { %v2882_v43 = vpack.c.bf16 %v2658_v12, %v2654_v41  ;;  %v2878_v14 = vpack.c.bf16 %v2650_v33, %v2646_v52  ;;  %v2387_v48 = vunpack.c.3.s8 %v2287_v42 }
 0x1c2   :  { %2995 = vmatpush.bf16.msrb.mxu1 %v2914_v8  ;;  %v2655_v33 = vcvt.s32.f32 %v2399_v22  ;;  %v2406_v22 = vunpack.c.0.s8 %v2294_v50 }
 0x1c3   :  { %2982 = vmatpush.bf16.msrb.mxu0 %v2882_v43  ;;  %v2659_v43 = vcvt.s32.f32 %v2403_v11  ;;  %v2410_v11 = vunpack.c.1.s8 %v2294_v50 }
 0x1c4   :  { %2228 = vmatpush.bf16.msra.mxu3 %v2022_v25 }
 0x1c5   :  { %v2883_v40 = vpack.c.bf16 %v2659_v43, %v2655_v33  ;;  %v2502_v33 = vunpack.c.0.s8 %v2318_v30  ;;  %v2506_v43 = vunpack.c.1.s8 %v2318_v30 }
 0x1c6   :  { %2996 = vmatpush.bf16.msrb.mxu1 %v2910_v44 }
 0x1c7   :  { %2983 = vmatpush.bf16.msrb.mxu0 %v2878_v14  ;;  %v2322_v14 = vld [vmem:[#allocation4 + $0x560] sm:$0xff] }
 0x1c8   :  { %2229 = vmatpush.bf16.msra.mxu3 %v2018_v21  ;;  %v2302_v21 = vld [vmem:[#allocation4 + $0x4c0] sm:$0xff]  ;;  %v2526_v60 = vunpack.c.2.s8 %v2322_v14  ;;  %v2530_v29 = vunpack.c.3.s8 %v2322_v14  ;;  %v2518_v45 = vunpack.c.0.s8 %v2322_v14 }
 0x1c9   :  { %v2446_v59 = vunpack.c.2.s8 %v2302_v21  ;;  %v2438_v49 = vunpack.c.0.s8 %v2302_v21  ;;  %v2442_v5 = vunpack.c.1.s8 %v2302_v21 }
 0x1ca   :  { %v2786_v46 = vcvt.s32.f32 %v2530_v29  ;;  %v2314_v29 = vld [vmem:[#allocation4 + $0x520] sm:$0xff] }
 0x1cb   :  { %2984 = vmatpush.bf16.msrb.mxu0 %v2874_v26  ;;  %v2702_v3 = vcvt.s32.f32 %v2446_v59  ;;  %v2694_v24 = vcvt.s32.f32 %v2438_v49  ;;  %v2698_v52 = vcvt.s32.f32 %v2442_v5  ;;  %v2391_v26 = vunpack.c.0.s8 %v2291_v58 }
 0x1cc   :  { %2230 = vmatpush.bf16.msra.mxu3 %v2014_v53  ;;  %v2450_v53 = vunpack.c.3.s8 %v2302_v21 }
 0x1cd   :  { %v2902_v16 = vpack.c.bf16 %v2698_v52, %v2694_v24  ;;  %v2647_v7 = vcvt.s32.f32 %v2391_v26 }
 0x1ce   :  { %v2706_v62 = vcvt.s32.f32 %v2450_v53  ;;  %v2510_v53 = vunpack.c.2.s8 %v2318_v30 }
 0x1cf   :  { %2985 = vmatpush.bf16.msrb.mxu0 %v2870_v19  ;;  %v2395_v19 = vunpack.c.1.s8 %v2291_v58  ;;  %v2379_v58 = vunpack.c.1.s8 %v2287_v42 }
 0x1d0   :  { %2231 = vmatpush.bf16.msra.mxu3 %v2010_v32  ;;  %v2858_v32 = vpack.c.bf16 %v2610_v35, %v2606_v55  ;;  %v2906_v54 = vpack.c.bf16 %v2706_v62, %v2702_v3  ;;  %v2514_v55 = vunpack.c.3.s8 %v2318_v30  ;;  %v2670_v3 = vcvt.s32.f32 %v2414_v9 }
 0x1d1   :  { %v2651_v6 = vcvt.s32.f32 %v2395_v19  ;;  %v2674_v62 = vcvt.s32.f32 %v2418_v15  ;;  %v2766_v1 = vcvt.s32.f32 %v2510_v53  ;;  %v2635_v52 = vcvt.s32.f32 %v2379_v58 }
 0x1d2   :  { %2997 = vmatpush.bf16.msrb.mxu1 %v2906_v54  ;;  %v2770_v49 = vcvt.s32.f32 %v2514_v55  ;;  %v2486_v30 = vunpack.c.0.s8 %v2314_v29 }
 0x1d3   :  { %2986 = vmatpush.bf16.msrb.mxu0 %v2866_v47  ;;  %v2522_v47 = vunpack.c.1.s8 %v2322_v14  ;;  %v2879_v8 = vpack.c.bf16 %v2651_v6, %v2647_v7  ;;  %v2890_v54 = vpack.c.bf16 %v2674_v62, %v2670_v3  ;;  %v2666_v14 = vcvt.s32.f32 %v2410_v11 }
 0x1d4   :  { %2232 = vmatpush.bf16.msra.mxu3 %v2006_v18  ;;  %v2598_v18 = vcvt.s32.f32 %v2342_v13  ;;  %v2938_v24 = vpack.c.bf16 %v2770_v49, %v2766_v1  ;;  %v2494_v7 = vunpack.c.2.s8 %v2314_v29  ;;  %v2742_v62 = vcvt.s32.f32 %v2486_v30  ;;  %v2310_v1 = vld [vmem:[#allocation4 + $0x500] sm:$0xff] }
 0x1d5   :  { %v2778_v51 = vcvt.s32.f32 %v2522_v47  ;;  %v2478_v11 = vunpack.c.2.s8 %v2310_v1 }
 0x1d6   :  { %v2854_v10 = vpack.c.bf16 %v2602_v37, %v2598_v18  ;;  %2998 = vmatpush.bf16.msrb.mxu1 %v2902_v16  ;;  %v2283_v18 = vld [vmem:[#allocation4 + $0x428] sm:$0xff]  ;;  %v2758_v16 = vcvt.s32.f32 %v2502_v33  ;;  %v2750_v47 = vcvt.s32.f32 %v2494_v7  ;;  %v2470_v7 = vunpack.c.0.s8 %v2310_v1 }
 0x1d7   :  { %v6864_v17 = vpop.f32.mrf.mxu0  ;;  %v2307_v37 = vld [vmem:[#allocation4 + $0x4e8] sm:$0xff] }
 0x1d8   :  { %2233 = vmatpush.bf16.msra.mxu3 %v2002_v36  ;;  %v2298_v36 = vld [vmem:[#allocation4 + $0x4a0] sm:$0xff] }
 0x1d9   :  { %v2430_v34 = vunpack.c.2.s8 %v2298_v36  ;;  %v2434_v39 = vunpack.c.3.s8 %v2298_v36  ;;  %v2422_v61 = vunpack.c.0.s8 %v2298_v36  ;;  %v2426_v0 = vunpack.c.1.s8 %v2298_v36 }
 0x1da   :  { %v2662_v36 = vcvt.s32.f32 %v2406_v22 }
 0x1db   :  { %2234 = vmatmul.bf16.vlgmr.msra.gmra.mxu3 %v6854_v20  ;;  %v2362_v20 = vunpack.c.1.s8 %v2282_v4  ;;  %v2686_v31 = vcvt.s32.f32 %v2430_v34  ;;  %v2690_v28 = vcvt.s32.f32 %v2434_v39  ;;  %v2782_v4 = vcvt.s32.f32 %v2526_v60 }
 0x1dc   :  { %v2678_v38 = vcvt.s32.f32 %v2422_v61  ;;  %v2463_v60 = vunpack.c.2.s8 %v2307_v37  ;;  %v2498_v61 = vunpack.c.3.s8 %v2314_v29 }
 0x1dd   :  { %v2618_v25 = vcvt.s32.f32 %v2362_v20  ;;  %v2898_v56 = vpack.c.bf16 %v2690_v28, %v2686_v31  ;;  %v2946_v57 = vpack.c.bf16 %v2786_v46, %v2782_v4  ;;  %v2383_v20 = vunpack.c.2.s8 %v2287_v42 }
 0x1de   :  { %v2886_v28 = vpack.c.bf16 %v2666_v14, %v2662_v36  ;;  %v2467_v46 = vunpack.c.3.s8 %v2307_v37  ;;  %v2734_v36 = vcvt.s32.f32 %v2478_v11 }
 0x1df   :  { %v2042_v23 = vpop.f32.mrf.mxu0  ;;  %v2862_v27 = vpack.c.bf16 %v2618_v25, %v2614_v63  ;;  %2999 = vmatpush.bf16.msrb.mxu1 %v2898_v56  ;;  %3008 = vmatpush.bf16.msrb.mxu2 %v2946_v57  ;;  %v2682_v25 = vcvt.s32.f32 %v2426_v0  ;;  %v2639_v21 = vcvt.s32.f32 %v2383_v20  ;;  %v2719_v56 = vcvt.s32.f32 %v2463_v60  ;;  %v6885_v60 = vld [vmem:[#allocation4 + $0x5e0] sm:$0xff] }
 0x1e0   :  { %v2774_v23 = vcvt.s32.f32 %v2518_v45  ;;  %v2363_v57 = vunpack.c.1.s8 %v2283_v18  ;;  %v2723_v0 = vcvt.s32.f32 %v2467_v46  ;;  %v6876_v45 = vld [vmem:[#allocation6 + $0x1] ss:$8 sm:$0xf]  ;;  %v2754_v20 = vcvt.s32.f32 %v2498_v61 }
 0x1e1   :  { %2987 = vmatpush.bf16.msrb.mxu0 %v2862_v27  ;;  %v2643_v27 = vcvt.s32.f32 %v2387_v48  ;;  %v2894_v59 = vpack.c.bf16 %v2682_v25, %v2678_v38  ;;  %v2242_v38 = vperm.slane %v6876_v45, 0  ;;  %v2299_v61 = vld [vmem:[#allocation4 + $0x4a8] sm:$0xff] }
 0x1e2   :  { %v2942_v44 = vpack.c.bf16 %v2778_v51, %v2774_v23  ;;  %v2915_v25 = vpack.c.bf16 %v2723_v0, %v2719_v56  ;;  %v6879_v23 = vld [vmem:[#allocation9 + $0x2] ss:$8 sm:$0xf]  ;;  %v2930_v15 = vpack.c.bf16 %v2754_v20, %v2750_v47  ;;  %v2431_v30 = vunpack.c.2.s8 %v2299_v61 }
 0x1e3   :  { %v2875_v35 = vpack.c.bf16 %v2643_v27, %v2639_v21  ;;  %3000 = vmatpush.bf16.msrb.mxu1 %v2894_v59  ;;  %v2303_v21 = vld [vmem:[#allocation4 + $0x4c8] sm:$0xff]  ;;  %v2257_v9 = vperm.slane %v6879_v23, 0 }
 0x1e4   :  { %3009 = vmatpush.bf16.msrb.mxu2 %v2942_v44  ;;  %v2490_v44 = vunpack.c.1.s8 %v2314_v29 }
 0x1e5   :  { %2988 = vmatpush.bf16.msrb.mxu0 %v2858_v32  ;;  %v2375_v32 = vunpack.c.0.s8 %v2287_v42  ;;  %v2359_v42 = vunpack.c.0.s8 %v2283_v18 }
 0x1e6   :  { %v2746_v49 = vcvt.s32.f32 %v2490_v44 }
 0x1e7   :  { %v2053_v41 = vpop.f32.mrf.mxu1  ;;  %v6866_v12 = vpop.f32.mrf.mxu0  ;;  %v2631_v5 = vcvt.s32.f32 %v2375_v32  ;;  %3001 = vmatpush.bf16.msrb.mxu1 %v2890_v54  ;;  %v2615_v48 = vcvt.s32.f32 %v2359_v42  ;;  %v2447_v54 = vunpack.c.2.s8 %v2303_v21 }
 0x1e8   :  { %v6869_v13 = vadd.f32 %v2053_v41, %v6864_v17  ;;  %v2367_v17 = vunpack.c.2.s8 %v2283_v18  ;;  %v2371_v41 = vunpack.c.3.s8 %v2283_v18  ;;  %3010 = vmatpush.bf16.msrb.mxu2 %v2938_v24  ;;  %v2482_v18 = vunpack.c.3.s8 %v2310_v1 }
 0x1e9   :  { %2989 = vmatpush.bf16.msrb.mxu0 %v2854_v10  ;;  %v2871_v39 = vpack.c.bf16 %v2635_v52, %v2631_v5  ;;  %v2451_v5 = vunpack.c.3.s8 %v2303_v21  ;;  %v2926_v24 = vpack.c.bf16 %v2746_v49, %v2742_v62  ;;  %v2703_v52 = vcvt.s32.f32 %v2447_v54 }
 0x1ea   :  { %v2623_v26 = vcvt.s32.f32 %v2367_v17  ;;  %v2627_v19 = vcvt.s32.f32 %v2371_v41  ;;  %v2738_v14 = vcvt.s32.f32 %v2482_v18 }
 0x1eb   :  { %3002 = vmatpush.bf16.msrb.mxu1 %v2886_v28  ;;  %v2707_v33 = vcvt.s32.f32 %v2451_v5  ;;  %v2258_v5 = vperm.slane %v6879_v23, 1 }
 0x1ec   :  { %v2867_v6 = vpack.c.bf16 %v2627_v19, %v2623_v26  ;;  %v2922_v29 = vpack.c.bf16 %v2738_v14, %v2734_v36  ;;  %v2423_v36 = vunpack.c.0.s8 %v2299_v61  ;;  %v2427_v14 = vunpack.c.1.s8 %v2299_v61 }
 0x1ed   :  { %3034 = vmatpush.bf16.msra.mxu0 %v2883_v40  ;;  %v2762_v40 = vcvt.s32.f32 %v2506_v43  ;;  %v2292_v43 = vld [vmem:[#allocation4 + $0x470] sm:$0xff] }
 0x1ee   :  { %v2400_v26 = vunpack.c.2.s8 %v2292_v43  ;;  %v2404_v19 = vunpack.c.3.s8 %v2292_v43 }
 0x1ef   :  { %v2055_v2 = vpop.f32.mrf.mxu1  ;;  %v2094_v63 = vpop.f32.mrf.mxu0  ;;  %v2934_v4 = vpack.c.bf16 %v2762_v40, %v2758_v16  ;;  %3047 = vmatpush.bf16.msra.mxu1 %v2915_v25  ;;  %v2439_v16 = vunpack.c.0.s8 %v2303_v21  ;;  %v2443_v40 = vunpack.c.1.s8 %v2303_v21 }
 0x1f0   :  { %v2619_v2 = vcvt.s32.f32 %v2363_v57  ;;  %v2279_v63 = vld [vmem:[#allocation4 + $0x408] sm:$0xff]  ;;  %v6887_v0 = vcvt.s32.f32 %v2400_v26  ;;  %v6889_v47 = vcvt.s32.f32 %v2404_v19 }
 0x1f1   :  { %3035 = vmatpush.bf16.msra.mxu0 %v2879_v8  ;;  %3011 = vmatpush.bf16.msrb.mxu2 %v2934_v4  ;;  %v2459_v8 = vunpack.c.1.s8 %v2307_v37  ;;  %v2351_v32 = vunpack.c.2.s8 %v2279_v63  ;;  %v2355_v58 = vunpack.c.3.s8 %v2279_v63  ;;  %v2347_v17 = vunpack.c.1.s8 %v2279_v63 }
 0x1f2   :  { %v2863_v59 = vpack.c.bf16 %v2619_v2, %v2615_v48  ;;  %v2695_v46 = vcvt.s32.f32 %v2439_v16  ;;  %v2699_v56 = vcvt.s32.f32 %v2443_v40  ;;  %v2726_v2 = vcvt.s32.f32 %v2470_v7 }
 0x1f3   :  { %v2715_v50 = vcvt.s32.f32 %v2459_v8  ;;  %v2607_v22 = vcvt.s32.f32 %v2351_v32  ;;  %v2603_v28 = vcvt.s32.f32 %v2347_v17  ;;  %v2323_v8 = vld [vmem:[#allocation4 + $0x568] sm:$0xff]  ;;  %v2884_v25 = vpack.c.bf16 %v6889_v47, %v6887_v0  ;;  %v2334_v17 = vld [vmem:[#allocation4 + $0x5c0] sm:$0xff] }
 0x1f4   :  { %v2903_v48 = vpack.c.bf16 %v2699_v56, %v2695_v46  ;;  %v2523_v16 = vunpack.c.1.s8 %v2323_v8  ;;  %v2679_v40 = vcvt.s32.f32 %v2423_v36  ;;  %v2574_v46 = vunpack.c.2.s8 %v2334_v17  ;;  %v2319_v56 = vld [vmem:[#allocation4 + $0x548] sm:$0xff] }
 0x1f5   :  { %3036 = vmatpush.bf16.msra.mxu0 %v2875_v35  ;;  %3012 = vmatpush.bf16.msrb.mxu2 %v2930_v15  ;;  %v2527_v15 = vunpack.c.2.s8 %v2323_v8 }
 0x1f7   :  { %v2105_v10 = vpop.f32.mrf.mxu1  ;;  %v6871_v34 = vpop.f32.mrf.mxu0  ;;  %v2783_v62 = vcvt.s32.f32 %v2527_v15 }
 0x1f8   :  { %v6874_v31 = vadd.f32 %v2105_v10, %v6866_v12  ;;  %v2455_v12 = vunpack.c.0.s8 %v2307_v37  ;;  %v2343_v37 = vunpack.c.0.s8 %v2279_v63 }
 0x1f9   :  { %3037 = vmatpush.bf16.msra.mxu0 %v2871_v39  ;;  %3013 = vmatpush.bf16.msrb.mxu2 %v2926_v24  ;;  %v2907_v39 = vpack.c.bf16 %v2707_v33, %v2703_v52  ;;  %v2586_v24 = vunpack.c.1.s8 %v6885_v60 }
 0x1fa   :  { %v2711_v51 = vcvt.s32.f32 %v2455_v12  ;;  %v2599_v41 = vcvt.s32.f32 %v2343_v37  ;;  %v2590_v12 = vunpack.c.2.s8 %v6885_v60  ;;  %v2582_v37 = vunpack.c.0.s8 %v6885_v60 }
 0x1fc   :  { %v2911_v3 = vpack.c.bf16 %v2715_v50, %v2711_v51  ;;  %v2855_v57 = vpack.c.bf16 %v2603_v28, %v2599_v41  ;;  %v2594_v51 = vunpack.c.3.s8 %v6885_v60  ;;  %v2846_v50 = vcvt.s32.f32 %v2590_v12 }
 0x1fd   :  { %3038 = vmatpush.bf16.msra.mxu0 %v2867_v6  ;;  %v2474_v6 = vunpack.c.1.s8 %v2310_v1  ;;  %3014 = vmatpush.bf16.msrb.mxu2 %v2922_v29  ;;  %v2243_v1 = vperm.slane %v6876_v45, 1  ;;  %v2838_v41 = vcvt.s32.f32 %v2582_v37  ;;  %v2683_v60 = vcvt.s32.f32 %v2427_v14 }
 0x1fe   :  { %v2066_v27 = vpop.f32.mrf.mxu2  ;;  %3048 = vmatpush.bf16.msra.mxu1 %v2911_v3  ;;  %v2850_v44 = vcvt.s32.f32 %v2594_v51 }
 0x1ff   :  { %v6883_v53 = vadd.f32 %v2066_v27, %v6869_v13  ;;  %v2107_v55 = vpop.f32.mrf.mxu1  ;;  %v2146_v35 = vpop.f32.mrf.mxu0  ;;  %v2611_v13 = vcvt.s32.f32 %v2355_v58  ;;  %v2730_v63 = vcvt.s32.f32 %v2474_v6  ;;  %v2435_v27 = vunpack.c.3.s8 %v2299_v61 }
 0x200   :  { %v2392_v55 = vunpack.c.0.s8 %v2292_v43  ;;  %v2396_v35 = vunpack.c.1.s8 %v2292_v43  ;;  %v2978_v49 = vpack.c.bf16 %v2850_v44, %v2846_v50  ;;  %v2895_v7 = vpack.c.bf16 %v2683_v60, %v2679_v40 }
 0x201   :  { %3039 = vmatpush.bf16.msra.mxu0 %v2863_v59  ;;  %v2859_v10 = vpack.c.bf16 %v2611_v13, %v2607_v22  ;;  %v2918_v21 = vpack.c.bf16 %v2730_v63, %v2726_v2  ;;  %v2531_v59 = vunpack.c.3.s8 %v2323_v8  ;;  %v2691_v3 = vcvt.s32.f32 %v2435_v27  ;;  %v2288_v13 = vld [vmem:[#allocation4 + $0x450] sm:$0xff] }
 0x202   :  { %3049 = vmatpush.bf16.msra.mxu1 %v2907_v39  ;;  %v6899_v58 = vcvt.s32.f32 %v2392_v55  ;;  %v6901_v54 = vcvt.s32.f32 %v2396_v35  ;;  %3021 = vmatpush.bf16.msrb.mxu3 %v2978_v49  ;;  %v2519_v39 = vunpack.c.0.s8 %v2323_v8  ;;  %v2384_v29 = vunpack.c.2.s8 %v2288_v13 }
 0x203   :  { %3015 = vmatpush.bf16.msrb.mxu2 %v2918_v21  ;;  %v2787_v32 = vcvt.s32.f32 %v2531_v59  ;;  %v2388_v28 = vunpack.c.3.s8 %v2288_v13  ;;  %v2830_v8 = vcvt.s32.f32 %v2574_v46  ;;  %v2511_v50 = vunpack.c.2.s8 %v2319_v56  ;;  %v2315_v46 = vld [vmem:[#allocation4 + $0x528] sm:$0xff] }
 0x204   :  { %v2880_v43 = vpack.c.bf16 %v6901_v54, %v6899_v58  ;;  %v2775_v19 = vcvt.s32.f32 %v2519_v39  ;;  %v6911_v6 = vcvt.s32.f32 %v2384_v29  ;;  %v2376_v59 = vunpack.c.0.s8 %v2288_v13  ;;  %v2308_v39 = vld [vmem:[#allocation4 + $0x4f0] sm:$0xff]  ;;  %v6926_v29 = vld [vmem:[#allocation4 + $0x5a0] sm:$0xff] }
 0x205   :  { %3040 = vmatpush.bf16.msra.mxu0 %v2859_v10  ;;  %v2947_v18 = vpack.c.bf16 %v2787_v32, %v2783_v62  ;;  %v2842_v10 = vcvt.s32.f32 %v2586_v24  ;;  %v6913_v61 = vcvt.s32.f32 %v2388_v28  ;;  %v2380_v44 = vunpack.c.1.s8 %v2288_v13 }
 0x206   :  { %v2068_v4 = vpop.f32.mrf.mxu2  ;;  %3050 = vmatpush.bf16.msra.mxu1 %v2903_v48  ;;  %v2767_v55 = vcvt.s32.f32 %v2511_v50  ;;  %v6919_v32 = vcvt.s32.f32 %v2376_v59 }
 0x207   :  { %3060 = vmatpush.bf16.msra.mxu2 %v2947_v18  ;;  %v2974_v26 = vpack.c.bf16 %v2842_v10, %v2838_v41  ;;  %v2779_v4 = vcvt.s32.f32 %v2523_v16  ;;  %v2876_v63 = vpack.c.bf16 %v6913_v61, %v6911_v6  ;;  %v6921_v49 = vcvt.s32.f32 %v2380_v44 }
 0x208   :  { %v2157_v42 = vpop.f32.mrf.mxu1  ;;  %v2503_v41 = vunpack.c.0.s8 %v2319_v56  ;;  %v2507_v10 = vunpack.c.1.s8 %v2319_v56 }
 0x209   :  { %v6893_v20 = vadd.f32 %v2157_v42, %v6871_v34  ;;  %3041 = vmatpush.bf16.msra.mxu0 %v2855_v57  ;;  %v2687_v34 = vcvt.s32.f32 %v2431_v30  ;;  %v2578_v42 = vunpack.c.3.s8 %v2334_v17  ;;  %3022 = vmatpush.bf16.msrb.mxu3 %v2974_v26  ;;  %v2943_v12 = vpack.c.bf16 %v2779_v4, %v2775_v19 }
 0x20a   :  { %v2515_v30 = vunpack.c.3.s8 %v2319_v56  ;;  %v2872_v13 = vpack.c.bf16 %v6921_v49, %v6919_v32  ;;  %v2763_v19 = vcvt.s32.f32 %v2507_v10 }
 0x20b   :  { %v2899_v11 = vpack.c.bf16 %v2691_v3, %v2687_v34  ;;  %v2834_v51 = vcvt.s32.f32 %v2578_v42  ;;  %3061 = vmatpush.bf16.msra.mxu2 %v2943_v12  ;;  %v2566_v3 = vunpack.c.0.s8 %v2334_v17  ;;  %v2464_v12 = vunpack.c.2.s8 %v2308_v39 }
 0x20c   :  { %v2771_v35 = vcvt.s32.f32 %v2515_v30 }
 0x20d   :  { %3051 = vmatpush.bf16.msra.mxu1 %v2899_v11  ;;  %v2970_v34 = vpack.c.bf16 %v2834_v51, %v2830_v8  ;;  %v2284_v11 = vld [vmem:[#allocation4 + $0x430] sm:$0xff]  ;;  %v2822_v37 = vcvt.s32.f32 %v2566_v3  ;;  %v6937_v30 = vcvt.s32.f32 %v2464_v12 }
 0x20e   :  { %v2939_v18 = vpack.c.bf16 %v2771_v35, %v2767_v55  ;;  %v2368_v60 = vunpack.c.2.s8 %v2284_v11  ;;  %v2372_v4 = vunpack.c.3.s8 %v2284_v11 }
 0x20f   :  { %v2118_v22 = vpop.f32.mrf.mxu2  ;;  %3023 = vmatpush.bf16.msrb.mxu3 %v2970_v34 }
 0x210   :  { %v6907_v52 = vadd.f32 %v2118_v22, %v6874_v31  ;;  %v2159_v33 = vpop.f32.mrf.mxu1  ;;  %v2295_v31 = vld [vmem:[#allocation4 + $0x488] sm:$0xff]  ;;  %v2570_v22 = vunpack.c.1.s8 %v2334_v17  ;;  %3062 = vmatpush.bf16.msra.mxu2 %v2939_v18  ;;  %v6930_v56 = vcvt.s32.f32 %v2368_v60  ;;  %v6932_v8 = vcvt.s32.f32 %v2372_v4 }
 0x211   :  { %v2415_v48 = vunpack.c.2.s8 %v2295_v31  ;;  %v2419_v2 = vunpack.c.3.s8 %v2295_v31  ;;  %3052 = vmatpush.bf16.msra.mxu1 %v2895_v7  ;;  %v2407_v24 = vunpack.c.0.s8 %v2295_v31  ;;  %v2411_v33 = vunpack.c.1.s8 %v2295_v31 }
 0x212   :  { %v2826_v14 = vcvt.s32.f32 %v2570_v22  ;;  %v2759_v31 = vcvt.s32.f32 %v2503_v41  ;;  %v2360_v22 = vunpack.c.0.s8 %v2284_v11  ;;  %v2364_v18 = vunpack.c.1.s8 %v2284_v11 }
 0x213   :  { %v2671_v27 = vcvt.s32.f32 %v2415_v48  ;;  %v2675_v15 = vcvt.s32.f32 %v2419_v2  ;;  %v2663_v40 = vcvt.s32.f32 %v2407_v24  ;;  %v2667_v17 = vcvt.s32.f32 %v2411_v33 }
 0x214   :  { %v2966_v26 = vpack.c.bf16 %v2826_v14, %v2822_v37  ;;  %v2468_v48 = vunpack.c.3.s8 %v2308_v39  ;;  %v2558_v2 = vunpack.c.2.s8 %v6926_v29  ;;  %v2456_v37 = vunpack.c.0.s8 %v2308_v39 }
 0x215   :  { %v2891_v62 = vpack.c.bf16 %v2675_v15, %v2671_v27  ;;  %v2887_v42 = vpack.c.bf16 %v2667_v17, %v2663_v40  ;;  %v2868_v15 = vpack.c.bf16 %v6932_v8, %v6930_v56  ;;  %v6951_v14 = vcvt.s32.f32 %v2360_v22  ;;  %v2280_v40 = vld [vmem:[#allocation4 + $0x410] sm:$0xff] }
 0x216   :  { %3024 = vmatpush.bf16.msrb.mxu3 %v2966_v26  ;;  %v6945_v59 = vcvt.s32.f32 %v2468_v48  ;;  %v2814_v44 = vcvt.s32.f32 %v2558_v2  ;;  %v6953_v41 = vcvt.s32.f32 %v2364_v18  ;;  %v6955_v10 = vcvt.s32.f32 %v2456_v37 }
 0x217   :  { %v6915_v57 = vpop.f32.mrf.mxu0  ;;  %v2120_v21 = vpop.f32.mrf.mxu2  ;;  %3053 = vmatpush.bf16.msra.mxu1 %v2891_v62  ;;  %v2259_v60 = vperm.slane %v6879_v23, 2  ;;  %v2491_v4 = vunpack.c.1.s8 %v2315_v46  ;;  %v2352_v47 = vunpack.c.2.s8 %v2280_v40 }
 0x218   :  { %v2495_v21 = vunpack.c.2.s8 %v2315_v46  ;;  %v2916_v62 = vpack.c.bf16 %v6945_v59, %v6937_v30  ;;  %v2864_v26 = vpack.c.bf16 %v6953_v41, %v6951_v14 }
 0x21a   :  { %v2751_v35 = vcvt.s32.f32 %v2495_v21 }
 0x21b   :  { %3054 = vmatpush.bf16.msra.mxu1 %v2887_v42  ;;  %v6969_v42 = vld [vmem:[#allocation4 + $0x580] sm:$0xff] }
 0x21c   :  { %v2542_v21 = vunpack.c.2.s8 %v6969_v42 }
 0x21e   :  { %v2079_v36 = vpop.f32.mrf.mxu3  ;;  %v2798_v37 = vcvt.s32.f32 %v2542_v21 }
 0x21f   :  { %v2080_v16 = vadd.f32 %v2079_v36, %v6883_v53  ;;  %v2198_v28 = vpop.f32.mrf.mxu0  ;;  %v2935_v53 = vpack.c.bf16 %v2763_v19, %v2759_v31  ;;  %v2460_v36 = vunpack.c.1.s8 %v2308_v39  ;;  %v2554_v31 = vunpack.c.1.s8 %v6926_v29 }
 0x220   :  { %v2550_v28 = vunpack.c.0.s8 %v6926_v29  ;;  %v2487_v19 = vunpack.c.0.s8 %v2315_v46 }
 0x221   :  { %v2250_v7 = vmul.f32 %v2242_v38, %v2080_v16  ;;  %v2170_v50 = vpop.f32.mrf.mxu2  ;;  %v2562_v38 = vunpack.c.3.s8 %v6926_v29  ;;  %3063 = vmatpush.bf16.msra.mxu2 %v2935_v53  ;;  %v2244_v16 = vperm.slane %v6876_v45, 2  ;;  %v6959_v11 = vcvt.s32.f32 %v2460_v36 }
 0x222   :  { %v6941_v27 = vadd.f32 %v2170_v50, %v6893_v20  ;;  %v2806_v0 = vcvt.s32.f32 %v2550_v28  ;;  %v2743_v2 = vcvt.s32.f32 %v2487_v19  ;;  %v2356_v50 = vunpack.c.3.s8 %v2280_v40  ;;  %v6996_v28 = vld [vmem:[#allocation4 + $0x478] sm:$0xff] }
 0x223   :  { %v2265_v51 = vadd.f32 %v2257_v9, %v2250_v7  ;;  %v2818_v55 = vcvt.s32.f32 %v2562_v38  ;;  %v2499_v9 = vunpack.c.3.s8 %v2315_v46  ;;  %v2304_v7 = vld [vmem:[#allocation4 + $0x4d0] sm:$0xff]  ;;  %v2912_v48 = vpack.c.bf16 %v6959_v11, %v6955_v10 }
 0x224   :  { %v6976_v29 = vcvt.s32.f32 %v2352_v47  ;;  %v2448_v46 = vunpack.c.2.s8 %v2304_v7  ;;  %v2452_v38 = vunpack.c.3.s8 %v2304_v7  ;;  %v2405_v6 = vunpack.c.3.s8 %v6996_v28 }
 0x225   :  { %v2269_v34 = vmax.f32 %v2265_v51, 0.0  ;;  %v2962_v24 = vpack.c.bf16 %v2818_v55, %v2814_v44  ;;  %v2755_v33 = vcvt.s32.f32 %v2499_v9  ;;  %v2747_v51 = vcvt.s32.f32 %v2491_v4  ;;  %v2311_v44 = vld [vmem:[#allocation4 + $0x508] sm:$0xff] }
 0x226   :  { %v2081_v3 = vpop.f32.mrf.mxu3  ;;  %v6982_v9 = vcvt.s32.f32 %v2356_v50  ;;  %v6986_v22 = vcvt.s32.f32 %v2448_v46  ;;  %v6988_v18 = vcvt.s32.f32 %v2452_v38  ;;  %v2339_v46 = vld [vmem:[#allocation4 + $0x5e8] sm:$0xff]  ;;  %v7021_v21 = vcvt.s32.f32 %v2405_v6 }
 0x227   :  { %v6949_v20 = vpack.c.bf16 %v2269_v34, %v2269_v34  ;;  %3025 = vmatpush.bf16.msrb.mxu3 %v2962_v24  ;;  %v2931_v17 = vpack.c.bf16 %v2755_v33, %v2751_v35  ;;  %v2927_v55 = vpack.c.bf16 %v2747_v51, %v2743_v2  ;;  %v2546_v35 = vunpack.c.3.s8 %v6969_v42 }
 0x228   :  { %v2209_v39 = vpop.f32.mrf.mxu1  ;;  %v2860_v58 = vpack.c.bf16 %v6982_v9, %v6976_v29  ;;  %v2483_v24 = vunpack.c.3.s8 %v2311_v44  ;;  %v2908_v36 = vpack.c.bf16 %v6988_v18, %v6986_v22  ;;  %v2401_v51 = vunpack.c.2.s8 %v6996_v28 }
 0x229   :  { %2990 = vmatmul.bf16.vlgmr.msrb.gmra.mxu0 %v6949_v20  ;;  %v6972_v12 = vadd.f32 %v2209_v39, %v6915_v57  ;;  %v2172_v53 = vpop.f32.mrf.mxu2  ;;  %3064 = vmatpush.bf16.msra.mxu2 %v2931_v17  ;;  %v2802_v54 = vcvt.s32.f32 %v2546_v35  ;;  %v2348_v17 = vunpack.c.1.s8 %v2280_v40  ;;  %v2393_v56 = vunpack.c.0.s8 %v6996_v28 }
 0x22a   :  { %3086 = vmatpush.bf16.msrb.mxu0 %v2884_v25  ;;  %v2810_v25 = vcvt.s32.f32 %v2554_v31  ;;  %v2739_v4 = vcvt.s32.f32 %v2483_v24  ;;  %v2440_v53 = vunpack.c.0.s8 %v2304_v7  ;;  %v7019_v38 = vcvt.s32.f32 %v2401_v51 }
 0x22b   :  { %v2954_v31 = vpack.c.bf16 %v2802_v54, %v2798_v37  ;;  %v7005_v47 = vcvt.s32.f32 %v2348_v17  ;;  %v2475_v54 = vunpack.c.1.s8 %v2311_v44  ;;  %v2591_v24 = vunpack.c.2.s8 %v2339_v46 }
 0x22c   :  { %v2958_v34 = vpack.c.bf16 %v2810_v25, %v2806_v0  ;;  %v2444_v25 = vunpack.c.1.s8 %v2304_v7  ;;  %v7007_v2 = vcvt.s32.f32 %v2440_v53  ;;  %v2885_v32 = vpack.c.bf16 %v7021_v21, %v7019_v38 }
 0x22d   :  { %3065 = vmatpush.bf16.msra.mxu2 %v2927_v55  ;;  %v2300_v55 = vld [vmem:[#allocation4 + $0x4b0] sm:$0xff]  ;;  %v2397_v8 = vunpack.c.1.s8 %v6996_v28  ;;  %v2583_v59 = vunpack.c.0.s8 %v2339_v46  ;;  %v7058_v28 = vcvt.s32.f32 %v2393_v56 }
 0x22e   :  { %3087 = vmatpush.bf16.msrb.mxu0 %v2880_v43  ;;  %v2131_v57 = vpop.f32.mrf.mxu3  ;;  %3026 = vmatpush.bf16.msrb.mxu3 %v2958_v34  ;;  %v2479_v43 = vunpack.c.2.s8 %v2311_v44  ;;  %v7013_v50 = vcvt.s32.f32 %v2444_v25  ;;  %v2471_v34 = vunpack.c.0.s8 %v2311_v44  ;;  %v2436_v17 = vunpack.c.3.s8 %v2300_v55 }
 0x22f   :  { %v2132_v3 = vadd.f32 %v2131_v57, %v6907_v52  ;;  %v2344_v52 = vunpack.c.0.s8 %v2280_v40  ;;  %v2538_v57 = vunpack.c.1.s8 %v6969_v42  ;;  %v2839_v14 = vcvt.s32.f32 %v2583_v59 }
 0x230   :  { %v2211_v39 = vpop.f32.mrf.mxu1  ;;  %v2735_v19 = vcvt.s32.f32 %v2479_v43  ;;  %v2324_v43 = vld [vmem:[#allocation4 + $0x570] sm:$0xff]  ;;  %v7040_v25 = vcvt.s32.f32 %v2436_v17 }
 0x231   :  { %v2251_v33 = vmul.f32 %v2243_v1, %v2132_v3  ;;  %v7003_v1 = vcvt.s32.f32 %v2344_v52  ;;  %v2904_v3 = vpack.c.bf16 %v7013_v50, %v7007_v2  ;;  %v2794_v49 = vcvt.s32.f32 %v2538_v57  ;;  %v7062_v57 = vld [vmem:[#allocation4 + $0x458] sm:$0xff] }
 0x232   :  { %3088 = vmatpush.bf16.msrb.mxu0 %v2876_v63  ;;  %3027 = vmatpush.bf16.msrb.mxu3 %v2954_v31  ;;  %v2923_v40 = vpack.c.bf16 %v2739_v4, %v2735_v19  ;;  %v2432_v52 = vunpack.c.2.s8 %v2300_v55  ;;  %v2847_v39 = vcvt.s32.f32 %v2591_v24  ;;  %v2528_v31 = vunpack.c.2.s8 %v2324_v43 }
 0x233   :  { %v2266_v0 = vadd.f32 %v2258_v5, %v2251_v33  ;;  %v2856_v63 = vpack.c.bf16 %v7005_v47, %v7003_v1  ;;  %v2534_v5 = vunpack.c.0.s8 %v6969_v42  ;;  %v2731_v42 = vcvt.s32.f32 %v2475_v54 }
 0x234   :  { %3066 = vmatpush.bf16.msra.mxu2 %v2923_v40  ;;  %v2595_v33 = vunpack.c.3.s8 %v2339_v46  ;;  %v2532_v19 = vunpack.c.3.s8 %v2324_v43  ;;  %v7042_v40 = vcvt.s32.f32 %v2528_v31  ;;  %v2377_v47 = vunpack.c.0.s8 %v7062_v57 }
 0x235   :  { %v2270_v61 = vmax.f32 %v2266_v0, 0.0  ;;  %v2790_v37 = vcvt.s32.f32 %v2534_v5  ;;  %v7038_v0 = vcvt.s32.f32 %v2432_v52  ;;  %v7060_v5 = vcvt.s32.f32 %v2397_v8  ;;  %v2320_v52 = vld [vmem:[#allocation4 + $0x550] sm:$0xff] }
 0x236   :  { %3089 = vmatpush.bf16.msrb.mxu0 %v2872_v13  ;;  %v2133_v7 = vpop.f32.mrf.mxu3  ;;  %v2727_v13 = vcvt.s32.f32 %v2471_v34  ;;  %v2851_v53 = vcvt.s32.f32 %v2595_v33  ;;  %v7044_v51 = vcvt.s32.f32 %v2532_v19  ;;  %v2524_v34 = vunpack.c.1.s8 %v2324_v43 }
 0x237   :  { %v7024_v35 = vpack.c.bf16 %v2270_v61, %v2270_v61  ;;  %v2950_v44 = vpack.c.bf16 %v2794_v49, %v2790_v37  ;;  %v2424_v7 = vunpack.c.0.s8 %v2300_v55  ;;  %v2881_v10 = vpack.c.bf16 %v7060_v5, %v7058_v28  ;;  %v2335_v37 = vld [vmem:[#allocation4 + $0x5c8] sm:$0xff] }
 0x238   :  { %v2919_v4 = vpack.c.bf16 %v2731_v42, %v2727_v13  ;;  %v2979_v30 = vpack.c.bf16 %v2851_v53, %v2847_v39  ;;  %v2948_v61 = vpack.c.bf16 %v7044_v51, %v7042_v40  ;;  %v2296_v42 = vld [vmem:[#allocation4 + $0x490] sm:$0xff]  ;;  %v2389_v33 = vunpack.c.3.s8 %v7062_v57 }
 0x239   :  { %3003 = vmatmul.bf16.vlgmr.msrb.gmra.mxu1 %v7024_v35  ;;  %3042 = vmatmul.bf16.vlgmr.msra.gmra.mxu0 %v6949_v20  ;;  %v7067_v11 = vcvt.s32.f32 %v2424_v7  ;;  %v2575_v9 = vunpack.c.2.s8 %v2335_v37  ;;  %v2420_v31 = vunpack.c.3.s8 %v2296_v42  ;;  %v2512_v19 = vunpack.c.2.s8 %v2320_v52 }
 0x23a   :  { %3090 = vmatpush.bf16.msrb.mxu0 %v2868_v15  ;;  %3099 = vmatpush.bf16.msrb.mxu1 %v2916_v62  ;;  %v2900_v15 = vpack.c.bf16 %v7040_v25, %v7038_v0  ;;  %v2587_v62 = vunpack.c.1.s8 %v2339_v46  ;;  %v2645_v18 = vcvt.s32.f32 %v2389_v33  ;;  %v2516_v8 = vunpack.c.3.s8 %v2320_v52 }
 0x23b   :  { %3028 = vmatpush.bf16.msrb.mxu3 %v2950_v44  ;;  %3067 = vmatpush.bf16.msra.mxu2 %v2919_v4  ;;  %v2831_v39 = vcvt.s32.f32 %v2575_v9  ;;  %v2676_v59 = vcvt.s32.f32 %v2420_v31  ;;  %v7110_v1 = vcvt.s32.f32 %v2512_v19  ;;  %v2381_v50 = vunpack.c.1.s8 %v7062_v57 }
 0x23c   :  { %v2843_v41 = vcvt.s32.f32 %v2587_v62  ;;  %v2633_v28 = vcvt.s32.f32 %v2377_v47  ;;  %v2571_v38 = vunpack.c.1.s8 %v2335_v37  ;;  %v2408_v21 = vunpack.c.0.s8 %v2296_v42 }
 0x23d   :  { %v2637_v7 = vcvt.s32.f32 %v2381_v50 }
 0x23e   :  { %3091 = vmatpush.bf16.msrb.mxu0 %v2864_v26  ;;  %3100 = vmatpush.bf16.msrb.mxu1 %v2912_v48  ;;  %v2183_v6 = vpop.f32.mrf.mxu3  ;;  %v2428_v26 = vunpack.c.1.s8 %v2300_v55  ;;  %v2520_v48 = vunpack.c.0.s8 %v2324_v43  ;;  %v2975_v13 = vpack.c.bf16 %v2843_v41, %v2839_v14  ;;  %v2309_v14 = vld [vmem:[#allocation4 + $0x4f8] sm:$0xff]  ;;  %v2827_v41 = vcvt.s32.f32 %v2571_v38 }
 0x23f   :  { %v2184_v46 = vadd.f32 %v2183_v6, %v6941_v27  ;;  %3073 = vmatpush.bf16.msra.mxu3 %v2979_v30  ;;  %v2222_v49 = vpop.f32.mrf.mxu2  ;;  %v2385_v27 = vunpack.c.2.s8 %v7062_v57 }
 0x240   :  { %v7071_v24 = vcvt.s32.f32 %v2428_v26  ;;  %v7075_v55 = vadd.f32 %v2222_v49, %v6972_v12  ;;  %v7083_v43 = vcvt.s32.f32 %v2520_v48  ;;  %v2664_v26 = vcvt.s32.f32 %v2408_v21 }
 0x241   :  { %v2252_v54 = vmul.f32 %v2244_v16, %v2184_v46  ;;  %v7085_v16 = vcvt.s32.f32 %v2524_v34  ;;  %v7092_v29 = vcvt.s32.f32 %v2385_v27  ;;  %v2412_v46 = vunpack.c.1.s8 %v2296_v42  ;;  %v2316_v27 = vld [vmem:[#allocation4 + $0x530] sm:$0xff] }
 0x242   :  { %3092 = vmatpush.bf16.msrb.mxu0 %v2860_v58  ;;  %3101 = vmatpush.bf16.msrb.mxu1 %v2908_v36  ;;  %v2896_v12 = vpack.c.bf16 %v7071_v24, %v7067_v11  ;;  %v2579_v58 = vunpack.c.3.s8 %v2335_v37  ;;  %v2416_v36 = vunpack.c.2.s8 %v2296_v42  ;;  %v2504_v11 = vunpack.c.0.s8 %v2320_v52 }
 0x243   :  { %v2267_v17 = vadd.f32 %v2259_v60, %v2252_v54  ;;  %3074 = vmatpush.bf16.msra.mxu3 %v2975_v13  ;;  %v2944_v22 = vpack.c.bf16 %v7085_v16, %v7083_v43  ;;  %v2877_v4 = vpack.c.bf16 %v2645_v18, %v7092_v29  ;;  %v2508_v48 = vunpack.c.1.s8 %v2320_v52 }
 0x244   :  { %v2835_v53 = vcvt.s32.f32 %v2579_v58  ;;  %v7103_v56 = vcvt.s32.f32 %v2416_v36  ;;  %v2873_v34 = vpack.c.bf16 %v2637_v7, %v2633_v28  ;;  %v2760_v49 = vcvt.s32.f32 %v2504_v11 }
 0x245   :  { %v2271_v44 = vmax.f32 %v2267_v17, 0.0  ;;  %v2764_v13 = vcvt.s32.f32 %v2508_v48  ;;  %v2465_v24 = vunpack.c.2.s8 %v2309_v14  ;;  %v2496_v29 = vunpack.c.2.s8 %v2316_v27 }
 0x246   :  { %3093 = vmatpush.bf16.msrb.mxu0 %v2856_v63  ;;  %3102 = vmatpush.bf16.msrb.mxu1 %v2904_v3  ;;  %v2185_v60 = vpop.f32.mrf.mxu3  ;;  %v2971_v2 = vpack.c.bf16 %v2835_v53, %v2831_v39  ;;  %v2772_v63 = vcvt.s32.f32 %v2516_v8  ;;  %v2567_v3 = vunpack.c.0.s8 %v2335_v37  ;;  %v2892_v6 = vpack.c.bf16 %v2676_v59, %v7103_v56  ;;  %v7127_v56 = vld [vmem:[#allocation4 + $0x418] sm:$0xff] }
 0x247   :  { %v7105_v30 = vpack.c.bf16 %v2271_v44, %v2271_v44  ;;  %v2224_v62 = vpop.f32.mrf.mxu2  ;;  %v2668_v37 = vcvt.s32.f32 %v2412_v46  ;;  %v2721_v43 = vcvt.s32.f32 %v2465_v24  ;;  %v2500_v9 = vunpack.c.3.s8 %v2316_v27 }
 0x248   :  { %v2940_v5 = vpack.c.bf16 %v2772_v63, %v7110_v1  ;;  %v2823_v57 = vcvt.s32.f32 %v2567_v3  ;;  %3075 = vmatpush.bf16.msra.mxu3 %v2971_v2  ;;  %v2245_v36 = vperm.slane %v6876_v45, 3  ;;  %v2752_v39 = vcvt.s32.f32 %v2496_v29  ;;  %v2305_v62 = vld [vmem:[#allocation4 + $0x4d8] sm:$0xff] }
 0x249   :  { %3016 = vmatmul.bf16.vlgmr.msrb.gmra.mxu2 %v7105_v30  ;;  %3055 = vmatmul.bf16.vlgmr.msra.gmra.mxu1 %v7024_v35  ;;  %v2888_v42 = vpack.c.bf16 %v2668_v37, %v2664_v26  ;;  %v2461_v53 = vunpack.c.1.s8 %v2309_v14  ;;  %v2488_v3 = vunpack.c.0.s8 %v2316_v27  ;;  %v2492_v38 = vunpack.c.1.s8 %v2316_v27  ;;  %v2301_v45 = vld [vmem:[#allocation4 + $0x4b8] sm:$0xff] }
 0x24a   :  { %3138 = vmatpush.bf16.msra.mxu0 %v2885_v32  ;;  %v2285_v32 = vld [vmem:[#allocation4 + $0x438] sm:$0xff]  ;;  %3103 = vmatpush.bf16.msrb.mxu1 %v2900_v15  ;;  %v2331_v15 = vld [vmem:[#allocation4 + $0x5a8] sm:$0xff]  ;;  %v2967_v54 = vpack.c.bf16 %v2827_v41, %v2823_v57  ;;  %v2353_v21 = vunpack.c.2.s8 %v7127_v56  ;;  %v2357_v46 = vunpack.c.3.s8 %v7127_v56  ;;  %v2449_v48 = vunpack.c.2.s8 %v2305_v62 }
 0x24b   :  { %3094 = vmatmul.bf16.vlgmr.msrb.gmra.mxu0 %v6949_v20  ;;  %3112 = vmatpush.bf16.msrb.mxu2 %v2948_v61  ;;  %v2369_v0 = vunpack.c.2.s8 %v2285_v32  ;;  %v2373_v25 = vunpack.c.3.s8 %v2285_v32  ;;  %v2469_v61 = vunpack.c.3.s8 %v2309_v14  ;;  %v2559_v16 = vunpack.c.2.s8 %v2331_v15 }
 0x24c   :  { %v2563_v33 = vunpack.c.3.s8 %v2331_v15  ;;  %3076 = vmatpush.bf16.msra.mxu3 %v2967_v54  ;;  %v2361_v31 = vunpack.c.0.s8 %v2285_v32  ;;  %v2365_v60 = vunpack.c.1.s8 %v2285_v32  ;;  %v2551_v1 = vunpack.c.0.s8 %v2331_v15  ;;  %v2327_v32 = vld [vmem:[#allocation4 + $0x588] sm:$0xff] }
 0x24d   :  { %v2625_v40 = vcvt.s32.f32 %v2369_v0  ;;  %v2629_v51 = vcvt.s32.f32 %v2373_v25  ;;  %v2725_v17 = vcvt.s32.f32 %v2469_v61  ;;  %v2815_v18 = vcvt.s32.f32 %v2559_v16 }
 0x24e   :  { %3139 = vmatpush.bf16.msra.mxu0 %v2881_v10  ;;  %3104 = vmatpush.bf16.msrb.mxu1 %v2896_v12  ;;  %v2936_v10 = vpack.c.bf16 %v2764_v13, %v2760_v49  ;;  %v2819_v58 = vcvt.s32.f32 %v2563_v33  ;;  %v2260_v12 = vperm.slane %v6879_v23, 3  ;;  %v2617_v59 = vcvt.s32.f32 %v2361_v31 }
 0x24f   :  { %3113 = vmatpush.bf16.msrb.mxu2 %v2944_v22  ;;  %v2869_v52 = vpack.c.bf16 %v2629_v51, %v2625_v40  ;;  %v2917_v44 = vpack.c.bf16 %v2725_v17, %v2721_v43  ;;  %v2756_v22 = vcvt.s32.f32 %v2500_v9  ;;  %v2555_v47 = vunpack.c.1.s8 %v2331_v15 }
 0x250   :  { %v2963_v19 = vpack.c.bf16 %v2819_v58, %v2815_v18  ;;  %v2621_v2 = vcvt.s32.f32 %v2365_v60  ;;  %v2717_v50 = vcvt.s32.f32 %v2461_v53  ;;  %v2744_v57 = vcvt.s32.f32 %v2488_v3 }
 0x251   :  { %v2932_v8 = vpack.c.bf16 %v2756_v22, %v2752_v39  ;;  %v2811_v28 = vcvt.s32.f32 %v2555_v47  ;;  %v2748_v26 = vcvt.s32.f32 %v2492_v38  ;;  %v2609_v11 = vcvt.s32.f32 %v2353_v21  ;;  %v2340_v39 = vld [vmem:[#allocation4 + $0x5f0] sm:$0xff]  ;;  %v2325_v47 = vld [vmem:[#allocation4 + $0x578] sm:$0xff] }
 0x252   :  { %3140 = vmatpush.bf16.msra.mxu0 %v2877_v4  ;;  %3105 = vmatpush.bf16.msrb.mxu1 %v2892_v6  ;;  %v2457_v4 = vunpack.c.0.s8 %v2309_v14  ;;  %v2807_v6 = vcvt.s32.f32 %v2551_v1  ;;  %v2312_v14 = vld [vmem:[#allocation4 + $0x510] sm:$0xff]  ;;  %v2453_v37 = vunpack.c.3.s8 %v2305_v62  ;;  %v2543_v0 = vunpack.c.2.s8 %v2327_v32 }
 0x253   :  { %3114 = vmatpush.bf16.msrb.mxu2 %v2940_v5  ;;  %3077 = vmatpush.bf16.msra.mxu3 %v2963_v19  ;;  %v2865_v5 = vpack.c.bf16 %v2621_v2, %v2617_v59  ;;  %v2547_v25 = vunpack.c.3.s8 %v2327_v32  ;;  %v2928_v15 = vpack.c.bf16 %v2748_v26, %v2744_v57  ;;  %v2705_v54 = vcvt.s32.f32 %v2449_v48 }
 0x254   :  { %v2713_v63 = vcvt.s32.f32 %v2457_v4  ;;  %v2959_v41 = vpack.c.bf16 %v2811_v28, %v2807_v6  ;;  %v2480_v49 = vunpack.c.2.s8 %v2312_v14  ;;  %v2484_v13 = vunpack.c.3.s8 %v2312_v14 }
 0x255   :  { %v2799_v40 = vcvt.s32.f32 %v2543_v0  ;;  %v2803_v51 = vcvt.s32.f32 %v2547_v25  ;;  %v2345_v16 = vunpack.c.0.s8 %v7127_v56  ;;  %v2349_v17 = vunpack.c.1.s8 %v7127_v56 }
 0x256   :  { %3141 = vmatpush.bf16.msra.mxu0 %v2873_v34  ;;  %3106 = vmatpush.bf16.msrb.mxu1 %v2888_v42  ;;  %v2913_v7 = vpack.c.bf16 %v2717_v50, %v2713_v63  ;;  %v2613_v34 = vcvt.s32.f32 %v2357_v46  ;;  %v2709_v42 = vcvt.s32.f32 %v2453_v37  ;;  %v2740_v43 = vcvt.s32.f32 %v2484_v13 }
 0x257   :  { %3115 = vmatpush.bf16.msrb.mxu2 %v2936_v10  ;;  %3078 = vmatpush.bf16.msra.mxu3 %v2959_v41  ;;  %v2736_v10 = vcvt.s32.f32 %v2480_v49  ;;  %v2441_v29 = vunpack.c.0.s8 %v2305_v62  ;;  %v2601_v58 = vcvt.s32.f32 %v2345_v16  ;;  %v2535_v31 = vunpack.c.0.s8 %v2327_v32 }
 0x258   :  { %v2861_v27 = vpack.c.bf16 %v2613_v34, %v2609_v11  ;;  %v2909_v33 = vpack.c.bf16 %v2709_v42, %v2705_v54  ;;  %v2539_v19 = vunpack.c.1.s8 %v2327_v32  ;;  %v2472_v53 = vunpack.c.0.s8 %v2312_v14  ;;  %v2336_v34 = vld [vmem:[#allocation4 + $0x5d0] sm:$0xff]  ;;  %v2297_v54 = vld [vmem:[#allocation4 + $0x498] sm:$0xff] }
 0x259   :  { %3068 = vmatmul.bf16.vlgmr.msra.gmra.mxu2 %v7105_v30  ;;  %3107 = vmatmul.bf16.vlgmr.msrb.gmra.mxu1 %v7024_v35  ;;  %v2924_v18 = vpack.c.bf16 %v2740_v43, %v2736_v10  ;;  %v2697_v22 = vcvt.s32.f32 %v2441_v29  ;;  %v2476_v56 = vunpack.c.1.s8 %v2312_v14  ;;  %v2592_v1 = vunpack.c.2.s8 %v2340_v39 }
 0x25a   :  { %3142 = vmatpush.bf16.msra.mxu0 %v2869_v52  ;;  %3151 = vmatpush.bf16.msra.mxu1 %v2917_v44  ;;  %v2955_v52 = vpack.c.bf16 %v2803_v51, %v2799_v40  ;;  %v2445_v44 = vunpack.c.1.s8 %v2305_v62  ;;  %v2795_v59 = vcvt.s32.f32 %v2539_v19  ;;  %v2728_v50 = vcvt.s32.f32 %v2472_v53 }
 0x25b   :  { %3116 = vmatpush.bf16.msrb.mxu2 %v2932_v8  ;;  %v2791_v8 = vcvt.s32.f32 %v2535_v31  ;;  %v2732_v3 = vcvt.s32.f32 %v2476_v56  ;;  %v2848_v6 = vcvt.s32.f32 %v2592_v1  ;;  %v2433_v28 = vunpack.c.2.s8 %v2301_v45 }
 0x25c   :  { %3079 = vmatpush.bf16.msra.mxu3 %v2955_v52  ;;  %v2701_v4 = vcvt.s32.f32 %v2445_v44  ;;  %v2437_v32 = vunpack.c.3.s8 %v2301_v45  ;;  %v2533_v46 = vunpack.c.3.s8 %v2325_v47  ;;  %v2584_v14 = vunpack.c.0.s8 %v2340_v39 }
 0x25d   :  { %v2951_v23 = vpack.c.bf16 %v2795_v59, %v2791_v8  ;;  %v2920_v21 = vpack.c.bf16 %v2732_v3, %v2728_v50  ;;  %v2689_v57 = vcvt.s32.f32 %v2433_v28  ;;  %v2588_v11 = vunpack.c.1.s8 %v2340_v39 }
 0x25e   :  { %v2235_v24 = vpop.f32.mrf.mxu3  ;;  %3143 = vmatpush.bf16.msra.mxu0 %v2865_v5  ;;  %3152 = vmatpush.bf16.msra.mxu1 %v2913_v7  ;;  %v2905_v63 = vpack.c.bf16 %v2701_v4, %v2697_v22  ;;  %v2529_v5 = vunpack.c.2.s8 %v2325_v47  ;;  %v2693_v41 = vcvt.s32.f32 %v2437_v32  ;;  %v2425_v48 = vunpack.c.0.s8 %v2301_v45 }
 0x25f   :  { %v2236_v61 = vadd.f32 %v2235_v24, %v7075_v55  ;;  %3117 = vmatpush.bf16.msrb.mxu2 %v2928_v15  ;;  %v2605_v55 = vcvt.s32.f32 %v2349_v17  ;;  %v2789_v0 = vcvt.s32.f32 %v2533_v46  ;;  %v2840_v25 = vcvt.s32.f32 %v2584_v14 }
 0x260   :  { %3080 = vmatpush.bf16.msra.mxu3 %v2951_v23  ;;  %v2785_v26 = vcvt.s32.f32 %v2529_v5  ;;  %v2429_v15 = vunpack.c.1.s8 %v2301_v45  ;;  %v2901_v49 = vpack.c.bf16 %v2693_v41, %v2689_v57  ;;  %v2844_v13 = vcvt.s32.f32 %v2588_v11  ;;  %v2332_v45 = vld [vmem:[#allocation4 + $0x5b0] sm:$0xff] }
 0x261   :  { %v2253_v9 = vmul.f32 %v2245_v36, %v2236_v61  ;;  %v2857_v36 = vpack.c.bf16 %v2605_v55, %v2601_v58  ;;  %v2681_v24 = vcvt.s32.f32 %v2425_v48  ;;  %v2525_v51 = vunpack.c.1.s8 %v2325_v47  ;;  %v2321_v61 = vld [vmem:[#allocation4 + $0x558] sm:$0xff]  ;;  %v2328_v41 = vld [vmem:[#allocation4 + $0x590] sm:$0xff] }
 0x262   :  { %3144 = vmatpush.bf16.msra.mxu0 %v2861_v27  ;;  %3153 = vmatpush.bf16.msra.mxu1 %v2909_v33  ;;  %v2521_v27 = vunpack.c.0.s8 %v2325_v47  ;;  %v2949_v42 = vpack.c.bf16 %v2789_v0, %v2785_v26  ;;  %v2685_v40 = vcvt.s32.f32 %v2429_v15  ;;  %v2976_v10 = vpack.c.bf16 %v2844_v13, %v2840_v25  ;;  %v2317_v47 = vld [vmem:[#allocation4 + $0x538] sm:$0xff] }
 0x263   :  { %v2268_v60 = vadd.f32 %v2260_v12, %v2253_v9  ;;  %3118 = vmatpush.bf16.msrb.mxu2 %v2924_v18  ;;  %v2596_v12 = vunpack.c.3.s8 %v2340_v39  ;;  %v2580_v16 = vunpack.c.3.s8 %v2336_v34  ;;  %v2417_v33 = vunpack.c.2.s8 %v2297_v54 }
 0x264   :  { %v2777_v43 = vcvt.s32.f32 %v2521_v27  ;;  %v2897_v52 = vpack.c.bf16 %v2685_v40, %v2681_v24  ;;  %v2781_v17 = vcvt.s32.f32 %v2525_v51  ;;  %v2421_v9 = vunpack.c.3.s8 %v2297_v54 }
 0x265   :  { %v2272_v2 = vmax.f32 %v2268_v60, 0.0  ;;  %v2852_v7 = vcvt.s32.f32 %v2596_v12  ;;  %v2836_v18 = vcvt.s32.f32 %v2580_v16  ;;  %v2673_v58 = vcvt.s32.f32 %v2417_v33 }
 0x266   :  { %v2237_v62 = vpop.f32.mrf.mxu3  ;;  %3145 = vmatpush.bf16.msra.mxu0 %v2857_v36  ;;  %3154 = vmatpush.bf16.msra.mxu1 %v2905_v63  ;;  %v2513_v44 = vunpack.c.2.s8 %v2321_v61  ;;  %v2517_v39 = vunpack.c.3.s8 %v2321_v61  ;;  %v2945_v55 = vpack.c.bf16 %v2781_v17, %v2777_v43  ;;  %v2677_v22 = vcvt.s32.f32 %v2421_v9 }
 0x267   :  { %v7140_v38 = vpack.c.bf16 %v2272_v2, %v2272_v2  ;;  %3119 = vmatpush.bf16.msrb.mxu2 %v2920_v21  ;;  %v2980_v37 = vpack.c.bf16 %v2852_v7, %v2848_v6  ;;  %v2568_v31 = vunpack.c.0.s8 %v2336_v34  ;;  %v2572_v19 = vunpack.c.1.s8 %v2336_v34 }
 0x268   :  { %v2769_v4 = vcvt.s32.f32 %v2513_v44  ;;  %v2773_v53 = vcvt.s32.f32 %v2517_v39  ;;  %v2409_v56 = vunpack.c.0.s8 %v2297_v54  ;;  %v2893_v36 = vpack.c.bf16 %v2677_v22, %v2673_v58 }
 0x269   :  { %3029 = vmatmul.bf16.vlgmr.msrb.gmra.mxu3 %v7140_v38  ;;  %3146 = vmatmul.bf16.vlgmr.msra.gmra.mxu0 %v6949_v20  ;;  %v2576_v20 = vunpack.c.2.s8 %v2336_v34  ;;  %v2824_v8 = vcvt.s32.f32 %v2568_v31  ;;  %v2828_v59 = vcvt.s32.f32 %v2572_v19  ;;  %v2413_v1 = vunpack.c.1.s8 %v2297_v54 }
 0x26a   :  { %3125 = vmatpush.bf16.msrb.mxu3 %v2980_v37  ;;  %3155 = vmatpush.bf16.msra.mxu1 %v2901_v49  ;;  %v2941_v2 = vpack.c.bf16 %v2773_v53, %v2769_v4  ;;  %v2665_v63 = vcvt.s32.f32 %v2409_v56  ;;  %v2505_v50 = vunpack.c.0.s8 %v2321_v61  ;;  %v2509_v3 = vunpack.c.1.s8 %v2321_v61  ;;  %v2313_v37 = vld [vmem:[#allocation4 + $0x518] sm:$0xff] }
 0x26b   :  { %3120 = vmatmul.bf16.vlgmr.msrb.gmra.mxu2 %v7105_v30  ;;  %v2832_v29 = vcvt.s32.f32 %v2576_v20  ;;  %v2968_v62 = vpack.c.bf16 %v2828_v59, %v2824_v8  ;;  %v2669_v23 = vcvt.s32.f32 %v2413_v1  ;;  %v2560_v12 = vunpack.c.2.s8 %v2332_v45  ;;  %v2337_v53 = vld [vmem:[#allocation4 + $0x5d8] sm:$0xff] }
 0x26c   :  { %3164 = vmatpush.bf16.msra.mxu2 %v2949_v42  ;;  %v2564_v6 = vunpack.c.3.s8 %v2332_v45  ;;  %v2761_v28 = vcvt.s32.f32 %v2505_v50  ;;  %v2765_v21 = vcvt.s32.f32 %v2509_v3  ;;  %v2497_v32 = vunpack.c.2.s8 %v2317_v47 }
 0x26d   :  { %v2972_v60 = vpack.c.bf16 %v2836_v18, %v2832_v29  ;;  %v2501_v5 = vunpack.c.3.s8 %v2317_v47  ;;  %v2889_v7 = vpack.c.bf16 %v2669_v23, %v2665_v63  ;;  %v2816_v57 = vcvt.s32.f32 %v2560_v12 }
 0x26e   :  { %3126 = vmatpush.bf16.msrb.mxu3 %v2976_v10  ;;  %3156 = vmatpush.bf16.msra.mxu1 %v2897_v52  ;;  %v2820_v46 = vcvt.s32.f32 %v2564_v6  ;;  %v2552_v14 = vunpack.c.0.s8 %v2332_v45  ;;  %v2937_v26 = vpack.c.bf16 %v2765_v21, %v2761_v28  ;;  %v2753_v11 = vcvt.s32.f32 %v2497_v32  ;;  %v2341_v10 = vld [vmem:[#allocation4 + $0x5f8] sm:$0xff] }
 0x26f   :  { %v2757_v48 = vcvt.s32.f32 %v2501_v5  ;;  %v2556_v34 = vunpack.c.1.s8 %v2332_v45  ;;  %v2489_v15 = vunpack.c.0.s8 %v2317_v47  ;;  %v2493_v54 = vunpack.c.1.s8 %v2317_v47  ;;  %v2333_v28 = vld [vmem:[#allocation4 + $0x5b8] sm:$0xff] }
 0x270   :  { %3165 = vmatpush.bf16.msra.mxu2 %v2945_v55  ;;  %v2964_v0 = vpack.c.bf16 %v2820_v46, %v2816_v57  ;;  %v2808_v25 = vcvt.s32.f32 %v2552_v14  ;;  %v2544_v24 = vunpack.c.2.s8 %v2328_v41  ;;  %v2548_v27 = vunpack.c.3.s8 %v2328_v41 }
 0x271   :  { %v2933_v49 = vpack.c.bf16 %v2757_v48, %v2753_v11  ;;  %v2812_v13 = vcvt.s32.f32 %v2556_v34  ;;  %v2745_v42 = vcvt.s32.f32 %v2489_v15  ;;  %v2749_v40 = vcvt.s32.f32 %v2493_v54  ;;  %v2329_v48 = vld [vmem:[#allocation4 + $0x598] sm:$0xff] }
 0x272   :  { %3127 = vmatpush.bf16.msrb.mxu3 %v2972_v60  ;;  %3157 = vmatpush.bf16.msra.mxu1 %v2893_v36  ;;  %v2481_v51 = vunpack.c.2.s8 %v2313_v37  ;;  %v2485_v20 = vunpack.c.3.s8 %v2313_v37  ;;  %v2800_v43 = vcvt.s32.f32 %v2544_v24  ;;  %v2804_v16 = vcvt.s32.f32 %v2548_v27  ;;  %v3241_v27 = vld [vmem:[#allocation4 + $0x660] sm:$0xff] }
 0x273   :  { %v2960_v61 = vpack.c.bf16 %v2812_v13, %v2808_v25  ;;  %v2536_v33 = vunpack.c.0.s8 %v2328_v41  ;;  %v2540_v52 = vunpack.c.1.s8 %v2328_v41  ;;  %v2929_v17 = vpack.c.bf16 %v2749_v40, %v2745_v42 }
 0x274   :  { %3166 = vmatpush.bf16.msra.mxu2 %v2941_v2  ;;  %v2737_v29 = vcvt.s32.f32 %v2481_v51  ;;  %v2741_v9 = vcvt.s32.f32 %v2485_v20  ;;  %v2473_v18 = vunpack.c.0.s8 %v2313_v37  ;;  %v2477_v58 = vunpack.c.1.s8 %v2313_v37 }
 0x275   :  { %v2593_v44 = vunpack.c.2.s8 %v2341_v10  ;;  %v2597_v39 = vunpack.c.3.s8 %v2341_v10  ;;  %v2956_v55 = vpack.c.bf16 %v2804_v16, %v2800_v43  ;;  %v2792_v22 = vcvt.s32.f32 %v2536_v33 }
 0x276   :  { %3128 = vmatpush.bf16.msrb.mxu3 %v2968_v62  ;;  %3158 = vmatpush.bf16.msra.mxu1 %v2889_v7  ;;  %v2796_v31 = vcvt.s32.f32 %v2540_v52  ;;  %v2585_v4 = vunpack.c.0.s8 %v2341_v10  ;;  %v2925_v56 = vpack.c.bf16 %v2741_v9, %v2737_v29  ;;  %v2729_v45 = vcvt.s32.f32 %v2473_v18 }
 0x277   :  { %v2849_v19 = vcvt.s32.f32 %v2593_v44  ;;  %v2853_v60 = vcvt.s32.f32 %v2597_v39  ;;  %v2733_v36 = vcvt.s32.f32 %v2477_v58  ;;  %v2577_v59 = vunpack.c.2.s8 %v2337_v53  ;;  %v3237_v58 = vld [vmem:[#allocation4 + $0x640] sm:$0xff] }
 0x278   :  { %3167 = vmatpush.bf16.msra.mxu2 %v2937_v26  ;;  %v2952_v8 = vpack.c.bf16 %v2796_v31, %v2792_v22  ;;  %v2841_v47 = vcvt.s32.f32 %v2585_v4  ;;  %v2581_v63 = vunpack.c.3.s8 %v2337_v53  ;;  %v2569_v12 = vunpack.c.0.s8 %v2337_v53 }
 0x279   :  { %3081 = vmatmul.bf16.vlgmr.msra.gmra.mxu3 %v7140_v38  ;;  %3159 = vmatmul.bf16.vlgmr.msra.gmra.mxu1 %v7024_v35  ;;  %v2589_v35 = vunpack.c.1.s8 %v2341_v10  ;;  %v2981_v1 = vpack.c.bf16 %v2853_v60, %v2849_v19  ;;  %v2921_v50 = vpack.c.bf16 %v2733_v36, %v2729_v45  ;;  %v2833_v3 = vcvt.s32.f32 %v2577_v59  ;;  %v3233_v45 = vld [vmem:[#allocation4 + $0x620] sm:$0xff] }
 0x27a   :  { %3129 = vmatpush.bf16.msrb.mxu3 %v2964_v0  ;;  %v2837_v23 = vcvt.s32.f32 %v2581_v63  ;;  %v2573_v6 = vunpack.c.1.s8 %v2337_v53  ;;  %v2561_v21 = vunpack.c.2.s8 %v2333_v28  ;;  %v2825_v5 = vcvt.s32.f32 %v2569_v12  ;;  %v3257_v36 = vld [vmem:[#allocation4 + $0x6e0] sm:$0xff] }
 0x27b   :  { %v2845_v2 = vcvt.s32.f32 %v2589_v35  ;;  %v2565_v57 = vunpack.c.3.s8 %v2333_v28  ;;  %v2553_v46 = vunpack.c.0.s8 %v2333_v28  ;;  %v2557_v11 = vunpack.c.1.s8 %v2333_v28 }
 0x27c   :  { %3168 = vmatpush.bf16.msra.mxu2 %v2933_v49  ;;  %v2973_v32 = vpack.c.bf16 %v2837_v23, %v2833_v3  ;;  %v2829_v7 = vcvt.s32.f32 %v2573_v6  ;;  %v2817_v41 = vcvt.s32.f32 %v2561_v21  ;;  %v2545_v34 = vunpack.c.2.s8 %v2329_v48 }
 0x27d   :  { %v2977_v62 = vpack.c.bf16 %v2845_v2, %v2841_v47  ;;  %v2821_v26 = vcvt.s32.f32 %v2565_v57  ;;  %v2549_v37 = vunpack.c.3.s8 %v2329_v48  ;;  %v2809_v25 = vcvt.s32.f32 %v2553_v46  ;;  %v3229_v46 = vld [vmem:[#allocation4 + $0x600] sm:$0xff] }
 0x27e   :  { %3130 = vmatpush.bf16.msrb.mxu3 %v2960_v61  ;;  %v2969_v14 = vpack.c.bf16 %v2829_v7, %v2825_v5  ;;  %v2813_v15 = vcvt.s32.f32 %v2557_v11  ;;  %v2801_v54 = vcvt.s32.f32 %v2545_v34  ;;  %v2537_v49 = vunpack.c.0.s8 %v2329_v48 }
 0x27f   :  { %v2965_v0 = vpack.c.bf16 %v2821_v26, %v2817_v41  ;;  %v2541_v13 = vunpack.c.1.s8 %v2329_v48  ;;  %v3349_v42 = vunpack.c.2.s8 %v3241_v27  ;;  %v3353_v40 = vunpack.c.3.s8 %v3241_v27 }
 0x280   :  { %3169 = vmatpush.bf16.msra.mxu2 %v2929_v17  ;;  %v2961_v24 = vpack.c.bf16 %v2813_v15, %v2809_v25  ;;  %v3341_v51 = vunpack.c.0.s8 %v3241_v27  ;;  %v3345_v20 = vunpack.c.1.s8 %v3241_v27  ;;  %v2793_v10 = vcvt.s32.f32 %v2537_v49  ;;  %v3242_v27 = vld [vmem:[#allocation4 + $0x668] sm:$0xff] }
 0x281   :  { %v2797_v43 = vcvt.s32.f32 %v2541_v13  ;;  %v3605_v16 = vcvt.s32.f32 %v3349_v42  ;;  %v3609_v33 = vcvt.s32.f32 %v3353_v40  ;;  %v3333_v44 = vunpack.c.2.s8 %v3237_v58 }
 0x282   :  { %3131 = vmatpush.bf16.msrb.mxu3 %v2956_v55  ;;  %v3597_v52 = vcvt.s32.f32 %v3341_v51  ;;  %v3601_v17 = vcvt.s32.f32 %v3345_v20  ;;  %v3337_v39 = vunpack.c.3.s8 %v3237_v58  ;;  %v3325_v55 = vunpack.c.0.s8 %v3237_v58 }
 0x283   :  { %v3833_v29 = vpack.c.bf16 %v3609_v33, %v3605_v16  ;;  %v2953_v9 = vpack.c.bf16 %v2797_v43, %v2793_v10  ;;  %v3329_v22 = vunpack.c.1.s8 %v3237_v58  ;;  %v3589_v31 = vcvt.s32.f32 %v3333_v44 }
 0x284   :  { %3170 = vmatpush.bf16.msra.mxu2 %v2925_v56  ;;  %v3829_v18 = vpack.c.bf16 %v3601_v17, %v3597_v52  ;;  %v3593_v19 = vcvt.s32.f32 %v3337_v39  ;;  %v3581_v60 = vcvt.s32.f32 %v3325_v55  ;;  %v3321_v59 = vunpack.c.3.s8 %v3233_v45 }
 0x285   :  { %3933 = vmatpush.bf16.msrb.mxu0 %v3833_v29  ;;  %v3585_v4 = vcvt.s32.f32 %v3329_v22  ;;  %v3417_v47 = vunpack.c.3.s8 %v3257_v36  ;;  %v3309_v12 = vunpack.c.0.s8 %v3233_v45  ;;  %v3313_v6 = vunpack.c.1.s8 %v3233_v45 }
 0x286   :  { %3132 = vmatpush.bf16.msrb.mxu3 %v2952_v8  ;;  %v3825_v35 = vpack.c.bf16 %v3593_v19, %v3589_v31  ;;  %v3317_v8 = vunpack.c.2.s8 %v3233_v45  ;;  %v3577_v63 = vcvt.s32.f32 %v3321_v59  ;;  %v3409_v28 = vunpack.c.1.s8 %v3257_v36 }
 0x287   :  { %v3821_v56 = vpack.c.bf16 %v3585_v4, %v3581_v60  ;;  %v3673_v3 = vcvt.s32.f32 %v3417_v47  ;;  %v3569_v5 = vcvt.s32.f32 %v3313_v6  ;;  %v3301_v26 = vunpack.c.2.s8 %v3229_v46 }
 0x288   :  { %3171 = vmatpush.bf16.msra.mxu2 %v2921_v50  ;;  %v3573_v2 = vcvt.s32.f32 %v3317_v8  ;;  %v3665_v57 = vcvt.s32.f32 %v3409_v28  ;;  %v3305_v11 = vunpack.c.3.s8 %v3229_v46  ;;  %v3293_v49 = vunpack.c.0.s8 %v3229_v46 }
 0x289   :  { %3133 = vmatmul.bf16.vlgmr.msrb.gmra.mxu3 %v7140_v38  ;;  %3934 = vmatpush.bf16.msrb.mxu0 %v3829_v18  ;;  %v3297_v13 = vunpack.c.1.s8 %v3229_v46  ;;  %v3350_v51 = vunpack.c.2.s8 %v3242_v27  ;;  %v3354_v20 = vunpack.c.3.s8 %v3242_v27  ;;  %v3273_v18 = vld [vmem:[#allocation4 + $0x760] sm:$0xff]  ;;  %v3342_v60 = vunpack.c.0.s8 %v3242_v27 }
 0x28a   :  { %3177 = vmatpush.bf16.msra.mxu3 %v2981_v1  ;;  %v3413_v1 = vunpack.c.2.s8 %v3257_v36  ;;  %v3561_v25 = vcvt.s32.f32 %v3305_v11  ;;  %v3549_v43 = vcvt.s32.f32 %v3293_v49  ;;  %v3477_v55 = vunpack.c.2.s8 %v3273_v18 }
 0x28b   :  { %3172 = vmatmul.bf16.vlgmr.msra.gmra.mxu2 %v7105_v30  ;;  %v2805_v30 = vcvt.s32.f32 %v2549_v37  ;;  %v3553_v16 = vcvt.s32.f32 %v3297_v13  ;;  %v3606_v17 = vcvt.s32.f32 %v3350_v51  ;;  %v3610_v29 = vcvt.s32.f32 %v3354_v20 }
 0x28c   :  { %v3669_v50 = vcvt.s32.f32 %v3413_v1  ;;  %v3481_v19 = vunpack.c.3.s8 %v3273_v18  ;;  %v3346_v45 = vunpack.c.1.s8 %v3242_v27  ;;  %v3598_v8 = vcvt.s32.f32 %v3342_v60  ;;  %v3265_v60 = vld [vmem:[#allocation4 + $0x720] sm:$0xff] }
 0x28d   :  { %v2957_v61 = vpack.c.bf16 %v2805_v30, %v2801_v54  ;;  %3935 = vmatpush.bf16.msrb.mxu0 %v3825_v35  ;;  %v3805_v58 = vpack.c.bf16 %v3553_v16, %v3549_v43  ;;  %v3834_v31 = vpack.c.bf16 %v3610_v29, %v3606_v17  ;;  %v3234_v16 = vld [vmem:[#allocation4 + $0x628] sm:$0xff] }
 0x28e   :  { %3178 = vmatpush.bf16.msra.mxu3 %v2977_v62  ;;  %v3817_v62 = vpack.c.bf16 %v3577_v63, %v3573_v2  ;;  %v3865_v23 = vpack.c.bf16 %v3673_v3, %v3669_v50  ;;  %v3602_v1 = vcvt.s32.f32 %v3346_v45  ;;  %v3238_v63 = vld [vmem:[#allocation4 + $0x648] sm:$0xff]  ;;  %v3469_v3 = vunpack.c.0.s8 %v3273_v18 }
 0x28f   :  { %v3330_v13 = vunpack.c.1.s8 %v3238_v63  ;;  %v3318_v29 = vunpack.c.2.s8 %v3234_v16 }
 0x290   :  { %3946 = vmatpush.bf16.msrb.mxu1 %v3865_v23  ;;  %v3334_v23 = vunpack.c.2.s8 %v3238_v63 }
 0x291   :  { %3936 = vmatpush.bf16.msrb.mxu0 %v3821_v56  ;;  %v3733_v56 = vcvt.s32.f32 %v3477_v55  ;;  %v3586_v51 = vcvt.s32.f32 %v3330_v13  ;;  %v3261_v13 = vld [vmem:[#allocation4 + $0x700] sm:$0xff] }
 0x292   :  { %3179 = vmatpush.bf16.msra.mxu3 %v2973_v32  ;;  %v3565_v32 = vcvt.s32.f32 %v3309_v12 }
 0x294   :  { %v3813_v41 = vpack.c.bf16 %v3569_v5, %v3565_v32  ;;  %v3338_v32 = vunpack.c.3.s8 %v3238_v63  ;;  %v3245_v5 = vld [vmem:[#allocation4 + $0x680] sm:$0xff] }
 0x295   :  { %3937 = vmatpush.bf16.msrb.mxu0 %v3817_v62  ;;  %v3473_v62 = vunpack.c.1.s8 %v3273_v18  ;;  %v3357_v20 = vunpack.c.0.s8 %v3245_v5  ;;  %v3361_v43 = vunpack.c.1.s8 %v3245_v5 }
 0x296   :  { %3180 = vmatpush.bf16.msra.mxu3 %v2969_v14  ;;  %v3253_v14 = vld [vmem:[#allocation4 + $0x6c0] sm:$0xff]  ;;  %v3594_v11 = vcvt.s32.f32 %v3338_v32 }
 0x297   :  { %v3397_v48 = vunpack.c.2.s8 %v3253_v14  ;;  %v3401_v37 = vunpack.c.3.s8 %v3253_v14  ;;  %v3393_v40 = vunpack.c.1.s8 %v3253_v14  ;;  %v3729_v46 = vcvt.s32.f32 %v3473_v62 }
 0x299   :  { %3938 = vmatpush.bf16.msrb.mxu0 %v3813_v41  ;;  %v3653_v15 = vcvt.s32.f32 %v3397_v48  ;;  %v3657_v54 = vcvt.s32.f32 %v3401_v37  ;;  %v3649_v52 = vcvt.s32.f32 %v3393_v40  ;;  %v3365_v41 = vunpack.c.2.s8 %v3245_v5 }
 0x29a   :  { %3181 = vmatpush.bf16.msra.mxu3 %v2965_v0  ;;  %v3557_v0 = vcvt.s32.f32 %v3301_v26  ;;  %v3369_v48 = vunpack.c.3.s8 %v3245_v5 }
 0x29b   :  { %v3857_v42 = vpack.c.bf16 %v3657_v54, %v3653_v15  ;;  %v3326_v15 = vunpack.c.0.s8 %v3238_v63  ;;  %v7163_v63 = vld [vmem:[#allocation6 + $0x2] ss:$8 sm:$0xf] }
 0x29c   :  { %v3809_v30 = vpack.c.bf16 %v3561_v25, %v3557_v0  ;;  %v3621_v0 = vcvt.s32.f32 %v3365_v41 }
 0x29e   :  { %3182 = vmatpush.bf16.msra.mxu3 %v2961_v24  ;;  %v3389_v24 = vunpack.c.0.s8 %v3253_v14  ;;  %3939 = vmatpush.bf16.msrb.mxu0 %v3809_v30  ;;  %v3590_v14 = vcvt.s32.f32 %v3334_v23  ;;  %v3625_v30 = vcvt.s32.f32 %v3369_v48 }
 0x2a0   :  { %v3645_v33 = vcvt.s32.f32 %v3389_v24  ;;  %v3826_v54 = vpack.c.bf16 %v3594_v11, %v3590_v14  ;;  %v3841_v40 = vpack.c.bf16 %v3625_v30, %v3621_v0  ;;  %v3441_v0 = vunpack.c.1.s8 %v3265_v60 }
 0x2a2   :  { %3183 = vmatpush.bf16.msra.mxu3 %v2957_v61  ;;  %v3853_v22 = vpack.c.bf16 %v3649_v52, %v3645_v33  ;;  %3940 = vmatpush.bf16.msrb.mxu0 %v3805_v58 }
 0x2a6   :  { %3184 = vmatpush.bf16.msra.mxu3 %v2953_v9  ;;  %v7150_v53 = vpop.f32.mrf.mxu0  ;;  %v3249_v9 = vld [vmem:[#allocation4 + $0x6a0] sm:$0xff]  ;;  %3985 = vmatpush.bf16.msra.mxu0 %v3834_v31 }
 0x2a7   :  { %v3381_v44 = vunpack.c.2.s8 %v3249_v9  ;;  %v3385_v39 = vunpack.c.3.s8 %v3249_v9  ;;  %v3373_v47 = vunpack.c.0.s8 %v3249_v9  ;;  %v3377_v2 = vunpack.c.1.s8 %v3249_v9  ;;  %v3258_v9 = vld [vmem:[#allocation4 + $0x6e8] sm:$0xff] }
 0x2a8   :  { %v3418_v45 = vunpack.c.3.s8 %v3258_v9  ;;  %v3406_v32 = vunpack.c.0.s8 %v3258_v9  ;;  %v3410_v5 = vunpack.c.1.s8 %v3258_v9 }
 0x2a9   :  { %3185 = vmatmul.bf16.vlgmr.msra.gmra.mxu3 %v7140_v38  ;;  %v3405_v38 = vunpack.c.0.s8 %v3257_v36  ;;  %v3637_v4 = vcvt.s32.f32 %v3381_v44  ;;  %v3641_v35 = vcvt.s32.f32 %v3385_v39  ;;  %v3737_v36 = vcvt.s32.f32 %v3481_v19 }
 0x2aa   :  { %v3629_v28 = vcvt.s32.f32 %v3373_v47  ;;  %v3613_v44 = vcvt.s32.f32 %v3357_v20  ;;  %v3617_v39 = vcvt.s32.f32 %v3361_v43  ;;  %v3574_v19 = vcvt.s32.f32 %v3318_v29 }
 0x2ab   :  { %v3661_v7 = vcvt.s32.f32 %v3405_v38  ;;  %v3849_v59 = vpack.c.bf16 %v3641_v35, %v3637_v4  ;;  %v3897_v50 = vpack.c.bf16 %v3737_v36, %v3733_v56  ;;  %v3830_v38 = vpack.c.bf16 %v3602_v1, %v3598_v8 }
 0x2ac   :  { %v3837_v4 = vpack.c.bf16 %v3617_v39, %v3613_v44  ;;  %v3414_v56 = vunpack.c.2.s8 %v3258_v9  ;;  %v3445_v8 = vunpack.c.2.s8 %v3265_v60  ;;  %v3310_v1 = vunpack.c.0.s8 %v3234_v16 }
 0x2ad   :  { %v3861_v34 = vpack.c.bf16 %v3665_v57, %v3661_v7  ;;  %v3269_v7 = vld [vmem:[#allocation4 + $0x740] sm:$0xff]  ;;  %3959 = vmatpush.bf16.msrb.mxu2 %v3897_v50  ;;  %v3725_v57 = vcvt.s32.f32 %v3469_v3  ;;  %3986 = vmatpush.bf16.msra.mxu0 %v3830_v38  ;;  %v3314_v50 = vunpack.c.1.s8 %v3234_v16  ;;  %v3193_v3 = vperm.slane %v7163_v63, 0 }
 0x2ae   :  { %v2993_v21 = vpop.f32.mrf.mxu0  ;;  %v3465_v25 = vunpack.c.3.s8 %v3269_v7  ;;  %v3453_v52 = vunpack.c.0.s8 %v3269_v7  ;;  %v3457_v17 = vunpack.c.1.s8 %v3269_v7  ;;  %v3701_v62 = vcvt.s32.f32 %v3445_v8 }
 0x2af   :  { %3947 = vmatpush.bf16.msrb.mxu1 %v3861_v34  ;;  %v3633_v21 = vcvt.s32.f32 %v3377_v2  ;;  %v3461_v34 = vunpack.c.2.s8 %v3269_v7  ;;  %v3893_v37 = vpack.c.bf16 %v3729_v46, %v3725_v57  ;;  %v3674_v2 = vcvt.s32.f32 %v3418_v45  ;;  %v3230_v7 = vld [vmem:[#allocation4 + $0x608] sm:$0xff] }
 0x2b0   :  { %v3721_v27 = vcvt.s32.f32 %v3465_v25  ;;  %v3713_v31 = vcvt.s32.f32 %v3457_v17  ;;  %v3254_v57 = vld [vmem:[#allocation4 + $0x6c8] sm:$0xff]  ;;  %v3306_v30 = vunpack.c.3.s8 %v3230_v7  ;;  %v3294_v9 = vunpack.c.0.s8 %v3230_v7 }
 0x2b1   :  { %v3845_v26 = vpack.c.bf16 %v3633_v21, %v3629_v28  ;;  %v3717_v49 = vcvt.s32.f32 %v3461_v34  ;;  %3960 = vmatpush.bf16.msrb.mxu2 %v3893_v37  ;;  %3987 = vmatpush.bf16.msra.mxu0 %v3826_v54  ;;  %v7166_v28 = vld [vmem:[#allocation9 + $0x3] ss:$8 sm:$0xf]  ;;  %v3570_v21 = vcvt.s32.f32 %v3314_v50  ;;  %v3662_v34 = vcvt.s32.f32 %v3406_v32 }
 0x2b2   :  { %v3208_v14 = vperm.slane %v7166_v28, 0  ;;  %v3666_v37 = vcvt.s32.f32 %v3410_v5  ;;  %v3302_v54 = vunpack.c.2.s8 %v3230_v7  ;;  %v3562_v20 = vcvt.s32.f32 %v3306_v30 }
 0x2b3   :  { %3948 = vmatpush.bf16.msrb.mxu1 %v3857_v42  ;;  %v3582_v42 = vcvt.s32.f32 %v3326_v15  ;;  %v3889_v33 = vpack.c.bf16 %v3721_v27, %v3717_v49  ;;  %v3398_v49 = vunpack.c.2.s8 %v3254_v57  ;;  %v3697_v27 = vcvt.s32.f32 %v3441_v0 }
 0x2b4   :  { %v3298_v44 = vunpack.c.1.s8 %v3230_v7  ;;  %v3390_v39 = vunpack.c.0.s8 %v3254_v57 }
 0x2b5   :  { %v3822_v58 = vpack.c.bf16 %v3586_v51, %v3582_v42  ;;  %3961 = vmatpush.bf16.msrb.mxu2 %v3889_v33  ;;  %v3402_v42 = vunpack.c.3.s8 %v3254_v57  ;;  %v3558_v51 = vcvt.s32.f32 %v3302_v54  ;;  %v3654_v43 = vcvt.s32.f32 %v3398_v49  ;;  %v3243_v33 = vld [vmem:[#allocation4 + $0x670] sm:$0xff] }
 0x2b6   :  { %v7152_v61 = vpop.f32.mrf.mxu1  ;;  %v7154_v10 = vpop.f32.mrf.mxu0  ;;  %v3646_v45 = vcvt.s32.f32 %v3390_v39 }
 0x2b7   :  { %3949 = vmatpush.bf16.msrb.mxu1 %v3853_v22  ;;  %v3005_v24 = vadd.f32 %v7152_v61, %v7150_v53  ;;  %v3322_v53 = vunpack.c.3.s8 %v3234_v16  ;;  %v3709_v22 = vcvt.s32.f32 %v3453_v52  ;;  %3988 = vmatpush.bf16.msra.mxu0 %v3822_v58  ;;  %v3433_v16 = vunpack.c.3.s8 %v3261_v13 }
 0x2b8   :  { %v3658_v17 = vcvt.s32.f32 %v3402_v42 }
 0x2b9   :  { %v3578_v35 = vcvt.s32.f32 %v3322_v53  ;;  %v3885_v36 = vpack.c.bf16 %v3713_v31, %v3709_v22  ;;  %v3689_v58 = vcvt.s32.f32 %v3433_v16  ;;  %v3550_v31 = vcvt.s32.f32 %v3294_v9 }
 0x2ba   :  { %v3858_v22 = vpack.c.bf16 %v3658_v17, %v3654_v43 }
 0x2bb   :  { %3950 = vmatpush.bf16.msrb.mxu1 %v3849_v59  ;;  %v3449_v59 = vunpack.c.3.s8 %v3265_v60  ;;  %v3818_v47 = vpack.c.bf16 %v3578_v35, %v3574_v19  ;;  %3962 = vmatpush.bf16.msrb.mxu2 %v3885_v36  ;;  %v3394_v19 = vunpack.c.1.s8 %v3254_v57  ;;  %v3355_v36 = vunpack.c.3.s8 %v3243_v33 }
 0x2bd   :  { %v3705_v23 = vcvt.s32.f32 %v3449_v59  ;;  %3989 = vmatpush.bf16.msra.mxu0 %v3818_v47  ;;  %v3650_v59 = vcvt.s32.f32 %v3394_v19  ;;  %v3421_v47 = vunpack.c.0.s8 %v3261_v13 }
 0x2be   :  { %v3006_v12 = vpop.f32.mrf.mxu1  ;;  %v3045_v6 = vpop.f32.mrf.mxu0 }
 0x2bf   :  { %3951 = vmatpush.bf16.msrb.mxu1 %v3845_v26  ;;  %v3566_v12 = vcvt.s32.f32 %v3310_v1  ;;  %v3881_v41 = vpack.c.bf16 %v3705_v23, %v3701_v62  ;;  %v3437_v26 = vunpack.c.0.s8 %v3265_v60  ;;  %v3351_v60 = vunpack.c.2.s8 %v3243_v33 }
 0x2c0   :  { %v7176_v23 = vcvt.s32.f32 %v3355_v36 }
 0x2c1   :  { %v3814_v48 = vpack.c.bf16 %v3570_v21, %v3566_v12  ;;  %3963 = vmatpush.bf16.msrb.mxu2 %v3881_v41  ;;  %v3693_v15 = vcvt.s32.f32 %v3437_v26  ;;  %v7171_v1 = vcvt.s32.f32 %v3351_v60  ;;  %v3677_v21 = vcvt.s32.f32 %v3421_v47 }
 0x2c3   :  { %3952 = vmatpush.bf16.msrb.mxu1 %v3841_v40  ;;  %3990 = vmatpush.bf16.msra.mxu0 %v3814_v48  ;;  %v3429_v40 = vunpack.c.2.s8 %v3261_v13  ;;  %v3877_v52 = vpack.c.bf16 %v3697_v27, %v3693_v15  ;;  %v3835_v7 = vpack.c.bf16 %v7176_v23, %v7171_v1  ;;  %v3347_v15 = vunpack.c.1.s8 %v3243_v33 }
 0x2c5   :  { %v3685_v29 = vcvt.s32.f32 %v3429_v40  ;;  %3964 = vmatpush.bf16.msrb.mxu2 %v3877_v52 }
 0x2c6   :  { %v3056_v18 = vpop.f32.mrf.mxu1 }
 0x2c7   :  { %v7159_v61 = vadd.f32 %v3056_v18, %v7154_v10  ;;  %v3670_v10 = vcvt.s32.f32 %v3414_v56  ;;  %3953 = vmatpush.bf16.msrb.mxu1 %v3837_v4  ;;  %v3810_v18 = vpack.c.bf16 %v3562_v20, %v3558_v51  ;;  %v3289_v4 = vld [vmem:[#allocation4 + $0x7e0] sm:$0xff]  ;;  %v3873_v35 = vpack.c.bf16 %v3689_v58, %v3685_v29  ;;  %v3239_v20 = vld [vmem:[#allocation4 + $0x650] sm:$0xff] }
 0x2c8   :  { %v7161_v55 = vpop.f32.mrf.mxu0  ;;  %v3554_v56 = vcvt.s32.f32 %v3298_v44  ;;  %v3541_v12 = vunpack.c.2.s8 %v3289_v4  ;;  %v3545_v5 = vunpack.c.3.s8 %v3289_v4  ;;  %v7186_v51 = vcvt.s32.f32 %v3347_v15  ;;  %v3285_v58 = vld [vmem:[#allocation4 + $0x7c0] sm:$0xff] }
 0x2c9   :  { %v3866_v38 = vpack.c.bf16 %v3674_v2, %v3670_v10  ;;  %3991 = vmatpush.bf16.msra.mxu0 %v3810_v18  ;;  %v3425_v10 = vunpack.c.1.s8 %v3261_v13  ;;  %v3250_v2 = vld [vmem:[#allocation4 + $0x6a8] sm:$0xff]  ;;  %3965 = vmatpush.bf16.msrb.mxu2 %v3873_v35  ;;  %v3533_v52 = vunpack.c.0.s8 %v3289_v4  ;;  %v3537_v17 = vunpack.c.1.s8 %v3289_v4 }
 0x2ca   :  { %v3806_v62 = vpack.c.bf16 %v3554_v56, %v3550_v31  ;;  %v3797_v57 = vcvt.s32.f32 %v3541_v12  ;;  %v3382_v41 = vunpack.c.2.s8 %v3250_v2  ;;  %v3386_v26 = vunpack.c.3.s8 %v3250_v2  ;;  %v3246_v31 = vld [vmem:[#allocation4 + $0x688] sm:$0xff] }
 0x2cb   :  { %3998 = vmatpush.bf16.msra.mxu1 %v3866_v38  ;;  %v3854_v38 = vpack.c.bf16 %v3650_v59, %v3646_v45  ;;  %v3681_v32 = vcvt.s32.f32 %v3425_v10  ;;  %v3374_v9 = vunpack.c.0.s8 %v3250_v2  ;;  %v3789_v44 = vcvt.s32.f32 %v3533_v52  ;;  %v3270_v45 = vld [vmem:[#allocation4 + $0x748] sm:$0xff] }
 0x2cc   :  { %v3017_v6 = vpop.f32.mrf.mxu2  ;;  %v3642_v0 = vcvt.s32.f32 %v3386_v26  ;;  %v3793_v39 = vcvt.s32.f32 %v3537_v17  ;;  %v3339_v56 = vunpack.c.3.s8 %v3239_v20  ;;  %v3525_v59 = vunpack.c.2.s8 %v3285_v58 }
 0x2cd   :  { %v7168_v46 = vadd.f32 %v3017_v6, %v3005_v24  ;;  %v3862_v24 = vpack.c.bf16 %v3666_v37, %v3662_v34  ;;  %v3274_v6 = vld [vmem:[#allocation4 + $0x768] sm:$0xff]  ;;  %3992 = vmatpush.bf16.msra.mxu0 %v3806_v62  ;;  %v3638_v37 = vcvt.s32.f32 %v3382_v41  ;;  %v3630_v19 = vcvt.s32.f32 %v3374_v9 }
 0x2ce   :  { %v3058_v11 = vpop.f32.mrf.mxu1  ;;  %v3478_v48 = vunpack.c.2.s8 %v3274_v6  ;;  %v3482_v34 = vunpack.c.3.s8 %v3274_v6  ;;  %v3470_v18 = vunpack.c.0.s8 %v3274_v6  ;;  %v3925_v4 = vpack.c.bf16 %v3793_v39, %v3789_v44 }
 0x2cf   :  { %3999 = vmatpush.bf16.msra.mxu1 %v3862_v24  ;;  %v3801_v11 = vcvt.s32.f32 %v3545_v5  ;;  %v3194_v24 = vperm.slane %v7163_v63, 1  ;;  %v3850_v42 = vpack.c.bf16 %v3642_v0, %v3638_v37  ;;  %v3529_v62 = vunpack.c.3.s8 %v3285_v58 }
 0x2d0   :  { %v3097_v25 = vpop.f32.mrf.mxu0  ;;  %v3734_v49 = vcvt.s32.f32 %v3478_v48  ;;  %v3738_v13 = vcvt.s32.f32 %v3482_v34  ;;  %v3726_v35 = vcvt.s32.f32 %v3470_v18  ;;  %v3366_v12 = vunpack.c.2.s8 %v3246_v31  ;;  %v3259_v18 = vld [vmem:[#allocation4 + $0x6f0] sm:$0xff] }
 0x2d1   :  { %v3343_v25 = vunpack.c.0.s8 %v3243_v33  ;;  %v3929_v30 = vpack.c.bf16 %v3801_v11, %v3797_v57  ;;  %v3209_v33 = vperm.slane %v7166_v28, 1  ;;  %v3462_v5 = vunpack.c.2.s8 %v3270_v45 }
 0x2d2   :  { %v3898_v16 = vpack.c.bf16 %v3738_v13, %v3734_v49  ;;  %v3785_v41 = vcvt.s32.f32 %v3529_v62  ;;  %v3622_v26 = vcvt.s32.f32 %v3366_v12  ;;  %v3327_v34 = vunpack.c.0.s8 %v3239_v20 }
 0x2d3   :  { %4000 = vmatpush.bf16.msra.mxu1 %v3858_v22  ;;  %v7184_v40 = vcvt.s32.f32 %v3343_v25  ;;  %3972 = vmatpush.bf16.msrb.mxu3 %v3929_v30  ;;  %v3335_v22 = vunpack.c.2.s8 %v3239_v20  ;;  %v3718_v48 = vcvt.s32.f32 %v3462_v5  ;;  %v3331_v37 = vunpack.c.1.s8 %v3239_v20 }
 0x2d4   :  { %v3019_v53 = vpop.f32.mrf.mxu2  ;;  %v3517_v15 = vunpack.c.0.s8 %v3285_v58  ;;  %v7199_v49 = vcvt.s32.f32 %v3327_v34  ;;  %v3454_v39 = vunpack.c.0.s8 %v3270_v45 }
 0x2d5   :  { %v3831_v29 = vpack.c.bf16 %v7186_v51, %v7184_v40  ;;  %v3474_v53 = vunpack.c.1.s8 %v3274_v6  ;;  %v7201_v13 = vcvt.s32.f32 %v3331_v37 }
 0x2d6   :  { %v3108_v8 = vpop.f32.mrf.mxu1  ;;  %v3773_v17 = vcvt.s32.f32 %v3517_v15 }
 0x2d7   :  { %v7174_v50 = vadd.f32 %v3108_v8, %v7161_v55  ;;  %4001 = vmatpush.bf16.msra.mxu1 %v3854_v38  ;;  %v3869_v55 = vpack.c.bf16 %v3681_v32, %v3677_v21  ;;  %v3730_v36 = vcvt.s32.f32 %v3474_v53  ;;  %v7191_v8 = vcvt.s32.f32 %v3335_v22  ;;  %3973 = vmatpush.bf16.msrb.mxu3 %v3925_v4 }
 0x2d8   :  { %v3781_v21 = vcvt.s32.f32 %v3525_v59  ;;  %v3370_v32 = vunpack.c.3.s8 %v3246_v31  ;;  %v3710_v4 = vcvt.s32.f32 %v3454_v39  ;;  %v3281_v59 = vld [vmem:[#allocation4 + $0x7a0] sm:$0xff] }
 0x2d9   :  { %3966 = vmatpush.bf16.msrb.mxu2 %v3869_v55  ;;  %v3894_v38 = vpack.c.bf16 %v3730_v36, %v3726_v35  ;;  %v3466_v55 = vunpack.c.3.s8 %v3270_v45  ;;  %v3415_v36 = vunpack.c.2.s8 %v3259_v18 }
 0x2da   :  { %v3626_v11 = vcvt.s32.f32 %v3370_v32  ;;  %v3921_v0 = vpack.c.bf16 %v3785_v41, %v3781_v21 }
 0x2db   :  { %4002 = vmatpush.bf16.msra.mxu1 %v3850_v42  ;;  %v3722_v25 = vcvt.s32.f32 %v3466_v55  ;;  %v3358_v42 = vunpack.c.0.s8 %v3246_v31  ;;  %v3513_v55 = vunpack.c.3.s8 %v3281_v59 }
 0x2dc   :  { %v3069_v54 = vpop.f32.mrf.mxu2  ;;  %v3842_v30 = vpack.c.bf16 %v3626_v11, %v3622_v26  ;;  %3974 = vmatpush.bf16.msrb.mxu3 %v3921_v0  ;;  %v3509_v26 = vunpack.c.2.s8 %v3281_v59 }
 0x2dd   :  { %v7182_v27 = vadd.f32 %v3069_v54, %v7159_v61  ;;  %v3378_v61 = vunpack.c.1.s8 %v3250_v2  ;;  %4011 = vmatpush.bf16.msra.mxu2 %v3898_v16  ;;  %v7195_v2 = vcvt.s32.f32 %v3339_v56  ;;  %v3521_v54 = vunpack.c.1.s8 %v3285_v58 }
 0x2de   :  { %v3110_v43 = vpop.f32.mrf.mxu1  ;;  %v3890_v52 = vpack.c.bf16 %v3722_v25, %v3718_v48  ;;  %v3823_v58 = vpack.c.bf16 %v7201_v13, %v7199_v49  ;;  %v3614_v44 = vcvt.s32.f32 %v3358_v42  ;;  %v3765_v0 = vcvt.s32.f32 %v3509_v26  ;;  %v3251_v13 = vld [vmem:[#allocation4 + $0x6b0] sm:$0xff] }
 0x2df   :  { %v3634_v60 = vcvt.s32.f32 %v3378_v61  ;;  %v3827_v57 = vpack.c.bf16 %v7195_v2, %v7191_v8  ;;  %v3235_v43 = vld [vmem:[#allocation4 + $0x630] sm:$0xff]  ;;  %v3777_v9 = vcvt.s32.f32 %v3521_v54  ;;  %v3362_v61 = vunpack.c.1.s8 %v3246_v31 }
 0x2e0   :  { %v3319_v35 = vunpack.c.2.s8 %v3235_v43  ;;  %v3323_v31 = vunpack.c.3.s8 %v3235_v43  ;;  %v3769_v25 = vcvt.s32.f32 %v3513_v55  ;;  %v3311_v15 = vunpack.c.0.s8 %v3235_v43  ;;  %v7252_v55 = vld [vmem:[#allocation4 + $0x708] sm:$0xff] }
 0x2e1   :  { %v3846_v10 = vpack.c.bf16 %v3634_v60, %v3630_v19  ;;  %4012 = vmatpush.bf16.msra.mxu2 %v3894_v38  ;;  %v3917_v22 = vpack.c.bf16 %v3777_v9, %v3773_v17  ;;  %v3618_v19 = vcvt.s32.f32 %v3362_v61  ;;  %v3458_v60 = vunpack.c.1.s8 %v3270_v45  ;;  %v3266_v38 = vld [vmem:[#allocation4 + $0x728] sm:$0xff] }
 0x2e2   :  { %v7208_v12 = vcvt.s32.f32 %v3319_v35  ;;  %v7215_v32 = vcvt.s32.f32 %v3323_v31  ;;  %v3446_v34 = vunpack.c.2.s8 %v3266_v38  ;;  %v3450_v37 = vunpack.c.3.s8 %v3266_v38 }
 0x2e3   :  { %4003 = vmatpush.bf16.msra.mxu1 %v3846_v10  ;;  %3975 = vmatpush.bf16.msrb.mxu3 %v3917_v22  ;;  %v3838_v10 = vpack.c.bf16 %v3618_v19, %v3614_v44  ;;  %v3714_v62 = vcvt.s32.f32 %v3458_v60  ;;  %v7227_v17 = vcvt.s32.f32 %v3311_v15  ;;  %v3407_v9 = vunpack.c.0.s8 %v3259_v18 }
 0x2e4   :  { %v3071_v6 = vpop.f32.mrf.mxu2  ;;  %v3819_v48 = vpack.c.bf16 %v7215_v32, %v7208_v12  ;;  %v3706_v42 = vcvt.s32.f32 %v3450_v37  ;;  %v3411_v61 = vunpack.c.1.s8 %v3259_v18  ;;  %v3210_v22 = vperm.slane %v7166_v28, 2 }
 0x2e5   :  { %4013 = vmatpush.bf16.msra.mxu2 %v3890_v52  ;;  %v3419_v6 = vunpack.c.3.s8 %v3259_v18  ;;  %v3886_v5 = vpack.c.bf16 %v3714_v62, %v3710_v4  ;;  %v3913_v52 = vpack.c.bf16 %v3769_v25, %v3765_v0  ;;  %v7237_v19 = vcvt.s32.f32 %v3407_v9  ;;  %v7243_v62 = vld [vmem:[#allocation4 + $0x780] sm:$0xff]  ;;  %v7272_v9 = vld [vmem:[#allocation4 + $0x678] sm:$0xff] }
 0x2e6   :  { %v7193_v47 = vpop.f32.mrf.mxu0  ;;  %v7239_v60 = vcvt.s32.f32 %v3411_v61  ;;  %v3501_v18 = vunpack.c.0.s8 %v3281_v59  ;;  %v3505_v35 = vunpack.c.1.s8 %v3281_v59  ;;  %v3438_v31 = vunpack.c.0.s8 %v3266_v38 }
 0x2e7   :  { %4004 = vmatpush.bf16.msra.mxu1 %v3842_v30  ;;  %v7219_v41 = vcvt.s32.f32 %v3419_v6  ;;  %v3702_v30 = vcvt.s32.f32 %v3446_v34  ;;  %3976 = vmatpush.bf16.msrb.mxu3 %v3913_v52  ;;  %v3493_v37 = vunpack.c.2.s8 %v7243_v62  ;;  %v3497_v15 = vunpack.c.3.s8 %v7243_v62 }
 0x2e8   :  { %v3863_v23 = vpack.c.bf16 %v7239_v60, %v7237_v19  ;;  %v3761_v6 = vcvt.s32.f32 %v3505_v35  ;;  %v3694_v59 = vcvt.s32.f32 %v3438_v31  ;;  %v3430_v51 = vunpack.c.2.s8 %v7252_v55 }
 0x2e9   :  { %4014 = vmatpush.bf16.msra.mxu2 %v3886_v5  ;;  %v3882_v44 = vpack.c.bf16 %v3706_v42, %v3702_v30  ;;  %v3749_v40 = vcvt.s32.f32 %v3493_v37  ;;  %v3434_v52 = vunpack.c.3.s8 %v7252_v55  ;;  %v3352_v8 = vunpack.c.2.s8 %v7272_v9 }
 0x2ea   :  { %v3489_v37 = vunpack.c.1.s8 %v7243_v62  ;;  %v3422_v49 = vunpack.c.0.s8 %v7252_v55  ;;  %v3344_v12 = vunpack.c.0.s8 %v7272_v9 }
 0x2eb   :  { %4005 = vmatpush.bf16.msra.mxu1 %v3838_v10  ;;  %v3255_v10 = vld [vmem:[#allocation4 + $0x6d0] sm:$0xff]  ;;  %v3690_v31 = vcvt.s32.f32 %v3434_v52 }
 0x2ec   :  { %v3030_v16 = vpop.f32.mrf.mxu3  ;;  %v3403_v34 = vunpack.c.3.s8 %v3255_v10 }
 0x2ed   :  { %v3031_v20 = vadd.f32 %v3030_v16, %v7168_v46  ;;  %v3315_v16 = vunpack.c.1.s8 %v3235_v43  ;;  %4015 = vmatpush.bf16.msra.mxu2 %v3882_v44  ;;  %v3686_v44 = vcvt.s32.f32 %v3430_v51 }
 0x2ee   :  { %v3149_v53 = vpop.f32.mrf.mxu0  ;;  %v3121_v46 = vpop.f32.mrf.mxu2  ;;  %v7264_v42 = vcvt.s32.f32 %v3403_v34 }
 0x2ef   :  { %v3201_v56 = vmul.f32 %v3193_v3, %v3031_v20  ;;  %v7213_v45 = vadd.f32 %v3121_v46, %v7174_v50  ;;  %v7217_v3 = vcvt.s32.f32 %v3415_v36  ;;  %v3231_v20 = vld [vmem:[#allocation4 + $0x610] sm:$0xff]  ;;  %v7230_v39 = vcvt.s32.f32 %v3315_v16 }
 0x2f0   :  { %v3195_v53 = vperm.slane %v7163_v63, 2  ;;  %v3442_v36 = vunpack.c.1.s8 %v3266_v38  ;;  %v3303_v46 = vunpack.c.2.s8 %v3231_v20  ;;  %v3307_v5 = vunpack.c.3.s8 %v3231_v20 }
 0x2f1   :  { %v3216_v21 = vadd.f32 %v3208_v14, %v3201_v56  ;;  %v3867_v50 = vpack.c.bf16 %v7219_v41, %v7217_v3  ;;  %v3815_v4 = vpack.c.bf16 %v7230_v39, %v7227_v17  ;;  %v3753_v16 = vcvt.s32.f32 %v3497_v15 }
 0x2f2   :  { %v7250_v26 = vcvt.s32.f32 %v3303_v46  ;;  %v7259_v25 = vcvt.s32.f32 %v3307_v5  ;;  %v3348_v41 = vunpack.c.1.s8 %v7272_v9  ;;  %v3375_v17 = vunpack.c.0.s8 %v3251_v13 }
 0x2f3   :  { %v3220_v11 = vmax.f32 %v3216_v21, 0.0  ;;  %v3698_v21 = vcvt.s32.f32 %v3442_v36  ;;  %v3391_v36 = vunpack.c.0.s8 %v3255_v10  ;;  %v3379_v39 = vunpack.c.1.s8 %v3251_v13 }
 0x2f4   :  { %v3032_v14 = vpop.f32.mrf.mxu3 }
 0x2f5   :  { %v7225_v54 = vpack.c.bf16 %v3220_v11, %v3220_v11  ;;  %v3878_v0 = vpack.c.bf16 %v3698_v21, %v3694_v59  ;;  %v7286_v59 = vcvt.s32.f32 %v3391_v36  ;;  %v3290_v21 = vld [vmem:[#allocation4 + $0x7e8] sm:$0xff] }
 0x2f6   :  { %v3123_v43 = vpop.f32.mrf.mxu2  ;;  %v3160_v56 = vpop.f32.mrf.mxu1  ;;  %v3542_v15 = vunpack.c.2.s8 %v3290_v21 }
 0x2f7   :  { %3941 = vmatmul.bf16.vlgmr.msrb.gmra.mxu0 %v7225_v54  ;;  %v7246_v1 = vadd.f32 %v3160_v56, %v7193_v47  ;;  %v3399_v47 = vunpack.c.2.s8 %v3255_v10  ;;  %4016 = vmatpush.bf16.msra.mxu2 %v3878_v0  ;;  %v3295_v43 = vunpack.c.0.s8 %v3231_v20  ;;  %v3905_v56 = vpack.c.bf16 %v3753_v16, %v3749_v40  ;;  %v3275_v40 = vld [vmem:[#allocation4 + $0x770] sm:$0xff] }
 0x2f8   :  { %4037 = vmatpush.bf16.msrb.mxu0 %v3835_v7  ;;  %v3757_v7 = vcvt.s32.f32 %v3501_v18  ;;  %v3299_v18 = vunpack.c.1.s8 %v3231_v20  ;;  %v3356_v20 = vunpack.c.3.s8 %v7272_v9  ;;  %v3426_v0 = vunpack.c.1.s8 %v7252_v55 }
 0x2f9   :  { %v7262_v30 = vcvt.s32.f32 %v3399_v47  ;;  %v7281_v46 = vcvt.s32.f32 %v3295_v43  ;;  %v3546_v16 = vunpack.c.3.s8 %v3290_v21  ;;  %v3798_v52 = vcvt.s32.f32 %v3542_v15 }
 0x2fa   :  { %v3909_v11 = vpack.c.bf16 %v3761_v6, %v3757_v7  ;;  %v7283_v7 = vcvt.s32.f32 %v3299_v18  ;;  %v3395_v6 = vunpack.c.1.s8 %v3255_v10  ;;  %v7296_v10 = vcvt.s32.f32 %v3352_v8 }
 0x2fb   :  { %v3859_v61 = vpack.c.bf16 %v7264_v42, %v7262_v30  ;;  %v7301_v34 = vcvt.s32.f32 %v3356_v20  ;;  %v3682_v55 = vcvt.s32.f32 %v3426_v0  ;;  %v3387_v43 = vunpack.c.3.s8 %v3251_v13  ;;  %v3286_v0 = vld [vmem:[#allocation4 + $0x7c8] sm:$0xff]  ;;  %v3271_v30 = vld [vmem:[#allocation4 + $0x750] sm:$0xff] }
 0x2fc   :  { %4038 = vmatpush.bf16.msrb.mxu0 %v3831_v29  ;;  %v3082_v38 = vpop.f32.mrf.mxu3  ;;  %3977 = vmatpush.bf16.msrb.mxu3 %v3909_v11  ;;  %v3807_v5 = vpack.c.bf16 %v7283_v7, %v7281_v46  ;;  %v3485_v11 = vunpack.c.0.s8 %v7243_v62  ;;  %v3678_v62 = vcvt.s32.f32 %v3422_v49  ;;  %v7336_v8 = vcvt.s32.f32 %v3344_v12 }
 0x2fd   :  { %v3083_v14 = vadd.f32 %v3082_v38, %v7182_v27  ;;  %v3811_v27 = vpack.c.bf16 %v7259_v25, %v7250_v26  ;;  %v7294_v38 = vcvt.s32.f32 %v3395_v6  ;;  %v3836_v51 = vpack.c.bf16 %v7301_v34, %v7296_v10 }
 0x2fe   :  { %v3162_v35 = vpop.f32.mrf.mxu1  ;;  %v7320_v6 = vcvt.s32.f32 %v3387_v43  ;;  %v7340_v20 = vcvt.s32.f32 %v3348_v41  ;;  %v7347_v49 = vcvt.s32.f32 %v3375_v17  ;;  %v3518_v34 = vunpack.c.0.s8 %v3286_v0 }
 0x2ff   :  { %v3202_v29 = vmul.f32 %v3194_v24, %v3083_v14  ;;  %v3741_v14 = vcvt.s32.f32 %v3485_v11  ;;  %v3479_v35 = vunpack.c.2.s8 %v3275_v40  ;;  %v3475_v11 = vunpack.c.1.s8 %v3275_v40 }
 0x300   :  { %4039 = vmatpush.bf16.msrb.mxu0 %v3827_v57  ;;  %3978 = vmatpush.bf16.msrb.mxu3 %v3905_v56  ;;  %v3874_v57 = vpack.c.bf16 %v3690_v31, %v3686_v44  ;;  %v3383_v44 = vunpack.c.2.s8 %v3251_v13  ;;  %v3483_v56 = vunpack.c.3.s8 %v3275_v40  ;;  %v3870_v31 = vpack.c.bf16 %v3682_v55, %v3678_v62  ;;  %v3247_v62 = vld [vmem:[#allocation4 + $0x690] sm:$0xff] }
 0x301   :  { %v3217_v24 = vadd.f32 %v3209_v33, %v3202_v29  ;;  %v3745_v29 = vcvt.s32.f32 %v3489_v37  ;;  %v3367_v43 = vunpack.c.2.s8 %v3247_v62  ;;  %v3359_v17 = vunpack.c.0.s8 %v3247_v62 }
 0x302   :  { %4017 = vmatpush.bf16.msra.mxu2 %v3874_v57  ;;  %v7318_v36 = vcvt.s32.f32 %v3383_v44  ;;  %v7325_v3 = vcvt.s32.f32 %v3483_v56  ;;  %v3538_v57 = vunpack.c.1.s8 %v3290_v21  ;;  %v3467_v56 = vunpack.c.3.s8 %v3271_v30 }
 0x303   :  { %v3221_v2 = vmax.f32 %v3217_v24, 0.0  ;;  %v3901_v18 = vpack.c.bf16 %v3745_v29, %v3741_v14  ;;  %v3802_v24 = vcvt.s32.f32 %v3546_v16  ;;  %v7349_v14 = vcvt.s32.f32 %v3379_v39 }
 0x304   :  { %4040 = vmatpush.bf16.msrb.mxu0 %v3823_v58  ;;  %v3084_v33 = vpop.f32.mrf.mxu3  ;;  %v3855_v58 = vpack.c.bf16 %v7294_v38, %v7286_v59  ;;  %v3623_v12 = vcvt.s32.f32 %v3367_v43  ;;  %v7385_v7 = vcvt.s32.f32 %v3467_v56 }
 0x305   :  { %v7299_v47 = vpack.c.bf16 %v3221_v2, %v3221_v2  ;;  %3979 = vmatpush.bf16.msrb.mxu3 %v3901_v18  ;;  %v3930_v32 = vpack.c.bf16 %v3802_v24, %v3798_v52  ;;  %v3534_v2 = vunpack.c.0.s8 %v3290_v21  ;;  %v3471_v33 = vunpack.c.0.s8 %v3275_v40 }
 0x306   :  { %4018 = vmatpush.bf16.msra.mxu2 %v3870_v31  ;;  %v3832_v21 = vpack.c.bf16 %v7340_v20, %v7336_v8  ;;  %v3847_v26 = vpack.c.bf16 %v7349_v14, %v7347_v49  ;;  %v3530_v52 = vunpack.c.3.s8 %v3286_v0  ;;  %v3522_v20 = vunpack.c.1.s8 %v3286_v0 }
 0x307   :  { %3954 = vmatmul.bf16.vlgmr.msrb.gmra.mxu1 %v7299_v47  ;;  %3993 = vmatmul.bf16.vlgmr.msra.gmra.mxu0 %v7225_v54  ;;  %v3790_v60 = vcvt.s32.f32 %v3534_v2  ;;  %v7357_v40 = vcvt.s32.f32 %v3471_v33 }
 0x308   :  { %4041 = vmatpush.bf16.msrb.mxu0 %v3819_v48  ;;  %4050 = vmatpush.bf16.msrb.mxu1 %v3867_v50  ;;  %v7323_v48 = vcvt.s32.f32 %v3479_v35  ;;  %v3851_v50 = vpack.c.bf16 %v7320_v6, %v7318_v36  ;;  %v3786_v24 = vcvt.s32.f32 %v3530_v52  ;;  %v3463_v35 = vunpack.c.2.s8 %v3271_v30 }
 0x309   :  { %4024 = vmatpush.bf16.msra.mxu3 %v3930_v32  ;;  %v3778_v36 = vcvt.s32.f32 %v3522_v20  ;;  %v3615_v6 = vcvt.s32.f32 %v3359_v17  ;;  %v3278_v17 = vld [vmem:[#allocation4 + $0x788] sm:$0xff] }
 0x30a   :  { %v3899_v9 = vpack.c.bf16 %v7325_v3, %v7323_v48  ;;  %v7383_v46 = vcvt.s32.f32 %v3463_v35 }
 0x30c   :  { %4042 = vmatpush.bf16.msrb.mxu0 %v3815_v4  ;;  %4051 = vmatpush.bf16.msrb.mxu1 %v3863_v23  ;;  %v7342_v4 = vld [vmem:[#allocation4 + $0x658] sm:$0xff]  ;;  %v3134_v19 = vpop.f32.mrf.mxu3  ;;  %v3794_v23 = vcvt.s32.f32 %v3538_v57  ;;  %v3891_v2 = vpack.c.bf16 %v7385_v7, %v7383_v46 }
 0x30d   :  { %v3135_v37 = vadd.f32 %v3134_v19, %v7213_v45  ;;  %v7359_v45 = vcvt.s32.f32 %v3475_v11  ;;  %v3336_v29 = vunpack.c.2.s8 %v7342_v4  ;;  %v3340_v25 = vunpack.c.3.s8 %v7342_v4  ;;  %v3282_v11 = vld [vmem:[#allocation4 + $0x7a8] sm:$0xff] }
 0x30e   :  { %v3173_v15 = vpop.f32.mrf.mxu2  ;;  %v3926_v13 = vpack.c.bf16 %v3794_v23, %v3790_v60  ;;  %v3328_v59 = vunpack.c.0.s8 %v7342_v4  ;;  %v3332_v10 = vunpack.c.1.s8 %v7342_v4  ;;  %v3774_v4 = vcvt.s32.f32 %v3518_v34  ;;  %v3260_v23 = vld [vmem:[#allocation4 + $0x6f8] sm:$0xff] }
 0x30f   :  { %v3203_v16 = vmul.f32 %v3195_v53, %v3135_v37  ;;  %v7365_v55 = vadd.f32 %v3173_v15, %v7246_v1  ;;  %v3895_v42 = vpack.c.bf16 %v7359_v45, %v7357_v40  ;;  %v3596_v53 = vcvt.s32.f32 %v3340_v25 }
 0x310   :  { %4043 = vmatpush.bf16.msrb.mxu0 %v3811_v27  ;;  %4052 = vmatpush.bf16.msrb.mxu1 %v3859_v61  ;;  %v3592_v27 = vcvt.s32.f32 %v3336_v29  ;;  %v3526_v61 = vunpack.c.2.s8 %v3286_v0  ;;  %v3371_v1 = vunpack.c.3.s8 %v3247_v62  ;;  %v3584_v57 = vcvt.s32.f32 %v3328_v59  ;;  %v7406_v0 = vld [vmem:[#allocation4 + $0x730] sm:$0xff]  ;;  %v7417_v59 = vld [vmem:[#allocation4 + $0x6d8] sm:$0xff] }
 0x311   :  { %4025 = vmatpush.bf16.msra.mxu3 %v3926_v13  ;;  %v3218_v44 = vadd.f32 %v3210_v22, %v3203_v16  ;;  %v3588_v39 = vcvt.s32.f32 %v3332_v10  ;;  %v3363_v19 = vunpack.c.1.s8 %v3247_v62  ;;  %v3455_v60 = vunpack.c.0.s8 %v3271_v30 }
 0x312   :  { %v3782_v18 = vcvt.s32.f32 %v3526_v61  ;;  %v3828_v22 = vpack.c.bf16 %v3596_v53, %v3592_v27  ;;  %v3627_v32 = vcvt.s32.f32 %v3371_v1  ;;  %v3918_v15 = vpack.c.bf16 %v3778_v36, %v3774_v4 }
 0x313   :  { %v3222_v31 = vmax.f32 %v3218_v44, 0.0  ;;  %v3824_v37 = vpack.c.bf16 %v3588_v39, %v3584_v57  ;;  %v3619_v49 = vcvt.s32.f32 %v3363_v19  ;;  %v3711_v14 = vcvt.s32.f32 %v3455_v60 }
 0x314   :  { %4044 = vmatpush.bf16.msrb.mxu0 %v3807_v5  ;;  %4053 = vmatpush.bf16.msrb.mxu1 %v3855_v58  ;;  %v3136_v41 = vpop.f32.mrf.mxu3  ;;  %v3922_v8 = vpack.c.bf16 %v3786_v24, %v3782_v18  ;;  %v3843_v38 = vpack.c.bf16 %v3627_v32, %v3623_v12  ;;  %v7393_v58 = vld [vmem:[#allocation4 + $0x638] sm:$0xff]  ;;  %v3416_v62 = vunpack.c.2.s8 %v3260_v23  ;;  %v3510_v16 = vunpack.c.2.s8 %v3282_v11 }
 0x315   :  { %v7388_v5 = vpack.c.bf16 %v3222_v31, %v3222_v31  ;;  %v3320_v33 = vunpack.c.2.s8 %v7393_v58  ;;  %v3839_v48 = vpack.c.bf16 %v3619_v49, %v3615_v6  ;;  %v3514_v27 = vunpack.c.3.s8 %v3282_v11  ;;  %v3232_v32 = vld [vmem:[#allocation4 + $0x618] sm:$0xff] }
 0x316   :  { %4026 = vmatpush.bf16.msra.mxu3 %v3922_v8  ;;  %v3447_v61 = vunpack.c.2.s8 %v7406_v0  ;;  %v3766_v44 = vcvt.s32.f32 %v3510_v16  ;;  %v3451_v53 = vunpack.c.3.s8 %v7406_v0  ;;  %v3196_v18 = vperm.slane %v7163_v63, 3 }
 0x317   :  { %4006 = vmatmul.bf16.vlgmr.msra.gmra.mxu1 %v7299_v47  ;;  %4045 = vmatmul.bf16.vlgmr.msrb.gmra.mxu0 %v7225_v54  ;;  %v3576_v29 = vcvt.s32.f32 %v3320_v33  ;;  %v3770_v43 = vcvt.s32.f32 %v3514_v27  ;;  %v3211_v24 = vperm.slane %v7166_v28, 3  ;;  %v3316_v35 = vunpack.c.1.s8 %v7393_v58 }
 0x318   :  { %4089 = vmatpush.bf16.msra.mxu0 %v3836_v51  ;;  %v3175_v51 = vpop.f32.mrf.mxu2  ;;  %4054 = vmatpush.bf16.msrb.mxu1 %v3851_v50  ;;  %v3459_v50 = vunpack.c.1.s8 %v3271_v30  ;;  %v3672_v30 = vcvt.s32.f32 %v3416_v62  ;;  %v3703_v1 = vcvt.s32.f32 %v3447_v61  ;;  %v3707_v45 = vcvt.s32.f32 %v3451_v53 }
 0x319   :  { %3967 = vmatmul.bf16.vlgmr.msrb.gmra.mxu2 %v7388_v5  ;;  %v3914_v56 = vpack.c.bf16 %v3770_v43, %v3766_v44  ;;  %v3408_v31 = vunpack.c.0.s8 %v3260_v23  ;;  %v3502_v12 = vunpack.c.0.s8 %v3282_v11  ;;  %v3572_v46 = vcvt.s32.f32 %v3316_v35 }
 0x31a   :  { %4063 = vmatpush.bf16.msrb.mxu2 %v3899_v9  ;;  %v3715_v13 = vcvt.s32.f32 %v3459_v50  ;;  %v3420_v9 = vunpack.c.3.s8 %v3260_v23  ;;  %4027 = vmatpush.bf16.msra.mxu3 %v3918_v15  ;;  %v3883_v41 = vpack.c.bf16 %v3707_v45, %v3703_v1  ;;  %v3506_v7 = vunpack.c.1.s8 %v3282_v11  ;;  %v3291_v45 = vld [vmem:[#allocation4 + $0x7f0] sm:$0xff] }
 0x31b   :  { %v3758_v34 = vcvt.s32.f32 %v3502_v12  ;;  %v3439_v51 = vunpack.c.0.s8 %v7406_v0  ;;  %v3443_v57 = vunpack.c.1.s8 %v7406_v0  ;;  %v3304_v20 = vunpack.c.2.s8 %v3232_v32 }
 0x31c   :  { %4090 = vmatpush.bf16.msra.mxu0 %v3832_v21  ;;  %v3324_v21 = vunpack.c.3.s8 %v7393_v58  ;;  %4055 = vmatpush.bf16.msrb.mxu1 %v3847_v26  ;;  %v3887_v25 = vpack.c.bf16 %v3715_v13, %v3711_v14  ;;  %v3676_v52 = vcvt.s32.f32 %v3420_v9  ;;  %v3308_v19 = vunpack.c.3.s8 %v3232_v32 }
 0x31d   :  { %v3695_v4 = vcvt.s32.f32 %v3439_v51  ;;  %v3400_v60 = vunpack.c.2.s8 %v7417_v59  ;;  %v3699_v6 = vcvt.s32.f32 %v3443_v57  ;;  %v3560_v50 = vcvt.s32.f32 %v3304_v20 }
 0x31e   :  { %v3580_v3 = vcvt.s32.f32 %v3324_v21  ;;  %4064 = vmatpush.bf16.msrb.mxu2 %v3895_v42  ;;  %v3868_v40 = vpack.c.bf16 %v3676_v52, %v3672_v30  ;;  %v3312_v42 = vunpack.c.0.s8 %v7393_v58  ;;  %4028 = vmatpush.bf16.msra.mxu3 %v3914_v56  ;;  %v3404_v33 = vunpack.c.3.s8 %v7417_v59 }
 0x31f   :  { %v3564_v11 = vcvt.s32.f32 %v3308_v19  ;;  %v3494_v49 = vunpack.c.2.s8 %v3278_v17  ;;  %v3498_v14 = vunpack.c.3.s8 %v3278_v17  ;;  %v3879_v21 = vpack.c.bf16 %v3699_v6, %v3695_v4 }
 0x320   :  { %4091 = vmatpush.bf16.msra.mxu0 %v3828_v22  ;;  %v3820_v26 = vpack.c.bf16 %v3580_v3, %v3576_v29  ;;  %4056 = vmatpush.bf16.msrb.mxu1 %v3843_v38  ;;  %v3412_v22 = vunpack.c.1.s8 %v3260_v23  ;;  %v3568_v8 = vcvt.s32.f32 %v3312_v42  ;;  %v3664_v38 = vcvt.s32.f32 %v3408_v31  ;;  %v3263_v23 = vld [vmem:[#allocation4 + $0x710] sm:$0xff] }
 0x321   :  { %v3660_v0 = vcvt.s32.f32 %v3404_v33  ;;  %v3431_v15 = vunpack.c.2.s8 %v3263_v23  ;;  %v3435_v13 = vunpack.c.3.s8 %v3263_v23  ;;  %v3812_v29 = vpack.c.bf16 %v3564_v11, %v3560_v50  ;;  %v3287_v11 = vld [vmem:[#allocation4 + $0x7d0] sm:$0xff] }
 0x322   :  { %4065 = vmatpush.bf16.msrb.mxu2 %v3891_v2  ;;  %v3668_v10 = vcvt.s32.f32 %v3412_v22  ;;  %v3816_v58 = vpack.c.bf16 %v3572_v46, %v3568_v8  ;;  %v3762_v2 = vcvt.s32.f32 %v3506_v7  ;;  %v3750_v62 = vcvt.s32.f32 %v3494_v49 }
 0x323   :  { %v3296_v3 = vunpack.c.0.s8 %v3232_v32  ;;  %v3691_v30 = vcvt.s32.f32 %v3435_v13  ;;  %v3300_v27 = vunpack.c.1.s8 %v3232_v32  ;;  %v3392_v44 = vunpack.c.0.s8 %v7417_v59 }
 0x324   :  { %4092 = vmatpush.bf16.msra.mxu0 %v3824_v37  ;;  %4057 = vmatpush.bf16.msrb.mxu1 %v3839_v48  ;;  %v3864_v39 = vpack.c.bf16 %v3668_v10, %v3664_v38  ;;  %v3910_v36 = vpack.c.bf16 %v3762_v2, %v3758_v34  ;;  %v3656_v37 = vcvt.s32.f32 %v3400_v60  ;;  %v3754_v48 = vcvt.s32.f32 %v3498_v14  ;;  %v3276_v38 = vld [vmem:[#allocation4 + $0x778] sm:$0xff] }
 0x325   :  { %v3552_v52 = vcvt.s32.f32 %v3296_v3  ;;  %v3556_v43 = vcvt.s32.f32 %v3300_v27  ;;  %v3396_v1 = vunpack.c.1.s8 %v7417_v59  ;;  %v3648_v35 = vcvt.s32.f32 %v3392_v44 }
 0x326   :  { %4066 = vmatpush.bf16.msrb.mxu2 %v3887_v25  ;;  %4029 = vmatpush.bf16.msra.mxu3 %v3910_v36  ;;  %v3860_v16 = vpack.c.bf16 %v3660_v0, %v3656_v37  ;;  %v3687_v25 = vcvt.s32.f32 %v3431_v15  ;;  %v3490_v56 = vunpack.c.1.s8 %v3278_v17  ;;  %v3423_v31 = vunpack.c.0.s8 %v3263_v23  ;;  %v3248_v0 = vld [vmem:[#allocation4 + $0x698] sm:$0xff] }
 0x327   :  { %4058 = vmatmul.bf16.vlgmr.msrb.gmra.mxu1 %v7299_v47  ;;  %v3808_v22 = vpack.c.bf16 %v3556_v43, %v3552_v52  ;;  %v3652_v12 = vcvt.s32.f32 %v3396_v1  ;;  %v3543_v59 = vunpack.c.2.s8 %v3291_v45  ;;  %v3547_v10 = vunpack.c.3.s8 %v3291_v45 }
 0x328   :  { %4093 = vmatpush.bf16.msra.mxu0 %v3820_v26  ;;  %4102 = vmatpush.bf16.msra.mxu1 %v3868_v40  ;;  %v3906_v26 = vpack.c.bf16 %v3754_v48, %v3750_v62  ;;  %v3875_v53 = vpack.c.bf16 %v3691_v30, %v3687_v25  ;;  %v3486_v40 = vunpack.c.0.s8 %v3278_v17  ;;  %v3746_v46 = vcvt.s32.f32 %v3490_v56 }
 0x329   :  { %4019 = vmatmul.bf16.vlgmr.msra.gmra.mxu2 %v7388_v5  ;;  %v3679_v7 = vcvt.s32.f32 %v3423_v31  ;;  %v3856_v63 = vpack.c.bf16 %v3652_v12, %v3648_v35  ;;  %v3799_v2 = vcvt.s32.f32 %v3543_v59  ;;  %v3484_v60 = vunpack.c.3.s8 %v3276_v38 }
 0x32a   :  { %4067 = vmatpush.bf16.msrb.mxu2 %v3883_v41  ;;  %4030 = vmatpush.bf16.msra.mxu3 %v3906_v26  ;;  %v3742_v32 = vcvt.s32.f32 %v3486_v40  ;;  %v3427_v41 = vunpack.c.1.s8 %v3263_v23  ;;  %v3535_v23 = vunpack.c.0.s8 %v3291_v45  ;;  %v3539_v50 = vunpack.c.1.s8 %v3291_v45 }
 0x32b   :  { %v3740_v49 = vcvt.s32.f32 %v3484_v60  ;;  %v3527_v3 = vunpack.c.2.s8 %v3287_v11  ;;  %v3519_v56 = vunpack.c.0.s8 %v3287_v11  ;;  %v3523_v31 = vunpack.c.1.s8 %v3287_v11 }
 0x32c   :  { %4094 = vmatpush.bf16.msra.mxu0 %v3816_v58  ;;  %4103 = vmatpush.bf16.msra.mxu1 %v3864_v39  ;;  %v3186_v9 = vpop.f32.mrf.mxu3  ;;  %v3902_v58 = vpack.c.bf16 %v3746_v46, %v3742_v32  ;;  %v3803_v39 = vcvt.s32.f32 %v3547_v10  ;;  %v3791_v14 = vcvt.s32.f32 %v3535_v23  ;;  %v3795_v15 = vcvt.s32.f32 %v3539_v50 }
 0x32d   :  { %v3187_v61 = vadd.f32 %v3186_v9, %v7365_v55  ;;  %v3252_v55 = vld [vmem:[#allocation4 + $0x6b8] sm:$0xff]  ;;  %v3531_v9 = vunpack.c.3.s8 %v3287_v11  ;;  %v3783_v52 = vcvt.s32.f32 %v3527_v3  ;;  %v3360_v12 = vunpack.c.0.s8 %v3248_v0 }
 0x32e   :  { %4068 = vmatpush.bf16.msrb.mxu2 %v3879_v21  ;;  %v3384_v34 = vunpack.c.2.s8 %v3252_v55  ;;  %v3388_v57 = vunpack.c.3.s8 %v3252_v55  ;;  %4031 = vmatpush.bf16.msra.mxu3 %v3902_v58  ;;  %v3931_v36 = vpack.c.bf16 %v3803_v39, %v3799_v2  ;;  %v3376_v33 = vunpack.c.0.s8 %v3252_v55 }
 0x32f   :  { %v3204_v42 = vmul.f32 %v3196_v18, %v3187_v61  ;;  %v3683_v18 = vcvt.s32.f32 %v3427_v41  ;;  %v3380_v21 = vunpack.c.1.s8 %v3252_v55  ;;  %v3927_v25 = vpack.c.bf16 %v3795_v15, %v3791_v14  ;;  %v3283_v41 = vld [vmem:[#allocation4 + $0x7b0] sm:$0xff] }
 0x330   :  { %4095 = vmatpush.bf16.msra.mxu0 %v3812_v29  ;;  %4104 = vmatpush.bf16.msra.mxu1 %v3860_v16  ;;  %v3640_v28 = vcvt.s32.f32 %v3384_v34  ;;  %v3644_v19 = vcvt.s32.f32 %v3388_v57  ;;  %v3632_v13 = vcvt.s32.f32 %v3376_v33  ;;  %v3476_v29 = vunpack.c.1.s8 %v3276_v38  ;;  %v3272_v16 = vld [vmem:[#allocation4 + $0x758] sm:$0xff] }
 0x331   :  { %v3219_v8 = vadd.f32 %v3211_v24, %v3204_v42  ;;  %v3871_v17 = vpack.c.bf16 %v3683_v18, %v3679_v7  ;;  %v3480_v24 = vunpack.c.2.s8 %v3276_v38  ;;  %v3636_v48 = vcvt.s32.f32 %v3380_v21 }
 0x332   :  { %4069 = vmatpush.bf16.msrb.mxu2 %v3875_v53  ;;  %v3852_v37 = vpack.c.bf16 %v3644_v19, %v3640_v28  ;;  %v3732_v27 = vcvt.s32.f32 %v3476_v29  ;;  %v3368_v61 = vunpack.c.2.s8 %v3248_v0  ;;  %v3787_v44 = vcvt.s32.f32 %v3531_v9 }
 0x333   :  { %v3223_v51 = vmax.f32 %v3219_v8, 0.0  ;;  %v3736_v6 = vcvt.s32.f32 %v3480_v24  ;;  %v3848_v26 = vpack.c.bf16 %v3636_v48, %v3632_v13  ;;  %v3372_v53 = vunpack.c.3.s8 %v3248_v0 }
 0x334   :  { %4096 = vmatpush.bf16.msra.mxu0 %v3808_v22  ;;  %v3188_v20 = vpop.f32.mrf.mxu3  ;;  %4105 = vmatpush.bf16.msra.mxu1 %v3856_v63  ;;  %v3624_v1 = vcvt.s32.f32 %v3368_v61  ;;  %v3464_v40 = vunpack.c.2.s8 %v3272_v16  ;;  %v3468_v45 = vunpack.c.3.s8 %v3272_v16  ;;  %v3923_v42 = vpack.c.bf16 %v3787_v44, %v3783_v52  ;;  %v3292_v61 = vld [vmem:[#allocation4 + $0x7f8] sm:$0xff] }
 0x335   :  { %v7432_v4 = vpack.c.bf16 %v3223_v51, %v3223_v51  ;;  %v3900_v62 = vpack.c.bf16 %v3740_v49, %v3736_v6  ;;  %v3628_v35 = vcvt.s32.f32 %v3372_v53  ;;  %v3364_v32 = vunpack.c.1.s8 %v3248_v0 }
 0x336   :  { %4070 = vmatpush.bf16.msrb.mxu2 %v3871_v17  ;;  %v3720_v55 = vcvt.s32.f32 %v3464_v40  ;;  %v3724_v22 = vcvt.s32.f32 %v3468_v45  ;;  %v3775_v46 = vcvt.s32.f32 %v3519_v56  ;;  %v3779_v7 = vcvt.s32.f32 %v3523_v31 }
 0x337   :  { %4097 = vmatmul.bf16.vlgmr.msra.gmra.mxu0 %v7225_v54  ;;  %3980 = vmatmul.bf16.vlgmr.msrb.gmra.mxu3 %v7432_v4  ;;  %v3472_v54 = vunpack.c.0.s8 %v3276_v38  ;;  %v3844_v8 = vpack.c.bf16 %v3628_v35, %v3624_v1  ;;  %v3456_v59 = vunpack.c.0.s8 %v3272_v16  ;;  %v3268_v38 = vld [vmem:[#allocation4 + $0x738] sm:$0xff]  ;;  %v3616_v18 = vcvt.s32.f32 %v3360_v12 }
 0x338   :  { %4076 = vmatpush.bf16.msrb.mxu3 %v3931_v36  ;;  %4106 = vmatpush.bf16.msra.mxu1 %v3852_v37  ;;  %v3892_v63 = vpack.c.bf16 %v3724_v22, %v3720_v55  ;;  %v3620_v10 = vcvt.s32.f32 %v3364_v32  ;;  %v3460_v34 = vunpack.c.1.s8 %v3272_v16  ;;  %v3919_v51 = vpack.c.bf16 %v3779_v7, %v3775_v46  ;;  %v3279_v36 = vld [vmem:[#allocation4 + $0x790] sm:$0xff]  ;;  %v3264_v37 = vld [vmem:[#allocation4 + $0x718] sm:$0xff] }
 0x339   :  { %4071 = vmatmul.bf16.vlgmr.msrb.gmra.mxu2 %v7388_v5  ;;  %v3728_v30 = vcvt.s32.f32 %v3472_v54  ;;  %v3712_v58 = vcvt.s32.f32 %v3456_v59  ;;  %v3511_v2 = vunpack.c.2.s8 %v3283_v41  ;;  %v3515_v57 = vunpack.c.3.s8 %v3283_v41  ;;  %v3288_v22 = vld [vmem:[#allocation4 + $0x7d8] sm:$0xff] }
 0x33a   :  { %4115 = vmatpush.bf16.msra.mxu2 %v3900_v62  ;;  %v3840_v20 = vpack.c.bf16 %v3620_v10, %v3616_v18  ;;  %v3716_v17 = vcvt.s32.f32 %v3460_v34  ;;  %v3448_v39 = vunpack.c.2.s8 %v3268_v38  ;;  %v3452_v28 = vunpack.c.3.s8 %v3268_v38 }
 0x33b   :  { %v3896_v43 = vpack.c.bf16 %v3732_v27, %v3728_v30  ;;  %v3767_v24 = vcvt.s32.f32 %v3511_v2  ;;  %v3771_v19 = vcvt.s32.f32 %v3515_v57  ;;  %v3503_v60 = vunpack.c.0.s8 %v3283_v41  ;;  %v3284_v57 = vld [vmem:[#allocation4 + $0x7b8] sm:$0xff] }
 0x33c   :  { %4077 = vmatpush.bf16.msrb.mxu3 %v3927_v25  ;;  %4107 = vmatpush.bf16.msra.mxu1 %v3848_v26  ;;  %v3507_v23 = vunpack.c.1.s8 %v3283_v41  ;;  %v3888_v6 = vpack.c.bf16 %v3716_v17, %v3712_v58  ;;  %v3704_v50 = vcvt.s32.f32 %v3448_v39  ;;  %v3708_v33 = vcvt.s32.f32 %v3452_v28 }
 0x33d   :  { %v3440_v11 = vunpack.c.0.s8 %v3268_v38  ;;  %v3915_v49 = vpack.c.bf16 %v3771_v19, %v3767_v24  ;;  %v3759_v14 = vcvt.s32.f32 %v3503_v60  ;;  %v3444_v0 = vunpack.c.1.s8 %v3268_v38 }
 0x33e   :  { %4116 = vmatpush.bf16.msra.mxu2 %v3896_v43  ;;  %v3763_v21 = vcvt.s32.f32 %v3507_v23  ;;  %v3884_v15 = vpack.c.bf16 %v3708_v33, %v3704_v50  ;;  %v3495_v54 = vunpack.c.2.s8 %v3279_v36  ;;  %v3499_v29 = vunpack.c.3.s8 %v3279_v36  ;;  %v3280_v50 = vld [vmem:[#allocation4 + $0x798] sm:$0xff] }
 0x33f   :  { %v3696_v13 = vcvt.s32.f32 %v3440_v11  ;;  %v3700_v48 = vcvt.s32.f32 %v3444_v0  ;;  %v3432_v3 = vunpack.c.2.s8 %v3264_v37  ;;  %v3436_v9 = vunpack.c.3.s8 %v3264_v37 }
 0x340   :  { %4078 = vmatpush.bf16.msrb.mxu3 %v3923_v42  ;;  %4108 = vmatpush.bf16.msra.mxu1 %v3844_v8  ;;  %v3911_v62 = vpack.c.bf16 %v3763_v21, %v3759_v14  ;;  %v3751_v16 = vcvt.s32.f32 %v3495_v54  ;;  %v3755_v25 = vcvt.s32.f32 %v3499_v29  ;;  %v3487_v30 = vunpack.c.0.s8 %v3279_v36 }
 0x341   :  { %v3491_v27 = vunpack.c.1.s8 %v3279_v36  ;;  %v3880_v26 = vpack.c.bf16 %v3700_v48, %v3696_v13  ;;  %v3688_v52 = vcvt.s32.f32 %v3432_v3  ;;  %v3692_v44 = vcvt.s32.f32 %v3436_v9 }
 0x342   :  { %4117 = vmatpush.bf16.msra.mxu2 %v3892_v63  ;;  %v3424_v53 = vunpack.c.0.s8 %v3264_v37  ;;  %v3428_v43 = vunpack.c.1.s8 %v3264_v37  ;;  %v3544_v1 = vunpack.c.2.s8 %v3292_v61  ;;  %v3548_v40 = vunpack.c.3.s8 %v3292_v61 }
 0x343   :  { %v3907_v45 = vpack.c.bf16 %v3755_v25, %v3751_v16  ;;  %v3743_v42 = vcvt.s32.f32 %v3487_v30  ;;  %v3747_v35 = vcvt.s32.f32 %v3491_v27  ;;  %v3540_v55 = vunpack.c.1.s8 %v3292_v61 }
 0x344   :  { %4079 = vmatpush.bf16.msrb.mxu3 %v3919_v51  ;;  %4109 = vmatpush.bf16.msra.mxu1 %v3840_v20  ;;  %v3800_v56 = vcvt.s32.f32 %v3544_v1  ;;  %v3804_v31 = vcvt.s32.f32 %v3548_v40  ;;  %v3876_v12 = vpack.c.bf16 %v3692_v44, %v3688_v52  ;;  %v3680_v32 = vcvt.s32.f32 %v3424_v53 }
 0x345   :  { %v3684_v41 = vcvt.s32.f32 %v3428_v43  ;;  %v3903_v8 = vpack.c.bf16 %v3747_v35, %v3743_v42  ;;  %v3528_v46 = vunpack.c.2.s8 %v3288_v22  ;;  %v3796_v38 = vcvt.s32.f32 %v3540_v55  ;;  %v4188_v43 = vld [vmem:[#allocation4 + $0x840] sm:$0xff] }
 0x346   :  { %4118 = vmatpush.bf16.msra.mxu2 %v3888_v6  ;;  %v3932_v7 = vpack.c.bf16 %v3804_v31, %v3800_v56  ;;  %v3532_v63 = vunpack.c.3.s8 %v3288_v22  ;;  %v3520_v10 = vunpack.c.0.s8 %v3288_v22  ;;  %v3524_v2 = vunpack.c.1.s8 %v3288_v22 }
 0x347   :  { %4032 = vmatmul.bf16.vlgmr.msra.gmra.mxu3 %v7432_v4  ;;  %4110 = vmatmul.bf16.vlgmr.msra.gmra.mxu1 %v7299_v47  ;;  %v3536_v47 = vunpack.c.0.s8 %v3292_v61  ;;  %v3872_v18 = vpack.c.bf16 %v3684_v41, %v3680_v32  ;;  %v3784_v51 = vcvt.s32.f32 %v3528_v46  ;;  %v3512_v28 = vunpack.c.2.s8 %v3284_v57  ;;  %v4184_v32 = vld [vmem:[#allocation4 + $0x820] sm:$0xff] }
 0x348   :  { %4080 = vmatpush.bf16.msrb.mxu3 %v3915_v49  ;;  %v3788_v58 = vcvt.s32.f32 %v3532_v63  ;;  %v3776_v20 = vcvt.s32.f32 %v3520_v10  ;;  %v3780_v39 = vcvt.s32.f32 %v3524_v2  ;;  %v3516_v24 = vunpack.c.3.s8 %v3284_v57  ;;  %v4208_v41 = vld [vmem:[#allocation4 + $0x8e0] sm:$0xff] }
 0x349   :  { %v3792_v59 = vcvt.s32.f32 %v3536_v47  ;;  %v3504_v19 = vunpack.c.0.s8 %v3284_v57  ;;  %v3768_v23 = vcvt.s32.f32 %v3512_v28  ;;  %v3508_v6 = vunpack.c.1.s8 %v3284_v57 }
 0x34a   :  { %4119 = vmatpush.bf16.msra.mxu2 %v3884_v15  ;;  %v3924_v17 = vpack.c.bf16 %v3788_v58, %v3784_v51  ;;  %v3920_v60 = vpack.c.bf16 %v3780_v39, %v3776_v20  ;;  %v3772_v36 = vcvt.s32.f32 %v3516_v24  ;;  %v3496_v33 = vunpack.c.2.s8 %v3280_v50 }
 0x34b   :  { %v3928_v34 = vpack.c.bf16 %v3796_v38, %v3792_v59  ;;  %v3500_v11 = vunpack.c.3.s8 %v3280_v50  ;;  %v3760_v49 = vcvt.s32.f32 %v3504_v19  ;;  %v3764_v14 = vcvt.s32.f32 %v3508_v6  ;;  %v4180_v19 = vld [vmem:[#allocation4 + $0x800] sm:$0xff] }
 0x34c   :  { %4081 = vmatpush.bf16.msrb.mxu3 %v3911_v62  ;;  %v3916_v37 = vpack.c.bf16 %v3772_v36, %v3768_v23  ;;  %v3752_v21 = vcvt.s32.f32 %v3496_v33  ;;  %v3488_v15 = vunpack.c.0.s8 %v3280_v50  ;;  %v3492_v13 = vunpack.c.1.s8 %v3280_v50 }
 0x34d   :  { %v3756_v0 = vcvt.s32.f32 %v3500_v11  ;;  %v3912_v54 = vpack.c.bf16 %v3764_v14, %v3760_v49  ;;  %v4284_v1 = vunpack.c.2.s8 %v4188_v43  ;;  %v4288_v40 = vunpack.c.3.s8 %v4188_v43 }
 0x34e   :  { %4120 = vmatpush.bf16.msra.mxu2 %v3880_v26  ;;  %v3744_v16 = vcvt.s32.f32 %v3488_v15  ;;  %v3748_v25 = vcvt.s32.f32 %v3492_v13  ;;  %v4280_v42 = vunpack.c.1.s8 %v4188_v43  ;;  %v4272_v46 = vunpack.c.3.s8 %v4184_v32 }
 0x34f   :  { %v3908_v9 = vpack.c.bf16 %v3756_v0, %v3752_v21  ;;  %v4540_v35 = vcvt.s32.f32 %v4284_v1  ;;  %v4544_v56 = vcvt.s32.f32 %v4288_v40  ;;  %v4368_v59 = vunpack.c.3.s8 %v4208_v41 }
 0x350   :  { %4082 = vmatpush.bf16.msrb.mxu3 %v3907_v45  ;;  %v3904_v44 = vpack.c.bf16 %v3748_v25, %v3744_v16  ;;  %v4276_v45 = vunpack.c.0.s8 %v4188_v43  ;;  %v4536_v47 = vcvt.s32.f32 %v4280_v42  ;;  %v4528_v63 = vcvt.s32.f32 %v4272_v46 }
 0x351   :  { %v4776_v55 = vpack.c.bf16 %v4544_v56, %v4540_v35  ;;  %v4624_v10 = vcvt.s32.f32 %v4368_v59  ;;  %v4260_v58 = vunpack.c.0.s8 %v4184_v32  ;;  %v4264_v2 = vunpack.c.1.s8 %v4184_v32 }
 0x352   :  { %4121 = vmatpush.bf16.msra.mxu2 %v3876_v12  ;;  %v4532_v31 = vcvt.s32.f32 %v4276_v45  ;;  %v4360_v57 = vunpack.c.1.s8 %v4208_v41  ;;  %v4252_v23 = vunpack.c.2.s8 %v4180_v19  ;;  %v4256_v36 = vunpack.c.3.s8 %v4180_v19 }
 0x353   :  { %v4520_v39 = vcvt.s32.f32 %v4264_v2  ;;  %v4244_v13 = vunpack.c.0.s8 %v4180_v19 }
 0x354   :  { %4083 = vmatpush.bf16.msrb.mxu3 %v3903_v8  ;;  %v4772_v12 = vpack.c.bf16 %v4536_v47, %v4532_v31  ;;  %v4268_v8 = vunpack.c.2.s8 %v4184_v32  ;;  %v4616_v24 = vcvt.s32.f32 %v4360_v57  ;;  %v4512_v49 = vcvt.s32.f32 %v4256_v36 }
 0x355   :  { %v4500_v25 = vcvt.s32.f32 %v4244_v13 }
 0x356   :  { %4122 = vmatpush.bf16.msra.mxu2 %v3872_v18  ;;  %v4524_v38 = vcvt.s32.f32 %v4268_v8 }
 0x357   :  { %4084 = vmatmul.bf16.vlgmr.msrb.gmra.mxu3 %v7432_v4 }
 0x358   :  { %4128 = vmatpush.bf16.msra.mxu3 %v3932_v7  ;;  %v4364_v7 = vunpack.c.2.s8 %v4208_v41 }
 0x359   :  { %4123 = vmatmul.bf16.vlgmr.msra.gmra.mxu2 %v7388_v5  ;;  %v4192_v5 = vld [vmem:[#allocation4 + $0x860] sm:$0xff] }
 0x35a   :  { %v4300_v29 = vunpack.c.2.s8 %v4192_v5  ;;  %v4304_v62 = vunpack.c.3.s8 %v4192_v5  ;;  %v4292_v48 = vunpack.c.0.s8 %v4192_v5  ;;  %v4296_v3 = vunpack.c.1.s8 %v4192_v5 }
 0x35b   :  { %v4620_v18 = vcvt.s32.f32 %v4364_v7 }
 0x35c   :  { %4129 = vmatpush.bf16.msra.mxu3 %v3928_v34  ;;  %v4556_v30 = vcvt.s32.f32 %v4300_v29  ;;  %v4560_v27 = vcvt.s32.f32 %v4304_v62  ;;  %v4548_v61 = vcvt.s32.f32 %v4292_v48  ;;  %v4552_v26 = vcvt.s32.f32 %v4296_v3  ;;  %v4193_v62 = vld [vmem:[#allocation4 + $0x868] sm:$0xff] }
 0x35d   :  { %v4768_v34 = vpack.c.bf16 %v4528_v63, %v4524_v38  ;;  %v4816_v51 = vpack.c.bf16 %v4624_v10, %v4620_v18  ;;  %v4305_v16 = vunpack.c.3.s8 %v4193_v62  ;;  %v4293_v47 = vunpack.c.0.s8 %v4193_v62  ;;  %v4189_v63 = vld [vmem:[#allocation4 + $0x848] sm:$0xff] }
 0x35e   :  { %v4784_v52 = vpack.c.bf16 %v4560_v27, %v4556_v30  ;;  %v4780_v53 = vpack.c.bf16 %v4552_v26, %v4548_v61  ;;  %v4200_v61 = vld [vmem:[#allocation4 + $0x8a0] sm:$0xff]  ;;  %v4285_v2 = vunpack.c.2.s8 %v4189_v63 }
 0x35f   :  { %4897 = vmatpush.bf16.msrb.mxu1 %v4816_v51  ;;  %v4224_v26 = vld [vmem:[#allocation4 + $0x960] sm:$0xff]  ;;  %v4332_v43 = vunpack.c.2.s8 %v4200_v61  ;;  %v4336_v40 = vunpack.c.3.s8 %v4200_v61  ;;  %v4549_v8 = vcvt.s32.f32 %v4293_v47  ;;  %v4324_v38 = vunpack.c.0.s8 %v4200_v61 }
 0x360   :  { %4130 = vmatpush.bf16.msra.mxu3 %v3924_v17  ;;  %4884 = vmatpush.bf16.msrb.mxu0 %v4784_v52  ;;  %v4516_v17 = vcvt.s32.f32 %v4260_v58  ;;  %v4428_v45 = vunpack.c.2.s8 %v4224_v26  ;;  %v4432_v42 = vunpack.c.3.s8 %v4224_v26  ;;  %v4420_v51 = vunpack.c.0.s8 %v4224_v26 }
 0x361   :  { %v4588_v31 = vcvt.s32.f32 %v4332_v43  ;;  %v4424_v58 = vunpack.c.1.s8 %v4224_v26  ;;  %v4580_v57 = vcvt.s32.f32 %v4324_v38 }
 0x362   :  { %v4764_v33 = vpack.c.bf16 %v4520_v39, %v4516_v17  ;;  %v4688_v32 = vcvt.s32.f32 %v4432_v42  ;;  %v4196_v17 = vld [vmem:[#allocation4 + $0x880] sm:$0xff] }
 0x363   :  { %v4220_v39 = vld [vmem:[#allocation4 + $0x940] sm:$0xff]  ;;  %v4316_v36 = vunpack.c.2.s8 %v4196_v17 }
 0x364   :  { %4131 = vmatpush.bf16.msra.mxu3 %v3920_v60  ;;  %4885 = vmatpush.bf16.msrb.mxu0 %v4780_v53  ;;  %v4204_v60 = vld [vmem:[#allocation4 + $0x8c0] sm:$0xff]  ;;  %v4561_v53 = vcvt.s32.f32 %v4305_v16  ;;  %v4312_v16 = vunpack.c.1.s8 %v4196_v17 }
 0x365   :  { %v4348_v6 = vunpack.c.2.s8 %v4204_v60  ;;  %v4352_v50 = vunpack.c.3.s8 %v4204_v60  ;;  %v4340_v5 = vunpack.c.0.s8 %v4204_v60  ;;  %v4344_v29 = vunpack.c.1.s8 %v4204_v60 }
 0x366   :  { %v4541_v60 = vcvt.s32.f32 %v4285_v2 }
 0x367   :  { %v4604_v14 = vcvt.s32.f32 %v4348_v6  ;;  %v4608_v21 = vcvt.s32.f32 %v4352_v50  ;;  %v4596_v27 = vcvt.s32.f32 %v4340_v5  ;;  %v4600_v52 = vcvt.s32.f32 %v4344_v29 }
 0x368   :  { %4132 = vmatpush.bf16.msra.mxu3 %v3916_v37  ;;  %4886 = vmatpush.bf16.msrb.mxu0 %v4776_v55  ;;  %v4508_v37 = vcvt.s32.f32 %v4252_v23  ;;  %v4592_v55 = vcvt.s32.f32 %v4336_v40  ;;  %v4320_v6 = vunpack.c.3.s8 %v4196_v17  ;;  %v4412_v50 = vunpack.c.2.s8 %v4220_v39 }
 0x369   :  { %v4808_v15 = vpack.c.bf16 %v4608_v21, %v4604_v14  ;;  %v4804_v35 = vpack.c.bf16 %v4600_v52, %v4596_v27  ;;  %v4572_v21 = vcvt.s32.f32 %v4316_v36  ;;  %v4281_v5 = vunpack.c.1.s8 %v4189_v63 }
 0x36a   :  { %v4760_v0 = vpack.c.bf16 %v4512_v49, %v4508_v37  ;;  %v4800_v46 = vpack.c.bf16 %v4592_v55, %v4588_v31  ;;  %v4416_v37 = vunpack.c.3.s8 %v4220_v39  ;;  %v4277_v49 = vunpack.c.0.s8 %v4189_v63  ;;  %v4216_v31 = vld [vmem:[#allocation4 + $0x920] sm:$0xff] }
 0x36b   :  { %v4537_v52 = vcvt.s32.f32 %v4281_v5  ;;  %v4392_v36 = vunpack.c.1.s8 %v4216_v31 }
 0x36c   :  { %4133 = vmatpush.bf16.msra.mxu3 %v3912_v54  ;;  %4887 = vmatpush.bf16.msrb.mxu0 %v4772_v12  ;;  %v4248_v54 = vunpack.c.1.s8 %v4180_v19  ;;  %v4684_v12 = vcvt.s32.f32 %v4428_v45  ;;  %v4680_v19 = vcvt.s32.f32 %v4424_v58  ;;  %v4533_v29 = vcvt.s32.f32 %v4277_v49 }
 0x36e   :  { %v4504_v30 = vcvt.s32.f32 %v4248_v54  ;;  %v4848_v7 = vpack.c.bf16 %v4688_v32, %v4684_v12  ;;  %v4672_v54 = vcvt.s32.f32 %v4416_v37  ;;  %v4773_v45 = vpack.c.bf16 %v4537_v52, %v4533_v29 }
 0x36f   :  { %v4396_v32 = vunpack.c.2.s8 %v4216_v31 }
 0x370   :  { %4134 = vmatpush.bf16.msra.mxu3 %v3908_v9  ;;  %4888 = vmatpush.bf16.msrb.mxu0 %v4768_v34  ;;  %v4301_v9 = vunpack.c.2.s8 %v4193_v62  ;;  %v4756_v1 = vpack.c.bf16 %v4504_v30, %v4500_v25  ;;  %v4328_v34 = vunpack.c.1.s8 %v4200_v61  ;;  %v4404_v25 = vunpack.c.0.s8 %v4220_v39  ;;  %v4185_v30 = vld [vmem:[#allocation4 + $0x828] sm:$0xff] }
 0x371   :  { %4910 = vmatpush.bf16.msrb.mxu2 %v4848_v7  ;;  %v4652_v38 = vcvt.s32.f32 %v4396_v32 }
 0x372   :  { %v4660_v40 = vcvt.s32.f32 %v4404_v25 }
 0x374   :  { %4135 = vmatpush.bf16.msra.mxu3 %v3904_v44  ;;  %v7442_v22 = vpop.f32.mrf.mxu0  ;;  %4889 = vmatpush.bf16.msrb.mxu0 %v4764_v33  ;;  %v4557_v44 = vcvt.s32.f32 %v4301_v9  ;;  %v4308_v9 = vunpack.c.0.s8 %v4196_v17  ;;  %v4181_v17 = vld [vmem:[#allocation4 + $0x808] sm:$0xff] }
 0x376   :  { %v4785_v56 = vpack.c.bf16 %v4561_v53, %v4557_v44  ;;  %v4408_v44 = vunpack.c.1.s8 %v4220_v39  ;;  %v4269_v53 = vunpack.c.2.s8 %v4185_v30  ;;  %v4564_v43 = vcvt.s32.f32 %v4308_v9 }
 0x377   :  { %4136 = vmatmul.bf16.vlgmr.msra.gmra.mxu3 %v7432_v4  ;;  %v4356_v4 = vunpack.c.0.s8 %v4208_v41  ;;  %v4297_v41 = vunpack.c.1.s8 %v4193_v62 }
 0x378   :  { %4890 = vmatpush.bf16.msrb.mxu0 %v4760_v0  ;;  %v4576_v0 = vcvt.s32.f32 %v4320_v6  ;;  %v4664_v42 = vcvt.s32.f32 %v4408_v44  ;;  %v4205_v6 = vld [vmem:[#allocation4 + $0x8c8] sm:$0xff] }
 0x379   :  { %v4612_v28 = vcvt.s32.f32 %v4356_v4  ;;  %v4553_v59 = vcvt.s32.f32 %v4297_v41  ;;  %v4349_v29 = vunpack.c.2.s8 %v4205_v6 }
 0x37a   :  { %v4792_v62 = vpack.c.bf16 %v4576_v0, %v4572_v21  ;;  %v4836_v41 = vpack.c.bf16 %v4664_v42, %v4660_v40  ;;  %v4648_v21 = vcvt.s32.f32 %v4392_v36  ;;  %v4253_v0 = vunpack.c.2.s8 %v4181_v17 }
 0x37b   :  { %v4812_v11 = vpack.c.bf16 %v4616_v24, %v4612_v28  ;;  %v4781_v4 = vpack.c.bf16 %v4553_v59, %v4549_v8  ;;  %v4584_v28 = vcvt.s32.f32 %v4328_v34  ;;  %v4676_v24 = vcvt.s32.f32 %v4420_v51 }
 0x37c   :  { %v3944_v20 = vpop.f32.mrf.mxu0  ;;  %4891 = vmatpush.bf16.msrb.mxu0 %v4756_v1  ;;  %v4568_v1 = vcvt.s32.f32 %v4312_v16  ;;  %v4341_v40 = vunpack.c.0.s8 %v4205_v6 }
 0x37d   :  { %4898 = vmatpush.bf16.msrb.mxu1 %v4812_v11  ;;  %v4289_v20 = vunpack.c.3.s8 %v4189_v63  ;;  %v4796_v33 = vpack.c.bf16 %v4584_v28, %v4580_v57  ;;  %v4844_v11 = vpack.c.bf16 %v4680_v19, %v4676_v24  ;;  %v4265_v63 = vunpack.c.1.s8 %v4185_v30  ;;  %v7460_v24 = vld [vmem:[#allocation9 + $0x4] ss:$8 sm:$0xf] }
 0x37e   :  { %v4788_v47 = vpack.c.bf16 %v4568_v1, %v4564_v43  ;;  %v4249_v1 = vunpack.c.1.s8 %v4181_v17 }
 0x37f   :  { %v4545_v23 = vcvt.s32.f32 %v4289_v20  ;;  %4911 = vmatpush.bf16.msrb.mxu2 %v4844_v11  ;;  %v4521_v57 = vcvt.s32.f32 %v4265_v63  ;;  %v4159_v11 = vperm.slane %v7460_v24, 0 }
 0x380   :  { %4936 = vmatpush.bf16.msra.mxu0 %v4785_v56  ;;  %v4525_v56 = vcvt.s32.f32 %v4269_v53  ;;  %v4245_v53 = vunpack.c.0.s8 %v4181_v17  ;;  %v4505_v32 = vcvt.s32.f32 %v4249_v1  ;;  %v4236_v1 = vld [vmem:[#allocation4 + $0x9c0] sm:$0xff] }
 0x381   :  { %4899 = vmatpush.bf16.msrb.mxu1 %v4808_v15  ;;  %v4777_v14 = vpack.c.bf16 %v4545_v23, %v4541_v60  ;;  %v4668_v15 = vcvt.s32.f32 %v4412_v50  ;;  %v4388_v23 = vunpack.c.0.s8 %v4216_v31 }
 0x382   :  { %v4501_v42 = vcvt.s32.f32 %v4245_v53 }
 0x383   :  { %v4840_v26 = vpack.c.bf16 %v4672_v54, %v4668_v15  ;;  %v4257_v15 = vunpack.c.3.s8 %v4181_v17  ;;  %v4212_v54 = vld [vmem:[#allocation4 + $0x900] sm:$0xff] }
 0x384   :  { %v7444_v48 = vpop.f32.mrf.mxu1  ;;  %v7446_v3 = vpop.f32.mrf.mxu0  ;;  %4937 = vmatpush.bf16.msra.mxu0 %v4781_v4  ;;  %v4380_v9 = vunpack.c.2.s8 %v4212_v54  ;;  %v4757_v63 = vpack.c.bf16 %v4505_v32, %v4501_v42  ;;  %v4221_v32 = vld [vmem:[#allocation4 + $0x948] sm:$0xff] }
 0x385   :  { %4900 = vmatpush.bf16.msrb.mxu1 %v4804_v35  ;;  %v7450_v13 = vadd.f32 %v7444_v48, %v7442_v22  ;;  %v4209_v22 = vld [vmem:[#allocation4 + $0x8e8] sm:$0xff]  ;;  %4912 = vmatpush.bf16.msrb.mxu2 %v4840_v26  ;;  %v4273_v35 = vunpack.c.3.s8 %v4185_v30  ;;  %v4513_v25 = vcvt.s32.f32 %v4257_v15  ;;  %v4605_v26 = vcvt.s32.f32 %v4349_v29 }
 0x386   :  { %v4365_v55 = vunpack.c.2.s8 %v4209_v22  ;;  %v4369_v12 = vunpack.c.3.s8 %v4209_v22  ;;  %v4357_v58 = vunpack.c.0.s8 %v4209_v22  ;;  %v4361_v20 = vunpack.c.1.s8 %v4209_v22 }
 0x387   :  { %v4529_v8 = vcvt.s32.f32 %v4273_v35  ;;  %v4636_v44 = vcvt.s32.f32 %v4380_v9  ;;  %v4345_v35 = vunpack.c.1.s8 %v4205_v6 }
 0x388   :  { %4938 = vmatpush.bf16.msra.mxu0 %v4777_v14  ;;  %v4621_v7 = vcvt.s32.f32 %v4365_v55  ;;  %v4625_v59 = vcvt.s32.f32 %v4369_v12  ;;  %v4613_v60 = vcvt.s32.f32 %v4357_v58  ;;  %v4617_v49 = vcvt.s32.f32 %v4361_v20  ;;  %v4225_v58 = vld [vmem:[#allocation4 + $0x968] sm:$0xff] }
 0x389   :  { %4901 = vmatpush.bf16.msrb.mxu1 %v4800_v46  ;;  %v4400_v46 = vunpack.c.3.s8 %v4216_v31  ;;  %4913 = vmatpush.bf16.msrb.mxu2 %v4836_v41  ;;  %v4644_v14 = vcvt.s32.f32 %v4388_v23  ;;  %v7466_v31 = vld [vmem:[#allocation4 + $0x9e0] sm:$0xff]  ;;  %v4597_v41 = vcvt.s32.f32 %v4341_v40  ;;  %v4429_v36 = vunpack.c.2.s8 %v4225_v58 }
 0x38a   :  { %v4817_v2 = vpack.c.bf16 %v4625_v59, %v4621_v7  ;;  %v4813_v5 = vpack.c.bf16 %v4617_v49, %v4613_v60  ;;  %v4601_v7 = vcvt.s32.f32 %v4345_v35  ;;  %v4496_v20 = vunpack.c.3.s8 %v7466_v31  ;;  %v4197_v35 = vld [vmem:[#allocation4 + $0x888] sm:$0xff] }
 0x38b   :  { %v4656_v34 = vcvt.s32.f32 %v4400_v46  ;;  %v4828_v16 = vpack.c.bf16 %v4648_v21, %v4644_v14  ;;  %v4201_v46 = vld [vmem:[#allocation4 + $0x8a8] sm:$0xff]  ;;  %v4425_v42 = vunpack.c.1.s8 %v4225_v58 }
 0x38c   :  { %v3957_v18 = vpop.f32.mrf.mxu1  ;;  %v3996_v10 = vpop.f32.mrf.mxu0  ;;  %4939 = vmatpush.bf16.msra.mxu0 %v4773_v45  ;;  %v4333_v17 = vunpack.c.2.s8 %v4201_v46  ;;  %v4752_v60 = vcvt.s32.f32 %v4496_v20  ;;  %v4325_v53 = vunpack.c.0.s8 %v4201_v46  ;;  %v4413_v20 = vunpack.c.2.s8 %v4221_v32 }
 0x38d   :  { %4902 = vmatpush.bf16.msrb.mxu1 %v4796_v33  ;;  %v4769_v18 = vpack.c.bf16 %v4529_v8, %v4525_v56  ;;  %v7457_v10 = vld [vmem:[#allocation6 + $0x3] ss:$8 sm:$0xf]  ;;  %v4832_v19 = vpack.c.bf16 %v4656_v34, %v4652_v38  ;;  %v4372_v38 = vunpack.c.0.s8 %v4212_v54  ;;  %v4376_v34 = vunpack.c.1.s8 %v4212_v54 }
 0x38e   :  { %v4144_v4 = vperm.slane %v7457_v10, 0  ;;  %v4589_v23 = vcvt.s32.f32 %v4333_v17 }
 0x38f   :  { %4914 = vmatpush.bf16.msrb.mxu2 %v4832_v19  ;;  %v4337_v19 = vunpack.c.3.s8 %v4201_v46 }
 0x390   :  { %4940 = vmatpush.bf16.msra.mxu0 %v4769_v18 }
 0x391   :  { %4903 = vmatpush.bf16.msrb.mxu1 %v4792_v62  ;;  %v4353_v62 = vunpack.c.3.s8 %v4205_v6  ;;  %v4433_v6 = vunpack.c.3.s8 %v4225_v58 }
 0x393   :  { %v4609_v52 = vcvt.s32.f32 %v4353_v62  ;;  %4915 = vmatpush.bf16.msrb.mxu2 %v4828_v16  ;;  %v4689_v15 = vcvt.s32.f32 %v4433_v6 }
 0x394   :  { %v4007_v27 = vpop.f32.mrf.mxu1  ;;  %v7452_v61 = vpop.f32.mrf.mxu0 }
 0x395   :  { %v7455_v48 = vadd.f32 %v4007_v27, %v7446_v3  ;;  %v4261_v3 = vunpack.c.0.s8 %v4185_v30  ;;  %4904 = vmatpush.bf16.msrb.mxu1 %v4788_v47  ;;  %v4384_v30 = vunpack.c.3.s8 %v4212_v54  ;;  %v4194_v27 = vld [vmem:[#allocation4 + $0x870] sm:$0xff]  ;;  %v4809_v45 = vpack.c.bf16 %v4609_v52, %v4605_v26 }
 0x396   :  { %v4302_v56 = vunpack.c.2.s8 %v4194_v27  ;;  %v4306_v8 = vunpack.c.3.s8 %v4194_v27  ;;  %v4294_v49 = vunpack.c.0.s8 %v4194_v27  ;;  %v4298_v14 = vunpack.c.1.s8 %v4194_v27 }
 0x397   :  { %v4517_v51 = vcvt.s32.f32 %v4261_v3  ;;  %v4640_v43 = vcvt.s32.f32 %v4384_v30  ;;  %v4145_v54 = vperm.slane %v7457_v10, 1  ;;  %v4484_v26 = vunpack.c.0.s8 %v7466_v31 }
 0x398   :  { %v7471_v59 = vcvt.s32.f32 %v4302_v56  ;;  %v7473_v18 = vcvt.s32.f32 %v4306_v8  ;;  %v7480_v9 = vcvt.s32.f32 %v4294_v49  ;;  %v7482_v16 = vcvt.s32.f32 %v4298_v14 }
 0x399   :  { %4949 = vmatpush.bf16.msra.mxu1 %v4817_v2  ;;  %v4765_v37 = vpack.c.bf16 %v4521_v57, %v4517_v51  ;;  %v4824_v12 = vpack.c.bf16 %v4640_v43, %v4636_v44  ;;  %v4492_v51 = vunpack.c.2.s8 %v7466_v31  ;;  %v4805_v2 = vpack.c.bf16 %v4601_v7, %v4597_v41 }
 0x39a   :  { %v4628_v57 = vcvt.s32.f32 %v4372_v38  ;;  %v4488_v52 = vunpack.c.1.s8 %v7466_v31  ;;  %v4782_v44 = vpack.c.bf16 %v7482_v16, %v7480_v9  ;;  %v4421_v43 = vunpack.c.0.s8 %v4225_v58 }
 0x39b   :  { %4941 = vmatpush.bf16.msra.mxu0 %v4765_v37  ;;  %4916 = vmatpush.bf16.msrb.mxu2 %v4824_v12  ;;  %v4593_v37 = vcvt.s32.f32 %v4337_v19  ;;  %v4740_v40 = vcvt.s32.f32 %v4484_v26  ;;  %v4581_v56 = vcvt.s32.f32 %v4325_v53  ;;  %v4681_v8 = vcvt.s32.f32 %v4425_v42 }
 0x39c   :  { %v3968_v39 = vpop.f32.mrf.mxu2  ;;  %v4009_v28 = vpop.f32.mrf.mxu1  ;;  %v4468_v14 = vunpack.c.0.s8 %v4236_v1  ;;  %v4313_v53 = vunpack.c.1.s8 %v4197_v35  ;;  %v4409_v42 = vunpack.c.1.s8 %v4221_v32 }
 0x39d   :  { %v7463_v50 = vadd.f32 %v3968_v39, %v7450_v13  ;;  %v4048_v33 = vpop.f32.mrf.mxu0  ;;  %v4509_v13 = vcvt.s32.f32 %v4253_v0  ;;  %4950 = vmatpush.bf16.msra.mxu1 %v4813_v5  ;;  %v4632_v39 = vcvt.s32.f32 %v4376_v34  ;;  %v4748_v28 = vcvt.s32.f32 %v4492_v51 }
 0x39e   :  { %v4685_v0 = vcvt.s32.f32 %v4429_v36  ;;  %v4801_v62 = vpack.c.bf16 %v4593_v37, %v4589_v23  ;;  %v4480_v34 = vunpack.c.3.s8 %v4236_v1  ;;  %v4317_v51 = vunpack.c.2.s8 %v4197_v35 }
 0x39f   :  { %v4761_v22 = vpack.c.bf16 %v4513_v25, %v4509_v13  ;;  %v4820_v33 = vpack.c.bf16 %v4632_v39, %v4628_v57  ;;  %v4880_v21 = vpack.c.bf16 %v4752_v60, %v4748_v28  ;;  %v4160_v13 = vperm.slane %v7460_v24, 1  ;;  %v4190_v25 = vld [vmem:[#allocation4 + $0x850] sm:$0xff] }
 0x3a0   :  { %v4849_v27 = vpack.c.bf16 %v4689_v15, %v4685_v0  ;;  %v4290_v12 = vunpack.c.3.s8 %v4190_v25  ;;  %v4321_v57 = vunpack.c.3.s8 %v4197_v35  ;;  %v4736_v28 = vcvt.s32.f32 %v4480_v34 }
 0x3a1   :  { %4942 = vmatpush.bf16.msra.mxu0 %v4761_v22  ;;  %4951 = vmatpush.bf16.msra.mxu1 %v4809_v45  ;;  %v4329_v22 = vunpack.c.1.s8 %v4201_v46  ;;  %v4744_v45 = vcvt.s32.f32 %v4488_v52  ;;  %v4476_v46 = vunpack.c.2.s8 %v4236_v1  ;;  %v4573_v19 = vcvt.s32.f32 %v4317_v51 }
 0x3a2   :  { %4917 = vmatpush.bf16.msrb.mxu2 %v4820_v33  ;;  %4923 = vmatpush.bf16.msrb.mxu3 %v4880_v21  ;;  %v4417_v60 = vunpack.c.3.s8 %v4221_v32  ;;  %v4577_v23 = vcvt.s32.f32 %v4321_v57  ;;  %v4669_v36 = vcvt.s32.f32 %v4413_v20  ;;  %v4278_v6 = vunpack.c.0.s8 %v4190_v25 }
 0x3a3   :  { %v4876_v41 = vpack.c.bf16 %v4744_v45, %v4740_v40  ;;  %v4282_v33 = vunpack.c.1.s8 %v4190_v25  ;;  %v4472_v21 = vunpack.c.1.s8 %v4236_v1  ;;  %v4724_v26 = vcvt.s32.f32 %v4468_v14 }
 0x3a4   :  { %v3970_v47 = vpop.f32.mrf.mxu2  ;;  %v4059_v55 = vpop.f32.mrf.mxu1  ;;  %v4673_v49 = vcvt.s32.f32 %v4417_v60  ;;  %v4793_v0 = vpack.c.bf16 %v4577_v23, %v4573_v19  ;;  %v7500_v15 = vcvt.s32.f32 %v4278_v6  ;;  %v4405_v45 = vunpack.c.0.s8 %v4221_v32 }
 0x3a5   :  { %v7469_v3 = vadd.f32 %v4059_v55, %v7452_v61  ;;  %4943 = vmatpush.bf16.msra.mxu0 %v4757_v63  ;;  %v4786_v61 = vpack.c.bf16 %v7473_v18, %v7471_v59  ;;  %4952 = vmatpush.bf16.msra.mxu1 %v4805_v2  ;;  %v4585_v47 = vcvt.s32.f32 %v4329_v22  ;;  %v4677_v55 = vcvt.s32.f32 %v4421_v43  ;;  %v4210_v22 = vld [vmem:[#allocation4 + $0x8f0] sm:$0xff]  ;;  %v7551_v59 = vld [vmem:[#allocation4 + $0x908] sm:$0xff] }
 0x3a6   :  { %4962 = vmatpush.bf16.msra.mxu2 %v4849_v27  ;;  %v7496_v63 = vcvt.s32.f32 %v4290_v12  ;;  %4924 = vmatpush.bf16.msrb.mxu3 %v4876_v41  ;;  %v4732_v2 = vcvt.s32.f32 %v4476_v46  ;;  %v4841_v27 = vpack.c.bf16 %v4673_v49, %v4669_v36  ;;  %v4728_v52 = vcvt.s32.f32 %v4472_v21  ;;  %v4232_v46 = vld [vmem:[#allocation4 + $0x9a0] sm:$0xff] }
 0x3a7   :  { %v4797_v38 = vpack.c.bf16 %v4585_v47, %v4581_v56  ;;  %v4845_v58 = vpack.c.bf16 %v4681_v8, %v4677_v55  ;;  %v4569_v47 = vcvt.s32.f32 %v4313_v53  ;;  %v4661_v12 = vcvt.s32.f32 %v4405_v45 }
 0x3a8   :  { %v4872_v37 = vpack.c.bf16 %v4736_v28, %v4732_v2  ;;  %v4868_v56 = vpack.c.bf16 %v4728_v52, %v4724_v26  ;;  %v4665_v41 = vcvt.s32.f32 %v4409_v42  ;;  %v4370_v32 = vunpack.c.3.s8 %v4210_v22  ;;  %v4217_v2 = vld [vmem:[#allocation4 + $0x928] sm:$0xff] }
 0x3a9   :  { %4953 = vmatpush.bf16.msra.mxu1 %v4801_v62  ;;  %v4186_v62 = vld [vmem:[#allocation4 + $0x830] sm:$0xff]  ;;  %v4460_v19 = vunpack.c.2.s8 %v4232_v46  ;;  %v4464_v60 = vunpack.c.3.s8 %v4232_v46  ;;  %v4397_v36 = vunpack.c.2.s8 %v4217_v2  ;;  %v4358_v53 = vunpack.c.0.s8 %v4210_v22 }
 0x3aa   :  { %4963 = vmatpush.bf16.msra.mxu2 %v4845_v58  ;;  %4925 = vmatpush.bf16.msrb.mxu3 %v4872_v37  ;;  %v4270_v55 = vunpack.c.2.s8 %v4186_v62  ;;  %v4274_v8 = vunpack.c.3.s8 %v4186_v62  ;;  %v4837_v57 = vpack.c.bf16 %v4665_v41, %v4661_v12  ;;  %v4262_v6 = vunpack.c.0.s8 %v4186_v62 }
 0x3ab   :  { %v4716_v49 = vcvt.s32.f32 %v4460_v19  ;;  %v4720_v14 = vcvt.s32.f32 %v4464_v60  ;;  %v4146_v45 = vperm.slane %v7457_v10, 2  ;;  %v4161_v42 = vperm.slane %v7460_v24, 2 }
 0x3ac   :  { %v4020_v5 = vpop.f32.mrf.mxu2  ;;  %v4061_v29 = vpop.f32.mrf.mxu1  ;;  %v7509_v58 = vcvt.s32.f32 %v4270_v55  ;;  %v7514_v20 = vcvt.s32.f32 %v4274_v8  ;;  %v4452_v12 = vunpack.c.0.s8 %v4232_v46  ;;  %v4456_v41 = vunpack.c.1.s8 %v4232_v46 }
 0x3ad   :  { %v7486_v30 = vadd.f32 %v4020_v5, %v7455_v48  ;;  %v4286_v48 = vunpack.c.2.s8 %v4190_v25  ;;  %4954 = vmatpush.bf16.msra.mxu1 %v4797_v38  ;;  %v7502_v5 = vcvt.s32.f32 %v4282_v33  ;;  %v4309_v29 = vunpack.c.0.s8 %v4197_v35 }
 0x3ae   :  { %4964 = vmatpush.bf16.msra.mxu2 %v4841_v27  ;;  %v4366_v35 = vunpack.c.2.s8 %v4210_v22  ;;  %4926 = vmatpush.bf16.msrb.mxu3 %v4868_v56  ;;  %v4770_v23 = vpack.c.bf16 %v7514_v20, %v7509_v58  ;;  %v7526_v27 = vcvt.s32.f32 %v4262_v6  ;;  %v4864_v52 = vpack.c.bf16 %v4720_v14, %v4716_v49 }
 0x3af   :  { %v7494_v7 = vcvt.s32.f32 %v4286_v48  ;;  %v4774_v25 = vpack.c.bf16 %v7502_v5, %v7500_v15  ;;  %v4565_v1 = vcvt.s32.f32 %v4309_v29  ;;  %v4266_v29 = vunpack.c.1.s8 %v4186_v62  ;;  %v4226_v15 = vld [vmem:[#allocation4 + $0x970] sm:$0xff] }
 0x3b0   :  { %v7535_v62 = vcvt.s32.f32 %v4358_v53  ;;  %v4708_v46 = vcvt.s32.f32 %v4452_v12 }
 0x3b1   :  { %v4778_v39 = vpack.c.bf16 %v7496_v63, %v7494_v7  ;;  %4955 = vmatpush.bf16.msra.mxu1 %v4793_v0  ;;  %v4789_v51 = vpack.c.bf16 %v4569_v47, %v4565_v1  ;;  %v7530_v1 = vcvt.s32.f32 %v4266_v29 }
 0x3b2   :  { %4965 = vmatpush.bf16.msra.mxu2 %v4837_v57  ;;  %4927 = vmatpush.bf16.msrb.mxu3 %v4864_v52  ;;  %v4712_v57 = vcvt.s32.f32 %v4456_v41  ;;  %v4381_v52 = vunpack.c.2.s8 %v7551_v59 }
 0x3b4   :  { %v7492_v31 = vpop.f32.mrf.mxu0  ;;  %v4022_v17 = vpop.f32.mrf.mxu2  ;;  %v4860_v18 = vpack.c.bf16 %v4712_v57, %v4708_v46 }
 0x3b5   :  { %v7516_v17 = vcvt.s32.f32 %v4366_v35  ;;  %4956 = vmatpush.bf16.msra.mxu1 %v4789_v51  ;;  %v4766_v35 = vpack.c.bf16 %v7530_v1, %v7526_v27  ;;  %v7547_v51 = vld [vmem:[#allocation4 + $0x980] sm:$0xff]  ;;  %v4422_v1 = vunpack.c.0.s8 %v4226_v15 }
 0x3b6   :  { %4928 = vmatpush.bf16.msrb.mxu3 %v4860_v18  ;;  %v4436_v63 = vunpack.c.0.s8 %v7547_v51 }
 0x3ba   :  { %v3981_v43 = vpop.f32.mrf.mxu3 }
 0x3bb   :  { %v3982_v48 = vadd.f32 %v3981_v43, %v7463_v50  ;;  %v4362_v43 = vunpack.c.1.s8 %v4210_v22  ;;  %v4206_v22 = vld [vmem:[#allocation4 + $0x8d0] sm:$0xff] }
 0x3bc   :  { %v4100_v40 = vpop.f32.mrf.mxu0  ;;  %v4072_v34 = vpop.f32.mrf.mxu2  ;;  %v4342_v46 = vunpack.c.0.s8 %v4206_v22 }
 0x3bd   :  { %v4152_v38 = vmul.f32 %v4144_v4, %v3982_v48  ;;  %v7512_v50 = vadd.f32 %v4072_v34, %v7469_v3  ;;  %v7520_v4 = vcvt.s32.f32 %v4370_v32  ;;  %v4401_v3 = vunpack.c.3.s8 %v4217_v2  ;;  %v4182_v48 = vld [vmem:[#allocation4 + $0x810] sm:$0xff] }
 0x3be   :  { %v7537_v55 = vcvt.s32.f32 %v4362_v43  ;;  %v4393_v34 = vunpack.c.1.s8 %v4217_v2  ;;  %v4258_v60 = vunpack.c.3.s8 %v4182_v48  ;;  %v4246_v53 = vunpack.c.0.s8 %v4182_v48  ;;  %v7571_v43 = vld [vmem:[#allocation4 + $0x878] sm:$0xff] }
 0x3bf   :  { %v4167_v28 = vadd.f32 %v4159_v11, %v4152_v38  ;;  %v4818_v37 = vpack.c.bf16 %v7520_v4, %v7516_v17  ;;  %v4653_v11 = vcvt.s32.f32 %v4397_v36  ;;  %v4657_v0 = vcvt.s32.f32 %v4401_v3 }
 0x3c0   :  { %v4389_v38 = vunpack.c.0.s8 %v4217_v2  ;;  %v4814_v32 = vpack.c.bf16 %v7537_v55, %v7535_v62  ;;  %v4649_v19 = vcvt.s32.f32 %v4393_v34  ;;  %v4350_v36 = vunpack.c.2.s8 %v4206_v22 }
 0x3c1   :  { %v4171_v33 = vmax.f32 %v4167_v28, 0.0  ;;  %v4833_v40 = vpack.c.bf16 %v4657_v0, %v4653_v11  ;;  %v4254_v28 = vunpack.c.2.s8 %v4182_v48  ;;  %v4354_v3 = vunpack.c.3.s8 %v4206_v22 }
 0x3c2   :  { %v3983_v21 = vpop.f32.mrf.mxu3  ;;  %v4444_v2 = vunpack.c.2.s8 %v7547_v51  ;;  %v7559_v49 = vcvt.s32.f32 %v4258_v60  ;;  %v7561_v14 = vcvt.s32.f32 %v4350_v36  ;;  %v4250_v12 = vunpack.c.1.s8 %v4182_v48 }
 0x3c3   :  { %v7528_v26 = vpack.c.bf16 %v4171_v33, %v4171_v33  ;;  %4966 = vmatpush.bf16.msra.mxu2 %v4833_v40  ;;  %v4448_v21 = vunpack.c.3.s8 %v7547_v51  ;;  %v7565_v0 = vcvt.s32.f32 %v4354_v3  ;;  %v7580_v34 = vcvt.s32.f32 %v4246_v53 }
 0x3c4   :  { %v4111_v56 = vpop.f32.mrf.mxu1  ;;  %v4074_v47 = vpop.f32.mrf.mxu2  ;;  %v4700_v29 = vcvt.s32.f32 %v4444_v2  ;;  %v7587_v48 = vcvt.s32.f32 %v4342_v46  ;;  %v4307_v7 = vunpack.c.3.s8 %v7571_v43  ;;  %v4440_v2 = vunpack.c.1.s8 %v7547_v51 }
 0x3c5   :  { %4892 = vmatmul.bf16.vlgmr.msrb.gmra.mxu0 %v7528_v26  ;;  %v7540_v8 = vadd.f32 %v4111_v56, %v7492_v31  ;;  %v4645_v31 = vcvt.s32.f32 %v4389_v38  ;;  %v4704_v16 = vcvt.s32.f32 %v4448_v21  ;;  %v4810_v56 = vpack.c.bf16 %v7565_v0, %v7561_v14  ;;  %v4202_v21 = vld [vmem:[#allocation4 + $0x8b0] sm:$0xff] }
 0x3c6   :  { %4988 = vmatpush.bf16.msrb.mxu0 %v4786_v61  ;;  %v7553_v61 = vcvt.s32.f32 %v4254_v28  ;;  %v4637_v47 = vcvt.s32.f32 %v4381_v52  ;;  %v7584_v28 = vcvt.s32.f32 %v4250_v12  ;;  %v7600_v3 = vcvt.s32.f32 %v4307_v7 }
 0x3c7   :  { %v4829_v33 = vpack.c.bf16 %v4649_v19, %v4645_v31  ;;  %v4856_v41 = vpack.c.bf16 %v4704_v16, %v4700_v29  ;;  %v4303_v31 = vunpack.c.2.s8 %v7571_v43  ;;  %v4377_v52 = vunpack.c.1.s8 %v7551_v59 }
 0x3c8   :  { %v4762_v9 = vpack.c.bf16 %v7559_v49, %v7553_v61  ;;  %v4758_v36 = vpack.c.bf16 %v7584_v28, %v7580_v34  ;;  %v4299_v20 = vunpack.c.1.s8 %v7571_v43 }
 0x3c9   :  { %4967 = vmatpush.bf16.msra.mxu2 %v4829_v33  ;;  %4929 = vmatpush.bf16.msrb.mxu3 %v4856_v41  ;;  %v4373_v33 = vunpack.c.0.s8 %v7551_v59  ;;  %v4633_v51 = vcvt.s32.f32 %v4377_v52  ;;  %v4430_v41 = vunpack.c.2.s8 %v4226_v15  ;;  %v4237_v52 = vld [vmem:[#allocation4 + $0x9c8] sm:$0xff] }
 0x3ca   :  { %4989 = vmatpush.bf16.msrb.mxu0 %v4782_v44  ;;  %v4033_v6 = vpop.f32.mrf.mxu3  ;;  %v4385_v44 = vunpack.c.3.s8 %v7551_v59  ;;  %v4477_v61 = vunpack.c.2.s8 %v4237_v52  ;;  %v4481_v49 = vunpack.c.3.s8 %v4237_v52 }
 0x3cb   :  { %v4034_v11 = vadd.f32 %v4033_v6, %v7486_v30  ;;  %v4692_v6 = vcvt.s32.f32 %v4436_v63  ;;  %v7624_v7 = vcvt.s32.f32 %v4430_v41 }
 0x3cc   :  { %v4113_v30 = vpop.f32.mrf.mxu1  ;;  %v4641_v38 = vcvt.s32.f32 %v4385_v44  ;;  %v4629_v44 = vcvt.s32.f32 %v4373_v33  ;;  %v4737_v41 = vcvt.s32.f32 %v4481_v49 }
 0x3cd   :  { %v4153_v40 = vmul.f32 %v4145_v54, %v4034_v11  ;;  %v4346_v54 = vunpack.c.1.s8 %v4206_v22  ;;  %v4334_v30 = vunpack.c.2.s8 %v4202_v21 }
 0x3ce   :  { %4990 = vmatpush.bf16.msrb.mxu0 %v4778_v39  ;;  %v4825_v19 = vpack.c.bf16 %v4641_v38, %v4637_v47  ;;  %v4241_v39 = vld [vmem:[#allocation4 + $0x9e8] sm:$0xff]  ;;  %v4338_v47 = vunpack.c.3.s8 %v4202_v21  ;;  %v4434_v38 = vunpack.c.3.s8 %v4226_v15  ;;  %v4821_v46 = vpack.c.bf16 %v4633_v51, %v4629_v44 }
 0x3cf   :  { %v4168_v57 = vadd.f32 %v4160_v13, %v4153_v40  ;;  %v7593_v18 = vcvt.s32.f32 %v4346_v54  ;;  %v7595_v13 = vcvt.s32.f32 %v4303_v31  ;;  %v4493_v16 = vunpack.c.2.s8 %v4241_v39 }
 0x3d0   :  { %4968 = vmatpush.bf16.msra.mxu2 %v4825_v19  ;;  %v4497_v53 = vunpack.c.3.s8 %v4241_v39  ;;  %v7621_v54 = vcvt.s32.f32 %v4338_v47  ;;  %v4295_v31 = vunpack.c.0.s8 %v7571_v43  ;;  %v7626_v58 = vcvt.s32.f32 %v4434_v38 }
 0x3d1   :  { %v4172_v60 = vmax.f32 %v4168_v57, 0.0  ;;  %v4806_v29 = vpack.c.bf16 %v7593_v18, %v7587_v48  ;;  %v4787_v5 = vpack.c.bf16 %v7600_v3, %v7595_v13  ;;  %v4749_v40 = vcvt.s32.f32 %v4493_v16 }
 0x3d2   :  { %4991 = vmatpush.bf16.msrb.mxu0 %v4774_v25  ;;  %v4035_v22 = vpop.f32.mrf.mxu3  ;;  %v4696_v25 = vcvt.s32.f32 %v4440_v2  ;;  %v4753_v12 = vcvt.s32.f32 %v4497_v53  ;;  %v7619_v57 = vcvt.s32.f32 %v4334_v30  ;;  %v7631_v4 = vcvt.s32.f32 %v4295_v31  ;;  %v4198_v53 = vld [vmem:[#allocation4 + $0x890] sm:$0xff] }
 0x3d3   :  { %v7604_v11 = vpack.c.bf16 %v4172_v60, %v4172_v60  ;;  %v4850_v43 = vpack.c.bf16 %v7626_v58, %v7624_v7  ;;  %v7641_v60 = vcvt.s32.f32 %v4299_v20  ;;  %v4326_v22 = vunpack.c.0.s8 %v4202_v21  ;;  %v4222_v30 = vld [vmem:[#allocation4 + $0x950] sm:$0xff] }
 0x3d4   :  { %v4852_v59 = vpack.c.bf16 %v4696_v25, %v4692_v6  ;;  %v4881_v19 = vpack.c.bf16 %v4753_v12, %v4749_v40  ;;  %4969 = vmatpush.bf16.msra.mxu2 %v4821_v46  ;;  %v4802_v17 = vpack.c.bf16 %v7621_v54, %v7619_v57  ;;  %v4330_v2 = vunpack.c.1.s8 %v4202_v21  ;;  %v7643_v6 = vld [vmem:[#allocation4 + $0x858] sm:$0xff] }
 0x3d5   :  { %4905 = vmatmul.bf16.vlgmr.msrb.gmra.mxu1 %v7604_v11  ;;  %4944 = vmatmul.bf16.vlgmr.msra.gmra.mxu0 %v7528_v26  ;;  %v4783_v62 = vpack.c.bf16 %v7641_v60, %v7631_v4  ;;  %v7648_v55 = vcvt.s32.f32 %v4326_v22  ;;  %v7654_v44 = vcvt.s32.f32 %v4422_v1  ;;  %v4291_v40 = vunpack.c.3.s8 %v7643_v6  ;;  %v4187_v60 = vld [vmem:[#allocation4 + $0x838] sm:$0xff] }
 0x3d6   :  { %4992 = vmatpush.bf16.msrb.mxu0 %v4770_v23  ;;  %5001 = vmatpush.bf16.msrb.mxu1 %v4818_v37  ;;  %v4485_v23 = vunpack.c.0.s8 %v4241_v39  ;;  %v4489_v37 = vunpack.c.1.s8 %v4241_v39  ;;  %v4733_v12 = vcvt.s32.f32 %v4477_v61  ;;  %v4414_v38 = vunpack.c.2.s8 %v4222_v30 }
 0x3d7   :  { %4930 = vmatpush.bf16.msrb.mxu3 %v4852_v59  ;;  %v4547_v0 = vcvt.s32.f32 %v4291_v40  ;;  %v4418_v20 = vunpack.c.3.s8 %v4222_v30  ;;  %v4279_v48 = vunpack.c.0.s8 %v7643_v6  ;;  %v4473_v13 = vunpack.c.1.s8 %v4237_v52 }
 0x3d8   :  { %v4741_v33 = vcvt.s32.f32 %v4485_v23  ;;  %v4745_v27 = vcvt.s32.f32 %v4489_v37  ;;  %v4873_v34 = vpack.c.bf16 %v4737_v41, %v4733_v12  ;;  %v7693_v28 = vcvt.s32.f32 %v4414_v38 }
 0x3d9   :  { %v4674_v18 = vcvt.s32.f32 %v4418_v20  ;;  %v4469_v23 = vunpack.c.0.s8 %v4237_v52  ;;  %v4310_v3 = vunpack.c.0.s8 %v4198_v53  ;;  %v4410_v52 = vunpack.c.1.s8 %v4222_v30 }
 0x3da   :  { %4993 = vmatpush.bf16.msrb.mxu0 %v4766_v35  ;;  %5002 = vmatpush.bf16.msrb.mxu1 %v4814_v32  ;;  %v4085_v63 = vpop.f32.mrf.mxu3  ;;  %v7650_v35 = vcvt.s32.f32 %v4330_v2  ;;  %v4426_v32 = vunpack.c.1.s8 %v4226_v15  ;;  %v4877_v25 = vpack.c.bf16 %v4745_v27, %v4741_v33  ;;  %v4211_v33 = vld [vmem:[#allocation4 + $0x8f8] sm:$0xff]  ;;  %v4729_v27 = vcvt.s32.f32 %v4473_v13 }
 0x3db   :  { %v4086_v39 = vadd.f32 %v4085_v63, %v7512_v50  ;;  %4975 = vmatpush.bf16.msra.mxu3 %v4881_v19  ;;  %v4287_v50 = vunpack.c.2.s8 %v7643_v6  ;;  %v4535_v63 = vcvt.s32.f32 %v4279_v48  ;;  %v4842_v22 = vpack.c.bf16 %v4674_v18, %v7693_v28  ;;  %v7716_v18 = vld [vmem:[#allocation4 + $0x8d8] sm:$0xff] }
 0x3dc   :  { %v4124_v16 = vpop.f32.mrf.mxu2  ;;  %v7668_v15 = vcvt.s32.f32 %v4426_v32  ;;  %v4566_v1 = vcvt.s32.f32 %v4310_v3  ;;  %v4271_v54 = vunpack.c.2.s8 %v4187_v60  ;;  %v4267_v41 = vunpack.c.1.s8 %v4187_v60 }
 0x3dd   :  { %v4154_v21 = vmul.f32 %v4146_v45, %v4086_v39  ;;  %v7658_v51 = vadd.f32 %v4124_v16, %v7540_v8  ;;  %v4798_v45 = vpack.c.bf16 %v7650_v35, %v7648_v55  ;;  %v7673_v47 = vcvt.s32.f32 %v4287_v50 }
 0x3de   :  { %4994 = vmatpush.bf16.msrb.mxu0 %v4762_v9  ;;  %5003 = vmatpush.bf16.msrb.mxu1 %v4810_v56  ;;  %v4846_v14 = vpack.c.bf16 %v7668_v15, %v7654_v44  ;;  %v4318_v9 = vunpack.c.2.s8 %v4198_v53  ;;  %v4322_v56 = vunpack.c.3.s8 %v4198_v53  ;;  %v4406_v39 = vunpack.c.0.s8 %v4222_v30 }
 0x3df   :  { %v4169_v8 = vadd.f32 %v4161_v42, %v4154_v21  ;;  %4976 = vmatpush.bf16.msra.mxu3 %v4877_v25  ;;  %v4779_v46 = vpack.c.bf16 %v4547_v0, %v7673_v47  ;;  %v4233_v21 = vld [vmem:[#allocation4 + $0x9a8] sm:$0xff]  ;;  %v4218_v25 = vld [vmem:[#allocation4 + $0x930] sm:$0xff]  ;;  %v4367_v15 = vunpack.c.2.s8 %v4211_v33  ;;  %v4527_v7 = vcvt.s32.f32 %v4271_v54 }
 0x3e0   :  { %v7684_v31 = vcvt.s32.f32 %v4318_v9  ;;  %v7686_v19 = vcvt.s32.f32 %v4322_v56  ;;  %v4662_v57 = vcvt.s32.f32 %v4406_v39  ;;  %v4398_v47 = vunpack.c.2.s8 %v4218_v25 }
 0x3e1   :  { %v4173_v59 = vmax.f32 %v4169_v8, 0.0  ;;  %v4623_v30 = vcvt.s32.f32 %v4367_v15  ;;  %v4465_v8 = vunpack.c.3.s8 %v4233_v21  ;;  %v4402_v9 = vunpack.c.3.s8 %v4218_v25 }
 0x3e2   :  { %4995 = vmatpush.bf16.msrb.mxu0 %v4758_v36  ;;  %5004 = vmatpush.bf16.msrb.mxu1 %v4806_v29  ;;  %v4087_v42 = vpop.f32.mrf.mxu3  ;;  %v4794_v36 = vpack.c.bf16 %v7686_v19, %v7684_v31  ;;  %v4283_v29 = vunpack.c.1.s8 %v7643_v6  ;;  %v4725_v6 = vcvt.s32.f32 %v4469_v23  ;;  %v4147_v55 = vperm.slane %v7457_v10, 3  ;;  %v7714_v19 = vld [vmem:[#allocation4 + $0x818] sm:$0xff] }
 0x3e3   :  { %v7688_v4 = vpack.c.bf16 %v4173_v59, %v4173_v59  ;;  %4977 = vmatpush.bf16.msra.mxu3 %v4873_v34  ;;  %v4721_v56 = vcvt.s32.f32 %v4465_v8  ;;  %v4654_v59 = vcvt.s32.f32 %v4398_v47  ;;  %v4162_v35 = vperm.slane %v7460_v24, 3 }
 0x3e4   :  { %v4126_v37 = vpop.f32.mrf.mxu2  ;;  %v4539_v2 = vcvt.s32.f32 %v4283_v29  ;;  %v4869_v44 = vpack.c.bf16 %v4729_v27, %v4725_v6  ;;  %v4658_v12 = vcvt.s32.f32 %v4402_v9  ;;  %v4359_v42 = vunpack.c.0.s8 %v4211_v33 }
 0x3e5   :  { %4918 = vmatmul.bf16.vlgmr.msrb.gmra.mxu2 %v7688_v4  ;;  %4957 = vmatmul.bf16.vlgmr.msra.gmra.mxu1 %v7604_v11  ;;  %v4453_v31 = vunpack.c.0.s8 %v4233_v21  ;;  %v4523_v28 = vcvt.s32.f32 %v4267_v41  ;;  %v4457_v48 = vunpack.c.1.s8 %v4233_v21  ;;  %v4390_v37 = vunpack.c.0.s8 %v4218_v25 }
 0x3e6   :  { %5040 = vmatpush.bf16.msra.mxu0 %v4787_v5  ;;  %v4314_v5 = vunpack.c.1.s8 %v4198_v53  ;;  %5005 = vmatpush.bf16.msrb.mxu1 %v4802_v17  ;;  %v4775_v16 = vpack.c.bf16 %v4539_v2, %v4535_v63  ;;  %v4275_v17 = vunpack.c.3.s8 %v4187_v60  ;;  %v4666_v53 = vcvt.s32.f32 %v4410_v52 }
 0x3e7   :  { %4996 = vmatmul.bf16.vlgmr.msrb.gmra.mxu0 %v7528_v26  ;;  %5014 = vmatpush.bf16.msrb.mxu2 %v4850_v43  ;;  %v4371_v43 = vunpack.c.3.s8 %v4211_v33  ;;  %v4834_v20 = vpack.c.bf16 %v4658_v12, %v4654_v59  ;;  %v4709_v23 = vcvt.s32.f32 %v4453_v31  ;;  %v4713_v13 = vcvt.s32.f32 %v4457_v48  ;;  %v4242_v12 = vld [vmem:[#allocation4 + $0x9f0] sm:$0xff]  ;;  %v4227_v48 = vld [vmem:[#allocation4 + $0x978] sm:$0xff] }
 0x3e8   :  { %v4570_v32 = vcvt.s32.f32 %v4314_v5  ;;  %v4531_v58 = vcvt.s32.f32 %v4275_v17  ;;  %v4838_v40 = vpack.c.bf16 %v4666_v53, %v4662_v57  ;;  %4978 = vmatpush.bf16.msra.mxu3 %v4869_v44  ;;  %v4394_v3 = vunpack.c.1.s8 %v4218_v25 }
 0x3e9   :  { %v4627_v49 = vcvt.s32.f32 %v4371_v43  ;;  %v4255_v5 = vunpack.c.2.s8 %v7714_v19  ;;  %v4646_v2 = vcvt.s32.f32 %v4390_v37  ;;  %v4259_v6 = vunpack.c.3.s8 %v7714_v19 }
 0x3ea   :  { %5041 = vmatpush.bf16.msra.mxu0 %v4783_v62  ;;  %v4790_v50 = vpack.c.bf16 %v4570_v32, %v4566_v1  ;;  %5006 = vmatpush.bf16.msrb.mxu1 %v4798_v45  ;;  %v4461_v62 = vunpack.c.2.s8 %v4233_v21  ;;  %v4771_v61 = vpack.c.bf16 %v4531_v58, %v4527_v7  ;;  %v4351_v39 = vunpack.c.2.s8 %v7716_v18 }
 0x3eb   :  { %5015 = vmatpush.bf16.msrb.mxu2 %v4846_v14  ;;  %v4819_v45 = vpack.c.bf16 %v4627_v49, %v4623_v30  ;;  %v4263_v14 = vunpack.c.0.s8 %v4187_v60  ;;  %v4229_v60 = vld [vmem:[#allocation4 + $0x988] sm:$0xff]  ;;  %v4861_v27 = vpack.c.bf16 %v4713_v13, %v4709_v23  ;;  %v4650_v1 = vcvt.s32.f32 %v4394_v3 }
 0x3ec   :  { %v4717_v0 = vcvt.s32.f32 %v4461_v62  ;;  %v4511_v32 = vcvt.s32.f32 %v4255_v5  ;;  %v4355_v52 = vunpack.c.3.s8 %v7716_v18  ;;  %v4515_v21 = vcvt.s32.f32 %v4259_v6 }
 0x3ed   :  { %v4519_v34 = vcvt.s32.f32 %v4263_v14  ;;  %v4445_v57 = vunpack.c.2.s8 %v4229_v60  ;;  %v4449_v54 = vunpack.c.3.s8 %v4229_v60  ;;  %v4830_v17 = vpack.c.bf16 %v4650_v1, %v4646_v2 }
 0x3ee   :  { %5042 = vmatpush.bf16.msra.mxu0 %v4779_v46  ;;  %5007 = vmatpush.bf16.msrb.mxu1 %v4794_v36  ;;  %v4865_v38 = vpack.c.bf16 %v4721_v56, %v4717_v0  ;;  %v4363_v46 = vunpack.c.1.s8 %v4211_v33  ;;  %v4615_v36 = vcvt.s32.f32 %v4359_v42  ;;  %v4214_v33 = vld [vmem:[#allocation4 + $0x910] sm:$0xff]  ;;  %v4611_v25 = vcvt.s32.f32 %v4355_v52 }
 0x3ef   :  { %5016 = vmatpush.bf16.msrb.mxu2 %v4842_v22  ;;  %v4767_v63 = vpack.c.bf16 %v4523_v28, %v4519_v34  ;;  %v4382_v44 = vunpack.c.2.s8 %v4214_v33  ;;  %v4763_v15 = vpack.c.bf16 %v4515_v21, %v4511_v32  ;;  %v4701_v7 = vcvt.s32.f32 %v4445_v57  ;;  %v4238_v21 = vld [vmem:[#allocation4 + $0x9d0] sm:$0xff] }
 0x3f0   :  { %4979 = vmatpush.bf16.msra.mxu3 %v4865_v38  ;;  %v4619_v29 = vcvt.s32.f32 %v4363_v46  ;;  %v4705_v58 = vcvt.s32.f32 %v4449_v54  ;;  %v4247_v43 = vunpack.c.0.s8 %v7714_v19  ;;  %v4343_v0 = vunpack.c.0.s8 %v7716_v18 }
 0x3f1   :  { %v4638_v30 = vcvt.s32.f32 %v4382_v44  ;;  %v4347_v59 = vunpack.c.1.s8 %v7716_v18  ;;  %v4441_v41 = vunpack.c.1.s8 %v4229_v60  ;;  %v4374_v38 = vunpack.c.0.s8 %v4214_v33 }
 0x3f2   :  { %5043 = vmatpush.bf16.msra.mxu0 %v4775_v16  ;;  %5008 = vmatpush.bf16.msrb.mxu1 %v4790_v50  ;;  %v4815_v22 = vpack.c.bf16 %v4619_v29, %v4615_v36  ;;  %v4607_v16 = vcvt.s32.f32 %v4351_v39  ;;  %v4386_v50 = vunpack.c.3.s8 %v4214_v33  ;;  %v4857_v47 = vpack.c.bf16 %v4705_v58, %v4701_v7 }
 0x3f3   :  { %5017 = vmatpush.bf16.msrb.mxu2 %v4838_v40  ;;  %v4503_v49 = vcvt.s32.f32 %v4247_v43  ;;  %v4599_v14 = vcvt.s32.f32 %v4343_v0  ;;  %v4603_v46 = vcvt.s32.f32 %v4347_v59  ;;  %v4378_v10 = vunpack.c.1.s8 %v4214_v33 }
 0x3f4   :  { %4980 = vmatpush.bf16.msra.mxu3 %v4861_v27  ;;  %v4811_v40 = vpack.c.bf16 %v4611_v25, %v4607_v16  ;;  %v4642_v8 = vcvt.s32.f32 %v4386_v50  ;;  %v4630_v34 = vcvt.s32.f32 %v4374_v38  ;;  %v4494_v28 = vunpack.c.2.s8 %v4242_v12  ;;  %v4199_v25 = vld [vmem:[#allocation4 + $0x898] sm:$0xff] }
 0x3f5   :  { %4970 = vmatmul.bf16.vlgmr.msra.gmra.mxu2 %v7688_v4  ;;  %5009 = vmatmul.bf16.vlgmr.msrb.gmra.mxu1 %v7604_v11  ;;  %v4807_v36 = vpack.c.bf16 %v4603_v46, %v4599_v14  ;;  %v4634_v29 = vcvt.s32.f32 %v4378_v10  ;;  %v4498_v23 = vunpack.c.3.s8 %v4242_v12  ;;  %v4435_v39 = vunpack.c.3.s8 %v4227_v48 }
 0x3f6   :  { %5044 = vmatpush.bf16.msra.mxu0 %v4771_v61  ;;  %5053 = vmatpush.bf16.msra.mxu1 %v4819_v45  ;;  %v4251_v61 = vunpack.c.1.s8 %v7714_v19  ;;  %v4826_v56 = vpack.c.bf16 %v4642_v8, %v4638_v30  ;;  %v4437_v45 = vunpack.c.0.s8 %v4229_v60  ;;  %v4486_v33 = vunpack.c.0.s8 %v4242_v12 }
 0x3f7   :  { %5018 = vmatpush.bf16.msrb.mxu2 %v4834_v20  ;;  %v4697_v20 = vcvt.s32.f32 %v4441_v41  ;;  %v4822_v5 = vpack.c.bf16 %v4634_v29, %v4630_v34  ;;  %v4754_v60 = vcvt.s32.f32 %v4498_v23  ;;  %v4490_v32 = vunpack.c.1.s8 %v4242_v12 }
 0x3f8   :  { %4981 = vmatpush.bf16.msra.mxu3 %v4857_v47  ;;  %v4693_v31 = vcvt.s32.f32 %v4437_v45  ;;  %v4691_v57 = vcvt.s32.f32 %v4435_v39  ;;  %v4742_v54 = vcvt.s32.f32 %v4486_v33  ;;  %v4478_v43 = vunpack.c.2.s8 %v4238_v21 }
 0x3f9   :  { %v4746_v44 = vcvt.s32.f32 %v4490_v32  ;;  %v4319_v47 = vunpack.c.2.s8 %v4199_v25  ;;  %v4470_v41 = vunpack.c.0.s8 %v4238_v21  ;;  %v4474_v38 = vunpack.c.1.s8 %v4238_v21 }
 0x3fa   :  { %v4137_v53 = vpop.f32.mrf.mxu3  ;;  %5045 = vmatpush.bf16.msra.mxu0 %v4767_v63  ;;  %5054 = vmatpush.bf16.msra.mxu1 %v4815_v22  ;;  %v4853_v24 = vpack.c.bf16 %v4697_v20, %v4693_v31  ;;  %v4431_v22 = vunpack.c.2.s8 %v4227_v48  ;;  %v4311_v31 = vunpack.c.0.s8 %v4199_v25  ;;  %v4315_v10 = vunpack.c.1.s8 %v4199_v25 }
 0x3fb   :  { %v4138_v62 = vadd.f32 %v4137_v53, %v7658_v51  ;;  %5019 = vmatpush.bf16.msrb.mxu2 %v4830_v17  ;;  %v4507_v51 = vcvt.s32.f32 %v4251_v61  ;;  %v4423_v53 = vunpack.c.0.s8 %v4227_v48  ;;  %v4575_v59 = vcvt.s32.f32 %v4319_v47  ;;  %v4243_v47 = vld [vmem:[#allocation4 + $0x9f8] sm:$0xff] }
 0x3fc   :  { %4982 = vmatpush.bf16.msra.mxu3 %v4853_v24  ;;  %v4687_v1 = vcvt.s32.f32 %v4431_v22  ;;  %v4726_v20 = vcvt.s32.f32 %v4470_v41  ;;  %v4730_v34 = vcvt.s32.f32 %v4474_v38  ;;  %v4571_v29 = vcvt.s32.f32 %v4315_v10 }
 0x3fd   :  { %v4155_v9 = vmul.f32 %v4147_v55, %v4138_v62  ;;  %v4203_v55 = vld [vmem:[#allocation4 + $0x8b8] sm:$0xff]  ;;  %v4759_v19 = vpack.c.bf16 %v4507_v51, %v4503_v49  ;;  %v4679_v30 = vcvt.s32.f32 %v4423_v53  ;;  %v4734_v49 = vcvt.s32.f32 %v4478_v43 }
 0x3fe   :  { %5046 = vmatpush.bf16.msra.mxu0 %v4763_v15  ;;  %5055 = vmatpush.bf16.msra.mxu1 %v4811_v40  ;;  %v4335_v63 = vunpack.c.2.s8 %v4203_v55  ;;  %v4339_v13 = vunpack.c.3.s8 %v4203_v55  ;;  %v4327_v52 = vunpack.c.0.s8 %v4203_v55  ;;  %v4331_v17 = vunpack.c.1.s8 %v4203_v55  ;;  %v4223_v62 = vld [vmem:[#allocation4 + $0x958] sm:$0xff]  ;;  %v4234_v55 = vld [vmem:[#allocation4 + $0x9b0] sm:$0xff] }
 0x3ff   :  { %v4170_v42 = vadd.f32 %v4162_v35, %v4155_v9  ;;  %5020 = vmatpush.bf16.msrb.mxu2 %v4826_v56  ;;  %v4750_v35 = vcvt.s32.f32 %v4494_v28  ;;  %v4427_v15 = vunpack.c.1.s8 %v4227_v48  ;;  %v4851_v7 = vpack.c.bf16 %v4691_v57, %v4687_v1  ;;  %v4219_v48 = vld [vmem:[#allocation4 + $0x938] sm:$0xff] }
 0x400   :  { %v4591_v2 = vcvt.s32.f32 %v4335_v63  ;;  %v4595_v6 = vcvt.s32.f32 %v4339_v13  ;;  %v4583_v50 = vcvt.s32.f32 %v4327_v52  ;;  %v4587_v58 = vcvt.s32.f32 %v4331_v17 }
 0x401   :  { %v4174_v18 = vmax.f32 %v4170_v42, 0.0  ;;  %v4882_v27 = vpack.c.bf16 %v4754_v60, %v4750_v35  ;;  %v4878_v40 = vpack.c.bf16 %v4746_v44, %v4742_v54  ;;  %v4683_v8 = vcvt.s32.f32 %v4427_v15 }
 0x402   :  { %v4139_v37 = vpop.f32.mrf.mxu3  ;;  %5047 = vmatpush.bf16.msra.mxu0 %v4759_v19  ;;  %5056 = vmatpush.bf16.msra.mxu1 %v4807_v36  ;;  %v4803_v16 = vpack.c.bf16 %v4595_v6, %v4591_v2  ;;  %v4799_v61 = vpack.c.bf16 %v4587_v58, %v4583_v50  ;;  %v4323_v9 = vunpack.c.3.s8 %v4199_v25  ;;  %v4415_v45 = vunpack.c.2.s8 %v4223_v62 }
 0x403   :  { %v7733_v3 = vpack.c.bf16 %v4174_v18, %v4174_v18  ;;  %5021 = vmatpush.bf16.msrb.mxu2 %v4822_v5  ;;  %v4847_v56 = vpack.c.bf16 %v4683_v8, %v4679_v30  ;;  %v4419_v12 = vunpack.c.3.s8 %v4223_v62  ;;  %v4407_v28 = vunpack.c.0.s8 %v4223_v62 }
 0x404   :  { %v4579_v14 = vcvt.s32.f32 %v4323_v9  ;;  %v4671_v42 = vcvt.s32.f32 %v4415_v45  ;;  %v4567_v36 = vcvt.s32.f32 %v4311_v31  ;;  %v4411_v23 = vunpack.c.1.s8 %v4223_v62 }
 0x405   :  { %4931 = vmatmul.bf16.vlgmr.msrb.gmra.mxu3 %v7733_v3  ;;  %5048 = vmatmul.bf16.vlgmr.msra.gmra.mxu0 %v7528_v26  ;;  %v4482_v26 = vunpack.c.3.s8 %v4238_v21  ;;  %v4675_v46 = vcvt.s32.f32 %v4419_v12  ;;  %v4870_v37 = vpack.c.bf16 %v4730_v34, %v4726_v20  ;;  %v4663_v24 = vcvt.s32.f32 %v4407_v28 }
 0x406   :  { %5027 = vmatpush.bf16.msrb.mxu3 %v4882_v27  ;;  %5057 = vmatpush.bf16.msra.mxu1 %v4803_v16  ;;  %v4795_v19 = vpack.c.bf16 %v4579_v14, %v4575_v59  ;;  %v4462_v35 = vunpack.c.2.s8 %v4234_v55  ;;  %v4466_v63 = vunpack.c.3.s8 %v4234_v55  ;;  %v4791_v13 = vpack.c.bf16 %v4571_v29, %v4567_v36  ;;  %v4230_v27 = vld [vmem:[#allocation4 + $0x990] sm:$0xff]  ;;  %v4215_v16 = vld [vmem:[#allocation4 + $0x918] sm:$0xff] }
 0x407   :  { %5022 = vmatmul.bf16.vlgmr.msrb.gmra.mxu2 %v7688_v4  ;;  %v4738_v0 = vcvt.s32.f32 %v4482_v26  ;;  %v4843_v18 = vpack.c.bf16 %v4675_v46, %v4671_v42  ;;  %v4667_v5 = vcvt.s32.f32 %v4411_v23  ;;  %v4399_v60 = vunpack.c.2.s8 %v4219_v48  ;;  %v4239_v46 = vld [vmem:[#allocation4 + $0x9d8] sm:$0xff] }
 0x408   :  { %5066 = vmatpush.bf16.msra.mxu2 %v4851_v7  ;;  %v4403_v22 = vunpack.c.3.s8 %v4219_v48  ;;  %v4718_v2 = vcvt.s32.f32 %v4462_v35  ;;  %v4722_v6 = vcvt.s32.f32 %v4466_v63  ;;  %v4454_v39 = vunpack.c.0.s8 %v4234_v55  ;;  %v4235_v63 = vld [vmem:[#allocation4 + $0x9b8] sm:$0xff] }
 0x409   :  { %v4874_v51 = vpack.c.bf16 %v4738_v0, %v4734_v49  ;;  %v4458_v33 = vunpack.c.1.s8 %v4234_v55  ;;  %v4839_v1 = vpack.c.bf16 %v4667_v5, %v4663_v24  ;;  %v4655_v32 = vcvt.s32.f32 %v4399_v60 }
 0x40a   :  { %5028 = vmatpush.bf16.msrb.mxu3 %v4878_v40  ;;  %5058 = vmatpush.bf16.msra.mxu1 %v4799_v61  ;;  %v4659_v52 = vcvt.s32.f32 %v4403_v22  ;;  %v4391_v21 = vunpack.c.0.s8 %v4219_v48  ;;  %v4866_v57 = vpack.c.bf16 %v4722_v6, %v4718_v2  ;;  %v4710_v54 = vcvt.s32.f32 %v4454_v39 }
 0x40b   :  { %v4714_v17 = vcvt.s32.f32 %v4458_v33  ;;  %v4395_v25 = vunpack.c.1.s8 %v4219_v48  ;;  %v4446_v53 = vunpack.c.2.s8 %v4230_v27  ;;  %v4450_v15 = vunpack.c.3.s8 %v4230_v27 }
 0x40c   :  { %5067 = vmatpush.bf16.msra.mxu2 %v4847_v56  ;;  %v4835_v44 = vpack.c.bf16 %v4659_v52, %v4655_v32  ;;  %v4647_v50 = vcvt.s32.f32 %v4391_v21  ;;  %v4383_v43 = vunpack.c.2.s8 %v4215_v16  ;;  %v4387_v26 = vunpack.c.3.s8 %v4215_v16  ;;  %v4231_v32 = vld [vmem:[#allocation4 + $0x998] sm:$0xff] }
 0x40d   :  { %v4862_v7 = vpack.c.bf16 %v4714_v17, %v4710_v54  ;;  %v4651_v58 = vcvt.s32.f32 %v4395_v25  ;;  %v4702_v62 = vcvt.s32.f32 %v4446_v53  ;;  %v4706_v40 = vcvt.s32.f32 %v4450_v15 }
 0x40e   :  { %5029 = vmatpush.bf16.msrb.mxu3 %v4874_v51  ;;  %5059 = vmatpush.bf16.msra.mxu1 %v4795_v19  ;;  %v4438_v30 = vunpack.c.0.s8 %v4230_v27  ;;  %v4442_v8 = vunpack.c.1.s8 %v4230_v27  ;;  %v4639_v49 = vcvt.s32.f32 %v4383_v43  ;;  %v4643_v0 = vcvt.s32.f32 %v4387_v26 }
 0x40f   :  { %v4831_v61 = vpack.c.bf16 %v4651_v58, %v4647_v50  ;;  %v4375_v9 = vunpack.c.0.s8 %v4215_v16  ;;  %v4379_v56 = vunpack.c.1.s8 %v4215_v16  ;;  %v4495_v59 = vunpack.c.2.s8 %v4243_v47 }
 0x410   :  { %5068 = vmatpush.bf16.msra.mxu2 %v4843_v18  ;;  %v4499_v45 = vunpack.c.3.s8 %v4243_v47  ;;  %v4858_v12 = vpack.c.bf16 %v4706_v40, %v4702_v62  ;;  %v4694_v51 = vcvt.s32.f32 %v4438_v30  ;;  %v4698_v14 = vcvt.s32.f32 %v4442_v8  ;;  %v5746_v62 = vld [vmem:[#allocation7 + $0x38] sm:$0xff]  ;;  %v5745_v8 = vld [vmem:[#allocation7 + $0x30] sm:$0xff] }
 0x411   :  { %v4751_v41 = vcvt.s32.f32 %v4495_v59  ;;  %v4491_v42 = vunpack.c.1.s8 %v4243_v47  ;;  %v4827_v31 = vpack.c.bf16 %v4643_v0, %v4639_v49  ;;  %v4631_v10 = vcvt.s32.f32 %v4375_v9  ;;  %5390 = vmatpush.bf16.msrb.mxu0 %v5746_v62  ;;  %v5743_v0 = vld [vmem:[#allocation7 + $0x20] sm:$0xff]  ;;  %v5742_v9 = vld [vmem:[#allocation7 + $0x18] sm:$0xff] }
 0x412   :  { %5030 = vmatpush.bf16.msrb.mxu3 %v4870_v37  ;;  %5060 = vmatpush.bf16.msra.mxu1 %v4791_v13  ;;  %v4755_v38 = vcvt.s32.f32 %v4499_v45  ;;  %v4635_v55 = vcvt.s32.f32 %v4379_v56  ;;  %v4854_v19 = vpack.c.bf16 %v4698_v14, %v4694_v51  ;;  %v4479_v20 = vunpack.c.2.s8 %v4239_v46  ;;  %v5754_v56 = vld [vmem:[#allocation7 + $0x78] sm:$0xff]  ;;  %v5741_v45 = vld [vmem:[#allocation7 + $0x10] sm:$0xff] }
 0x413   :  { %v4747_v48 = vcvt.s32.f32 %v4491_v42  ;;  %v4483_v18 = vunpack.c.3.s8 %v4239_v46  ;;  %v4471_v29 = vunpack.c.0.s8 %v4239_v46  ;;  %v4475_v35 = vunpack.c.1.s8 %v4239_v46  ;;  %v5739_v42 = vld [vmem:[#allocation7] sm:$0xff] }
 0x414   :  { %5069 = vmatpush.bf16.msra.mxu2 %v4839_v1  ;;  %v4883_v34 = vpack.c.bf16 %v4755_v38, %v4751_v41  ;;  %v4823_v36 = vpack.c.bf16 %v4635_v55, %v4631_v10  ;;  %v4735_v37 = vcvt.s32.f32 %v4479_v20  ;;  %v4463_v22 = vunpack.c.2.s8 %v4235_v63  ;;  %v5740_v38 = vld [vmem:[#allocation7 + $0x8] sm:$0xff]  ;;  %v5751_v46 = vld [vmem:[#allocation7 + $0x60] sm:$0xff]  ;;  %v5750_v55 = vld [vmem:[#allocation7 + $0x58] sm:$0xff] }
 0x415   :  { %4983 = vmatmul.bf16.vlgmr.msra.gmra.mxu3 %v7733_v3  ;;  %5061 = vmatmul.bf16.vlgmr.msra.gmra.mxu1 %v7604_v11  ;;  %v4487_v11 = vunpack.c.0.s8 %v4243_v47  ;;  %v4739_v24 = vcvt.s32.f32 %v4483_v18  ;;  %v4727_v13 = vcvt.s32.f32 %v4471_v29  ;;  %v4731_v60 = vcvt.s32.f32 %v4475_v35  ;;  %v5744_v47 = vld [vmem:[#allocation7 + $0x28] sm:$0xff]  ;;  %v5749_v20 = vld [vmem:[#allocation7 + $0x50] sm:$0xff]  ;;  %v5747_v29 = vld [vmem:[#allocation7 + $0x40] sm:$0xff] }
 0x416   :  { %5031 = vmatpush.bf16.msrb.mxu3 %v4866_v57  ;;  %v4467_v2 = vunpack.c.3.s8 %v4235_v63  ;;  %v4455_v6 = vunpack.c.0.s8 %v4235_v63  ;;  %v4719_v33 = vcvt.s32.f32 %v4463_v22  ;;  %v4459_v1 = vunpack.c.1.s8 %v4235_v63  ;;  %5391 = vmatpush.bf16.msrb.mxu0 %v5745_v8  ;;  %v5748_v18 = vld [vmem:[#allocation7 + $0x48] sm:$0xff]  ;;  %v5758_v63 = vld [vmem:[#allocation7 + $0x98] sm:$0xff] }
 0x417   :  { %v4743_v28 = vcvt.s32.f32 %v4487_v11  ;;  %v4875_v5 = vpack.c.bf16 %v4739_v24, %v4735_v37  ;;  %v4871_v39 = vpack.c.bf16 %v4731_v60, %v4727_v13  ;;  %v4447_v52 = vunpack.c.2.s8 %v4231_v32  ;;  %5403 = vmatpush.bf16.msrb.mxu1 %v5754_v56  ;;  %v5752_v11 = vld [vmem:[#allocation7 + $0x68] sm:$0xff] }
 0x418   :  { %5070 = vmatpush.bf16.msra.mxu2 %v4835_v44  ;;  %v4723_v27 = vcvt.s32.f32 %v4467_v2  ;;  %v4711_v16 = vcvt.s32.f32 %v4455_v6  ;;  %v4715_v57 = vcvt.s32.f32 %v4459_v1  ;;  %v4451_v54 = vunpack.c.3.s8 %v4231_v32  ;;  %v7753_v35 = vld [vmem:[#allocation6 + $0x4] ss:$8 sm:$0xf] }
 0x419   :  { %v4879_v23 = vpack.c.bf16 %v4747_v48, %v4743_v28  ;;  %v4439_v17 = vunpack.c.0.s8 %v4231_v32  ;;  %v4703_v44 = vcvt.s32.f32 %v4447_v52  ;;  %v4443_v53 = vunpack.c.1.s8 %v4231_v32 }
 0x41a   :  { %5032 = vmatpush.bf16.msrb.mxu3 %v4862_v7  ;;  %v4867_v21 = vpack.c.bf16 %v4723_v27, %v4719_v33  ;;  %v4863_v25 = vpack.c.bf16 %v4715_v57, %v4711_v16  ;;  %v4707_v50 = vcvt.s32.f32 %v4451_v54  ;;  %5392 = vmatpush.bf16.msrb.mxu0 %v5744_v47  ;;  %v5095_v22 = vperm.slane %v7753_v35, 0  ;;  %v5757_v27 = vld [vmem:[#allocation7 + $0x90] sm:$0xff]  ;;  %v5767_v47 = vld [vmem:[#allocation7 + $0xe0] sm:$0xff] }
 0x41b   :  { %v4695_v15 = vcvt.s32.f32 %v4439_v17  ;;  %v4699_v7 = vcvt.s32.f32 %v4443_v53  ;;  %v5755_v17 = vld [vmem:[#allocation7 + $0x80] sm:$0xff]  ;;  %v5769_v53 = vld [vmem:[#allocation7 + $0xf0] sm:$0xff] }
 0x41c   :  { %5071 = vmatpush.bf16.msra.mxu2 %v4831_v61 }
 0x41d   :  { %v4855_v58 = vpack.c.bf16 %v4699_v7, %v4695_v15  ;;  %v5096_v7 = vperm.slane %v7753_v35, 1 }
 0x41e   :  { %5033 = vmatpush.bf16.msrb.mxu3 %v4858_v12  ;;  %5393 = vmatpush.bf16.msrb.mxu0 %v5743_v0  ;;  %v5753_v12 = vld [vmem:[#allocation7 + $0x70] sm:$0xff] }
 0x41f   :  { %5404 = vmatpush.bf16.msrb.mxu1 %v5753_v12  ;;  %v5097_v12 = vperm.slane %v7753_v35, 2 }
 0x420   :  { %5072 = vmatpush.bf16.msra.mxu2 %v4827_v31 }
 0x422   :  { %5034 = vmatpush.bf16.msrb.mxu3 %v4854_v19  ;;  %5394 = vmatpush.bf16.msrb.mxu0 %v5742_v9  ;;  %v5762_v19 = vld [vmem:[#allocation7 + $0xb8] sm:$0xff] }
 0x423   :  { %5405 = vmatpush.bf16.msrb.mxu1 %v5752_v11  ;;  %v5766_v9 = vld [vmem:[#allocation7 + $0xd8] sm:$0xff] }
 0x424   :  { %5073 = vmatpush.bf16.msra.mxu2 %v4823_v36  ;;  %v5760_v36 = vld [vmem:[#allocation7 + $0xa8] sm:$0xff] }
 0x425   :  { %5035 = vmatmul.bf16.vlgmr.msrb.gmra.mxu3 %v7733_v3 }
 0x426   :  { %5079 = vmatpush.bf16.msra.mxu3 %v4883_v34  ;;  %5395 = vmatpush.bf16.msrb.mxu0 %v5741_v45  ;;  %v5761_v34 = vld [vmem:[#allocation7 + $0xb0] sm:$0xff] }
 0x427   :  { %5074 = vmatmul.bf16.vlgmr.msra.gmra.mxu2 %v7688_v4  ;;  %v4859_v4 = vpack.c.bf16 %v4707_v50, %v4703_v44  ;;  %5406 = vmatpush.bf16.msrb.mxu1 %v5751_v46 }
 0x428   :  { %5416 = vmatpush.bf16.msrb.mxu2 %v5762_v19 }
 0x42a   :  { %5080 = vmatpush.bf16.msra.mxu3 %v4879_v23  ;;  %5396 = vmatpush.bf16.msrb.mxu0 %v5740_v38  ;;  %v5759_v23 = vld [vmem:[#allocation7 + $0xa0] sm:$0xff]  ;;  %v5764_v38 = vld [vmem:[#allocation7 + $0xc8] sm:$0xff] }
 0x42b   :  { %5407 = vmatpush.bf16.msrb.mxu1 %v5750_v55 }
 0x42c   :  { %5417 = vmatpush.bf16.msrb.mxu2 %v5761_v34 }
 0x42e   :  { %5081 = vmatpush.bf16.msra.mxu3 %v4875_v5  ;;  %5397 = vmatpush.bf16.msrb.mxu0 %v5739_v42  ;;  %v7755_v5 = vld [vmem:[#allocation9 + $0x5] ss:$8 sm:$0xf] }
 0x42f   :  { %5408 = vmatpush.bf16.msrb.mxu1 %v5749_v20  ;;  %v5111_v62 = vperm.slane %v7755_v5, 1 }
 0x430   :  { %5418 = vmatpush.bf16.msrb.mxu2 %v5760_v36  ;;  %v5113_v36 = vperm.slane %v7755_v5, 3 }
 0x432   :  { %5082 = vmatpush.bf16.msra.mxu3 %v4871_v39  ;;  %v5110_v39 = vperm.slane %v7755_v5, 0 }
 0x433   :  { %5409 = vmatpush.bf16.msrb.mxu1 %v5748_v18 }
 0x434   :  { %5419 = vmatpush.bf16.msrb.mxu2 %v5759_v23 }
 0x436   :  { %5083 = vmatpush.bf16.msra.mxu3 %v4867_v21  ;;  %v5756_v21 = vld [vmem:[#allocation7 + $0x88] sm:$0xff] }
 0x437   :  { %5410 = vmatpush.bf16.msrb.mxu1 %v5747_v29 }
 0x438   :  { %5420 = vmatpush.bf16.msrb.mxu2 %v5758_v63 }
 0x43a   :  { %5084 = vmatpush.bf16.msra.mxu3 %v4863_v25  ;;  %v5770_v25 = vld [vmem:[#allocation7 + $0xf8] sm:$0xff] }
 0x43c   :  { %5421 = vmatpush.bf16.msrb.mxu2 %v5757_v27 }
 0x43e   :  { %5085 = vmatpush.bf16.msra.mxu3 %v4859_v4 }
 0x440   :  { %5422 = vmatpush.bf16.msrb.mxu2 %v5756_v21 }
 0x442   :  { %5086 = vmatpush.bf16.msra.mxu3 %v4855_v58  ;;  %v4893_v43 = vpop.f32.mrf.mxu0 }
 0x444   :  { %5423 = vmatpush.bf16.msrb.mxu2 %v5755_v17 }
 0x445   :  { %5087 = vmatmul.bf16.vlgmr.msra.gmra.mxu3 %v7733_v3 }
 0x446   :  { %5429 = vmatpush.bf16.msrb.mxu3 %v5770_v25 }
 0x44a   :  { %v4895_v26 = vpop.f32.mrf.mxu0  ;;  %5430 = vmatpush.bf16.msrb.mxu3 %v5769_v53 }
 0x452   :  { %v4906_v40 = vpop.f32.mrf.mxu1  ;;  %v7743_v30 = vpop.f32.mrf.mxu0 }
 0x453   :  { %v4907_v13 = vadd.f32 %v4906_v40, %v4893_v43  ;;  %v5768_v43 = vld [vmem:[#allocation7 + $0xe8] sm:$0xff] }
 0x454   :  { %5431 = vmatpush.bf16.msrb.mxu3 %v5768_v43 }
 0x458   :  { %5432 = vmatpush.bf16.msrb.mxu3 %v5767_v47 }
 0x45a   :  { %v4908_v61 = vpop.f32.mrf.mxu1  ;;  %v4947_v49 = vpop.f32.mrf.mxu0 }
 0x45c   :  { %5433 = vmatpush.bf16.msrb.mxu3 %v5766_v9 }
 0x462   :  { %v7745_v59 = vpop.f32.mrf.mxu1 }
 0x463   :  { %v4959_v4 = vadd.f32 %v7745_v59, %v7743_v30  ;;  %v5765_v59 = vld [vmem:[#allocation7 + $0xd0] sm:$0xff] }
 0x464   :  { %v7747_v3 = vpop.f32.mrf.mxu0  ;;  %5434 = vmatpush.bf16.msrb.mxu3 %v5765_v59 }
 0x468   :  { %v4919_v51 = vpop.f32.mrf.mxu2  ;;  %5435 = vmatpush.bf16.msrb.mxu3 %v5764_v38 }
 0x469   :  { %v4920_v60 = vadd.f32 %v4919_v51, %v4907_v13 }
 0x46a   :  { %v4960_v14 = vpop.f32.mrf.mxu1 }
 0x46c   :  { %v4999_v41 = vpop.f32.mrf.mxu0 }
 0x46d   :  { %v5112_v41 = vperm.slane %v7755_v5, 2 }
 0x470   :  { %v4921_v31 = vpop.f32.mrf.mxu2 }
 0x471   :  { %v5763_v31 = vld [vmem:[#allocation7 + $0xc0] sm:$0xff] }
 0x472   :  { %v7749_v10 = vpop.f32.mrf.mxu1  ;;  %5436 = vmatpush.bf16.msrb.mxu3 %v5763_v31 }
 0x473   :  { %v5011_v30 = vadd.f32 %v7749_v10, %v7747_v3 }
 0x478   :  { %v4971_v28 = vpop.f32.mrf.mxu2 }
 0x479   :  { %v4972_v15 = vadd.f32 %v4971_v28, %v4959_v4  ;;  %v5098_v28 = vperm.slane %v7753_v35, 3 }
 0x47a   :  { %v5012_v48 = vpop.f32.mrf.mxu1 }
 0x480   :  { %v4973_v24 = vpop.f32.mrf.mxu2 }
 0x482   :  { %v7751_v37 = vpop.f32.mrf.mxu0 }
 0x488   :  { %v4932_v2 = vpop.f32.mrf.mxu3 }
 0x489   :  { %v4933_v6 = vadd.f32 %v4932_v2, %v4920_v60 }
 0x48a   :  { %v5051_v33 = vpop.f32.mrf.mxu0  ;;  %v5023_v32 = vpop.f32.mrf.mxu2 }
 0x48b   :  { %v5103_v1 = vmul.f32 %v5095_v22, %v4933_v6  ;;  %v5024_v45 = vadd.f32 %v5023_v32, %v5011_v30 }
 0x48d   :  { %v5118_v52 = vadd.f32 %v5110_v39, %v5103_v1 }
 0x48f   :  { %v5122_v16 = vmax.f32 %v5118_v52, 0.0 }
 0x490   :  { %v4934_v57 = vpop.f32.mrf.mxu3 }
 0x491   :  { %v5126_v54 = vpack.c.bf16 %v5122_v16, %v5122_v16 }
 0x492   :  { %v5062_v44 = vpop.f32.mrf.mxu1  ;;  %v5025_v50 = vpop.f32.mrf.mxu2 }
 0x493   :  { %5398 = vmatmul.bf16.vlgmr.msrb.gmra.mxu0 %v5126_v54  ;;  %v5063_v10 = vadd.f32 %v5062_v44, %v7751_v37  ;;  %v5783_v37 = vld [vmem:[#allocation10] ss:$0 sm:$0xff] }
 0x498   :  { %v4984_v58 = vpop.f32.mrf.mxu3 }
 0x499   :  { %v4985_v26 = vadd.f32 %v4984_v58, %v4972_v15 }
 0x49a   :  { %v5064_v8 = vpop.f32.mrf.mxu1 }
 0x49b   :  { %v5104_v40 = vmul.f32 %v5096_v7, %v4985_v26 }
 0x49d   :  { %v5119_v61 = vadd.f32 %v5111_v62, %v5104_v40 }
 0x49f   :  { %v5123_v49 = vmax.f32 %v5119_v61, 0.0 }
 0x4a0   :  { %v4986_v0 = vpop.f32.mrf.mxu3 }
 0x4a1   :  { %v5127_v56 = vpack.c.bf16 %v5123_v49, %v5123_v49 }
 0x4a3   :  { %5411 = vmatmul.bf16.vlgmr.msrb.gmra.mxu1 %v5127_v56 }
 0x4a8   :  { %v5036_v51 = vpop.f32.mrf.mxu3 }
 0x4a9   :  { %v5037_v14 = vadd.f32 %v5036_v51, %v5024_v45 }
 0x4aa   :  { %v5075_v42 = vpop.f32.mrf.mxu2 }
 0x4ab   :  { %v5105_v11 = vmul.f32 %v5097_v12, %v5037_v14  ;;  %v5076_v34 = vadd.f32 %v5075_v42, %v5063_v10 }
 0x4ad   :  { %v5120_v46 = vadd.f32 %v5112_v41, %v5105_v11 }
 0x4af   :  { %v5124_v55 = vmax.f32 %v5120_v46, 0.0 }
 0x4b0   :  { %v5038_v19 = vpop.f32.mrf.mxu3 }
 0x4b1   :  { %v5128_v20 = vpack.c.bf16 %v5124_v55, %v5124_v55 }
 0x4b2   :  { %v5077_v3 = vpop.f32.mrf.mxu2 }
 0x4b3   :  { %5424 = vmatmul.bf16.vlgmr.msrb.gmra.mxu2 %v5128_v20 }
 0x4c8   :  { %v5088_v48 = vpop.f32.mrf.mxu3 }
 0x4c9   :  { %v5089_v18 = vadd.f32 %v5088_v48, %v5076_v34 }
 0x4cb   :  { %v5106_v29 = vmul.f32 %v5098_v28, %v5089_v18 }
 0x4cd   :  { %v5121_v23 = vadd.f32 %v5113_v36, %v5106_v29 }
 0x4cf   :  { %v5125_v24 = vmax.f32 %v5121_v23, 0.0 }
 0x4d0   :  { %v5090_v63 = vpop.f32.mrf.mxu3 }
 0x4d1   :  { %v5129_v13 = vpack.c.bf16 %v5125_v24, %v5125_v24 }
 0x4d3   :  { %5437 = vmatmul.bf16.vlgmr.msrb.gmra.mxu3 %v5129_v13 }
 0x510   :  { %v5399_v60 = vpop.f32.mrf.mxu0 }
 0x511   :  { %v5400_v27 = vadd.f32 %v5783_v37, %v5399_v60 }
 0x518   :  { %v5401_v22 = vpop.f32.mrf.mxu0 }
 0x520   :  { %v5412_v2 = vpop.f32.mrf.mxu1 }
 0x521   :  { %v5413_v1 = vadd.f32 %v5412_v2, %v5400_v27 }
 0x528   :  { %v5414_v6 = vpop.f32.mrf.mxu1 }
 0x536   :  { %v5425_v39 = vpop.f32.mrf.mxu2 }
 0x537   :  { %v5426_v35 = vadd.f32 %v5425_v39, %v5413_v1 }
 0x53e   :  { %v5427_v33 = vpop.f32.mrf.mxu2 }
 0x556   :  { %v5438_v32 = vpop.f32.mrf.mxu3 }
 0x557   :  { %v5439_v52 = vadd.f32 %v5438_v32, %v5426_v35 }
 0x559   :  { %5442 = vst [vmem:[%s7780_s7] sm:$0xff] %v5439_v52 }
 0x55e   :  { %v5440_v5 = vpop.f32.mrf.mxu3 }
 0x55f   :  { %5447 = vsyncpa [#allocation3], 1 }
 0x560   :  { %5448 = vsyncpa [#allocation5], 1 }
 0x561   :  { %5449 = vsyncpa [#allocation8], 1 }
 0x562   :  { %5450 = vsyncpa [#allocation11], 1 }

</bundles_post_ra>
